<compile_context>
chip_gen: v7x
topology: tpu7x:2x2x1
jax: 0.10.0
libtpu: 0.0.40
codegen_flags: <defaults>
</compile_context>

<pallas_src>
import functools

import numpy as np
import jax
import jax.numpy as jnp
from jax.experimental import pallas as pl
from jax.experimental.pallas import tpu as pltpu

EMBEDDING_DIM = 768
NUM_FILTERS = 256
KSIZES = (2, 3, 4)
NTAPS = sum(KSIZES)            # 9
OUT_DIM = NUM_FILTERS * 3      # 768

# VMEM budget model used to size b_tile:
#   per grid-step row of M = b_tile * S:
#     x tile (bf16, double-buffered)        : 768 * 2 * 2  = 3 KiB
#     f32 epilogue live set (y_k/acc/rolled): ~8 KiB (k=4 worst case, column-tiled)
_PER_ROW_BYTES = 12 * 1024
#   fixed: wcat+wl (bf16, counted double-buffered) + biases + output + slack
_FIXED_BYTES = 12 * 1024 * 1024


def _tpu_generation():
    try:
        kind = jax.devices()[0].device_kind.lower()
    except Exception:
        return 0
    for g in (7, 6, 5, 4):
        if f"v{g}" in kind:
            return g
    return 0


def _pick_b_tile(B, S, vmem_limit, two_cores):
    """Largest aligned divisor of B whose M = b_tile*S fits the VMEM budget.

    Alignment: b_tile % 8 == 0 or b_tile == B (clean, unmasked output stores).
    On v7x (two_cores) prefer >= 2 grid steps, but ONLY if each step still carries
    M >= 512 rows; otherwise a single step (grid=(1,)) keeps the MXU full.
    """
    max_rows = max(S, (vmem_limit - _FIXED_BYTES) // _PER_ROW_BYTES)
    max_rows = min(max_rows, 4096)
    cands = [d for d in range(1, B + 1) if B % d == 0 and (d % 8 == 0 or d == B)]
    fit = [d for d in cands if d * S <= max_rows] or [min(cands)]
    if two_cores:
        split = [d for d in fit if B // d >= 2 and d * S >= 512]
        if split:
            return max(split)
    return max(fit)


def textcnn_kernel(x_ref, wcat_ref, bcat_ref, wl_ref, bl_ref, o_ref, *, s_valid):
    BT, S, E = x_ref.shape
    NF = NUM_FILTERS
    M = BT * S

    # Layout-free flatten (S % 8 == 0 is guaranteed by the wrapper).
    x2d = x_ref[...].reshape(M, E)                                       # bf16 [M, E]
    bcat = bcat_ref[...]                                                 # f32  [1, 3*NF]

    # Position within the sequence, for masking invalid conv windows before max-pool.
    t_idx = jax.lax.broadcasted_iota(jnp.int32, (BT, S, 1), 1)

    feats = []
    col = 0
    for idx, k in enumerate(KSIZES):
        # One MXU matmul per conv (column-tiled epilogue): [M, E] @ [E, k*NF], f32 accumulate.
        w_k = wcat_ref[:, col:col + k * NF]                              # lane-aligned slab
        y_k = jnp.dot(x2d, w_k, preferred_element_type=jnp.float32)     # f32 [M, k*NF]

        # Shift-add the k taps: tap i is rolled UP by i rows (XLU roll, no misaligned slices).
        acc = y_k[:, 0:NF]
        for i in range(1, k):
            acc = acc + pltpu.roll(y_k[:, i * NF:(i + 1) * NF], shift=M - i, axis=0)
        acc = acc.reshape(BT, S, NF)                                     # layout-free split

        # Bias + ReLU, then mask rows t >= L (incl. rolled-in cross-batch / padded rows).
        # ReLU output >= 0, so masking to 0.0 never beats a valid window in the max-pool.
        z = jnp.maximum(acc + bcat[:, idx * NF:(idx + 1) * NF], 0.0)
        L = s_valid - k + 1
        z = jnp.where(t_idx < L, z, 0.0)
        feats.append(jnp.max(z, axis=1))                                 # [BT, NF]
        col += k * NF

    feat = jnp.concatenate(feats, axis=-1)                               # [BT, 3*NF] (k=2,3,4)
    out = jnp.dot(feat.astype(wl_ref.dtype), wl_ref[...],
                  preferred_element_type=jnp.float32) + bl_ref[...]
    o_ref[...] = out                                                     # [BT, 3*NF] f32


def _full_spec(arr):
    zeros = (0,) * arr.ndim
    return pl.BlockSpec(arr.shape, lambda b, _z=zeros: _z)


def textcnn_forward(x, params, b_tile=None):
    B, S, E = x.shape
    assert E == EMBEDDING_DIM
    assert S >= max(KSIZES), "sequence must be at least as long as the largest conv kernel"
    w2, b2, w3, b3, w4, b4, wl, bl = params

    # Pad S to a multiple of 8 so in-kernel reshapes are layout-free; padded rows are masked
    # inside the kernel (the validity bound uses the ORIGINAL S).
    s_valid = S
    s_pad = ((S + 7) // 8) * 8
    if s_pad != S:
        x = jnp.pad(x, ((0, 0), (0, s_pad - S), (0, 0)))

    gen = _tpu_generation()
    if gen in (4, 5, 6):
        vmem_limit = 64 * 1024 * 1024    # single TensorCore, 128 MiB physical VMEM
        two_cores = False
    else:                                # v7x or unknown: 64 MiB VMEM per TC, 2 TCs
        vmem_limit = 32 * 1024 * 1024
        two_cores = True

    if b_tile is None:
        b_tile = _pick_b_tile(B, s_pad, vmem_limit, two_cores)
    assert B % b_tile == 0, "batch must be divisible by b_tile"
    grid = (B // b_tile,)

    # Pack all 9 conv taps into one [E, 9*NF] matrix (column order: k=2 taps 0..1, k=3 taps
    # 0..2, k=4 taps 0..3); matmul operands are bf16, accumulation stays f32 in-kernel.
    conv_ws = ((2, w2), (3, w3), (4, w4))
    wcat = jnp.concatenate([w[i] for k, w in conv_ws for i in range(k)],
                           axis=1).astype(jnp.bfloat16)                  # [E, 9*NF]
    bcat = jnp.concatenate([b2, b3, b4], axis=1).astype(jnp.float32)     # [1, 3*NF]
    x_bf16 = x.astype(jnp.bfloat16)
    wl_bf16 = wl.astype(jnp.bfloat16)
    bl_f32 = bl.astype(jnp.float32)

    cost = pl.CostEstimate(
        flops=int(2 * B * s_pad * E * NTAPS * NUM_FILTERS + 2 * B * OUT_DIM * OUT_DIM),
        transcendentals=0,
        bytes_accessed=int(x_bf16.size * 2 + wcat.size * 2 + bcat.size * 4
                           + wl_bf16.size * 2 + bl_f32.size * 4 + B * OUT_DIM * 4),
    )

    kernel = functools.partial(textcnn_kernel, s_valid=s_valid)

    return pl.pallas_call(
        kernel,
        out_shape=jax.ShapeDtypeStruct((B, OUT_DIM), jnp.float32),
        grid=grid,
        in_specs=[
            pl.BlockSpec((b_tile, s_pad, E), lambda b: (b, 0, 0)),
            _full_spec(wcat), _full_spec(bcat),
            _full_spec(wl_bf16), _full_spec(bl_f32),
        ],
        out_specs=pl.BlockSpec((b_tile, OUT_DIM), lambda b: (b, 0)),
        compiler_params=pltpu.CompilerParams(
            dimension_semantics=("parallel",),
            vmem_limit_bytes=vmem_limit),
        cost_estimate=cost,
    )(x_bf16, wcat, bcat, wl_bf16, bl_f32)


def textcnn_ref(x, params):
    # Plain-JAX f32 reference (mirrors the PyTorch forward, post-BERT).
    w2, b2, w3, b3, w4, b4, wl, bl = params
    feats = []
    for k, w, b in ((2, w2, b2), (3, w3, b3), (4, w4, b4)):
        L = x.shape[1] - k + 1
        acc = sum(jnp.einsum('bse,ef->bsf', x[:, i:i + L, :], w[i]) for i in range(k))
        acc = jnp.maximum(acc + b[None, :, :], 0.0)
        feats.append(jnp.max(acc, axis=1))
    feat = jnp.concatenate(feats, axis=-1)
    return feat @ wl + bl


if __name__ == "__main__":
    B, S = 8, 16
    key = jax.random.PRNGKey(0)
    keys = jax.random.split(key, 10)

    # Stand-in for the frozen BERT sequence output [B, S, 768].
    x = jax.random.normal(keys[0], (B, S, EMBEDDING_DIM), jnp.float32)

    def uinit(k, shape, fan_in):
        bound = 1.0 / np.sqrt(fan_in)
        return jax.random.uniform(k, shape, jnp.float32, -bound, bound)

    params = []
    ki = 1
    for k in KSIZES:  # conv weights [k, E, NF], biases [1, NF]
        params.append(uinit(keys[ki], (k, EMBEDDING_DIM, NUM_FILTERS), k * EMBEDDING_DIM)); ki += 1
        params.append(uinit(keys[ki], (1, NUM_FILTERS), k * EMBEDDING_DIM)); ki += 1
    # linear: weight pre-transposed [3*NF, 3*NF], bias [1, 3*NF]
    params.append(uinit(keys[ki], (OUT_DIM, OUT_DIM), OUT_DIM)); ki += 1
    params.append(uinit(keys[ki], (1, OUT_DIM), OUT_DIM))

    out = jax.block_until_ready(textcnn_forward(x, params))
    ref = np.asarray(textcnn_ref(x, params))
    np.testing.assert_allclose(np.asarray(out), ref, rtol=2e-2, atol=2e-2)
    print("KERNEL_OK")
</pallas_src>

<mosaic_0001>
module attributes {stable_mosaic.version = 11 : i64} {
  func.func @textcnn_kernel(%arg0: i32, %arg1: memref<8x16x768xbf16, #tpu.memory_space<vmem>>, %arg2: memref<768x2304xbf16, #tpu.memory_space<vmem>>, %arg3: memref<1x768xf32, #tpu.memory_space<vmem>>, %arg4: memref<768x768xbf16, #tpu.memory_space<vmem>>, %arg5: memref<1x768xf32, #tpu.memory_space<vmem>>, %arg6: memref<8x768xf32, #tpu.memory_space<vmem>>) attributes {dimension_semantics = [#tpu.dimension_semantics<parallel>], iteration_bounds = array<i64: 1>, scalar_prefetch = 0 : i64, scratch_operands = 0 : i64, tpu.core_type = #tpu.core_type<tc>, window_params = [{transform_indices = @transform_0, window_bounds = array<i64: 8, 16, 768>}, {pipeline_mode = #tpu.pipeline_mode<synchronous>, transform_indices = @transform_1, window_bounds = array<i64: 768, 2304>}, {pipeline_mode = #tpu.pipeline_mode<synchronous>, transform_indices = @transform_2, window_bounds = array<i64: 1, 768>}, {pipeline_mode = #tpu.pipeline_mode<synchronous>, transform_indices = @transform_3, window_bounds = array<i64: 768, 768>}, {pipeline_mode = #tpu.pipeline_mode<synchronous>, transform_indices = @transform_4, window_bounds = array<i64: 1, 768>}, {transform_indices = @transform_5, window_bounds = array<i64: 8, 768>}]} {
    %c0 = arith.constant 0 : index
    %c0_0 = arith.constant 0 : index
    %c0_1 = arith.constant 0 : index
    %0 = vector.load %arg1[%c0, %c0_0, %c0_1] : memref<8x16x768xbf16, #tpu.memory_space<vmem>>, vector<8x16x768xbf16>
    %1 = vector.shape_cast %0 : vector<8x16x768xbf16> to vector<128x768xbf16>
    %c0_2 = arith.constant 0 : index
    %c0_3 = arith.constant 0 : index
    %2 = vector.load %arg3[%c0_2, %c0_3] : memref<1x768xf32, #tpu.memory_space<vmem>>, vector<1x768xf32>
    %3 = tpu.iota {dimensions = array<i32: 1>} : vector<8x16x1xi32>
    %c0_4 = arith.constant 0 : index
    %c0_5 = arith.constant 0 : index
    %4 = vector.load %arg2[%c0_4, %c0_5] : memref<768x2304xbf16, #tpu.memory_space<vmem>>, vector<768x512xbf16>
    %cst = arith.constant dense<0.000000e+00> : vector<128x512xf32>
    %5 = tpu.matmul %1, %4, %cst {dimension_numbers = #tpu.dot_dimension_numbers<[1], [0], [0], [1], [0, 0, 1, 1], [], []>} : vector<128x768xbf16>, vector<768x512xbf16>, vector<128x512xf32> -> vector<128x512xf32>
    %6 = vector.extract_strided_slice %5 {offsets = [0, 0], sizes = [128, 256], strides = [1, 1]} : vector<128x512xf32> to vector<128x256xf32>
    %7 = vector.extract_strided_slice %5 {offsets = [0, 256], sizes = [128, 256], strides = [1, 1]} : vector<128x512xf32> to vector<128x256xf32>
    %c127_i32 = arith.constant 127 : i32
    %8 = tpu.dynamic_rotate %7 by %c127_i32 dim 0 : vector<128x256xf32>, i32 -> vector<128x256xf32>
    %9 = arith.addf %6, %8 : vector<128x256xf32>
    %10 = vector.shape_cast %9 : vector<128x256xf32> to vector<8x16x256xf32>
    %11 = vector.extract_strided_slice %2 {offsets = [0, 0], sizes = [1, 256], strides = [1, 1]} : vector<1x768xf32> to vector<1x256xf32>
    %12 = vector.shape_cast %11 : vector<1x256xf32> to vector<1x1x256xf32>
    %13 = vector.broadcast %12 : vector<1x1x256xf32> to vector<8x16x256xf32>
    %14 = arith.addf %10, %13 : vector<8x16x256xf32>
    %cst_6 = arith.constant 0.000000e+00 : f32
    %15 = vector.broadcast %cst_6 : f32 to vector<8x16x256xf32>
    %16 = arith.maximumf %14, %15 : vector<8x16x256xf32>
    %c15_i32 = arith.constant 15 : i32
    %17 = vector.broadcast %c15_i32 : i32 to vector<8x16x1xi32>
    %18 = arith.cmpi slt, %3, %17 : vector<8x16x1xi32>
    %cst_7 = arith.constant 0.000000e+00 : f32
    %19 = vector.shape_cast %18 : vector<8x16x1xi1> to vector<8x16x1xi1>
    %20 = vector.broadcast %19 : vector<8x16x1xi1> to vector<8x16x256xi1>
    %21 = vector.broadcast %cst_7 : f32 to vector<8x16x256xf32>
    %22 = arith.select %20, %16, %21 : vector<8x16x256xi1>, vector<8x16x256xf32>
    %cst_8 = arith.constant dense<0xFF800000> : vector<8x256xf32>
    %23 = vector.multi_reduction <maximumf>, %22, %cst_8 [1] : vector<8x16x256xf32> to vector<8x256xf32>
    %c0_9 = arith.constant 0 : index
    %c512 = arith.constant 512 : index
    %24 = vector.load %arg2[%c0_9, %c512] : memref<768x2304xbf16, #tpu.memory_space<vmem>>, vector<768x768xbf16>
    %cst_10 = arith.constant dense<0.000000e+00> : vector<128x768xf32>
    %25 = tpu.matmul %1, %24, %cst_10 {dimension_numbers = #tpu.dot_dimension_numbers<[1], [0], [0], [1], [0, 0, 1, 1], [], []>} : vector<128x768xbf16>, vector<768x768xbf16>, vector<128x768xf32> -> vector<128x768xf32>
    %26 = vector.extract_strided_slice %25 {offsets = [0, 0], sizes = [128, 256], strides = [1, 1]} : vector<128x768xf32> to vector<128x256xf32>
    %27 = vector.extract_strided_slice %25 {offsets = [0, 256], sizes = [128, 256], strides = [1, 1]} : vector<128x768xf32> to vector<128x256xf32>
    %c127_i32_11 = arith.constant 127 : i32
    %28 = tpu.dynamic_rotate %27 by %c127_i32_11 dim 0 : vector<128x256xf32>, i32 -> vector<128x256xf32>
    %29 = arith.addf %26, %28 : vector<128x256xf32>
    %30 = vector.extract_strided_slice %25 {offsets = [0, 512], sizes = [128, 256], strides = [1, 1]} : vector<128x768xf32> to vector<128x256xf32>
    %c126_i32 = arith.constant 126 : i32
    %31 = tpu.dynamic_rotate %30 by %c126_i32 dim 0 : vector<128x256xf32>, i32 -> vector<128x256xf32>
    %32 = arith.addf %29, %31 : vector<128x256xf32>
    %33 = vector.shape_cast %32 : vector<128x256xf32> to vector<8x16x256xf32>
    %34 = vector.extract_strided_slice %2 {offsets = [0, 256], sizes = [1, 256], strides = [1, 1]} : vector<1x768xf32> to vector<1x256xf32>
    %35 = vector.shape_cast %34 : vector<1x256xf32> to vector<1x1x256xf32>
    %36 = vector.broadcast %35 : vector<1x1x256xf32> to vector<8x16x256xf32>
    %37 = arith.addf %33, %36 : vector<8x16x256xf32>
    %cst_12 = arith.constant 0.000000e+00 : f32
    %38 = vector.broadcast %cst_12 : f32 to vector<8x16x256xf32>
    %39 = arith.maximumf %37, %38 : vector<8x16x256xf32>
    %c14_i32 = arith.constant 14 : i32
    %40 = vector.broadcast %c14_i32 : i32 to vector<8x16x1xi32>
    %41 = arith.cmpi slt, %3, %40 : vector<8x16x1xi32>
    %cst_13 = arith.constant 0.000000e+00 : f32
    %42 = vector.shape_cast %41 : vector<8x16x1xi1> to vector<8x16x1xi1>
    %43 = vector.broadcast %42 : vector<8x16x1xi1> to vector<8x16x256xi1>
    %44 = vector.broadcast %cst_13 : f32 to vector<8x16x256xf32>
    %45 = arith.select %43, %39, %44 : vector<8x16x256xi1>, vector<8x16x256xf32>
    %cst_14 = arith.constant dense<0xFF800000> : vector<8x256xf32>
    %46 = vector.multi_reduction <maximumf>, %45, %cst_14 [1] : vector<8x16x256xf32> to vector<8x256xf32>
    %c0_15 = arith.constant 0 : index
    %c1280 = arith.constant 1280 : index
    %47 = vector.load %arg2[%c0_15, %c1280] : memref<768x2304xbf16, #tpu.memory_space<vmem>>, vector<768x1024xbf16>
    %cst_16 = arith.constant dense<0.000000e+00> : vector<128x1024xf32>
    %48 = tpu.matmul %1, %47, %cst_16 {dimension_numbers = #tpu.dot_dimension_numbers<[1], [0], [0], [1], [0, 0, 1, 1], [], []>} : vector<128x768xbf16>, vector<768x1024xbf16>, vector<128x1024xf32> -> vector<128x1024xf32>
    %49 = vector.extract_strided_slice %48 {offsets = [0, 0], sizes = [128, 256], strides = [1, 1]} : vector<128x1024xf32> to vector<128x256xf32>
    %50 = vector.extract_strided_slice %48 {offsets = [0, 256], sizes = [128, 256], strides = [1, 1]} : vector<128x1024xf32> to vector<128x256xf32>
    %c127_i32_17 = arith.constant 127 : i32
    %51 = tpu.dynamic_rotate %50 by %c127_i32_17 dim 0 : vector<128x256xf32>, i32 -> vector<128x256xf32>
    %52 = arith.addf %49, %51 : vector<128x256xf32>
    %53 = vector.extract_strided_slice %48 {offsets = [0, 512], sizes = [128, 256], strides = [1, 1]} : vector<128x1024xf32> to vector<128x256xf32>
    %c126_i32_18 = arith.constant 126 : i32
    %54 = tpu.dynamic_rotate %53 by %c126_i32_18 dim 0 : vector<128x256xf32>, i32 -> vector<128x256xf32>
    %55 = arith.addf %52, %54 : vector<128x256xf32>
    %56 = vector.extract_strided_slice %48 {offsets = [0, 768], sizes = [128, 256], strides = [1, 1]} : vector<128x1024xf32> to vector<128x256xf32>
    %c125_i32 = arith.constant 125 : i32
    %57 = tpu.dynamic_rotate %56 by %c125_i32 dim 0 : vector<128x256xf32>, i32 -> vector<128x256xf32>
    %58 = arith.addf %55, %57 : vector<128x256xf32>
    %59 = vector.shape_cast %58 : vector<128x256xf32> to vector<8x16x256xf32>
    %60 = vector.extract_strided_slice %2 {offsets = [0, 512], sizes = [1, 256], strides = [1, 1]} : vector<1x768xf32> to vector<1x256xf32>
    %61 = vector.shape_cast %60 : vector<1x256xf32> to vector<1x1x256xf32>
    %62 = vector.broadcast %61 : vector<1x1x256xf32> to vector<8x16x256xf32>
    %63 = arith.addf %59, %62 : vector<8x16x256xf32>
    %cst_19 = arith.constant 0.000000e+00 : f32
    %64 = vector.broadcast %cst_19 : f32 to vector<8x16x256xf32>
    %65 = arith.maximumf %63, %64 : vector<8x16x256xf32>
    %c13_i32 = arith.constant 13 : i32
    %66 = vector.broadcast %c13_i32 : i32 to vector<8x16x1xi32>
    %67 = arith.cmpi slt, %3, %66 : vector<8x16x1xi32>
    %cst_20 = arith.constant 0.000000e+00 : f32
    %68 = vector.shape_cast %67 : vector<8x16x1xi1> to vector<8x16x1xi1>
    %69 = vector.broadcast %68 : vector<8x16x1xi1> to vector<8x16x256xi1>
    %70 = vector.broadcast %cst_20 : f32 to vector<8x16x256xf32>
    %71 = arith.select %69, %65, %70 : vector<8x16x256xi1>, vector<8x16x256xf32>
    %cst_21 = arith.constant dense<0xFF800000> : vector<8x256xf32>
    %72 = vector.multi_reduction <maximumf>, %71, %cst_21 [1] : vector<8x16x256xf32> to vector<8x256xf32>
    %73 = tpu.concatenate %23, %46, %72 in 1 : vector<8x256xf32>, vector<8x256xf32>, vector<8x256xf32> -> vector<8x768xf32>
    %74 = arith.truncf %73 : vector<8x768xf32> to vector<8x768xbf16>
    %c0_22 = arith.constant 0 : index
    %c0_23 = arith.constant 0 : index
    %75 = vector.load %arg4[%c0_22, %c0_23] : memref<768x768xbf16, #tpu.memory_space<vmem>>, vector<768x768xbf16>
    %cst_24 = arith.constant dense<0.000000e+00> : vector<8x768xf32>
    %76 = tpu.matmul %74, %75, %cst_24 {dimension_numbers = #tpu.dot_dimension_numbers<[1], [0], [0], [1], [0, 0, 1, 1], [], []>} : vector<8x768xbf16>, vector<768x768xbf16>, vector<8x768xf32> -> vector<8x768xf32>
    %c0_25 = arith.constant 0 : index
    %c0_26 = arith.constant 0 : index
    %77 = vector.load %arg5[%c0_25, %c0_26] : memref<1x768xf32, #tpu.memory_space<vmem>>, vector<1x768xf32>
    %78 = vector.broadcast %77 : vector<1x768xf32> to vector<8x768xf32>
    %79 = arith.addf %76, %78 : vector<8x768xf32>
    %c0_27 = arith.constant 0 : index
    %c0_28 = arith.constant 0 : index
    %80 = vector.load %arg6[%c0_27, %c0_28] : memref<8x768xf32, #tpu.memory_space<vmem>>, vector<8x768xf32>
    tpu.vector_store %arg6[%c0_27, %c0_28], %79 {strides = array<i32>} : memref<8x768xf32, #tpu.memory_space<vmem>>, vector<8x768xf32>,
    return
  }
  func.func @transform_0(%arg0: i32) -> (i32, i32, i32) {
    %c0_i32 = arith.constant 0 : i32
    %c0_i32_0 = arith.constant 0 : i32
    %c0_i32_1 = arith.constant 0 : i32
    return %arg0, %c0_i32, %c0_i32_0 : i32, i32, i32
  }
  func.func @transform_1(%arg0: i32) -> (i32, i32) {
    %c0_i32 = arith.constant 0 : i32
    %c0_i32_0 = arith.constant 0 : i32
    %c0_i32_1 = arith.constant 0 : i32
    return %c0_i32, %c0_i32_0 : i32, i32
  }
  func.func @transform_2(%arg0: i32) -> (i32, i32) {
    %c0_i32 = arith.constant 0 : i32
    %c0_i32_0 = arith.constant 0 : i32
    %c0_i32_1 = arith.constant 0 : i32
    return %c0_i32, %c0_i32_0 : i32, i32
  }
  func.func @transform_3(%arg0: i32) -> (i32, i32) {
    %c0_i32 = arith.constant 0 : i32
    %c0_i32_0 = arith.constant 0 : i32
    %c0_i32_1 = arith.constant 0 : i32
    return %c0_i32, %c0_i32_0 : i32, i32
  }
  func.func @transform_4(%arg0: i32) -> (i32, i32) {
    %c0_i32 = arith.constant 0 : i32
    %c0_i32_0 = arith.constant 0 : i32
    %c0_i32_1 = arith.constant 0 : i32
    return %c0_i32, %c0_i32_0 : i32, i32
  }
  func.func @transform_5(%arg0: i32) -> (i32, i32) {
    %c0_i32 = arith.constant 0 : i32
    %c0_i32_0 = arith.constant 0 : i32
    return %arg0, %c0_i32 : i32, i32
  }
}

</mosaic_0001>

<bundles_post_ra>
// kernel: tpu_custom_call.1
= control target key start
LH: loop header
LB: loop body
LE: loop exit
PB: predicated region body
PF: predicated region fallthrough
CT: control target
= control target key end

     0   :  { %10 = vsyncpa [#allocation3], 0  ;;  %s17666_s0 = inlined_call_operand.hbm [shape: bf16[8,16,768], index: 0, kind: input, shape index: {}]   ;;  %s17667_s1 = inlined_call_operand.hbm [shape: bf16[768,2304], index: 1, kind: input, shape index: {}]   ;;  %s17668_s2 = inlined_call_operand.hbm [shape: f32[1,768], index: 2, kind: input, shape index: {}]   ;;  %s17669_s3 = inlined_call_operand.hbm [shape: bf16[768,768], index: 3, kind: input, shape index: {}]   ;;  %s17670_s4 = inlined_call_operand.hbm [shape: f32[1,768], index: 4, kind: input, shape index: {}]   ;;  %s17671_s5 = inlined_call_operand.hbm [shape: f32[8,768], index: 5, kind: output, shape index: {}]  }
   0x1   :  { %11 = vsyncpa [#allocation6], 0 }
   0x2   :  { %12 = vsyncpa [#allocation9], 0 }
   0x3   :  { %13 = vsyncpa [#allocation4], 0  ;;  %s16077_s18 = smov [#allocation5]   ;;  %s15937_s22 = scalar_lea.hbm %s17667_s1, 110592 }
   0x4   :  { %s31_s19 = sshll.u32 %s16077_s18, 4  ;;  %p15938_p0 = scmp.ne.s32.totalorder %s17667_s1, %s15937_s22  ;;  %s32_s19 = int_to_ptr.vmem [resolvable:$true] %s31_s19 }
   0x5   :  { %p15941_p1 = scmp.lt.u32.totalorder %s15937_s22, %s17667_s1 }
   0x7   :  { %p15943_p2 = pnand %p15941_p1, %p15938_p0 }
   0x9   :  { %15946 = shalt.err (!%p15943_p2)
}
   0xa   :  { %s15947_s27 = scalar_lea.vmem %s32_s19, 110592  ;;  %p15952_p4 = scmp.lt.s32.totalorder %s32_s19, %s32_s19 }
   0xb   :  { %p15948_p3 = scmp.ne.s32.totalorder %s32_s19, %s15947_s27  ;;  %p15953_p5 = scmp.lt.s32.totalorder %s15947_s27, %s15947_s27 }
   0xd   :  { %p15954_p6 = por %p15953_p5, %p15952_p4 }
   0xf   :  { %p15955_p7 = pnand %p15954_p6, %p15948_p3 }
  0x11   :  { %15958 = shalt.err (!%p15955_p7)
}
  0x12   :  { %s16078_s28 = smov 1152   ;;  %s16079_s29 = smov 72  }
  0x13   :  { %37 = dma.hbm_to_vmem [thread:$0]  %s17667_s1, 110592, %s32_s19, [#allocation6], %s16078_s28, %s16078_s28, %s16079_s29  }
  0x14   :  { %s16080_s7 = smov [#allocation8]   ;;  %s16081_s9 = smov [#allocation2]  }
  0x15   :  { %s53_s8 = sshll.u32 %s16080_s7, 4  ;;  %s19_s10 = sshll.u32 %s16081_s9, 4  ;;  %s54_s8 = int_to_ptr.vmem [resolvable:$true] %s53_s8  ;;  %s20_s10 = int_to_ptr.vmem [resolvable:$true] %s19_s10 }
  0x16   :  { %s15959_s13 = scalar_lea.hbm %s17669_s3, 36864 }
  0x17   :  { %p15960_p8 = scmp.ne.s32.totalorder %s17669_s3, %s15959_s13  ;;  %p15963_p9 = scmp.lt.u32.totalorder %s15959_s13, %s17669_s3 }
  0x19   :  { %p15965_p10 = pnand %p15963_p9, %p15960_p8 }
  0x1b   :  { %15968 = shalt.err (!%p15965_p10)
}
  0x1c   :  { %s15969_s1 = scalar_lea.vmem %s54_s8, 36864  ;;  %p15974_p12 = scmp.lt.s32.totalorder %s54_s8, %s54_s8 }
  0x1d   :  { %p15970_p11 = scmp.ne.s32.totalorder %s54_s8, %s15969_s1  ;;  %p15975_p13 = scmp.lt.s32.totalorder %s15969_s1, %s15969_s1 }
  0x1f   :  { %p15976_p0 = por %p15975_p13, %p15974_p12 }
  0x21   :  { %p15977_p1 = pnand %p15976_p0, %p15970_p11 }
  0x23   :  { %15980 = shalt.err (!%p15977_p1)
}
  0x24   :  { %s16082_s18 = smov 384   ;;  %s16083_s19 = smov 24  }
  0x25   :  { %59 = dma.hbm_to_vmem [thread:$0]  %s17669_s3, 36864, %s54_s8, [#allocation9], %s16082_s18, %s16082_s18, %s16083_s19  }
  0x26   :  { %s15981_s24 = scalar_lea.hbm %s17666_s0, 6144 }
  0x27   :  { %p15982_p2 = scmp.ne.s32.totalorder %s17666_s0, %s15981_s24  ;;  %p15985_p3 = scmp.lt.u32.totalorder %s15981_s24, %s17666_s0 }
  0x29   :  { %p15987_p4 = pnand %p15985_p3, %p15982_p2 }
  0x2b   :  { %15990 = shalt.err (!%p15987_p4)
}
  0x2c   :  { %s15991_s29 = scalar_lea.vmem %s20_s10, 6144  ;;  %p15996_p6 = scmp.lt.s32.totalorder %s20_s10, %s20_s10 }
  0x2d   :  { %p15992_p5 = scmp.ne.s32.totalorder %s20_s10, %s15991_s29  ;;  %p15997_p7 = scmp.lt.s32.totalorder %s15991_s29, %s15991_s29 }
  0x2f   :  { %p15998_p8 = por %p15997_p7, %p15996_p6 }
  0x31   :  { %p15999_p9 = pnand %p15998_p8, %p15992_p5 }
  0x33   :  { %16002 = shalt.err (!%p15999_p9)
}
  0x34   :  { %25 = dma.hbm_to_vmem [thread:$0]  %s17666_s0, 6144, %s20_s10, [#allocation3], %s16082_s18, %s16082_s18, %s16083_s19  }
  0x35   :  { %s16084_s6 = smov [#allocation7]   ;;  %s16085_s8 = smov [#allocation10]  }
  0x36   :  { %s44_s7 = sshll.u32 %s16084_s6, 4  ;;  %s66_s9 = sshll.u32 %s16085_s8, 4  ;;  %s45_s7 = int_to_ptr.vmem [resolvable:$true] %s44_s7  ;;  %s67_s9 = int_to_ptr.vmem [resolvable:$true] %s66_s9 }
  0x37   :  { %s16003_s13 = scalar_lea.hbm %s17668_s2, 96 }
  0x38   :  { %p16004_p10 = scmp.ne.s32.totalorder %s17668_s2, %s16003_s13  ;;  %p16007_p11 = scmp.lt.u32.totalorder %s16003_s13, %s17668_s2 }
  0x3a   :  { %p16009_p12 = pnand %p16007_p11, %p16004_p10 }
  0x3c   :  { %16012 = shalt.err (!%p16009_p12)
}
  0x3d   :  { %s16013_s0 = scalar_lea.vmem %s45_s7, 96  ;;  %p16018_p0 = scmp.lt.s32.totalorder %s45_s7, %s45_s7 }
  0x3e   :  { %p16014_p13 = scmp.ne.s32.totalorder %s45_s7, %s16013_s0  ;;  %p16019_p1 = scmp.lt.s32.totalorder %s16013_s0, %s16013_s0 }
  0x40   :  { %p16020_p2 = por %p16019_p1, %p16018_p0 }
  0x42   :  { %p16021_p3 = pnand %p16020_p2, %p16014_p13 }
  0x44   :  { %16024 = shalt.err (!%p16021_p3)
}
  0x45   :  { %47 = dma.hbm_to_vmem [thread:$0]  %s17668_s2, 96, %s45_s7, [#allocation6]  }
  0x46   :  { %s16025_s20 = scalar_lea.hbm %s17670_s4, 96 }
  0x47   :  { %p16026_p4 = scmp.ne.s32.totalorder %s17670_s4, %s16025_s20  ;;  %p16029_p5 = scmp.lt.u32.totalorder %s16025_s20, %s17670_s4 }
  0x49   :  { %p16031_p6 = pnand %p16029_p5, %p16026_p4 }
  0x4b   :  { %16034 = shalt.err (!%p16031_p6)
}
  0x4c   :  { %s16035_s25 = scalar_lea.vmem %s67_s9, 96  ;;  %p16040_p8 = scmp.lt.s32.totalorder %s67_s9, %s67_s9 }
  0x4d   :  { %p16036_p7 = scmp.ne.s32.totalorder %s67_s9, %s16035_s25  ;;  %p16041_p9 = scmp.lt.s32.totalorder %s16035_s25, %s16035_s25 }
  0x4f   :  { %p16042_p10 = por %p16041_p9, %p16040_p8 }
  0x51   :  { %p16043_p11 = pnand %p16042_p10, %p16036_p7 }
  0x53   :  { %16046 = shalt.err (!%p16043_p11)
}
  0x54   :  { %69 = dma.hbm_to_vmem [thread:$0]  %s17670_s4, 96, %s67_s9, [#allocation9]  }
  0x55   :  { %16069 = dma.done.wait [#allocation3], 6144  }
  0x56   :  { %16070 = vsyncadd [#allocation3], 4294961152 }
  0x57   :  { %16071 = dma.done.wait [#allocation6], 110688  }
  0x58   :  { %16072 = vsyncadd [#allocation6], 4294856608 }
  0x59   :  { %16073 = dma.done.wait [#allocation9], 36960  }
  0x5a   :  { %16074 = vsyncadd [#allocation9], 4294930336  ;;  %v13943_v0 = vld [vmem:[#allocation5 + $0x4] ss:$72 sps:$4 sm:$0xff]   ;;  %v13947_v2 = vld [vmem:[#allocation5] ss:$72 sps:$4 sm:$0xff]  }
  0x5b   :  { %v13945_v1 = vld [vmem:[#allocation5 + $0xc] ss:$72 sps:$4 sm:$0xff]   ;;  %1529 = vmatprep.subr.bf16.mxu0 %v13943_v0  ;;  %v13948_v3 = vld [vmem:[#allocation5 + $0x8] ss:$72 sps:$4 sm:$0xff]   ;;  %v13951_v5 = vld [vmem:[#allocation5 + $0x9c] ss:$72 sps:$4 sm:$0xff]  }
  0x5c   :  { %1868 = vmatprep.subr.bf16.mxu1 %v13945_v1  ;;  %v13949_v4 = vld [vmem:[#allocation5 + $0x94] ss:$72 sps:$4 sm:$0xff]   ;;  %1530 = vmatpush1.bf16.msra.mxu0 %v13947_v2  ;;  %v13953_v6 = vld [vmem:[#allocation5 + $0x90] ss:$72 sps:$4 sm:$0xff]   ;;  %v13955_v8 = vld [vmem:[#allocation5 + $0x124] ss:$72 sps:$4 sm:$0xff]  }
  0x5d   :  { %1869 = vmatpush1.bf16.msra.mxu1 %v13948_v3  ;;  %1531 = vmatprep.subr.bf16.mxu0 %v13949_v4  ;;  %v13954_v7 = vld [vmem:[#allocation5 + $0x98] ss:$72 sps:$4 sm:$0xff]   ;;  %v13957_v9 = vld [vmem:[#allocation5 + $0x12c] ss:$72 sps:$4 sm:$0xff]   ;;  %v13960_v11 = vld [vmem:[#allocation5 + $0x128] ss:$72 sps:$4 sm:$0xff]  }
  0x5e   :  { %1870 = vmatprep.subr.bf16.mxu1 %v13951_v5  ;;  %v13959_v10 = vld [vmem:[#allocation5 + $0x120] ss:$72 sps:$4 sm:$0xff]   ;;  %v13961_v12 = vld [vmem:[#allocation5 + $0x1b4] ss:$72 sps:$4 sm:$0xff]   ;;  %v13965_v14 = vld [vmem:[#allocation5 + $0x1b0] ss:$72 sps:$4 sm:$0xff]  }
  0x5f   :  { %v13963_v13 = vld [vmem:[#allocation5 + $0x1bc] ss:$72 sps:$4 sm:$0xff]   ;;  %v13966_v15 = vld [vmem:[#allocation5 + $0x1b8] ss:$72 sps:$4 sm:$0xff]   ;;  %v13969_v17 = vld [vmem:[#allocation5 + $0x24c] ss:$72 sps:$4 sm:$0xff]  }
  0x60   :  { %1532 = vmatpush1.bf16.msra.mxu0 %v13953_v6  ;;  %v13967_v16 = vld [vmem:[#allocation5 + $0x244] ss:$72 sps:$4 sm:$0xff]   ;;  %v13971_v18 = vld [vmem:[#allocation5 + $0x240] ss:$72 sps:$4 sm:$0xff]   ;;  %v13973_v20 = vld [vmem:[#allocation5 + $0x2d4] ss:$72 sps:$4 sm:$0xff]  }
  0x61   :  { %1871 = vmatpush1.bf16.msra.mxu1 %v13954_v7  ;;  %1533 = vmatprep.subr.bf16.mxu0 %v13955_v8  ;;  %v13972_v19 = vld [vmem:[#allocation5 + $0x248] ss:$72 sps:$4 sm:$0xff]   ;;  %v13975_v21 = vld [vmem:[#allocation5 + $0x2dc] ss:$72 sps:$4 sm:$0xff]   ;;  %v13978_v23 = vld [vmem:[#allocation5 + $0x2d8] ss:$72 sps:$4 sm:$0xff]  }
  0x62   :  { %1872 = vmatprep.subr.bf16.mxu1 %v13957_v9  ;;  %v13977_v22 = vld [vmem:[#allocation5 + $0x2d0] ss:$72 sps:$4 sm:$0xff]   ;;  %v13979_v24 = vld [vmem:[#allocation5 + $0x364] ss:$72 sps:$4 sm:$0xff]   ;;  %v13983_v26 = vld [vmem:[#allocation5 + $0x360] ss:$72 sps:$4 sm:$0xff]  }
  0x63   :  { %v13981_v25 = vld [vmem:[#allocation5 + $0x36c] ss:$72 sps:$4 sm:$0xff]   ;;  %v13984_v27 = vld [vmem:[#allocation5 + $0x368] ss:$72 sps:$4 sm:$0xff]   ;;  %v13987_v29 = vld [vmem:[#allocation5 + $0x3fc] ss:$72 sps:$4 sm:$0xff]  }
  0x64   :  { %1534 = vmatpush1.bf16.msra.mxu0 %v13959_v10  ;;  %v13985_v28 = vld [vmem:[#allocation5 + $0x3f4] ss:$72 sps:$4 sm:$0xff]   ;;  %v13989_v30 = vld [vmem:[#allocation5 + $0x3f0] ss:$72 sps:$4 sm:$0xff]   ;;  %v13991_v32 = vld [vmem:[#allocation5 + $0x484] ss:$72 sps:$4 sm:$0xff]  }
  0x65   :  { %1873 = vmatpush1.bf16.msra.mxu1 %v13960_v11  ;;  %1535 = vmatprep.subr.bf16.mxu0 %v13961_v12  ;;  %v13990_v31 = vld [vmem:[#allocation5 + $0x3f8] ss:$72 sps:$4 sm:$0xff]   ;;  %v13993_v33 = vld [vmem:[#allocation5 + $0x48c] ss:$72 sps:$4 sm:$0xff]   ;;  %v13996_v35 = vld [vmem:[#allocation5 + $0x488] ss:$72 sps:$4 sm:$0xff]  }
  0x66   :  { %1874 = vmatprep.subr.bf16.mxu1 %v13963_v13  ;;  %v13995_v34 = vld [vmem:[#allocation5 + $0x480] ss:$72 sps:$4 sm:$0xff]   ;;  %v13997_v36 = vld [vmem:[#allocation5 + $0x514] ss:$72 sps:$4 sm:$0xff]   ;;  %v14001_v38 = vld [vmem:[#allocation5 + $0x510] ss:$72 sps:$4 sm:$0xff]  }
  0x67   :  { %v13999_v37 = vld [vmem:[#allocation5 + $0x51c] ss:$72 sps:$4 sm:$0xff]   ;;  %v14002_v39 = vld [vmem:[#allocation5 + $0x518] ss:$72 sps:$4 sm:$0xff]   ;;  %v14005_v41 = vld [vmem:[#allocation5 + $0x5ac] ss:$72 sps:$4 sm:$0xff]  }
  0x68   :  { %1536 = vmatpush1.bf16.msra.mxu0 %v13965_v14  ;;  %v14003_v40 = vld [vmem:[#allocation5 + $0x5a4] ss:$72 sps:$4 sm:$0xff]   ;;  %v14007_v42 = vld [vmem:[#allocation5 + $0x5a0] ss:$72 sps:$4 sm:$0xff]   ;;  %v14009_v44 = vld [vmem:[#allocation5 + $0x634] ss:$72 sps:$4 sm:$0xff]  }
  0x69   :  { %1875 = vmatpush1.bf16.msra.mxu1 %v13966_v15  ;;  %1537 = vmatprep.subr.bf16.mxu0 %v13967_v16  ;;  %v14008_v43 = vld [vmem:[#allocation5 + $0x5a8] ss:$72 sps:$4 sm:$0xff]   ;;  %v14011_v45 = vld [vmem:[#allocation5 + $0x63c] ss:$72 sps:$4 sm:$0xff]   ;;  %v14014_v47 = vld [vmem:[#allocation5 + $0x638] ss:$72 sps:$4 sm:$0xff]  }
  0x6a   :  { %1876 = vmatprep.subr.bf16.mxu1 %v13969_v17  ;;  %v14013_v46 = vld [vmem:[#allocation5 + $0x630] ss:$72 sps:$4 sm:$0xff]   ;;  %v14039_v48 = vld [vmem:[#allocation2 + $0x4] ss:$24 sps:$4 sm:$0xff]   ;;  %v14017_v50 = vld [vmem:[#allocation5 + $0x6cc] ss:$72 sps:$4 sm:$0xff]  }
  0x6b   :  { %v14015_v49 = vld [vmem:[#allocation5 + $0x6c4] ss:$72 sps:$4 sm:$0xff]   ;;  %1561 = vmatprep.mubr.bf16.mxu0 %v14039_v48  ;;  %1900 = vmatprep.mubr.bf16.mxu1 %v14039_v48  ;;  %v14019_v51 = vld [vmem:[#allocation5 + $0x6c0] ss:$72 sps:$4 sm:$0xff]   ;;  %v14021_v53 = vld [vmem:[#allocation5 + $0x754] ss:$72 sps:$4 sm:$0xff]  }
  0x6c   :  { %1538 = vmatpush1.bf16.msra.mxu0 %v13971_v18  ;;  %v14020_v52 = vld [vmem:[#allocation5 + $0x6c8] ss:$72 sps:$4 sm:$0xff]   ;;  %v14023_v54 = vld [vmem:[#allocation5 + $0x75c] ss:$72 sps:$4 sm:$0xff]   ;;  %v14026_v56 = vld [vmem:[#allocation5 + $0x758] ss:$72 sps:$4 sm:$0xff]  }
  0x6d   :  { %1877 = vmatpush1.bf16.msra.mxu1 %v13972_v19  ;;  %1539 = vmatprep.subr.bf16.mxu0 %v13973_v20  ;;  %v14025_v55 = vld [vmem:[#allocation5 + $0x750] ss:$72 sps:$4 sm:$0xff]   ;;  %v14027_v57 = vld [vmem:[#allocation5 + $0x7e4] ss:$72 sps:$4 sm:$0xff]   ;;  %v14031_v59 = vld [vmem:[#allocation5 + $0x7e0] ss:$72 sps:$4 sm:$0xff]  }
  0x6e   :  { %1878 = vmatprep.subr.bf16.mxu1 %v13975_v21  ;;  %v14029_v58 = vld [vmem:[#allocation5 + $0x7ec] ss:$72 sps:$4 sm:$0xff]   ;;  %v14032_v60 = vld [vmem:[#allocation5 + $0x7e8] ss:$72 sps:$4 sm:$0xff]   ;;  %v14035_v62 = vld [vmem:[#allocation5 + $0x87c] ss:$72 sps:$4 sm:$0xff]  }
  0x6f   :  { %v14033_v61 = vld [vmem:[#allocation5 + $0x874] ss:$72 sps:$4 sm:$0xff]   ;;  %v14037_v63 = vld [vmem:[#allocation5 + $0x870] ss:$72 sps:$4 sm:$0xff]   ;;  %v14044_v1 = vld [vmem:[#allocation5 + $0x904] ss:$72 sps:$4 sm:$0xff]  }
  0x70   :  { %1540 = vmatpush1.bf16.msra.mxu0 %v13977_v22  ;;  %v14038_v0 = vld [vmem:[#allocation5 + $0x878] ss:$72 sps:$4 sm:$0xff]   ;;  %v14047_v2 = vld [vmem:[#allocation5 + $0x90c] ss:$72 sps:$4 sm:$0xff]   ;;  %v14045_v5 = vld [vmem:[#allocation5 + $0x908] ss:$72 sps:$4 sm:$0xff]  }
  0x71   :  { %1879 = vmatpush1.bf16.msra.mxu1 %v13978_v23  ;;  %1541 = vmatprep.subr.bf16.mxu0 %v13979_v24  ;;  %v14041_v3 = vld [vmem:[#allocation2] ss:$24 sps:$4 sm:$0xff]   ;;  %v14050_v6 = vld [vmem:[#allocation5 + $0x994] ss:$72 sps:$4 sm:$0xff]   ;;  %v14059_v11 = vld [vmem:[#allocation5 + $0xa24] ss:$72 sps:$4 sm:$0xff]  }
  0x72   :  { %1880 = vmatprep.subr.bf16.mxu1 %v13981_v25  ;;  %v14042_v4 = vld [vmem:[#allocation5 + $0x900] ss:$72 sps:$4 sm:$0xff]   ;;  %v14053_v7 = vld [vmem:[#allocation5 + $0x99c] ss:$72 sps:$4 sm:$0xff]   ;;  %v14054_v8 = vld [vmem:[#allocation2 + $0x34] ss:$24 sps:$4 sm:$0xff]  }
  0x73   :  { %v14048_v9 = vld [vmem:[#allocation5 + $0x990] ss:$72 sps:$4 sm:$0xff]   ;;  %v14062_v12 = vld [vmem:[#allocation5 + $0xa2c] ss:$72 sps:$4 sm:$0xff]   ;;  %v14057_v14 = vld [vmem:[#allocation5 + $0xa20] ss:$72 sps:$4 sm:$0xff]  }
  0x74   :  { %1542 = vmatpush1.bf16.msra.mxu0 %v13983_v26  ;;  %v14051_v10 = vld [vmem:[#allocation5 + $0x998] ss:$72 sps:$4 sm:$0xff]   ;;  %v14056_v13 = vld [vmem:[#allocation2 + $0x30] ss:$24 sps:$4 sm:$0xff]   ;;  %v14065_v16 = vld [vmem:[#allocation5 + $0xab4] ss:$72 sps:$4 sm:$0xff]  }
  0x75   :  { %1881 = vmatpush1.bf16.msra.mxu1 %v13984_v27  ;;  %1543 = vmatprep.subr.bf16.mxu0 %v13985_v28  ;;  %v14060_v15 = vld [vmem:[#allocation5 + $0xa28] ss:$72 sps:$4 sm:$0xff]   ;;  %v14068_v17 = vld [vmem:[#allocation5 + $0xabc] ss:$72 sps:$4 sm:$0xff]   ;;  %v14066_v20 = vld [vmem:[#allocation5 + $0xab8] ss:$72 sps:$4 sm:$0xff]  }
  0x76   :  { %1882 = vmatprep.subr.bf16.mxu1 %v13987_v29  ;;  %v14069_v18 = vld [vmem:[#allocation2 + $0x64] ss:$24 sps:$4 sm:$0xff]   ;;  %v14063_v19 = vld [vmem:[#allocation5 + $0xab0] ss:$72 sps:$4 sm:$0xff]   ;;  %v14077_v22 = vld [vmem:[#allocation5 + $0xb4c] ss:$72 sps:$4 sm:$0xff]  }
  0x77   :  { %v14074_v21 = vld [vmem:[#allocation5 + $0xb44] ss:$72 sps:$4 sm:$0xff]   ;;  %v14071_v23 = vld [vmem:[#allocation2 + $0x60] ss:$24 sps:$4 sm:$0xff]   ;;  %v14075_v25 = vld [vmem:[#allocation5 + $0xb48] ss:$72 sps:$4 sm:$0xff]  }
  0x78   :  { %1544 = vmatpush1.bf16.msra.mxu0 %v13989_v30  ;;  %v14072_v24 = vld [vmem:[#allocation5 + $0xb40] ss:$72 sps:$4 sm:$0xff]   ;;  %v14080_v26 = vld [vmem:[#allocation5 + $0xbd4] ss:$72 sps:$4 sm:$0xff]   ;;  %v14078_v29 = vld [vmem:[#allocation5 + $0xbd0] ss:$72 sps:$4 sm:$0xff]  }
  0x79   :  { %1883 = vmatpush1.bf16.msra.mxu1 %v13990_v31  ;;  %1545 = vmatprep.subr.bf16.mxu0 %v13991_v32  ;;  %v14083_v27 = vld [vmem:[#allocation5 + $0xbdc] ss:$72 sps:$4 sm:$0xff]   ;;  %v14084_v28 = vld [vmem:[#allocation2 + $0x94] ss:$24 sps:$4 sm:$0xff]   ;;  %v14081_v30 = vld [vmem:[#allocation5 + $0xbd8] ss:$72 sps:$4 sm:$0xff]  }
  0x7a   :  { %1884 = vmatprep.subr.bf16.mxu1 %v13993_v33  ;;  %v14089_v31 = vld [vmem:[#allocation5 + $0xc64] ss:$72 sps:$4 sm:$0xff]   ;;  %v14086_v33 = vld [vmem:[#allocation2 + $0x90] ss:$24 sps:$4 sm:$0xff]   ;;  %vm9882_vm2 = vcmask 1041409   ;;  %vm9884_vm3 = vcmask 1042434  }
  0x7b   :  { %v14092_v32 = vld [vmem:[#allocation5 + $0xc6c] ss:$72 sps:$4 sm:$0xff]   ;;  %vm9886_vm4 = vcmask 1043459   ;;  %vm9888_vm5 = vcmask 1044484   ;;  %vm9890_vm6 = vcmask 1045509   ;;  %vm9892_vm7 = vcmask 1046534  }
  0x7c   :  { %1546 = vmatpush1.bf16.msra.mxu0 %v13995_v34  ;;  %v14087_v34 = vld [vmem:[#allocation5 + $0xc60] ss:$72 sps:$4 sm:$0xff]   ;;  %v14114_v48 = vld [vmem:[#allocation2 + $0xf4] ss:$24 sps:$4 sm:$0xff]   ;;  %vm9894_vm8 = vcmask 1047559   ;;  %s16086_s4 = smov [#allocation11]  }
  0x7d   :  { %1885 = vmatpush1.bf16.msra.mxu1 %v13996_v35  ;;  %1547 = vmatprep.subr.bf16.mxu0 %v13997_v36  ;;  %v14090_v35 = vld [vmem:[#allocation5 + $0xc68] ss:$72 sps:$4 sm:$0xff]   ;;  %v14095_v36 = vld [vmem:[#allocation5 + $0xcf4] ss:$72 sps:$4 sm:$0xff]   ;;  %s12116_s27 = sshll.u32 %s16086_s4, 4  ;;  %s12117_s27 = int_to_ptr.vmem [resolvable:$true] %s12116_s27 }
  0x7e   :  { %1886 = vmatprep.subr.bf16.mxu1 %v13999_v37  ;;  %v14098_v37 = vld [vmem:[#allocation5 + $0xcfc] ss:$72 sps:$4 sm:$0xff]   ;;  %s16047_s28 = scalar_lea.vmem %s12117_s27, 768  ;;  %p16052_p13 = scmp.lt.s32.totalorder %s12117_s27, %s12117_s27 }
  0x7f   :  { %p16048_p12 = scmp.ne.s32.totalorder %s12117_s27, %s16047_s28  ;;  %p16053_p0 = scmp.lt.s32.totalorder %s16047_s28, %s16047_s28 }
  0x80   :  { %1548 = vmatpush1.bf16.msra.mxu0 %v14001_v38  ;;  %v14099_v38 = vld [vmem:[#allocation2 + $0xc4] ss:$24 sps:$4 sm:$0xff]  }
  0x81   :  { %1887 = vmatpush1.bf16.msra.mxu1 %v14002_v39  ;;  %1549 = vmatprep.subr.bf16.mxu0 %v14003_v40  ;;  %v14093_v39 = vld [vmem:[#allocation5 + $0xcf0] ss:$72 sps:$4 sm:$0xff]   ;;  %p16054_p1 = por %p16053_p0, %p16052_p13 }
  0x82   :  { %1888 = vmatprep.subr.bf16.mxu1 %v14005_v41  ;;  %v14096_v40 = vld [vmem:[#allocation5 + $0xcf8] ss:$72 sps:$4 sm:$0xff]   ;;  %v14104_v41 = vld [vmem:[#allocation5 + $0xd84] ss:$72 sps:$4 sm:$0xff]  }
  0x83   :  { %p16055_p2 = pnand %p16054_p1, %p16048_p12 }
  0x84   :  { %1550 = vmatpush1.bf16.msra.mxu0 %v14007_v42  ;;  %v14107_v42 = vld [vmem:[#allocation5 + $0xd8c] ss:$72 sps:$4 sm:$0xff]  }
  0x85   :  { %1889 = vmatpush1.bf16.msra.mxu1 %v14008_v43  ;;  %1551 = vmatprep.subr.bf16.mxu0 %v14009_v44  ;;  %v14101_v43 = vld [vmem:[#allocation2 + $0xc0] ss:$24 sps:$4 sm:$0xff]  }
  0x86   :  { %1890 = vmatprep.subr.bf16.mxu1 %v14011_v45  ;;  %v14102_v44 = vld [vmem:[#allocation5 + $0xd80] ss:$72 sps:$4 sm:$0xff]  }
  0x87   :  { %v14105_v45 = vld [vmem:[#allocation5 + $0xd88] ss:$72 sps:$4 sm:$0xff]  }
  0x88   :  { %1552 = vmatpush1.bf16.msra.mxu0 %v14013_v46  ;;  %v14110_v46 = vld [vmem:[#allocation5 + $0xe14] ss:$72 sps:$4 sm:$0xff]  }
  0x89   :  { %1891 = vmatpush1.bf16.msra.mxu1 %v14014_v47  ;;  %1553 = vmatprep.subr.bf16.mxu0 %v14015_v49  ;;  %v14113_v47 = vld [vmem:[#allocation5 + $0xe1c] ss:$72 sps:$4 sm:$0xff]   ;;  %v14108_v49 = vld [vmem:[#allocation5 + $0xe10] ss:$72 sps:$4 sm:$0xff]  }
  0x8a   :  { %1892 = vmatprep.subr.bf16.mxu1 %v14017_v50  ;;  %v14111_v50 = vld [vmem:[#allocation5 + $0xe18] ss:$72 sps:$4 sm:$0xff]  }
  0x8c   :  { %1554 = vmatpush1.bf16.msra.mxu0 %v14019_v51  ;;  %v14119_v51 = vld [vmem:[#allocation5 + $0xea4] ss:$72 sps:$4 sm:$0xff]  }
  0x8d   :  { %1893 = vmatpush1.bf16.msra.mxu1 %v14020_v52  ;;  %1555 = vmatprep.subr.bf16.mxu0 %v14021_v53  ;;  %v14122_v52 = vld [vmem:[#allocation5 + $0xeac] ss:$72 sps:$4 sm:$0xff]   ;;  %v14116_v53 = vld [vmem:[#allocation2 + $0xf0] ss:$24 sps:$4 sm:$0xff]  }
  0x8e   :  { %1894 = vmatprep.subr.bf16.mxu1 %v14023_v54  ;;  %v14117_v54 = vld [vmem:[#allocation5 + $0xea0] ss:$72 sps:$4 sm:$0xff]  }
  0x90   :  { %1556 = vmatpush1.bf16.msra.mxu0 %v14025_v55  ;;  %v14120_v55 = vld [vmem:[#allocation5 + $0xea8] ss:$72 sps:$4 sm:$0xff]  }
  0x91   :  { %1895 = vmatpush1.bf16.msra.mxu1 %v14026_v56  ;;  %1557 = vmatprep.subr.bf16.mxu0 %v14027_v57  ;;  %v14125_v56 = vld [vmem:[#allocation5 + $0xf34] ss:$72 sps:$4 sm:$0xff]  }
  0x92   :  { %1896 = vmatprep.subr.bf16.mxu1 %v14029_v58  ;;  %v14128_v57 = vld [vmem:[#allocation5 + $0xf3c] ss:$72 sps:$4 sm:$0xff]  }
  0x93   :  { %v14129_v58 = vld [vmem:[#allocation2 + $0x124] ss:$24 sps:$4 sm:$0xff]  }
  0x94   :  { %1558 = vmatpush1.bf16.msra.mxu0 %v14031_v59  ;;  %v14123_v59 = vld [vmem:[#allocation5 + $0xf30] ss:$72 sps:$4 sm:$0xff]  }
  0x95   :  { %1897 = vmatpush1.bf16.msra.mxu1 %v14032_v60  ;;  %1559 = vmatprep.subr.bf16.mxu0 %v14033_v61  ;;  %v14126_v60 = vld [vmem:[#allocation5 + $0xf38] ss:$72 sps:$4 sm:$0xff]   ;;  %v14134_v61 = vld [vmem:[#allocation5 + $0xfc4] ss:$72 sps:$4 sm:$0xff]  }
  0x96   :  { %1898 = vmatprep.subr.bf16.mxu1 %v14035_v62  ;;  %v14137_v62 = vld [vmem:[#allocation5 + $0xfcc] ss:$72 sps:$4 sm:$0xff]  }
  0x98   :  { %1560 = vmatpush1.bf16.msra.mxu0 %v14037_v63  ;;  %v14131_v63 = vld [vmem:[#allocation2 + $0x120] ss:$24 sps:$4 sm:$0xff]  }
  0x99   :  { %1899 = vmatpush1.bf16.msra.mxu1 %v14038_v0  ;;  %1642 = vmatprep.subr.bf16.mxu0 %v14044_v1  ;;  %v14132_v0 = vld [vmem:[#allocation5 + $0xfc0] ss:$72 sps:$4 sm:$0xff]  }
  0x9a   :  { %1981 = vmatprep.subr.bf16.mxu1 %v14047_v2  ;;  %v14135_v1 = vld [vmem:[#allocation5 + $0xfc8] ss:$72 sps:$4 sm:$0xff]   ;;  %v14140_v2 = vld [vmem:[#allocation5 + $0x1054] ss:$72 sps:$4 sm:$0xff]  }
  0x9b   :  { %1562 = vmatmul.mubr.bf16.vlgmr.msra.gmra.mrb[0].mxu0 %v14041_v3 }
  0x9c   :  { %1901 = vmatmul.mubr.bf16.vlgmr.msra.gmra.mrb[0].mxu1 %v14041_v3  ;;  %1643 = vmatpush1.bf16.msra.mxu0 %v14042_v4  ;;  %v14143_v3 = vld [vmem:[#allocation5 + $0x105c] ss:$72 sps:$4 sm:$0xff]   ;;  %v14144_v4 = vld [vmem:[#allocation2 + $0x154] ss:$24 sps:$4 sm:$0xff]  }
  0x9d   :  { %1982 = vmatpush1.bf16.msra.mxu1 %v14045_v5  ;;  %1644 = vmatprep.subr.bf16.mxu0 %v14050_v6  ;;  %v14138_v5 = vld [vmem:[#allocation5 + $0x1050] ss:$72 sps:$4 sm:$0xff]  }
  0x9e   :  { %1983 = vmatprep.subr.bf16.mxu1 %v14053_v7  ;;  %1571 = vmatprep.mubr.bf16.mxu0 %v14054_v8  ;;  %v14141_v6 = vld [vmem:[#allocation5 + $0x1058] ss:$72 sps:$4 sm:$0xff]   ;;  %v14149_v7 = vld [vmem:[#allocation5 + $0x10e4] ss:$72 sps:$4 sm:$0xff]  }
  0x9f   :  { %1910 = vmatprep.mubr.bf16.mxu1 %v14054_v8  ;;  %v14152_v8 = vld [vmem:[#allocation5 + $0x10ec] ss:$72 sps:$4 sm:$0xff]  }
  0xa0   :  { %1645 = vmatpush1.bf16.msra.mxu0 %v14048_v9  ;;  %v14146_v9 = vld [vmem:[#allocation2 + $0x150] ss:$24 sps:$4 sm:$0xff]  }
  0xa1   :  { %1984 = vmatpush1.bf16.msra.mxu1 %v14051_v10  ;;  %1646 = vmatprep.subr.bf16.mxu0 %v14059_v11  ;;  %v14147_v10 = vld [vmem:[#allocation5 + $0x10e0] ss:$72 sps:$4 sm:$0xff]  }
  0xa2   :  { %1985 = vmatprep.subr.bf16.mxu1 %v14062_v12  ;;  %v14150_v11 = vld [vmem:[#allocation5 + $0x10e8] ss:$72 sps:$4 sm:$0xff]   ;;  %v14155_v12 = vld [vmem:[#allocation5 + $0x1174] ss:$72 sps:$4 sm:$0xff]  }
  0xa3   :  { %1572 = vmatmul.mubr.bf16.gmra.mrb[4].mxu0 %v14056_v13 }
  0xa4   :  { %1911 = vmatmul.mubr.bf16.gmra.mrb[4].mxu1 %v14056_v13  ;;  %1647 = vmatpush1.bf16.msra.mxu0 %v14057_v14  ;;  %v14158_v13 = vld [vmem:[#allocation5 + $0x117c] ss:$72 sps:$4 sm:$0xff]  }
  0xa5   :  { %1986 = vmatpush1.bf16.msra.mxu1 %v14060_v15  ;;  %1648 = vmatprep.subr.bf16.mxu0 %v14065_v16  ;;  %v14159_v14 = vld [vmem:[#allocation2 + $0xc] ss:$24 sps:$4 sm:$0xff]   ;;  %v14153_v15 = vld [vmem:[#allocation5 + $0x1170] ss:$72 sps:$4 sm:$0xff]  }
  0xa6   :  { %1987 = vmatprep.subr.bf16.mxu1 %v14068_v17  ;;  %1581 = vmatprep.mubr.bf16.mxu0 %v14069_v18  ;;  %v14156_v16 = vld [vmem:[#allocation5 + $0x1178] ss:$72 sps:$4 sm:$0xff]   ;;  %v14164_v17 = vld [vmem:[#allocation5 + $0x1204] ss:$72 sps:$4 sm:$0xff]  }
  0xa7   :  { %1920 = vmatprep.mubr.bf16.mxu1 %v14069_v18  ;;  %v14167_v18 = vld [vmem:[#allocation5 + $0x120c] ss:$72 sps:$4 sm:$0xff]  }
  0xa8   :  { %1649 = vmatpush1.bf16.msra.mxu0 %v14063_v19  ;;  %v14161_v19 = vld [vmem:[#allocation2 + $0x8] ss:$24 sps:$4 sm:$0xff]  }
  0xa9   :  { %1988 = vmatpush1.bf16.msra.mxu1 %v14066_v20  ;;  %1650 = vmatprep.subr.bf16.mxu0 %v14074_v21  ;;  %v14162_v20 = vld [vmem:[#allocation5 + $0x1200] ss:$72 sps:$4 sm:$0xff]  }
  0xaa   :  { %1989 = vmatprep.subr.bf16.mxu1 %v14077_v22  ;;  %v14165_v21 = vld [vmem:[#allocation5 + $0x1208] ss:$72 sps:$4 sm:$0xff]   ;;  %v14170_v22 = vld [vmem:[#allocation5 + $0x1294] ss:$72 sps:$4 sm:$0xff]  }
  0xab   :  { %1582 = vmatmul.mubr.bf16.gmra.mrb[8].mxu0 %v14071_v23 }
  0xac   :  { %1921 = vmatmul.mubr.bf16.gmra.mrb[8].mxu1 %v14071_v23  ;;  %1651 = vmatpush1.bf16.msra.mxu0 %v14072_v24  ;;  %v14173_v23 = vld [vmem:[#allocation5 + $0x129c] ss:$72 sps:$4 sm:$0xff]  }
  0xad   :  { %1990 = vmatpush1.bf16.msra.mxu1 %v14075_v25  ;;  %1652 = vmatprep.subr.bf16.mxu0 %v14080_v26  ;;  %v14174_v24 = vld [vmem:[#allocation2 + $0x3c] ss:$24 sps:$4 sm:$0xff]   ;;  %v14168_v25 = vld [vmem:[#allocation5 + $0x1290] ss:$72 sps:$4 sm:$0xff]  }
  0xae   :  { %1991 = vmatprep.subr.bf16.mxu1 %v14083_v27  ;;  %1591 = vmatprep.mubr.bf16.mxu0 %v14084_v28  ;;  %v14171_v26 = vld [vmem:[#allocation5 + $0x1298] ss:$72 sps:$4 sm:$0xff]   ;;  %v14179_v27 = vld [vmem:[#allocation5 + $0x1324] ss:$72 sps:$4 sm:$0xff]  }
  0xaf   :  { %1930 = vmatprep.mubr.bf16.mxu1 %v14084_v28  ;;  %v14182_v28 = vld [vmem:[#allocation5 + $0x132c] ss:$72 sps:$4 sm:$0xff]  }
  0xb0   :  { %1653 = vmatpush1.bf16.msra.mxu0 %v14078_v29  ;;  %v14176_v29 = vld [vmem:[#allocation2 + $0x38] ss:$24 sps:$4 sm:$0xff]  }
  0xb1   :  { %1992 = vmatpush1.bf16.msra.mxu1 %v14081_v30  ;;  %1654 = vmatprep.subr.bf16.mxu0 %v14089_v31  ;;  %v14177_v30 = vld [vmem:[#allocation5 + $0x1320] ss:$72 sps:$4 sm:$0xff]  }
  0xb2   :  { %1993 = vmatprep.subr.bf16.mxu1 %v14092_v32  ;;  %v14180_v31 = vld [vmem:[#allocation5 + $0x1328] ss:$72 sps:$4 sm:$0xff]   ;;  %v14185_v32 = vld [vmem:[#allocation5 + $0x13b4] ss:$72 sps:$4 sm:$0xff]  }
  0xb3   :  { %1592 = vmatmul.mubr.bf16.gmra.mrb[12].mxu0 %v14086_v33 }
  0xb4   :  { %1931 = vmatmul.mubr.bf16.gmra.mrb[12].mxu1 %v14086_v33  ;;  %1655 = vmatpush1.bf16.msra.mxu0 %v14087_v34  ;;  %v14188_v33 = vld [vmem:[#allocation5 + $0x13bc] ss:$72 sps:$4 sm:$0xff]  }
  0xb5   :  { %1994 = vmatpush1.bf16.msra.mxu1 %v14090_v35  ;;  %1656 = vmatprep.subr.bf16.mxu0 %v14095_v36  ;;  %v14189_v34 = vld [vmem:[#allocation2 + $0x6c] ss:$24 sps:$4 sm:$0xff]   ;;  %v14183_v35 = vld [vmem:[#allocation5 + $0x13b0] ss:$72 sps:$4 sm:$0xff]  }
  0xb6   :  { %1995 = vmatprep.subr.bf16.mxu1 %v14098_v37  ;;  %1601 = vmatprep.mubr.bf16.mxu0 %v14099_v38  ;;  %v14186_v36 = vld [vmem:[#allocation5 + $0x13b8] ss:$72 sps:$4 sm:$0xff]   ;;  %v14194_v37 = vld [vmem:[#allocation5 + $0x1444] ss:$72 sps:$4 sm:$0xff]  }
  0xb7   :  { %1940 = vmatprep.mubr.bf16.mxu1 %v14099_v38  ;;  %v14197_v38 = vld [vmem:[#allocation5 + $0x144c] ss:$72 sps:$4 sm:$0xff]  }
  0xb8   :  { %1657 = vmatpush1.bf16.msra.mxu0 %v14093_v39  ;;  %v14191_v39 = vld [vmem:[#allocation2 + $0x68] ss:$24 sps:$4 sm:$0xff]  }
  0xb9   :  { %1996 = vmatpush1.bf16.msra.mxu1 %v14096_v40  ;;  %1658 = vmatprep.subr.bf16.mxu0 %v14104_v41  ;;  %v14192_v40 = vld [vmem:[#allocation5 + $0x1440] ss:$72 sps:$4 sm:$0xff]  }
  0xba   :  { %1997 = vmatprep.subr.bf16.mxu1 %v14107_v42  ;;  %v14195_v41 = vld [vmem:[#allocation5 + $0x1448] ss:$72 sps:$4 sm:$0xff]   ;;  %v14200_v42 = vld [vmem:[#allocation5 + $0x14d4] ss:$72 sps:$4 sm:$0xff]  }
  0xbb   :  { %1602 = vmatmul.mubr.bf16.gmra.mrb[16].mxu0 %v14101_v43 }
  0xbc   :  { %1941 = vmatmul.mubr.bf16.gmra.mrb[16].mxu1 %v14101_v43  ;;  %1659 = vmatpush1.bf16.msra.mxu0 %v14102_v44  ;;  %v14203_v43 = vld [vmem:[#allocation5 + $0x14dc] ss:$72 sps:$4 sm:$0xff]  }
  0xbd   :  { %1998 = vmatpush1.bf16.msra.mxu1 %v14105_v45  ;;  %1660 = vmatprep.subr.bf16.mxu0 %v14110_v46  ;;  %v14204_v44 = vld [vmem:[#allocation2 + $0x9c] ss:$24 sps:$4 sm:$0xff]   ;;  %v14198_v45 = vld [vmem:[#allocation5 + $0x14d0] ss:$72 sps:$4 sm:$0xff]  }
  0xbe   :  { %1999 = vmatprep.subr.bf16.mxu1 %v14113_v47  ;;  %1611 = vmatprep.mubr.bf16.mxu0 %v14114_v48  ;;  %v14201_v46 = vld [vmem:[#allocation5 + $0x14d8] ss:$72 sps:$4 sm:$0xff]   ;;  %v14209_v47 = vld [vmem:[#allocation5 + $0x1564] ss:$72 sps:$4 sm:$0xff]  }
  0xbf   :  { %1950 = vmatprep.mubr.bf16.mxu1 %v14114_v48  ;;  %v14212_v48 = vld [vmem:[#allocation5 + $0x156c] ss:$72 sps:$4 sm:$0xff]  }
  0xc0   :  { %1661 = vmatpush1.bf16.msra.mxu0 %v14108_v49  ;;  %v14206_v49 = vld [vmem:[#allocation2 + $0x98] ss:$24 sps:$4 sm:$0xff]  }
  0xc1   :  { %2000 = vmatpush1.bf16.msra.mxu1 %v14111_v50  ;;  %1662 = vmatprep.subr.bf16.mxu0 %v14119_v51  ;;  %v14207_v50 = vld [vmem:[#allocation5 + $0x1560] ss:$72 sps:$4 sm:$0xff]  }
  0xc2   :  { %2001 = vmatprep.subr.bf16.mxu1 %v14122_v52  ;;  %v14210_v51 = vld [vmem:[#allocation5 + $0x1568] ss:$72 sps:$4 sm:$0xff]   ;;  %v14215_v52 = vld [vmem:[#allocation5 + $0x15f4] ss:$72 sps:$4 sm:$0xff]  }
  0xc3   :  { %1612 = vmatmul.mubr.bf16.gmra.mrb[20].mxu0 %v14116_v53 }
  0xc4   :  { %1951 = vmatmul.mubr.bf16.gmra.mrb[20].mxu1 %v14116_v53  ;;  %1663 = vmatpush1.bf16.msra.mxu0 %v14117_v54  ;;  %v14218_v53 = vld [vmem:[#allocation5 + $0x15fc] ss:$72 sps:$4 sm:$0xff]  }
  0xc5   :  { %2002 = vmatpush1.bf16.msra.mxu1 %v14120_v55  ;;  %1664 = vmatprep.subr.bf16.mxu0 %v14125_v56  ;;  %v14219_v54 = vld [vmem:[#allocation2 + $0xcc] ss:$24 sps:$4 sm:$0xff]   ;;  %v14213_v55 = vld [vmem:[#allocation5 + $0x15f0] ss:$72 sps:$4 sm:$0xff]  }
  0xc6   :  { %2003 = vmatprep.subr.bf16.mxu1 %v14128_v57  ;;  %1621 = vmatprep.mubr.bf16.mxu0 %v14129_v58  ;;  %v14216_v56 = vld [vmem:[#allocation5 + $0x15f8] ss:$72 sps:$4 sm:$0xff]   ;;  %v14224_v57 = vld [vmem:[#allocation5 + $0x1684] ss:$72 sps:$4 sm:$0xff]  }
  0xc7   :  { %1960 = vmatprep.mubr.bf16.mxu1 %v14129_v58  ;;  %v14227_v58 = vld [vmem:[#allocation5 + $0x168c] ss:$72 sps:$4 sm:$0xff]  }
  0xc8   :  { %1665 = vmatpush1.bf16.msra.mxu0 %v14123_v59  ;;  %v14221_v59 = vld [vmem:[#allocation2 + $0xc8] ss:$24 sps:$4 sm:$0xff]  }
  0xc9   :  { %2004 = vmatpush1.bf16.msra.mxu1 %v14126_v60  ;;  %1666 = vmatprep.subr.bf16.mxu0 %v14134_v61  ;;  %v14222_v60 = vld [vmem:[#allocation5 + $0x1680] ss:$72 sps:$4 sm:$0xff]  }
  0xca   :  { %2005 = vmatprep.subr.bf16.mxu1 %v14137_v62  ;;  %v14225_v61 = vld [vmem:[#allocation5 + $0x1688] ss:$72 sps:$4 sm:$0xff]   ;;  %v14230_v62 = vld [vmem:[#allocation5 + $0x1714] ss:$72 sps:$4 sm:$0xff]  }
  0xcb   :  { %1622 = vmatmul.mubr.bf16.gmra.mrb[24].mxu0 %v14131_v63 }
  0xcc   :  { %1961 = vmatmul.mubr.bf16.gmra.mrb[24].mxu1 %v14131_v63  ;;  %1667 = vmatpush1.bf16.msra.mxu0 %v14132_v0  ;;  %v14233_v63 = vld [vmem:[#allocation5 + $0x171c] ss:$72 sps:$4 sm:$0xff]  }
  0xcd   :  { %2006 = vmatpush1.bf16.msra.mxu1 %v14135_v1  ;;  %1668 = vmatprep.subr.bf16.mxu0 %v14140_v2  ;;  %v14234_v0 = vld [vmem:[#allocation2 + $0xfc] ss:$24 sps:$4 sm:$0xff]   ;;  %v14228_v1 = vld [vmem:[#allocation5 + $0x1710] ss:$72 sps:$4 sm:$0xff]  }
  0xce   :  { %2007 = vmatprep.subr.bf16.mxu1 %v14143_v3  ;;  %1631 = vmatprep.mubr.bf16.mxu0 %v14144_v4  ;;  %v14231_v2 = vld [vmem:[#allocation5 + $0x1718] ss:$72 sps:$4 sm:$0xff]   ;;  %v14239_v3 = vld [vmem:[#allocation5 + $0x17a4] ss:$72 sps:$4 sm:$0xff]  }
  0xcf   :  { %1970 = vmatprep.mubr.bf16.mxu1 %v14144_v4  ;;  %v14242_v4 = vld [vmem:[#allocation5 + $0x17ac] ss:$72 sps:$4 sm:$0xff]  }
  0xd0   :  { %1669 = vmatpush1.bf16.msra.mxu0 %v14138_v5  ;;  %v14236_v5 = vld [vmem:[#allocation2 + $0xf8] ss:$24 sps:$4 sm:$0xff]  }
  0xd1   :  { %2008 = vmatpush1.bf16.msra.mxu1 %v14141_v6  ;;  %1670 = vmatprep.subr.bf16.mxu0 %v14149_v7  ;;  %v14237_v6 = vld [vmem:[#allocation5 + $0x17a0] ss:$72 sps:$4 sm:$0xff]  }
  0xd2   :  { %2009 = vmatprep.subr.bf16.mxu1 %v14152_v8  ;;  %v14240_v7 = vld [vmem:[#allocation5 + $0x17a8] ss:$72 sps:$4 sm:$0xff]   ;;  %v14245_v8 = vld [vmem:[#allocation5 + $0x1834] ss:$72 sps:$4 sm:$0xff]  }
  0xd3   :  { %1632 = vmatmul.mubr.bf16.gmra.mrb[28].mxu0 %v14146_v9 }
  0xd4   :  { %1971 = vmatmul.mubr.bf16.gmra.mrb[28].mxu1 %v14146_v9  ;;  %1671 = vmatpush1.bf16.msra.mxu0 %v14147_v10  ;;  %v14248_v9 = vld [vmem:[#allocation5 + $0x183c] ss:$72 sps:$4 sm:$0xff]  }
  0xd5   :  { %2010 = vmatpush1.bf16.msra.mxu1 %v14150_v11  ;;  %1672 = vmatprep.subr.bf16.mxu0 %v14155_v12  ;;  %v14249_v10 = vld [vmem:[#allocation2 + $0x12c] ss:$24 sps:$4 sm:$0xff]   ;;  %v14243_v11 = vld [vmem:[#allocation5 + $0x1830] ss:$72 sps:$4 sm:$0xff]  }
  0xd6   :  { %2011 = vmatprep.subr.bf16.mxu1 %v14158_v13  ;;  %1674 = vmatprep.mubr.bf16.mxu0 %v14159_v14  ;;  %v14246_v12 = vld [vmem:[#allocation5 + $0x1838] ss:$72 sps:$4 sm:$0xff]   ;;  %v14254_v13 = vld [vmem:[#allocation5 + $0x18c4] ss:$72 sps:$4 sm:$0xff]  }
  0xd7   :  { %2013 = vmatprep.mubr.bf16.mxu1 %v14159_v14  ;;  %v14257_v14 = vld [vmem:[#allocation5 + $0x18cc] ss:$72 sps:$4 sm:$0xff]  }
  0xd8   :  { %1673 = vmatpush1.bf16.msra.mxu0 %v14153_v15  ;;  %v14251_v15 = vld [vmem:[#allocation2 + $0x128] ss:$24 sps:$4 sm:$0xff]  }
  0xd9   :  { %2012 = vmatpush1.bf16.msra.mxu1 %v14156_v16  ;;  %1755 = vmatprep.subr.bf16.mxu0 %v14164_v17  ;;  %v14252_v16 = vld [vmem:[#allocation5 + $0x18c0] ss:$72 sps:$4 sm:$0xff]  }
  0xda   :  { %2094 = vmatprep.subr.bf16.mxu1 %v14167_v18  ;;  %v14255_v17 = vld [vmem:[#allocation5 + $0x18c8] ss:$72 sps:$4 sm:$0xff]   ;;  %v14260_v18 = vld [vmem:[#allocation5 + $0x1954] ss:$72 sps:$4 sm:$0xff]  }
  0xdb   :  { %1675 = vmatmul.mubr.bf16.vlgmr.msra.gmra.mrb[0].mxu0 %v14161_v19 }
  0xdc   :  { %2014 = vmatmul.mubr.bf16.vlgmr.msra.gmra.mrb[0].mxu1 %v14161_v19  ;;  %1756 = vmatpush1.bf16.msra.mxu0 %v14162_v20  ;;  %v14263_v19 = vld [vmem:[#allocation5 + $0x195c] ss:$72 sps:$4 sm:$0xff]  }
  0xdd   :  { %2095 = vmatpush1.bf16.msra.mxu1 %v14165_v21  ;;  %1757 = vmatprep.subr.bf16.mxu0 %v14170_v22  ;;  %v14264_v20 = vld [vmem:[#allocation2 + $0x15c] ss:$24 sps:$4 sm:$0xff]   ;;  %v14258_v21 = vld [vmem:[#allocation5 + $0x1950] ss:$72 sps:$4 sm:$0xff]  }
  0xde   :  { %2096 = vmatprep.subr.bf16.mxu1 %v14173_v23  ;;  %1684 = vmatprep.mubr.bf16.mxu0 %v14174_v24  ;;  %v14261_v22 = vld [vmem:[#allocation5 + $0x1958] ss:$72 sps:$4 sm:$0xff]   ;;  %v14269_v23 = vld [vmem:[#allocation5 + $0x19e4] ss:$72 sps:$4 sm:$0xff]  }
  0xdf   :  { %2023 = vmatprep.mubr.bf16.mxu1 %v14174_v24  ;;  %v14272_v24 = vld [vmem:[#allocation5 + $0x19ec] ss:$72 sps:$4 sm:$0xff]  }
  0xe0   :  { %1758 = vmatpush1.bf16.msra.mxu0 %v14168_v25  ;;  %v14266_v25 = vld [vmem:[#allocation2 + $0x158] ss:$24 sps:$4 sm:$0xff]  }
  0xe1   :  { %2097 = vmatpush1.bf16.msra.mxu1 %v14171_v26  ;;  %1759 = vmatprep.subr.bf16.mxu0 %v14179_v27  ;;  %v14267_v26 = vld [vmem:[#allocation5 + $0x19e0] ss:$72 sps:$4 sm:$0xff]  }
  0xe2   :  { %2098 = vmatprep.subr.bf16.mxu1 %v14182_v28  ;;  %v14270_v27 = vld [vmem:[#allocation5 + $0x19e8] ss:$72 sps:$4 sm:$0xff]   ;;  %v14275_v28 = vld [vmem:[#allocation5 + $0x1a74] ss:$72 sps:$4 sm:$0xff]  }
  0xe3   :  { %1685 = vmatmul.mubr.bf16.gmra.mrb[4].mxu0 %v14176_v29 }
  0xe4   :  { %2024 = vmatmul.mubr.bf16.gmra.mrb[4].mxu1 %v14176_v29  ;;  %1760 = vmatpush1.bf16.msra.mxu0 %v14177_v30  ;;  %v14278_v29 = vld [vmem:[#allocation5 + $0x1a7c] ss:$72 sps:$4 sm:$0xff]   ;;  %v14279_v30 = vld [vmem:[#allocation2 + $0x14] ss:$24 sps:$4 sm:$0xff]  }
  0xe5   :  { %2099 = vmatpush1.bf16.msra.mxu1 %v14180_v31  ;;  %1761 = vmatprep.subr.bf16.mxu0 %v14185_v32  ;;  %v14273_v31 = vld [vmem:[#allocation5 + $0x1a70] ss:$72 sps:$4 sm:$0xff]  }
  0xe6   :  { %2100 = vmatprep.subr.bf16.mxu1 %v14188_v33  ;;  %1694 = vmatprep.mubr.bf16.mxu0 %v14189_v34  ;;  %v14276_v32 = vld [vmem:[#allocation5 + $0x1a78] ss:$72 sps:$4 sm:$0xff]   ;;  %v14284_v33 = vld [vmem:[#allocation5 + $0x14] ss:$72 sps:$4 sm:$0xff]  }
  0xe7   :  { %2033 = vmatprep.mubr.bf16.mxu1 %v14189_v34  ;;  %v14287_v34 = vld [vmem:[#allocation5 + $0x1c] ss:$72 sps:$4 sm:$0xff]  }
  0xe8   :  { %1762 = vmatpush1.bf16.msra.mxu0 %v14183_v35  ;;  %v14281_v35 = vld [vmem:[#allocation2 + $0x10] ss:$24 sps:$4 sm:$0xff]  }
  0xe9   :  { %2101 = vmatpush1.bf16.msra.mxu1 %v14186_v36  ;;  %1763 = vmatprep.subr.bf16.mxu0 %v14194_v37  ;;  %v14282_v36 = vld [vmem:[#allocation5 + $0x10] ss:$72 sps:$4 sm:$0xff]  }
  0xea   :  { %2102 = vmatprep.subr.bf16.mxu1 %v14197_v38  ;;  %v14285_v37 = vld [vmem:[#allocation5 + $0x18] ss:$72 sps:$4 sm:$0xff]   ;;  %v14290_v38 = vld [vmem:[#allocation5 + $0xa4] ss:$72 sps:$4 sm:$0xff]  }
  0xeb   :  { %1695 = vmatmul.mubr.bf16.gmra.mrb[8].mxu0 %v14191_v39 }
  0xec   :  { %2034 = vmatmul.mubr.bf16.gmra.mrb[8].mxu1 %v14191_v39  ;;  %1764 = vmatpush1.bf16.msra.mxu0 %v14192_v40  ;;  %v14293_v39 = vld [vmem:[#allocation5 + $0xac] ss:$72 sps:$4 sm:$0xff]   ;;  %v14294_v40 = vld [vmem:[#allocation2 + $0x44] ss:$24 sps:$4 sm:$0xff]  }
  0xed   :  { %2103 = vmatpush1.bf16.msra.mxu1 %v14195_v41  ;;  %1765 = vmatprep.subr.bf16.mxu0 %v14200_v42  ;;  %v14288_v41 = vld [vmem:[#allocation5 + $0xa0] ss:$72 sps:$4 sm:$0xff]  }
  0xee   :  { %2104 = vmatprep.subr.bf16.mxu1 %v14203_v43  ;;  %1704 = vmatprep.mubr.bf16.mxu0 %v14204_v44  ;;  %v14291_v42 = vld [vmem:[#allocation5 + $0xa8] ss:$72 sps:$4 sm:$0xff]   ;;  %v14299_v43 = vld [vmem:[#allocation5 + $0x134] ss:$72 sps:$4 sm:$0xff]  }
  0xef   :  { %2043 = vmatprep.mubr.bf16.mxu1 %v14204_v44  ;;  %v14302_v44 = vld [vmem:[#allocation5 + $0x13c] ss:$72 sps:$4 sm:$0xff]  }
  0xf0   :  { %1766 = vmatpush1.bf16.msra.mxu0 %v14198_v45  ;;  %v14296_v45 = vld [vmem:[#allocation2 + $0x40] ss:$24 sps:$4 sm:$0xff]  }
  0xf1   :  { %2105 = vmatpush1.bf16.msra.mxu1 %v14201_v46  ;;  %1767 = vmatprep.subr.bf16.mxu0 %v14209_v47  ;;  %v14297_v46 = vld [vmem:[#allocation5 + $0x130] ss:$72 sps:$4 sm:$0xff]  }
  0xf2   :  { %2106 = vmatprep.subr.bf16.mxu1 %v14212_v48  ;;  %v14300_v47 = vld [vmem:[#allocation5 + $0x138] ss:$72 sps:$4 sm:$0xff]   ;;  %v14305_v48 = vld [vmem:[#allocation5 + $0x1c4] ss:$72 sps:$4 sm:$0xff]  }
  0xf3   :  { %1705 = vmatmul.mubr.bf16.gmra.mrb[12].mxu0 %v14206_v49 }
  0xf4   :  { %2044 = vmatmul.mubr.bf16.gmra.mrb[12].mxu1 %v14206_v49  ;;  %1768 = vmatpush1.bf16.msra.mxu0 %v14207_v50  ;;  %v14308_v49 = vld [vmem:[#allocation5 + $0x1cc] ss:$72 sps:$4 sm:$0xff]  }
  0xf5   :  { %2107 = vmatpush1.bf16.msra.mxu1 %v14210_v51  ;;  %1769 = vmatprep.subr.bf16.mxu0 %v14215_v52  ;;  %v14309_v50 = vld [vmem:[#allocation2 + $0x74] ss:$24 sps:$4 sm:$0xff]   ;;  %v14303_v51 = vld [vmem:[#allocation5 + $0x1c0] ss:$72 sps:$4 sm:$0xff]  }
  0xf6   :  { %2108 = vmatprep.subr.bf16.mxu1 %v14218_v53  ;;  %1714 = vmatprep.mubr.bf16.mxu0 %v14219_v54  ;;  %v14306_v52 = vld [vmem:[#allocation5 + $0x1c8] ss:$72 sps:$4 sm:$0xff]   ;;  %v14314_v53 = vld [vmem:[#allocation5 + $0x254] ss:$72 sps:$4 sm:$0xff]  }
  0xf7   :  { %2053 = vmatprep.mubr.bf16.mxu1 %v14219_v54  ;;  %v14317_v54 = vld [vmem:[#allocation5 + $0x25c] ss:$72 sps:$4 sm:$0xff]  }
  0xf8   :  { %1770 = vmatpush1.bf16.msra.mxu0 %v14213_v55  ;;  %v14311_v55 = vld [vmem:[#allocation2 + $0x70] ss:$24 sps:$4 sm:$0xff]  }
  0xf9   :  { %2109 = vmatpush1.bf16.msra.mxu1 %v14216_v56  ;;  %1771 = vmatprep.subr.bf16.mxu0 %v14224_v57  ;;  %v14312_v56 = vld [vmem:[#allocation5 + $0x250] ss:$72 sps:$4 sm:$0xff]  }
  0xfa   :  { %2110 = vmatprep.subr.bf16.mxu1 %v14227_v58  ;;  %v14315_v57 = vld [vmem:[#allocation5 + $0x258] ss:$72 sps:$4 sm:$0xff]   ;;  %v14320_v58 = vld [vmem:[#allocation5 + $0x2e4] ss:$72 sps:$4 sm:$0xff]  }
  0xfb   :  { %1715 = vmatmul.mubr.bf16.gmra.mrb[16].mxu0 %v14221_v59 }
  0xfc   :  { %2054 = vmatmul.mubr.bf16.gmra.mrb[16].mxu1 %v14221_v59  ;;  %1772 = vmatpush1.bf16.msra.mxu0 %v14222_v60  ;;  %v14323_v59 = vld [vmem:[#allocation5 + $0x2ec] ss:$72 sps:$4 sm:$0xff]   ;;  %v14324_v60 = vld [vmem:[#allocation2 + $0xa4] ss:$24 sps:$4 sm:$0xff]  }
  0xfd   :  { %2111 = vmatpush1.bf16.msra.mxu1 %v14225_v61  ;;  %1773 = vmatprep.subr.bf16.mxu0 %v14230_v62  ;;  %v14318_v61 = vld [vmem:[#allocation5 + $0x2e0] ss:$72 sps:$4 sm:$0xff]  }
  0xfe   :  { %2112 = vmatprep.subr.bf16.mxu1 %v14233_v63  ;;  %1724 = vmatprep.mubr.bf16.mxu0 %v14234_v0  ;;  %v14321_v62 = vld [vmem:[#allocation5 + $0x2e8] ss:$72 sps:$4 sm:$0xff]   ;;  %v14329_v63 = vld [vmem:[#allocation5 + $0x374] ss:$72 sps:$4 sm:$0xff]  }
  0xff   :  { %2063 = vmatprep.mubr.bf16.mxu1 %v14234_v0  ;;  %v14332_v0 = vld [vmem:[#allocation5 + $0x37c] ss:$72 sps:$4 sm:$0xff]  }
 0x100   :  { %1774 = vmatpush1.bf16.msra.mxu0 %v14228_v1  ;;  %v14326_v1 = vld [vmem:[#allocation2 + $0xa0] ss:$24 sps:$4 sm:$0xff]  }
 0x101   :  { %2113 = vmatpush1.bf16.msra.mxu1 %v14231_v2  ;;  %1775 = vmatprep.subr.bf16.mxu0 %v14239_v3  ;;  %v14327_v2 = vld [vmem:[#allocation5 + $0x370] ss:$72 sps:$4 sm:$0xff]  }
 0x102   :  { %2114 = vmatprep.subr.bf16.mxu1 %v14242_v4  ;;  %v14330_v3 = vld [vmem:[#allocation5 + $0x378] ss:$72 sps:$4 sm:$0xff]   ;;  %v14335_v4 = vld [vmem:[#allocation5 + $0x404] ss:$72 sps:$4 sm:$0xff]  }
 0x103   :  { %1725 = vmatmul.mubr.bf16.gmra.mrb[20].mxu0 %v14236_v5 }
 0x104   :  { %2064 = vmatmul.mubr.bf16.gmra.mrb[20].mxu1 %v14236_v5  ;;  %1776 = vmatpush1.bf16.msra.mxu0 %v14237_v6  ;;  %v14338_v5 = vld [vmem:[#allocation5 + $0x40c] ss:$72 sps:$4 sm:$0xff]  }
 0x105   :  { %2115 = vmatpush1.bf16.msra.mxu1 %v14240_v7  ;;  %1777 = vmatprep.subr.bf16.mxu0 %v14245_v8  ;;  %v14339_v6 = vld [vmem:[#allocation2 + $0xd4] ss:$24 sps:$4 sm:$0xff]   ;;  %v14333_v7 = vld [vmem:[#allocation5 + $0x400] ss:$72 sps:$4 sm:$0xff]  }
 0x106   :  { %2116 = vmatprep.subr.bf16.mxu1 %v14248_v9  ;;  %1734 = vmatprep.mubr.bf16.mxu0 %v14249_v10  ;;  %v14336_v8 = vld [vmem:[#allocation5 + $0x408] ss:$72 sps:$4 sm:$0xff]   ;;  %v14344_v9 = vld [vmem:[#allocation5 + $0x494] ss:$72 sps:$4 sm:$0xff]  }
 0x107   :  { %2073 = vmatprep.mubr.bf16.mxu1 %v14249_v10  ;;  %v14347_v10 = vld [vmem:[#allocation5 + $0x49c] ss:$72 sps:$4 sm:$0xff]  }
 0x108   :  { %1778 = vmatpush1.bf16.msra.mxu0 %v14243_v11  ;;  %v14341_v11 = vld [vmem:[#allocation2 + $0xd0] ss:$24 sps:$4 sm:$0xff]  }
 0x109   :  { %2117 = vmatpush1.bf16.msra.mxu1 %v14246_v12  ;;  %1779 = vmatprep.subr.bf16.mxu0 %v14254_v13  ;;  %v14342_v12 = vld [vmem:[#allocation5 + $0x490] ss:$72 sps:$4 sm:$0xff]  }
 0x10a   :  { %2118 = vmatprep.subr.bf16.mxu1 %v14257_v14  ;;  %v14345_v13 = vld [vmem:[#allocation5 + $0x498] ss:$72 sps:$4 sm:$0xff]   ;;  %v14350_v14 = vld [vmem:[#allocation5 + $0x524] ss:$72 sps:$4 sm:$0xff]  }
 0x10b   :  { %1735 = vmatmul.mubr.bf16.gmra.mrb[24].mxu0 %v14251_v15 }
 0x10c   :  { %2074 = vmatmul.mubr.bf16.gmra.mrb[24].mxu1 %v14251_v15  ;;  %1780 = vmatpush1.bf16.msra.mxu0 %v14252_v16  ;;  %v14353_v15 = vld [vmem:[#allocation5 + $0x52c] ss:$72 sps:$4 sm:$0xff]   ;;  %v14354_v16 = vld [vmem:[#allocation2 + $0x104] ss:$24 sps:$4 sm:$0xff]  }
 0x10d   :  { %2119 = vmatpush1.bf16.msra.mxu1 %v14255_v17  ;;  %1781 = vmatprep.subr.bf16.mxu0 %v14260_v18  ;;  %v14348_v17 = vld [vmem:[#allocation5 + $0x520] ss:$72 sps:$4 sm:$0xff]  }
 0x10e   :  { %2120 = vmatprep.subr.bf16.mxu1 %v14263_v19  ;;  %1744 = vmatprep.mubr.bf16.mxu0 %v14264_v20  ;;  %v14351_v18 = vld [vmem:[#allocation5 + $0x528] ss:$72 sps:$4 sm:$0xff]   ;;  %v14359_v19 = vld [vmem:[#allocation5 + $0x5b4] ss:$72 sps:$4 sm:$0xff]  }
 0x10f   :  { %2083 = vmatprep.mubr.bf16.mxu1 %v14264_v20  ;;  %v14362_v20 = vld [vmem:[#allocation5 + $0x5bc] ss:$72 sps:$4 sm:$0xff]  }
 0x110   :  { %1782 = vmatpush1.bf16.msra.mxu0 %v14258_v21  ;;  %v14356_v21 = vld [vmem:[#allocation2 + $0x100] ss:$24 sps:$4 sm:$0xff]  }
 0x111   :  { %2121 = vmatpush1.bf16.msra.mxu1 %v14261_v22  ;;  %1783 = vmatprep.subr.bf16.mxu0 %v14269_v23  ;;  %v14357_v22 = vld [vmem:[#allocation5 + $0x5b0] ss:$72 sps:$4 sm:$0xff]  }
 0x112   :  { %2122 = vmatprep.subr.bf16.mxu1 %v14272_v24  ;;  %v14360_v23 = vld [vmem:[#allocation5 + $0x5b8] ss:$72 sps:$4 sm:$0xff]   ;;  %v14365_v24 = vld [vmem:[#allocation5 + $0x644] ss:$72 sps:$4 sm:$0xff]  }
 0x113   :  { %1745 = vmatmul.mubr.bf16.gmra.mrb[28].mxu0 %v14266_v25 }
 0x114   :  { %2084 = vmatmul.mubr.bf16.gmra.mrb[28].mxu1 %v14266_v25  ;;  %1784 = vmatpush1.bf16.msra.mxu0 %v14267_v26  ;;  %v14368_v25 = vld [vmem:[#allocation5 + $0x64c] ss:$72 sps:$4 sm:$0xff]  }
 0x115   :  { %2123 = vmatpush1.bf16.msra.mxu1 %v14270_v27  ;;  %1785 = vmatprep.subr.bf16.mxu0 %v14275_v28  ;;  %v14369_v26 = vld [vmem:[#allocation2 + $0x134] ss:$24 sps:$4 sm:$0xff]   ;;  %v14363_v27 = vld [vmem:[#allocation5 + $0x640] ss:$72 sps:$4 sm:$0xff]  }
 0x116   :  { %2124 = vmatprep.subr.bf16.mxu1 %v14278_v29  ;;  %1787 = vmatprep.mubr.bf16.mxu0 %v14279_v30  ;;  %v14366_v28 = vld [vmem:[#allocation5 + $0x648] ss:$72 sps:$4 sm:$0xff]   ;;  %v14374_v29 = vld [vmem:[#allocation5 + $0x6d4] ss:$72 sps:$4 sm:$0xff]  }
 0x117   :  { %2126 = vmatprep.mubr.bf16.mxu1 %v14279_v30  ;;  %v14377_v30 = vld [vmem:[#allocation5 + $0x6dc] ss:$72 sps:$4 sm:$0xff]  }
 0x118   :  { %1786 = vmatpush1.bf16.msra.mxu0 %v14273_v31  ;;  %v14371_v31 = vld [vmem:[#allocation2 + $0x130] ss:$24 sps:$4 sm:$0xff]  }
 0x119   :  { %2125 = vmatpush1.bf16.msra.mxu1 %v14276_v32  ;;  %4257 = vmatprep.subr.bf16.mxu0 %v14284_v33  ;;  %v14372_v32 = vld [vmem:[#allocation5 + $0x6d0] ss:$72 sps:$4 sm:$0xff]  }
 0x11a   :  { %4596 = vmatprep.subr.bf16.mxu1 %v14287_v34  ;;  %v14375_v33 = vld [vmem:[#allocation5 + $0x6d8] ss:$72 sps:$4 sm:$0xff]   ;;  %v14380_v34 = vld [vmem:[#allocation5 + $0x764] ss:$72 sps:$4 sm:$0xff]  }
 0x11b   :  { %1788 = vmatmul.mubr.bf16.vlgmr.msra.gmra.mrb[0].mxu0 %v14281_v35 }
 0x11c   :  { %2127 = vmatmul.mubr.bf16.vlgmr.msra.gmra.mrb[0].mxu1 %v14281_v35  ;;  %4258 = vmatpush1.bf16.msra.mxu0 %v14282_v36  ;;  %v14383_v35 = vld [vmem:[#allocation5 + $0x76c] ss:$72 sps:$4 sm:$0xff]   ;;  %v14384_v36 = vld [vmem:[#allocation2 + $0x164] ss:$24 sps:$4 sm:$0xff]  }
 0x11d   :  { %4597 = vmatpush1.bf16.msra.mxu1 %v14285_v37  ;;  %4259 = vmatprep.subr.bf16.mxu0 %v14290_v38  ;;  %v14378_v37 = vld [vmem:[#allocation5 + $0x760] ss:$72 sps:$4 sm:$0xff]  }
 0x11e   :  { %4598 = vmatprep.subr.bf16.mxu1 %v14293_v39  ;;  %1797 = vmatprep.mubr.bf16.mxu0 %v14294_v40  ;;  %v14381_v38 = vld [vmem:[#allocation5 + $0x768] ss:$72 sps:$4 sm:$0xff]   ;;  %v14389_v39 = vld [vmem:[#allocation5 + $0x7f4] ss:$72 sps:$4 sm:$0xff]  }
 0x11f   :  { %2136 = vmatprep.mubr.bf16.mxu1 %v14294_v40  ;;  %v14392_v40 = vld [vmem:[#allocation5 + $0x7fc] ss:$72 sps:$4 sm:$0xff]  }
 0x120   :  { %4260 = vmatpush1.bf16.msra.mxu0 %v14288_v41  ;;  %v14386_v41 = vld [vmem:[#allocation2 + $0x160] ss:$24 sps:$4 sm:$0xff]  }
 0x121   :  { %4599 = vmatpush1.bf16.msra.mxu1 %v14291_v42  ;;  %4261 = vmatprep.subr.bf16.mxu0 %v14299_v43  ;;  %v14387_v42 = vld [vmem:[#allocation5 + $0x7f0] ss:$72 sps:$4 sm:$0xff]  }
 0x122   :  { %4600 = vmatprep.subr.bf16.mxu1 %v14302_v44  ;;  %v14390_v43 = vld [vmem:[#allocation5 + $0x7f8] ss:$72 sps:$4 sm:$0xff]   ;;  %v14395_v44 = vld [vmem:[#allocation5 + $0x884] ss:$72 sps:$4 sm:$0xff]  }
 0x123   :  { %1798 = vmatmul.mubr.bf16.gmra.mrb[4].mxu0 %v14296_v45 }
 0x124   :  { %2137 = vmatmul.mubr.bf16.gmra.mrb[4].mxu1 %v14296_v45  ;;  %4262 = vmatpush1.bf16.msra.mxu0 %v14297_v46  ;;  %v14398_v45 = vld [vmem:[#allocation5 + $0x88c] ss:$72 sps:$4 sm:$0xff]   ;;  %v14393_v46 = vld [vmem:[#allocation5 + $0x880] ss:$72 sps:$4 sm:$0xff]  }
 0x125   :  { %4601 = vmatpush1.bf16.msra.mxu1 %v14300_v47  ;;  %4263 = vmatprep.subr.bf16.mxu0 %v14305_v48  ;;  %v14396_v47 = vld [vmem:[#allocation5 + $0x888] ss:$72 sps:$4 sm:$0xff]   ;;  %v14401_v48 = vld [vmem:[#allocation5 + $0x914] ss:$72 sps:$4 sm:$0xff]  }
 0x126   :  { %4602 = vmatprep.subr.bf16.mxu1 %v14308_v49  ;;  %1807 = vmatprep.mubr.bf16.mxu0 %v14309_v50  ;;  %v14404_v49 = vld [vmem:[#allocation5 + $0x91c] ss:$72 sps:$4 sm:$0xff]  }
 0x127   :  { %2146 = vmatprep.mubr.bf16.mxu1 %v14309_v50  ;;  %v15743_v50 = vld [vmem:[#allocation2 + $0x4] ss:$24 sps:$4 sm:$0xff]  }
 0x128   :  { %4264 = vmatpush1.bf16.msra.mxu0 %v14303_v51  ;;  %v14399_v51 = vld [vmem:[#allocation5 + $0x910] ss:$72 sps:$4 sm:$0xff]  }
 0x129   :  { %4603 = vmatpush1.bf16.msra.mxu1 %v14306_v52  ;;  %4265 = vmatprep.subr.bf16.mxu0 %v14314_v53  ;;  %v14402_v52 = vld [vmem:[#allocation5 + $0x918] ss:$72 sps:$4 sm:$0xff]   ;;  %v14407_v53 = vld [vmem:[#allocation5 + $0x9a4] ss:$72 sps:$4 sm:$0xff]  }
 0x12a   :  { %4604 = vmatprep.subr.bf16.mxu1 %v14317_v54  ;;  %v14410_v54 = vld [vmem:[#allocation5 + $0x9ac] ss:$72 sps:$4 sm:$0xff]  }
 0x12b   :  { %1808 = vmatmul.mubr.bf16.gmra.mrb[8].mxu0 %v14311_v55 }
 0x12c   :  { %2147 = vmatmul.mubr.bf16.gmra.mrb[8].mxu1 %v14311_v55  ;;  %4266 = vmatpush1.bf16.msra.mxu0 %v14312_v56  ;;  %v15744_v55 = vld [vmem:[#allocation2] ss:$24 sps:$4 sm:$0xff]  }
 0x12d   :  { %4605 = vmatpush1.bf16.msra.mxu1 %v14315_v57  ;;  %4267 = vmatprep.subr.bf16.mxu0 %v14320_v58  ;;  %v14405_v56 = vld [vmem:[#allocation5 + $0x9a0] ss:$72 sps:$4 sm:$0xff]   ;;  %v14413_v58 = vld [vmem:[#allocation5 + $0xa34] ss:$72 sps:$4 sm:$0xff]  }
 0x12e   :  { %4606 = vmatprep.subr.bf16.mxu1 %v14323_v59  ;;  %1817 = vmatprep.mubr.bf16.mxu0 %v14324_v60  ;;  %v14408_v57 = vld [vmem:[#allocation5 + $0x9a8] ss:$72 sps:$4 sm:$0xff]   ;;  %v14416_v59 = vld [vmem:[#allocation5 + $0xa3c] ss:$72 sps:$4 sm:$0xff]  }
 0x12f   :  { %2156 = vmatprep.mubr.bf16.mxu1 %v14324_v60  ;;  %v15745_v60 = vld [vmem:[#allocation2 + $0x34] ss:$24 sps:$4 sm:$0xff]  }
 0x130   :  { %4268 = vmatpush1.bf16.msra.mxu0 %v14318_v61  ;;  %v14411_v61 = vld [vmem:[#allocation5 + $0xa30] ss:$72 sps:$4 sm:$0xff]  }
 0x131   :  { %4607 = vmatpush1.bf16.msra.mxu1 %v14321_v62  ;;  %4269 = vmatprep.subr.bf16.mxu0 %v14329_v63  ;;  %v14414_v62 = vld [vmem:[#allocation5 + $0xa38] ss:$72 sps:$4 sm:$0xff]   ;;  %v14419_v63 = vld [vmem:[#allocation5 + $0xac4] ss:$72 sps:$4 sm:$0xff]  }
 0x132   :  { %4608 = vmatprep.subr.bf16.mxu1 %v14332_v0  ;;  %v14422_v0 = vld [vmem:[#allocation5 + $0xacc] ss:$72 sps:$4 sm:$0xff]  }
 0x133   :  { %1818 = vmatmul.mubr.bf16.gmra.mrb[12].mxu0 %v14326_v1 }
 0x134   :  { %2157 = vmatmul.mubr.bf16.gmra.mrb[12].mxu1 %v14326_v1  ;;  %4270 = vmatpush1.bf16.msra.mxu0 %v14327_v2  ;;  %v15746_v1 = vld [vmem:[#allocation2 + $0x30] ss:$24 sps:$4 sm:$0xff]  }
 0x135   :  { %4609 = vmatpush1.bf16.msra.mxu1 %v14330_v3  ;;  %4271 = vmatprep.subr.bf16.mxu0 %v14335_v4  ;;  %v14417_v2 = vld [vmem:[#allocation5 + $0xac0] ss:$72 sps:$4 sm:$0xff]   ;;  %v14425_v4 = vld [vmem:[#allocation5 + $0xb54] ss:$72 sps:$4 sm:$0xff]  }
 0x136   :  { %4610 = vmatprep.subr.bf16.mxu1 %v14338_v5  ;;  %1827 = vmatprep.mubr.bf16.mxu0 %v14339_v6  ;;  %v14420_v3 = vld [vmem:[#allocation5 + $0xac8] ss:$72 sps:$4 sm:$0xff]   ;;  %v14428_v5 = vld [vmem:[#allocation5 + $0xb5c] ss:$72 sps:$4 sm:$0xff]  }
 0x137   :  { %2166 = vmatprep.mubr.bf16.mxu1 %v14339_v6  ;;  %v15747_v6 = vld [vmem:[#allocation2 + $0x64] ss:$24 sps:$4 sm:$0xff]  }
 0x138   :  { %4272 = vmatpush1.bf16.msra.mxu0 %v14333_v7  ;;  %v14423_v7 = vld [vmem:[#allocation5 + $0xb50] ss:$72 sps:$4 sm:$0xff]  }
 0x139   :  { %4611 = vmatpush1.bf16.msra.mxu1 %v14336_v8  ;;  %4273 = vmatprep.subr.bf16.mxu0 %v14344_v9  ;;  %v14426_v8 = vld [vmem:[#allocation5 + $0xb58] ss:$72 sps:$4 sm:$0xff]   ;;  %v14431_v9 = vld [vmem:[#allocation5 + $0xbe4] ss:$72 sps:$4 sm:$0xff]  }
 0x13a   :  { %4612 = vmatprep.subr.bf16.mxu1 %v14347_v10  ;;  %v14434_v10 = vld [vmem:[#allocation5 + $0xbec] ss:$72 sps:$4 sm:$0xff]  }
 0x13b   :  { %1828 = vmatmul.mubr.bf16.gmra.mrb[16].mxu0 %v14341_v11 }
 0x13c   :  { %2167 = vmatmul.mubr.bf16.gmra.mrb[16].mxu1 %v14341_v11  ;;  %4274 = vmatpush1.bf16.msra.mxu0 %v14342_v12  ;;  %v15748_v11 = vld [vmem:[#allocation2 + $0x60] ss:$24 sps:$4 sm:$0xff]  }
 0x13d   :  { %4613 = vmatpush1.bf16.msra.mxu1 %v14345_v13  ;;  %4275 = vmatprep.subr.bf16.mxu0 %v14350_v14  ;;  %v14429_v12 = vld [vmem:[#allocation5 + $0xbe0] ss:$72 sps:$4 sm:$0xff]   ;;  %v14437_v14 = vld [vmem:[#allocation5 + $0xc74] ss:$72 sps:$4 sm:$0xff]  }
 0x13e   :  { %4614 = vmatprep.subr.bf16.mxu1 %v14353_v15  ;;  %1837 = vmatprep.mubr.bf16.mxu0 %v14354_v16  ;;  %v14432_v13 = vld [vmem:[#allocation5 + $0xbe8] ss:$72 sps:$4 sm:$0xff]   ;;  %v14440_v15 = vld [vmem:[#allocation5 + $0xc7c] ss:$72 sps:$4 sm:$0xff]  }
 0x13f   :  { %2176 = vmatprep.mubr.bf16.mxu1 %v14354_v16  ;;  %v15749_v16 = vld [vmem:[#allocation2 + $0x94] ss:$24 sps:$4 sm:$0xff]  }
 0x140   :  { %4276 = vmatpush1.bf16.msra.mxu0 %v14348_v17  ;;  %v14435_v17 = vld [vmem:[#allocation5 + $0xc70] ss:$72 sps:$4 sm:$0xff]  }
 0x141   :  { %4615 = vmatpush1.bf16.msra.mxu1 %v14351_v18  ;;  %4277 = vmatprep.subr.bf16.mxu0 %v14359_v19  ;;  %v14438_v18 = vld [vmem:[#allocation5 + $0xc78] ss:$72 sps:$4 sm:$0xff]   ;;  %v14443_v19 = vld [vmem:[#allocation5 + $0xd04] ss:$72 sps:$4 sm:$0xff]  }
 0x142   :  { %4616 = vmatprep.subr.bf16.mxu1 %v14362_v20  ;;  %v14446_v20 = vld [vmem:[#allocation5 + $0xd0c] ss:$72 sps:$4 sm:$0xff]  }
 0x143   :  { %1838 = vmatmul.mubr.bf16.gmra.mrb[20].mxu0 %v14356_v21 }
 0x144   :  { %2177 = vmatmul.mubr.bf16.gmra.mrb[20].mxu1 %v14356_v21  ;;  %4278 = vmatpush1.bf16.msra.mxu0 %v14357_v22  ;;  %v15750_v21 = vld [vmem:[#allocation2 + $0x90] ss:$24 sps:$4 sm:$0xff]  }
 0x145   :  { %4617 = vmatpush1.bf16.msra.mxu1 %v14360_v23  ;;  %4279 = vmatprep.subr.bf16.mxu0 %v14365_v24  ;;  %v14441_v22 = vld [vmem:[#allocation5 + $0xd00] ss:$72 sps:$4 sm:$0xff]   ;;  %v14449_v24 = vld [vmem:[#allocation5 + $0xd94] ss:$72 sps:$4 sm:$0xff]  }
 0x146   :  { %4618 = vmatprep.subr.bf16.mxu1 %v14368_v25  ;;  %1847 = vmatprep.mubr.bf16.mxu0 %v14369_v26  ;;  %v14444_v23 = vld [vmem:[#allocation5 + $0xd08] ss:$72 sps:$4 sm:$0xff]   ;;  %v14452_v25 = vld [vmem:[#allocation5 + $0xd9c] ss:$72 sps:$4 sm:$0xff]  }
 0x147   :  { %2186 = vmatprep.mubr.bf16.mxu1 %v14369_v26  ;;  %v15751_v26 = vld [vmem:[#allocation2 + $0xc4] ss:$24 sps:$4 sm:$0xff]  }
 0x148   :  { %4280 = vmatpush1.bf16.msra.mxu0 %v14363_v27  ;;  %v14447_v27 = vld [vmem:[#allocation5 + $0xd90] ss:$72 sps:$4 sm:$0xff]  }
 0x149   :  { %4619 = vmatpush1.bf16.msra.mxu1 %v14366_v28  ;;  %4281 = vmatprep.subr.bf16.mxu0 %v14374_v29  ;;  %v14450_v28 = vld [vmem:[#allocation5 + $0xd98] ss:$72 sps:$4 sm:$0xff]   ;;  %v14455_v29 = vld [vmem:[#allocation5 + $0xe24] ss:$72 sps:$4 sm:$0xff]  }
 0x14a   :  { %4620 = vmatprep.subr.bf16.mxu1 %v14377_v30  ;;  %v14458_v30 = vld [vmem:[#allocation5 + $0xe2c] ss:$72 sps:$4 sm:$0xff]  }
 0x14b   :  { %1848 = vmatmul.mubr.bf16.gmra.mrb[24].mxu0 %v14371_v31 }
 0x14c   :  { %2187 = vmatmul.mubr.bf16.gmra.mrb[24].mxu1 %v14371_v31  ;;  %4282 = vmatpush1.bf16.msra.mxu0 %v14372_v32  ;;  %v15752_v31 = vld [vmem:[#allocation2 + $0xc0] ss:$24 sps:$4 sm:$0xff]  }
 0x14d   :  { %4621 = vmatpush1.bf16.msra.mxu1 %v14375_v33  ;;  %4283 = vmatprep.subr.bf16.mxu0 %v14380_v34  ;;  %v14453_v32 = vld [vmem:[#allocation5 + $0xe20] ss:$72 sps:$4 sm:$0xff]   ;;  %v14461_v34 = vld [vmem:[#allocation5 + $0xeb4] ss:$72 sps:$4 sm:$0xff]  }
 0x14e   :  { %4622 = vmatprep.subr.bf16.mxu1 %v14383_v35  ;;  %1857 = vmatprep.mubr.bf16.mxu0 %v14384_v36  ;;  %v14456_v33 = vld [vmem:[#allocation5 + $0xe28] ss:$72 sps:$4 sm:$0xff]   ;;  %v14464_v35 = vld [vmem:[#allocation5 + $0xebc] ss:$72 sps:$4 sm:$0xff]  }
 0x14f   :  { %2196 = vmatprep.mubr.bf16.mxu1 %v14384_v36  ;;  %v15753_v36 = vld [vmem:[#allocation2 + $0xf4] ss:$24 sps:$4 sm:$0xff]  }
 0x150   :  { %4284 = vmatpush1.bf16.msra.mxu0 %v14378_v37  ;;  %v14459_v37 = vld [vmem:[#allocation5 + $0xeb0] ss:$72 sps:$4 sm:$0xff]  }
 0x151   :  { %4623 = vmatpush1.bf16.msra.mxu1 %v14381_v38  ;;  %4285 = vmatprep.subr.bf16.mxu0 %v14389_v39  ;;  %v14462_v38 = vld [vmem:[#allocation5 + $0xeb8] ss:$72 sps:$4 sm:$0xff]   ;;  %v14467_v39 = vld [vmem:[#allocation5 + $0xf44] ss:$72 sps:$4 sm:$0xff]  }
 0x152   :  { %4624 = vmatprep.subr.bf16.mxu1 %v14392_v40  ;;  %v14470_v40 = vld [vmem:[#allocation5 + $0xf4c] ss:$72 sps:$4 sm:$0xff]  }
 0x153   :  { %1858 = vmatmul.mubr.bf16.gmra.mrb[28].mxu0 %v14386_v41 }
 0x154   :  { %2197 = vmatmul.mubr.bf16.gmra.mrb[28].mxu1 %v14386_v41  ;;  %4286 = vmatpush1.bf16.msra.mxu0 %v14387_v42  ;;  %v15754_v41 = vld [vmem:[#allocation2 + $0xf0] ss:$24 sps:$4 sm:$0xff]  }
 0x155   :  { %4625 = vmatpush1.bf16.msra.mxu1 %v14390_v43  ;;  %4287 = vmatprep.subr.bf16.mxu0 %v14395_v44  ;;  %v14465_v42 = vld [vmem:[#allocation5 + $0xf40] ss:$72 sps:$4 sm:$0xff]   ;;  %v14473_v44 = vld [vmem:[#allocation5 + $0xfd4] ss:$72 sps:$4 sm:$0xff]  }
 0x156   :  { %4626 = vmatprep.subr.bf16.mxu1 %v14398_v45  ;;  %4289 = vmatprep.mubr.bf16.mxu0 %v15743_v50  ;;  %v14468_v43 = vld [vmem:[#allocation5 + $0xf48] ss:$72 sps:$4 sm:$0xff]   ;;  %v14476_v45 = vld [vmem:[#allocation5 + $0xfdc] ss:$72 sps:$4 sm:$0xff]  }
 0x157   :  { %4628 = vmatprep.mubr.bf16.mxu1 %v15743_v50  ;;  %v14482_v50 = vld [vmem:[#allocation5 + $0x106c] ss:$72 sps:$4 sm:$0xff]  }
 0x158   :  { %4288 = vmatpush1.bf16.msra.mxu0 %v14393_v46  ;;  %v15755_v46 = vld [vmem:[#allocation2 + $0x124] ss:$24 sps:$4 sm:$0xff]  }
 0x159   :  { %4627 = vmatpush1.bf16.msra.mxu1 %v14396_v47  ;;  %4370 = vmatprep.subr.bf16.mxu0 %v14401_v48  ;;  %v14471_v47 = vld [vmem:[#allocation5 + $0xfd0] ss:$72 sps:$4 sm:$0xff]  }
 0x15a   :  { %4709 = vmatprep.subr.bf16.mxu1 %v14404_v49  ;;  %v14474_v48 = vld [vmem:[#allocation5 + $0xfd8] ss:$72 sps:$4 sm:$0xff]   ;;  %v14479_v49 = vld [vmem:[#allocation5 + $0x1064] ss:$72 sps:$4 sm:$0xff]  }
 0x15b   :  { %4290 = vmatmul.mubr.bf16.vlgmr.msra.gmra.mrb[32].mxu0 %v15744_v55 }
 0x15c   :  { %4629 = vmatmul.mubr.bf16.vlgmr.msra.gmra.mrb[32].mxu1 %v15744_v55  ;;  %4371 = vmatpush1.bf16.msra.mxu0 %v14399_v51  ;;  %v15756_v51 = vld [vmem:[#allocation2 + $0x120] ss:$24 sps:$4 sm:$0xff]   ;;  %v14488_v55 = vld [vmem:[#allocation5 + $0x10fc] ss:$72 sps:$4 sm:$0xff]  }
 0x15d   :  { %4710 = vmatpush1.bf16.msra.mxu1 %v14402_v52  ;;  %4372 = vmatprep.subr.bf16.mxu0 %v14407_v53  ;;  %v14477_v52 = vld [vmem:[#allocation5 + $0x1060] ss:$72 sps:$4 sm:$0xff]  }
 0x15e   :  { %4711 = vmatprep.subr.bf16.mxu1 %v14410_v54  ;;  %4299 = vmatprep.mubr.bf16.mxu0 %v15745_v60  ;;  %v14480_v53 = vld [vmem:[#allocation5 + $0x1068] ss:$72 sps:$4 sm:$0xff]   ;;  %v14485_v54 = vld [vmem:[#allocation5 + $0x10f4] ss:$72 sps:$4 sm:$0xff]  }
 0x15f   :  { %4638 = vmatprep.mubr.bf16.mxu1 %v15745_v60  ;;  %v14494_v60 = vld [vmem:[#allocation5 + $0x118c] ss:$72 sps:$4 sm:$0xff]  }
 0x160   :  { %4373 = vmatpush1.bf16.msra.mxu0 %v14405_v56  ;;  %v15757_v56 = vld [vmem:[#allocation2 + $0x154] ss:$24 sps:$4 sm:$0xff]  }
 0x161   :  { %4712 = vmatpush1.bf16.msra.mxu1 %v14408_v57  ;;  %4374 = vmatprep.subr.bf16.mxu0 %v14413_v58  ;;  %v14483_v57 = vld [vmem:[#allocation5 + $0x10f0] ss:$72 sps:$4 sm:$0xff]  }
 0x162   :  { %4713 = vmatprep.subr.bf16.mxu1 %v14416_v59  ;;  %v14486_v58 = vld [vmem:[#allocation5 + $0x10f8] ss:$72 sps:$4 sm:$0xff]   ;;  %v14491_v59 = vld [vmem:[#allocation5 + $0x1184] ss:$72 sps:$4 sm:$0xff]  }
 0x163   :  { %4300 = vmatmul.mubr.bf16.gmra.mrb[36].mxu0 %v15746_v1 }
 0x164   :  { %4639 = vmatmul.mubr.bf16.gmra.mrb[36].mxu1 %v15746_v1  ;;  %4375 = vmatpush1.bf16.msra.mxu0 %v14411_v61  ;;  %v15758_v61 = vld [vmem:[#allocation2 + $0x150] ss:$24 sps:$4 sm:$0xff]   ;;  %v14500_v1 = vld [vmem:[#allocation5 + $0x121c] ss:$72 sps:$4 sm:$0xff]  }
 0x165   :  { %4714 = vmatpush1.bf16.msra.mxu1 %v14414_v62  ;;  %4376 = vmatprep.subr.bf16.mxu0 %v14419_v63  ;;  %v14489_v62 = vld [vmem:[#allocation5 + $0x1180] ss:$72 sps:$4 sm:$0xff]  }
 0x166   :  { %4715 = vmatprep.subr.bf16.mxu1 %v14422_v0  ;;  %4309 = vmatprep.mubr.bf16.mxu0 %v15747_v6  ;;  %v14492_v63 = vld [vmem:[#allocation5 + $0x1188] ss:$72 sps:$4 sm:$0xff]   ;;  %v14497_v0 = vld [vmem:[#allocation5 + $0x1214] ss:$72 sps:$4 sm:$0xff]  }
 0x167   :  { %4648 = vmatprep.mubr.bf16.mxu1 %v15747_v6  ;;  %v14506_v6 = vld [vmem:[#allocation5 + $0x12ac] ss:$72 sps:$4 sm:$0xff]  }
 0x168   :  { %4377 = vmatpush1.bf16.msra.mxu0 %v14417_v2  ;;  %v15759_v2 = vld [vmem:[#allocation2 + $0xc] ss:$24 sps:$4 sm:$0xff]  }
 0x169   :  { %4716 = vmatpush1.bf16.msra.mxu1 %v14420_v3  ;;  %4378 = vmatprep.subr.bf16.mxu0 %v14425_v4  ;;  %v14495_v3 = vld [vmem:[#allocation5 + $0x1210] ss:$72 sps:$4 sm:$0xff]  }
 0x16a   :  { %4717 = vmatprep.subr.bf16.mxu1 %v14428_v5  ;;  %v14498_v4 = vld [vmem:[#allocation5 + $0x1218] ss:$72 sps:$4 sm:$0xff]   ;;  %v14503_v5 = vld [vmem:[#allocation5 + $0x12a4] ss:$72 sps:$4 sm:$0xff]  }
 0x16b   :  { %4310 = vmatmul.mubr.bf16.gmra.mrb[40].mxu0 %v15748_v11 }
 0x16c   :  { %4649 = vmatmul.mubr.bf16.gmra.mrb[40].mxu1 %v15748_v11  ;;  %4379 = vmatpush1.bf16.msra.mxu0 %v14423_v7  ;;  %v15760_v7 = vld [vmem:[#allocation2 + $0x8] ss:$24 sps:$4 sm:$0xff]   ;;  %v14512_v11 = vld [vmem:[#allocation5 + $0x133c] ss:$72 sps:$4 sm:$0xff]  }
 0x16d   :  { %4718 = vmatpush1.bf16.msra.mxu1 %v14426_v8  ;;  %4380 = vmatprep.subr.bf16.mxu0 %v14431_v9  ;;  %v14501_v8 = vld [vmem:[#allocation5 + $0x12a0] ss:$72 sps:$4 sm:$0xff]  }
 0x16e   :  { %4719 = vmatprep.subr.bf16.mxu1 %v14434_v10  ;;  %4319 = vmatprep.mubr.bf16.mxu0 %v15749_v16  ;;  %v14504_v9 = vld [vmem:[#allocation5 + $0x12a8] ss:$72 sps:$4 sm:$0xff]   ;;  %v14509_v10 = vld [vmem:[#allocation5 + $0x1334] ss:$72 sps:$4 sm:$0xff]  }
 0x16f   :  { %4658 = vmatprep.mubr.bf16.mxu1 %v15749_v16  ;;  %v14518_v16 = vld [vmem:[#allocation5 + $0x13cc] ss:$72 sps:$4 sm:$0xff]  }
 0x170   :  { %4381 = vmatpush1.bf16.msra.mxu0 %v14429_v12  ;;  %v15761_v12 = vld [vmem:[#allocation2 + $0x3c] ss:$24 sps:$4 sm:$0xff]  }
 0x171   :  { %4720 = vmatpush1.bf16.msra.mxu1 %v14432_v13  ;;  %4382 = vmatprep.subr.bf16.mxu0 %v14437_v14  ;;  %v14507_v13 = vld [vmem:[#allocation5 + $0x1330] ss:$72 sps:$4 sm:$0xff]  }
 0x172   :  { %4721 = vmatprep.subr.bf16.mxu1 %v14440_v15  ;;  %v14510_v14 = vld [vmem:[#allocation5 + $0x1338] ss:$72 sps:$4 sm:$0xff]   ;;  %v14515_v15 = vld [vmem:[#allocation5 + $0x13c4] ss:$72 sps:$4 sm:$0xff]  }
 0x173   :  { %4320 = vmatmul.mubr.bf16.gmra.mrb[44].mxu0 %v15750_v21 }
 0x174   :  { %4659 = vmatmul.mubr.bf16.gmra.mrb[44].mxu1 %v15750_v21  ;;  %4383 = vmatpush1.bf16.msra.mxu0 %v14435_v17  ;;  %v15762_v17 = vld [vmem:[#allocation2 + $0x38] ss:$24 sps:$4 sm:$0xff]   ;;  %v14524_v21 = vld [vmem:[#allocation5 + $0x145c] ss:$72 sps:$4 sm:$0xff]  }
 0x175   :  { %4722 = vmatpush1.bf16.msra.mxu1 %v14438_v18  ;;  %4384 = vmatprep.subr.bf16.mxu0 %v14443_v19  ;;  %v14513_v18 = vld [vmem:[#allocation5 + $0x13c0] ss:$72 sps:$4 sm:$0xff]  }
 0x176   :  { %4723 = vmatprep.subr.bf16.mxu1 %v14446_v20  ;;  %4329 = vmatprep.mubr.bf16.mxu0 %v15751_v26  ;;  %v14516_v19 = vld [vmem:[#allocation5 + $0x13c8] ss:$72 sps:$4 sm:$0xff]   ;;  %v14521_v20 = vld [vmem:[#allocation5 + $0x1454] ss:$72 sps:$4 sm:$0xff]  }
 0x177   :  { %4668 = vmatprep.mubr.bf16.mxu1 %v15751_v26  ;;  %v14530_v26 = vld [vmem:[#allocation5 + $0x14ec] ss:$72 sps:$4 sm:$0xff]  }
 0x178   :  { %4385 = vmatpush1.bf16.msra.mxu0 %v14441_v22  ;;  %v15763_v22 = vld [vmem:[#allocation2 + $0x6c] ss:$24 sps:$4 sm:$0xff]  }
 0x179   :  { %4724 = vmatpush1.bf16.msra.mxu1 %v14444_v23  ;;  %4386 = vmatprep.subr.bf16.mxu0 %v14449_v24  ;;  %v14519_v23 = vld [vmem:[#allocation5 + $0x1450] ss:$72 sps:$4 sm:$0xff]  }
 0x17a   :  { %4725 = vmatprep.subr.bf16.mxu1 %v14452_v25  ;;  %v14522_v24 = vld [vmem:[#allocation5 + $0x1458] ss:$72 sps:$4 sm:$0xff]   ;;  %v14527_v25 = vld [vmem:[#allocation5 + $0x14e4] ss:$72 sps:$4 sm:$0xff]  }
 0x17b   :  { %4330 = vmatmul.mubr.bf16.gmra.mrb[48].mxu0 %v15752_v31 }
 0x17c   :  { %4669 = vmatmul.mubr.bf16.gmra.mrb[48].mxu1 %v15752_v31  ;;  %4387 = vmatpush1.bf16.msra.mxu0 %v14447_v27  ;;  %v14525_v27 = vld [vmem:[#allocation5 + $0x14e0] ss:$72 sps:$4 sm:$0xff]   ;;  %v14536_v31 = vld [vmem:[#allocation5 + $0x157c] ss:$72 sps:$4 sm:$0xff]  }
 0x17d   :  { %4726 = vmatpush1.bf16.msra.mxu1 %v14450_v28  ;;  %4388 = vmatprep.subr.bf16.mxu0 %v14455_v29  ;;  %v14528_v28 = vld [vmem:[#allocation5 + $0x14e8] ss:$72 sps:$4 sm:$0xff]  }
 0x17e   :  { %4727 = vmatprep.subr.bf16.mxu1 %v14458_v30  ;;  %4339 = vmatprep.mubr.bf16.mxu0 %v15753_v36  ;;  %v15764_v29 = vld [vmem:[#allocation2 + $0x68] ss:$24 sps:$4 sm:$0xff]   ;;  %v14533_v30 = vld [vmem:[#allocation5 + $0x1574] ss:$72 sps:$4 sm:$0xff]  }
 0x17f   :  { %4678 = vmatprep.mubr.bf16.mxu1 %v15753_v36  ;;  %v14542_v36 = vld [vmem:[#allocation5 + $0x160c] ss:$72 sps:$4 sm:$0xff]  }
 0x180   :  { %4389 = vmatpush1.bf16.msra.mxu0 %v14453_v32  ;;  %v15765_v32 = vld [vmem:[#allocation2 + $0x9c] ss:$24 sps:$4 sm:$0xff]  }
 0x181   :  { %4728 = vmatpush1.bf16.msra.mxu1 %v14456_v33  ;;  %4390 = vmatprep.subr.bf16.mxu0 %v14461_v34  ;;  %v14531_v33 = vld [vmem:[#allocation5 + $0x1570] ss:$72 sps:$4 sm:$0xff]  }
 0x182   :  { %4729 = vmatprep.subr.bf16.mxu1 %v14464_v35  ;;  %v14534_v34 = vld [vmem:[#allocation5 + $0x1578] ss:$72 sps:$4 sm:$0xff]   ;;  %v14539_v35 = vld [vmem:[#allocation5 + $0x1604] ss:$72 sps:$4 sm:$0xff]  }
 0x183   :  { %4340 = vmatmul.mubr.bf16.gmra.mrb[52].mxu0 %v15754_v41 }
 0x184   :  { %4679 = vmatmul.mubr.bf16.gmra.mrb[52].mxu1 %v15754_v41  ;;  %4391 = vmatpush1.bf16.msra.mxu0 %v14459_v37  ;;  %v14537_v37 = vld [vmem:[#allocation5 + $0x1600] ss:$72 sps:$4 sm:$0xff]   ;;  %v14548_v41 = vld [vmem:[#allocation5 + $0x169c] ss:$72 sps:$4 sm:$0xff]  }
 0x185   :  { %4730 = vmatpush1.bf16.msra.mxu1 %v14462_v38  ;;  %4392 = vmatprep.subr.bf16.mxu0 %v14467_v39  ;;  %v14540_v38 = vld [vmem:[#allocation5 + $0x1608] ss:$72 sps:$4 sm:$0xff]  }
 0x186   :  { %4731 = vmatprep.subr.bf16.mxu1 %v14470_v40  ;;  %4349 = vmatprep.mubr.bf16.mxu0 %v15755_v46  ;;  %v15766_v39 = vld [vmem:[#allocation2 + $0x98] ss:$24 sps:$4 sm:$0xff]   ;;  %v14545_v40 = vld [vmem:[#allocation5 + $0x1694] ss:$72 sps:$4 sm:$0xff]  }
 0x187   :  { %4688 = vmatprep.mubr.bf16.mxu1 %v15755_v46  ;;  %v14554_v46 = vld [vmem:[#allocation5 + $0x172c] ss:$72 sps:$4 sm:$0xff]  }
 0x188   :  { %4393 = vmatpush1.bf16.msra.mxu0 %v14465_v42  ;;  %v15767_v42 = vld [vmem:[#allocation2 + $0xcc] ss:$24 sps:$4 sm:$0xff]  }
 0x189   :  { %4732 = vmatpush1.bf16.msra.mxu1 %v14468_v43  ;;  %4394 = vmatprep.subr.bf16.mxu0 %v14473_v44  ;;  %v14543_v43 = vld [vmem:[#allocation5 + $0x1690] ss:$72 sps:$4 sm:$0xff]  }
 0x18a   :  { %4733 = vmatprep.subr.bf16.mxu1 %v14476_v45  ;;  %v14546_v44 = vld [vmem:[#allocation5 + $0x1698] ss:$72 sps:$4 sm:$0xff]   ;;  %v14551_v45 = vld [vmem:[#allocation5 + $0x1724] ss:$72 sps:$4 sm:$0xff]  }
 0x18b   :  { %4350 = vmatmul.mubr.bf16.gmra.mrb[56].mxu0 %v15756_v51 }
 0x18c   :  { %4689 = vmatmul.mubr.bf16.gmra.mrb[56].mxu1 %v15756_v51  ;;  %4395 = vmatpush1.bf16.msra.mxu0 %v14471_v47  ;;  %v14549_v47 = vld [vmem:[#allocation5 + $0x1720] ss:$72 sps:$4 sm:$0xff]   ;;  %v14560_v51 = vld [vmem:[#allocation5 + $0x17bc] ss:$72 sps:$4 sm:$0xff]  }
 0x18d   :  { %4734 = vmatpush1.bf16.msra.mxu1 %v14474_v48  ;;  %4396 = vmatprep.subr.bf16.mxu0 %v14479_v49  ;;  %v14552_v48 = vld [vmem:[#allocation5 + $0x1728] ss:$72 sps:$4 sm:$0xff]  }
 0x18e   :  { %4735 = vmatprep.subr.bf16.mxu1 %v14482_v50  ;;  %4359 = vmatprep.mubr.bf16.mxu0 %v15757_v56  ;;  %v15768_v49 = vld [vmem:[#allocation2 + $0xc8] ss:$24 sps:$4 sm:$0xff]   ;;  %v14557_v50 = vld [vmem:[#allocation5 + $0x17b4] ss:$72 sps:$4 sm:$0xff]  }
 0x18f   :  { %4698 = vmatprep.mubr.bf16.mxu1 %v15757_v56  ;;  %v14566_v56 = vld [vmem:[#allocation5 + $0x184c] ss:$72 sps:$4 sm:$0xff]  }
 0x190   :  { %4397 = vmatpush1.bf16.msra.mxu0 %v14477_v52  ;;  %v15769_v52 = vld [vmem:[#allocation2 + $0xfc] ss:$24 sps:$4 sm:$0xff]  }
 0x191   :  { %4736 = vmatpush1.bf16.msra.mxu1 %v14480_v53  ;;  %4398 = vmatprep.subr.bf16.mxu0 %v14485_v54  ;;  %v14555_v53 = vld [vmem:[#allocation5 + $0x17b0] ss:$72 sps:$4 sm:$0xff]  }
 0x192   :  { %4737 = vmatprep.subr.bf16.mxu1 %v14488_v55  ;;  %v14558_v54 = vld [vmem:[#allocation5 + $0x17b8] ss:$72 sps:$4 sm:$0xff]   ;;  %v14563_v55 = vld [vmem:[#allocation5 + $0x1844] ss:$72 sps:$4 sm:$0xff]  }
 0x193   :  { %4360 = vmatmul.mubr.bf16.gmra.mrb[60].mxu0 %v15758_v61 }
 0x194   :  { %4699 = vmatmul.mubr.bf16.gmra.mrb[60].mxu1 %v15758_v61  ;;  %4399 = vmatpush1.bf16.msra.mxu0 %v14483_v57  ;;  %v14561_v57 = vld [vmem:[#allocation5 + $0x1840] ss:$72 sps:$4 sm:$0xff]   ;;  %v14572_v61 = vld [vmem:[#allocation5 + $0x18dc] ss:$72 sps:$4 sm:$0xff]  }
 0x195   :  { %4738 = vmatpush1.bf16.msra.mxu1 %v14486_v58  ;;  %4400 = vmatprep.subr.bf16.mxu0 %v14491_v59  ;;  %v14564_v58 = vld [vmem:[#allocation5 + $0x1848] ss:$72 sps:$4 sm:$0xff]  }
 0x196   :  { %4739 = vmatprep.subr.bf16.mxu1 %v14494_v60  ;;  %4402 = vmatprep.mubr.bf16.mxu0 %v15759_v2  ;;  %v15770_v59 = vld [vmem:[#allocation2 + $0xf8] ss:$24 sps:$4 sm:$0xff]   ;;  %v14569_v60 = vld [vmem:[#allocation5 + $0x18d4] ss:$72 sps:$4 sm:$0xff]  }
 0x197   :  { %4741 = vmatprep.mubr.bf16.mxu1 %v15759_v2  ;;  %v14578_v2 = vld [vmem:[#allocation5 + $0x196c] ss:$72 sps:$4 sm:$0xff]  }
 0x198   :  { %4401 = vmatpush1.bf16.msra.mxu0 %v14489_v62  ;;  %v15771_v62 = vld [vmem:[#allocation2 + $0x12c] ss:$24 sps:$4 sm:$0xff]  }
 0x199   :  { %4740 = vmatpush1.bf16.msra.mxu1 %v14492_v63  ;;  %4483 = vmatprep.subr.bf16.mxu0 %v14497_v0  ;;  %v14567_v63 = vld [vmem:[#allocation5 + $0x18d0] ss:$72 sps:$4 sm:$0xff]  }
 0x19a   :  { %4822 = vmatprep.subr.bf16.mxu1 %v14500_v1  ;;  %v14570_v0 = vld [vmem:[#allocation5 + $0x18d8] ss:$72 sps:$4 sm:$0xff]   ;;  %v14575_v1 = vld [vmem:[#allocation5 + $0x1964] ss:$72 sps:$4 sm:$0xff]  }
 0x19b   :  { %4403 = vmatmul.mubr.bf16.vlgmr.msra.gmra.mrb[32].mxu0 %v15760_v7 }
 0x19c   :  { %4742 = vmatmul.mubr.bf16.vlgmr.msra.gmra.mrb[32].mxu1 %v15760_v7  ;;  %4484 = vmatpush1.bf16.msra.mxu0 %v14495_v3  ;;  %v15772_v3 = vld [vmem:[#allocation2 + $0x128] ss:$24 sps:$4 sm:$0xff]   ;;  %v14584_v7 = vld [vmem:[#allocation5 + $0x19fc] ss:$72 sps:$4 sm:$0xff]  }
 0x19d   :  { %4823 = vmatpush1.bf16.msra.mxu1 %v14498_v4  ;;  %4485 = vmatprep.subr.bf16.mxu0 %v14503_v5  ;;  %v14573_v4 = vld [vmem:[#allocation5 + $0x1960] ss:$72 sps:$4 sm:$0xff]  }
 0x19e   :  { %4824 = vmatprep.subr.bf16.mxu1 %v14506_v6  ;;  %4412 = vmatprep.mubr.bf16.mxu0 %v15761_v12  ;;  %v14576_v5 = vld [vmem:[#allocation5 + $0x1968] ss:$72 sps:$4 sm:$0xff]   ;;  %v14581_v6 = vld [vmem:[#allocation5 + $0x19f4] ss:$72 sps:$4 sm:$0xff]  }
 0x19f   :  { %4751 = vmatprep.mubr.bf16.mxu1 %v15761_v12  ;;  %v14590_v12 = vld [vmem:[#allocation5 + $0x1a8c] ss:$72 sps:$4 sm:$0xff]  }
 0x1a0   :  { %4486 = vmatpush1.bf16.msra.mxu0 %v14501_v8  ;;  %v15773_v8 = vld [vmem:[#allocation2 + $0x15c] ss:$24 sps:$4 sm:$0xff]  }
 0x1a1   :  { %4825 = vmatpush1.bf16.msra.mxu1 %v14504_v9  ;;  %4487 = vmatprep.subr.bf16.mxu0 %v14509_v10  ;;  %v14579_v9 = vld [vmem:[#allocation5 + $0x19f0] ss:$72 sps:$4 sm:$0xff]  }
 0x1a2   :  { %4826 = vmatprep.subr.bf16.mxu1 %v14512_v11  ;;  %v14582_v10 = vld [vmem:[#allocation5 + $0x19f8] ss:$72 sps:$4 sm:$0xff]   ;;  %v14587_v11 = vld [vmem:[#allocation5 + $0x1a84] ss:$72 sps:$4 sm:$0xff]  }
 0x1a3   :  { %4413 = vmatmul.mubr.bf16.gmra.mrb[36].mxu0 %v15762_v17 }
 0x1a4   :  { %4752 = vmatmul.mubr.bf16.gmra.mrb[36].mxu1 %v15762_v17  ;;  %4488 = vmatpush1.bf16.msra.mxu0 %v14507_v13  ;;  %v15774_v13 = vld [vmem:[#allocation2 + $0x158] ss:$24 sps:$4 sm:$0xff]   ;;  %v14596_v17 = vld [vmem:[#allocation5 + $0x2c] ss:$72 sps:$4 sm:$0xff]  }
 0x1a5   :  { %4827 = vmatpush1.bf16.msra.mxu1 %v14510_v14  ;;  %4489 = vmatprep.subr.bf16.mxu0 %v14515_v15  ;;  %v14585_v14 = vld [vmem:[#allocation5 + $0x1a80] ss:$72 sps:$4 sm:$0xff]  }
 0x1a6   :  { %4828 = vmatprep.subr.bf16.mxu1 %v14518_v16  ;;  %4422 = vmatprep.mubr.bf16.mxu0 %v15763_v22  ;;  %v14588_v15 = vld [vmem:[#allocation5 + $0x1a88] ss:$72 sps:$4 sm:$0xff]   ;;  %v14593_v16 = vld [vmem:[#allocation5 + $0x24] ss:$72 sps:$4 sm:$0xff]  }
 0x1a7   :  { %4761 = vmatprep.mubr.bf16.mxu1 %v15763_v22  ;;  %v14602_v22 = vld [vmem:[#allocation5 + $0xbc] ss:$72 sps:$4 sm:$0xff]  }
 0x1a8   :  { %4490 = vmatpush1.bf16.msra.mxu0 %v14513_v18  ;;  %v15775_v18 = vld [vmem:[#allocation2 + $0x14] ss:$24 sps:$4 sm:$0xff]  }
 0x1a9   :  { %4829 = vmatpush1.bf16.msra.mxu1 %v14516_v19  ;;  %4491 = vmatprep.subr.bf16.mxu0 %v14521_v20  ;;  %v14591_v19 = vld [vmem:[#allocation5 + $0x20] ss:$72 sps:$4 sm:$0xff]  }
 0x1aa   :  { %4830 = vmatprep.subr.bf16.mxu1 %v14524_v21  ;;  %v14594_v20 = vld [vmem:[#allocation5 + $0x28] ss:$72 sps:$4 sm:$0xff]   ;;  %v14599_v21 = vld [vmem:[#allocation5 + $0xb4] ss:$72 sps:$4 sm:$0xff]  }
 0x1ab   :  { %4423 = vmatmul.mubr.bf16.gmra.mrb[40].mxu0 %v15764_v29 }
 0x1ac   :  { %4762 = vmatmul.mubr.bf16.gmra.mrb[40].mxu1 %v15764_v29  ;;  %4492 = vmatpush1.bf16.msra.mxu0 %v14519_v23  ;;  %v15776_v23 = vld [vmem:[#allocation2 + $0x10] ss:$24 sps:$4 sm:$0xff]  }
 0x1ad   :  { %4831 = vmatpush1.bf16.msra.mxu1 %v14522_v24  ;;  %4493 = vmatprep.subr.bf16.mxu0 %v14527_v25  ;;  %v14597_v24 = vld [vmem:[#allocation5 + $0xb0] ss:$72 sps:$4 sm:$0xff]   ;;  %v14603_v29 = vld [vmem:[#allocation5 + $0x140] ss:$72 sps:$4 sm:$0xff]  }
 0x1ae   :  { %4832 = vmatprep.subr.bf16.mxu1 %v14530_v26  ;;  %4432 = vmatprep.mubr.bf16.mxu0 %v15765_v32  ;;  %v14600_v25 = vld [vmem:[#allocation5 + $0xb8] ss:$72 sps:$4 sm:$0xff]   ;;  %v14605_v26 = vld [vmem:[#allocation5 + $0x144] ss:$72 sps:$4 sm:$0xff]  }
 0x1af   :  { %4771 = vmatprep.mubr.bf16.mxu1 %v15765_v32  ;;  %v14614_v32 = vld [vmem:[#allocation5 + $0x1dc] ss:$72 sps:$4 sm:$0xff]  }
 0x1b0   :  { %4494 = vmatpush1.bf16.msra.mxu0 %v14525_v27  ;;  %v14608_v27 = vld [vmem:[#allocation5 + $0x14c] ss:$72 sps:$4 sm:$0xff]  }
 0x1b1   :  { %4833 = vmatpush1.bf16.msra.mxu1 %v14528_v28  ;;  %4495 = vmatprep.subr.bf16.mxu0 %v14533_v30  ;;  %v15777_v28 = vld [vmem:[#allocation2 + $0x44] ss:$24 sps:$4 sm:$0xff]   ;;  %v14606_v30 = vld [vmem:[#allocation5 + $0x148] ss:$72 sps:$4 sm:$0xff]  }
 0x1b2   :  { %4834 = vmatprep.subr.bf16.mxu1 %v14536_v31  ;;  %v14611_v31 = vld [vmem:[#allocation5 + $0x1d4] ss:$72 sps:$4 sm:$0xff]  }
 0x1b3   :  { %4433 = vmatmul.mubr.bf16.gmra.mrb[44].mxu0 %v15766_v39 }
 0x1b4   :  { %4772 = vmatmul.mubr.bf16.gmra.mrb[44].mxu1 %v15766_v39  ;;  %4496 = vmatpush1.bf16.msra.mxu0 %v14531_v33  ;;  %v15778_v33 = vld [vmem:[#allocation2 + $0x40] ss:$24 sps:$4 sm:$0xff]   ;;  %v15779_v39 = vld [vmem:[#allocation2 + $0x74] ss:$24 sps:$4 sm:$0xff]  }
 0x1b5   :  { %4835 = vmatpush1.bf16.msra.mxu1 %v14534_v34  ;;  %4497 = vmatprep.subr.bf16.mxu0 %v14539_v35  ;;  %v14609_v34 = vld [vmem:[#allocation5 + $0x1d0] ss:$72 sps:$4 sm:$0xff]  }
 0x1b6   :  { %4836 = vmatprep.subr.bf16.mxu1 %v14542_v36  ;;  %4442 = vmatprep.mubr.bf16.mxu0 %v15767_v42  ;;  %v14612_v35 = vld [vmem:[#allocation5 + $0x1d8] ss:$72 sps:$4 sm:$0xff]   ;;  %v14617_v36 = vld [vmem:[#allocation5 + $0x264] ss:$72 sps:$4 sm:$0xff]  }
 0x1b7   :  { %4781 = vmatprep.mubr.bf16.mxu1 %v15767_v42  ;;  %v14623_v42 = vld [vmem:[#allocation5 + $0x2f4] ss:$72 sps:$4 sm:$0xff]  }
 0x1b8   :  { %4498 = vmatpush1.bf16.msra.mxu0 %v14537_v37  ;;  %v14620_v37 = vld [vmem:[#allocation5 + $0x26c] ss:$72 sps:$4 sm:$0xff]  }
 0x1b9   :  { %4837 = vmatpush1.bf16.msra.mxu1 %v14540_v38  ;;  %4499 = vmatprep.subr.bf16.mxu0 %v14545_v40  ;;  %v134_v38 = vlaneseq  ;;  %v14615_v40 = vld [vmem:[#allocation5 + $0x260] ss:$72 sps:$4 sm:$0xff]  }
 0x1ba   :  { %4838 = vmatprep.subr.bf16.mxu1 %v14548_v41  ;;  %v14618_v41 = vld [vmem:[#allocation5 + $0x268] ss:$72 sps:$4 sm:$0xff]  }
 0x1bb   :  { %4443 = vmatmul.mubr.bf16.gmra.mrb[48].mxu0 %v15768_v49 }
 0x1bc   :  { %4782 = vmatmul.mubr.bf16.gmra.mrb[48].mxu1 %v15768_v49  ;;  %4500 = vmatpush1.bf16.msra.mxu0 %v14543_v43  ;;  %v14626_v43 = vld [vmem:[#allocation5 + $0x2fc] ss:$72 sps:$4 sm:$0xff]   ;;  %v14632_v49 = vld [vmem:[#allocation5 + $0x38c] ss:$72 sps:$4 sm:$0xff]  }
 0x1bd   :  { %4839 = vmatpush1.bf16.msra.mxu1 %v14546_v44  ;;  %4501 = vmatprep.subr.bf16.mxu0 %v14551_v45  ;;  %v16177_v44 = vshrl.u32 %v134_v38, 7  ;;  %v15780_v45 = vld [vmem:[#allocation2 + $0x70] ss:$24 sps:$4 sm:$0xff]  }
 0x1be   :  { %4840 = vmatprep.subr.bf16.mxu1 %v14554_v46  ;;  %4452 = vmatprep.mubr.bf16.mxu0 %v15769_v52  ;;  %v14621_v46 = vld [vmem:[#allocation5 + $0x2f0] ss:$72 sps:$4 sm:$0xff]  }
 0x1bf   :  { %4791 = vmatprep.mubr.bf16.mxu1 %v15769_v52  ;;  %vm2239_vm0 = vcmp.lt.s32.totalorder %v16177_v44, 7  ;;  %v15781_v52 = vld [vmem:[#allocation2 + $0xa4] ss:$24 sps:$4 sm:$0xff]   ;;  %vm5402_vm9 = vcmp.lt.s32.totalorder %v16177_v44, 6  ;;  %vm9576_vm11 = vcmp.lt.s32.totalorder %v16177_v44, 5 }
 0x1c0   :  { %4502 = vmatpush1.bf16.msra.mxu0 %v14549_v47  ;;  %v14624_v47 = vld [vmem:[#allocation5 + $0x2f8] ss:$72 sps:$4 sm:$0xff]  }
 0x1c1   :  { %4841 = vmatpush1.bf16.msra.mxu1 %v14552_v48  ;;  %4503 = vmatprep.subr.bf16.mxu0 %v14557_v50  ;;  %v14629_v48 = vld [vmem:[#allocation5 + $0x384] ss:$72 sps:$4 sm:$0xff]  }
 0x1c2   :  { %4842 = vmatprep.subr.bf16.mxu1 %v14560_v51 }
 0x1c3   :  { %4453 = vmatmul.mubr.bf16.gmra.mrb[52].mxu0 %v15770_v59 }
 0x1c4   :  { %4792 = vmatmul.mubr.bf16.gmra.mrb[52].mxu1 %v15770_v59  ;;  %4504 = vmatpush1.bf16.msra.mxu0 %v14555_v53  ;;  %v14627_v53 = vld [vmem:[#allocation5 + $0x380] ss:$72 sps:$4 sm:$0xff]   ;;  %v14638_v59 = vld [vmem:[#allocation5 + $0x41c] ss:$72 sps:$4 sm:$0xff]  }
 0x1c5   :  { %4843 = vmatpush1.bf16.msra.mxu1 %v14558_v54  ;;  %4505 = vmatprep.subr.bf16.mxu0 %v14563_v55  ;;  %v14630_v54 = vld [vmem:[#allocation5 + $0x388] ss:$72 sps:$4 sm:$0xff]  }
 0x1c6   :  { %4844 = vmatprep.subr.bf16.mxu1 %v14566_v56  ;;  %4462 = vmatprep.mubr.bf16.mxu0 %v15771_v62 }
 0x1c7   :  { %4801 = vmatprep.mubr.bf16.mxu1 %v15771_v62 }
 0x1c8   :  { %4506 = vmatpush1.bf16.msra.mxu0 %v14561_v57 }
 0x1c9   :  { %4845 = vmatpush1.bf16.msra.mxu1 %v14564_v58  ;;  %4507 = vmatprep.subr.bf16.mxu0 %v14569_v60  ;;  %v14635_v58 = vld [vmem:[#allocation5 + $0x414] ss:$72 sps:$4 sm:$0xff]  }
 0x1ca   :  { %4846 = vmatprep.subr.bf16.mxu1 %v14572_v61 }
 0x1cb   :  { %4463 = vmatmul.mubr.bf16.gmra.mrb[56].mxu0 %v15772_v3 }
 0x1cc   :  { %4802 = vmatmul.mubr.bf16.gmra.mrb[56].mxu1 %v15772_v3  ;;  %4508 = vmatpush1.bf16.msra.mxu0 %v14567_v63 }
 0x1cd   :  { %4847 = vmatpush1.bf16.msra.mxu1 %v14570_v0  ;;  %4509 = vmatprep.subr.bf16.mxu0 %v14575_v1 }
 0x1ce   :  { %4848 = vmatprep.subr.bf16.mxu1 %v14578_v2  ;;  %4472 = vmatprep.mubr.bf16.mxu0 %v15773_v8  ;;  %v16187_v2 = vsub.s32 0, %v16177_v44 }
 0x1cf   :  { %4811 = vmatprep.mubr.bf16.mxu1 %v15773_v8 }
 0x1d0   :  { %4510 = vmatpush1.bf16.msra.mxu0 %v14573_v4  ;;  %17683 = vst [vmem:[#allocation16_spill] sm:$0xff] %v16187_v2  ;;  %v133_v4 = vld [vmem:[#allocation7] sm:$0x3f] }
 0x1d1   :  { %4849 = vmatpush1.bf16.msra.mxu1 %v14576_v5  ;;  %4511 = vmatprep.subr.bf16.mxu0 %v14581_v6  ;;  %v16194_v6 = vsub.s32 1, %v16177_v44 }
 0x1d2   :  { %4850 = vmatprep.subr.bf16.mxu1 %v14584_v7  ;;  %v15782_v7 = vld [vmem:[#allocation2 + $0xa0] ss:$24 sps:$4 sm:$0xff]  }
 0x1d3   :  { %4473 = vmatmul.mubr.bf16.gmra.mrb[60].mxu0 %v15774_v13  ;;  %17684 = vst [vmem:[#allocation17_spill] sm:$0xff] %v16194_v6 }
 0x1d4   :  { %4812 = vmatmul.mubr.bf16.gmra.mrb[60].mxu1 %v15774_v13  ;;  %4512 = vmatpush1.bf16.msra.mxu0 %v14579_v9  ;;  %v14641_v13 = vld [vmem:[#allocation5 + $0x4a4] ss:$72 sps:$4 sm:$0xff]  }
 0x1d5   :  { %4851 = vmatpush1.bf16.msra.mxu1 %v14582_v10  ;;  %4513 = vmatprep.subr.bf16.mxu0 %v14587_v11  ;;  %v14633_v10 = vld [vmem:[#allocation5 + $0x410] ss:$72 sps:$4 sm:$0xff]  }
 0x1d6   :  { %4852 = vmatprep.subr.bf16.mxu1 %v14590_v12  ;;  %4515 = vmatprep.mubr.bf16.mxu0 %v15775_v18  ;;  %v14636_v11 = vld [vmem:[#allocation5 + $0x418] ss:$72 sps:$4 sm:$0xff]  }
 0x1d7   :  { %4854 = vmatprep.mubr.bf16.mxu1 %v15775_v18  ;;  %v15783_v18 = vld [vmem:[#allocation2 + $0xd4] ss:$24 sps:$4 sm:$0xff]  }
 0x1d8   :  { %4514 = vmatpush1.bf16.msra.mxu0 %v14585_v14  ;;  %v14644_v14 = vld [vmem:[#allocation5 + $0x4ac] ss:$72 sps:$4 sm:$0xff]  }
 0x1d9   :  { %4853 = vmatpush1.bf16.msra.mxu1 %v14588_v15  ;;  %4935 = vmatprep.subr.bf16.mxu0 %v14593_v16  ;;  %v16201_v15 = vrot.slane %v133_v4, %v16187_v2 }
 0x1da   :  { %7996 = vmatprep.subr.bf16.mxu1 %v14596_v17 }
 0x1db   :  { %4516 = vmatmul.mubr.bf16.vlgmr.msra.gmra.mrb[32].mxu0 %v15776_v23 }
 0x1dc   :  { %4855 = vmatmul.mubr.bf16.vlgmr.msra.gmra.mrb[32].mxu1 %v15776_v23  ;;  %4936 = vmatpush1.bf16.msra.mxu0 %v14591_v19  ;;  %v14639_v19 = vld [vmem:[#allocation5 + $0x4a0] ss:$72 sps:$4 sm:$0xff]  }
 0x1dd   :  { %7997 = vmatpush1.bf16.msra.mxu1 %v14594_v20  ;;  %4937 = vmatprep.subr.bf16.mxu0 %v14599_v21  ;;  %v14642_v20 = vld [vmem:[#allocation5 + $0x4a8] ss:$72 sps:$4 sm:$0xff]   ;;  %v16204_v21 = vrot.slane %v133_v4, %v16194_v6 }
 0x1de   :  { %7998 = vmatprep.subr.bf16.mxu1 %v14602_v22  ;;  %4525 = vmatprep.mubr.bf16.mxu0 %v15777_v28 }
 0x1df   :  { %4864 = vmatprep.mubr.bf16.mxu1 %v15777_v28 }
 0x1e0   :  { %4938 = vmatpush1.bf16.msra.mxu0 %v14597_v24 }
 0x1e1   :  { %7999 = vmatpush1.bf16.msra.mxu1 %v14600_v25  ;;  %4939 = vmatprep.subr.bf16.mxu0 %v14605_v26  ;;  %v14647_v25 = vld [vmem:[#allocation5 + $0x534] ss:$72 sps:$4 sm:$0xff]  }
 0x1e2   :  { %8000 = vmatprep.subr.bf16.mxu1 %v14608_v27  ;;  %v14650_v26 = vld [vmem:[#allocation5 + $0x53c] ss:$72 sps:$4 sm:$0xff]  }
 0x1e3   :  { %4526 = vmatmul.mubr.bf16.gmra.mrb[36].mxu0 %v15778_v33 }
 0x1e4   :  { %4865 = vmatmul.mubr.bf16.gmra.mrb[36].mxu1 %v15778_v33  ;;  %4940 = vmatpush1.bf16.msra.mxu0 %v14603_v29 }
 0x1e5   :  { %8001 = vmatpush1.bf16.msra.mxu1 %v14606_v30  ;;  %4941 = vmatprep.subr.bf16.mxu0 %v14611_v31  ;;  %v16209_v30 = vadd.s32 8, %v16177_v44 }
 0x1e6   :  { %8002 = vmatprep.subr.bf16.mxu1 %v14614_v32  ;;  %4535 = vmatprep.mubr.bf16.mxu0 %v15779_v39 }
 0x1e7   :  { %4874 = vmatprep.mubr.bf16.mxu1 %v15779_v39  ;;  %vm2380_vm1 = vcmp.lt.s32.totalorder %v16209_v30, 15  ;;  %vm5543_vm10 = vcmp.lt.s32.totalorder %v16209_v30, 14  ;;  %vm9717_vm12 = vcmp.lt.s32.totalorder %v16209_v30, 13 }
 0x1e8   :  { %4942 = vmatpush1.bf16.msra.mxu0 %v14609_v34 }
 0x1e9   :  { %8003 = vmatpush1.bf16.msra.mxu1 %v14612_v35  ;;  %4943 = vmatprep.subr.bf16.mxu0 %v14617_v36 }
 0x1ea   :  { %8004 = vmatprep.subr.bf16.mxu1 %v14620_v37 }
 0x1eb   :  { %4536 = vmatmul.mubr.bf16.gmra.mrb[40].mxu0 %v15780_v45 }
 0x1ec   :  { %4875 = vmatmul.mubr.bf16.gmra.mrb[40].mxu1 %v15780_v45  ;;  %4944 = vmatpush1.bf16.msra.mxu0 %v14615_v40 }
 0x1ed   :  { %8005 = vmatpush1.bf16.msra.mxu1 %v14618_v41  ;;  %4945 = vmatprep.subr.bf16.mxu0 %v14623_v42  ;;  %v15784_v42 = vld [vmem:[#allocation2 + $0xd0] ss:$24 sps:$4 sm:$0xff]  }
 0x1ee   :  { %8006 = vmatprep.subr.bf16.mxu1 %v14626_v43  ;;  %v1789_v50 = vpop.f32.mrb[0].mxu0  ;;  %4545 = vmatprep.mubr.bf16.mxu0 %v15781_v52 }
 0x1ef   :  { %v16180_v51 = vpop.f32.mrb[0].mxu1  ;;  %4884 = vmatprep.mubr.bf16.mxu1 %v15781_v52  ;;  %v1791_v56 = vpop.f32.mrb[1].mxu0  ;;  %v14653_v52 = vld [vmem:[#allocation5 + $0x5c4] ss:$72 sps:$4 sm:$0xff]  }
 0x1f0   :  { %v2207_v55 = vrot.slane %v16180_v51, 1  ;;  %v16183_v57 = vpop.f32.mrb[1].mxu1  ;;  %v1793_v61 = vpop.f32.mrb[2].mxu0  ;;  %4946 = vmatpush1.bf16.msra.mxu0 %v14621_v46  ;;  %v14732_v51 = vld [vmem:[#allocation5 + $0xd18] ss:$72 sps:$4 sm:$0xff]  }
 0x1f1   :  { %v2208_v60 = vrot.slane %v16183_v57, 1  ;;  %v2132_v62 = vpop.f32.mrb[2].mxu1  ;;  %8007 = vmatpush1.bf16.msra.mxu1 %v14624_v47  ;;  %v1795_v0 = vpop.f32.mrb[3].mxu0  ;;  %4947 = vmatprep.subr.bf16.mxu0 %v14629_v48  ;;  %v14645_v47 = vld [vmem:[#allocation5 + $0x530] ss:$72 sps:$4 sm:$0xff]  }
 0x1f2   :  { %v2209_v63 = vrot.slane %v2132_v62, 1  ;;  %v2134_v1 = vpop.f32.mrb[3].mxu1  ;;  %8008 = vmatprep.subr.bf16.mxu1 %v14632_v49  ;;  %v14648_v48 = vld [vmem:[#allocation5 + $0x538] ss:$72 sps:$4 sm:$0xff]  }
 0x1f3   :  { %v2210_v3 = vrot.slane %v2134_v1, 1  ;;  %4546 = vmatmul.mubr.bf16.gmra.mrb[44].mxu0 %v15782_v7  ;;  %v14651_v62 = vld [vmem:[#allocation5 + $0x5c0] ss:$72 sps:$4 sm:$0xff]  }
 0x1f4   :  { %v2268_v5 = vsel %vm2239_vm0, %v2207_v55, %v2209_v63  ;;  %4885 = vmatmul.mubr.bf16.gmra.mrb[44].mxu1 %v15782_v7  ;;  %4948 = vmatpush1.bf16.msra.mxu0 %v14627_v53  ;;  %v14656_v53 = vld [vmem:[#allocation5 + $0x5cc] ss:$72 sps:$4 sm:$0xff]   ;;  %v14735_v57 = vld [vmem:[#allocation5 + $0xda0] ss:$72 sps:$4 sm:$0xff]  }
 0x1f5   :  { %v2272_v8 = vadd.f32 %v2268_v5, %v1789_v50  ;;  %v2269_v9 = vsel %vm2239_vm0, %v2208_v60, %v2210_v3  ;;  %8009 = vmatpush1.bf16.msra.mxu1 %v14630_v54  ;;  %4949 = vmatprep.subr.bf16.mxu0 %v14635_v58  ;;  %v14659_v5 = vld [vmem:[#allocation5 + $0x654] ss:$72 sps:$4 sm:$0xff]  }
 0x1f6   :  { %v2273_v12 = vadd.f32 %v2269_v9, %v1791_v56  ;;  %8010 = vmatprep.subr.bf16.mxu1 %v14638_v59  ;;  %v1799_v16 = vpop.f32.mrb[4].mxu0  ;;  %4555 = vmatprep.mubr.bf16.mxu0 %v15783_v18 }
 0x1f7   :  { %v2138_v17 = vpop.f32.mrb[4].mxu1  ;;  %4894 = vmatprep.mubr.bf16.mxu1 %v15783_v18  ;;  %v1801_v23 = vpop.f32.mrb[5].mxu0  ;;  %v2315_v35 = vadd.f32 %v16201_v15, %v2272_v8 }
 0x1f8   :  { %v2211_v22 = vrot.slane %v2138_v17, 1  ;;  %v2140_v24 = vpop.f32.mrb[5].mxu1  ;;  %v16206_v28 = vpop.f32.mrb[6].mxu0  ;;  %4950 = vmatpush1.bf16.msra.mxu0 %v14633_v10  ;;  %v2316_v39 = vadd.f32 %v16204_v21, %v2273_v12 }
 0x1f9   :  { %v2212_v27 = vrot.slane %v2140_v24, 1  ;;  %v2142_v29 = vpop.f32.mrb[6].mxu1  ;;  %8011 = vmatpush1.bf16.msra.mxu1 %v14636_v11  ;;  %v16213_v33 = vpop.f32.mrb[7].mxu0  ;;  %4951 = vmatprep.subr.bf16.mxu0 %v14641_v13  ;;  %v2347_v54 = vmax.f32 %v2315_v35, 0.0  ;;  %v14662_v13 = vld [vmem:[#allocation5 + $0x65c] ss:$72 sps:$4 sm:$0xff]  }
 0x1fa   :  { %v2266_v31 = vsel %vm2239_vm0, %v2209_v63, %v2211_v22  ;;  %v2213_v32 = vrot.slane %v2142_v29, 1  ;;  %v2144_v34 = vpop.f32.mrb[7].mxu1  ;;  %8012 = vmatprep.subr.bf16.mxu1 %v14644_v14  ;;  %v14654_v63 = vld [vmem:[#allocation5 + $0x5c8] ss:$72 sps:$4 sm:$0xff]   ;;  %v2348_v7 = vmax.f32 %v2316_v39, 0.0 }
 0x1fb   :  { %v2274_v36 = vadd.f32 %v2266_v31, %v1793_v61  ;;  %v2267_v37 = vsel %vm2239_vm0, %v2210_v3, %v2212_v27  ;;  %v2214_v38 = vrot.slane %v2144_v34, 1  ;;  %4556 = vmatmul.mubr.bf16.gmra.mrb[48].mxu0 %v15784_v42  ;;  %v15785_v61 = vld [vmem:[#allocation2 + $0x104] ss:$24 sps:$4 sm:$0xff]   ;;  %v15786_v31 = vld [vmem:[#allocation2 + $0x100] ss:$24 sps:$4 sm:$0xff]  }
 0x1fc   :  { %v2275_v40 = vadd.f32 %v2267_v37, %v1795_v0  ;;  %v2264_v41 = vsel %vm2239_vm0, %v2211_v22, %v2213_v32  ;;  %4895 = vmatmul.mubr.bf16.gmra.mrb[48].mxu1 %v15784_v42  ;;  %4952 = vmatpush1.bf16.msra.mxu0 %v14639_v19  ;;  %v14660_v37 = vld [vmem:[#allocation5 + $0x658] ss:$72 sps:$4 sm:$0xff]   ;;  %v14668_v42 = vld [vmem:[#allocation5 + $0x6ec] ss:$72 sps:$4 sm:$0xff]  }
 0x1fd   :  { %v2317_v43 = vadd.f32 %v16201_v15, %v2274_v36  ;;  %v2276_v45 = vadd.f32 %v2264_v41, %v1799_v16  ;;  %v2265_v46 = vsel %vm2239_vm0, %v2212_v27, %v2214_v38  ;;  %8013 = vmatpush1.bf16.msra.mxu1 %v14642_v20  ;;  %4953 = vmatprep.subr.bf16.mxu0 %v14647_v25  ;;  %v14665_v41 = vld [vmem:[#allocation5 + $0x6e4] ss:$72 sps:$4 sm:$0xff]  }
 0x1fe   :  { %v2318_v49 = vadd.f32 %v16204_v21, %v2275_v40  ;;  %v2277_v50 = vadd.f32 %v2265_v46, %v1801_v23  ;;  %8014 = vmatprep.subr.bf16.mxu1 %v14650_v26  ;;  %v1809_v58 = vpop.f32.mrb[8].mxu0  ;;  %4565 = vmatprep.mubr.bf16.mxu0 %v15785_v61 }
 0x1ff   :  { %v2349_v56 = vmax.f32 %v2317_v43, 0.0  ;;  %v2148_v59 = vpop.f32.mrb[8].mxu1  ;;  %4904 = vmatprep.mubr.bf16.mxu1 %v15785_v61  ;;  %v1811_v3 = vpop.f32.mrb[9].mxu0  ;;  %v16229_v9 = vadd.f32 %v16201_v15, %v2276_v45 }
 0x200   :  { %v2350_v0 = vmax.f32 %v2318_v49, 0.0  ;;  %v2215_v1 = vrot.slane %v2148_v59, 1  ;;  %v2150_v4 = vpop.f32.mrb[9].mxu1  ;;  %v16231_v11 = vpop.f32.mrb[10].mxu0  ;;  %4954 = vmatpush1.bf16.msra.mxu0 %v14645_v47  ;;  %v16238_v17 = vadd.f32 %v16204_v21, %v2277_v50  ;;  %v15787_v50 = vld [vmem:[#allocation2 + $0x134] ss:$24 sps:$4 sm:$0xff]  }
 0x201   :  { %v2387_v8 = vsel %vm2380_vm1, %v2349_v56, 0.0  ;;  %v2216_v10 = vrot.slane %v2150_v4, 1  ;;  %v16233_v12 = vpop.f32.mrb[10].mxu1  ;;  %8015 = vmatpush1.bf16.msra.mxu1 %v14648_v48  ;;  %v16242_v19 = vpop.f32.mrb[11].mxu0  ;;  %4955 = vmatprep.subr.bf16.mxu0 %v14653_v52  ;;  %v2351_v35 = vmax.f32 %v16229_v9, 0.0 }
 0x202   :  { %v2417_v14 = vmax.f32 %v2347_v54, %v2387_v8  ;;  %v2388_v16 = vsel %vm2380_vm1, %v2350_v0, 0.0  ;;  %v2262_v18 = vsel %vm2239_vm0, %v2213_v32, %v2215_v1  ;;  %v16244_v20 = vpop.f32.mrb[11].mxu1  ;;  %8016 = vmatprep.subr.bf16.mxu1 %v14656_v53  ;;  %v2217_v25 = vrot.slane %v16233_v12, 1  ;;  %v14657_v32 = vld [vmem:[#allocation5 + $0x650] ss:$72 sps:$4 sm:$0xff]  }
 0x203   :  { %v2424_v22 = vmax.f32 %v2348_v7, %v2388_v16  ;;  %v2278_v23 = vadd.f32 %v2262_v18, %v16206_v28  ;;  %v2263_v24 = vsel %vm2239_vm0, %v2214_v38, %v2216_v10  ;;  %v2218_v29 = vrot.slane %v16244_v20, 1  ;;  %4566 = vmatmul.mubr.bf16.gmra.mrb[52].mxu0 %v15786_v31  ;;  %v14663_v52 = vld [vmem:[#allocation5 + $0x6e0] ss:$72 sps:$4 sm:$0xff]   ;;  %v14674_v0 = vld [vmem:[#allocation5 + $0x77c] ss:$72 sps:$4 sm:$0xff]  }
 0x204   :  { %v2418_v26 = vrot.slane %v2417_v14, 4  ;;  %v2279_v27 = vadd.f32 %v2263_v24, %v16213_v33  ;;  %4905 = vmatmul.mubr.bf16.gmra.mrb[52].mxu1 %v15786_v31  ;;  %v2260_v28 = vsel %vm2239_vm0, %v2215_v1, %v2217_v25  ;;  %4956 = vmatpush1.bf16.msra.mxu0 %v14651_v62  ;;  %v2352_v45 = vmax.f32 %v16238_v17, 0.0  ;;  %v14666_v53 = vld [vmem:[#allocation5 + $0x6e8] ss:$72 sps:$4 sm:$0xff]  }
 0x205   :  { %v2425_v34 = vrot.slane %v2424_v22, 4  ;;  %v2321_v36 = vadd.f32 %v16201_v15, %v2278_v23  ;;  %8017 = vmatpush1.bf16.msra.mxu1 %v14654_v63  ;;  %v2280_v39 = vadd.f32 %v2260_v28, %v1809_v58  ;;  %v2261_v40 = vsel %vm2239_vm0, %v2216_v10, %v2218_v29  ;;  %4957 = vmatprep.subr.bf16.mxu0 %v14659_v5  ;;  %v14671_v63 = vld [vmem:[#allocation5 + $0x774] ss:$72 sps:$4 sm:$0xff]  }
 0x206   :  { %v2419_v38 = vmax.f32 %v2417_v14, %v2418_v26  ;;  %v2322_v33 = vadd.f32 %v16204_v21, %v2279_v27  ;;  %v2281_v47 = vadd.f32 %v2261_v40, %v1811_v3  ;;  %v16262_v48 = vpop.f32.mrb[12].mxu0  ;;  %8018 = vmatprep.subr.bf16.mxu1 %v14662_v13  ;;  %4575 = vmatprep.mubr.bf16.mxu0 %v15787_v50 }
 0x207   :  { %v2426_v43 = vmax.f32 %v2424_v22, %v2425_v34  ;;  %v2353_v46 = vmax.f32 %v2321_v36, 0.0  ;;  %v16264_v49 = vpop.f32.mrb[12].mxu1  ;;  %v16267_v58 = vadd.f32 %v16201_v15, %v2280_v39  ;;  %v16270_v61 = vpop.f32.mrb[13].mxu0  ;;  %4914 = vmatprep.mubr.bf16.mxu1 %v15787_v50  ;;  %v14669_v34 = vld [vmem:[#allocation5 + $0x770] ss:$72 sps:$4 sm:$0xff]  }
 0x208   :  { %v2420_v54 = vrot.slane %v2419_v38, 2  ;;  %v2354_v56 = vmax.f32 %v2322_v33, 0.0  ;;  %v2219_v59 = vrot.slane %v16264_v49, 1  ;;  %v16272_v62 = vpop.f32.mrb[13].mxu1  ;;  %v16277_v4 = vadd.f32 %v16204_v21, %v2281_v47  ;;  %v16280_v7 = vpop.f32.mrb[14].mxu0  ;;  %4958 = vmatpush1.bf16.msra.mxu0 %v14657_v32 }
 0x209   :  { %v2427_v1 = vrot.slane %v2426_v43, 2  ;;  %v2391_v3 = vsel %vm2380_vm1, %v2353_v46, 0.0  ;;  %v2220_v5 = vrot.slane %v16272_v62, 1  ;;  %v16282_v8 = vpop.f32.mrb[14].mxu1  ;;  %8019 = vmatpush1.bf16.msra.mxu1 %v14660_v37  ;;  %v2355_v13 = vmax.f32 %v16267_v58, 0.0  ;;  %v16287_v14 = vpop.f32.mrb[15].mxu0  ;;  %4959 = vmatprep.subr.bf16.mxu0 %v14665_v41 }
 0x20a   :  { %v2421_v9 = vmax.f32 %v2419_v38, %v2420_v54  ;;  %v2431_v10 = vmax.f32 %v2351_v35, %v2391_v3  ;;  %v2392_v12 = vsel %vm2380_vm1, %v2354_v56, 0.0  ;;  %v16289_v16 = vpop.f32.mrb[15].mxu1  ;;  %8020 = vmatprep.subr.bf16.mxu1 %v14668_v42  ;;  %v2356_v22 = vmax.f32 %v16277_v4, 0.0  ;;  %v15788_v32 = vld [vmem:[#allocation2 + $0x130] ss:$24 sps:$4 sm:$0xff]  }
 0x20b   :  { %v2428_v17 = vmax.f32 %v2426_v43, %v2427_v1  ;;  %v2438_v18 = vmax.f32 %v2352_v45, %v2392_v12  ;;  %v2258_v23 = vsel %vm2239_vm0, %v2217_v25, %v2219_v59  ;;  %v2259_v31 = vsel %vm2239_vm0, %v2218_v29, %v2220_v5  ;;  %4576 = vmatmul.mubr.bf16.gmra.mrb[56].mxu0 %v15788_v32  ;;  %v14672_v37 = vld [vmem:[#allocation5 + $0x778] ss:$72 sps:$4 sm:$0xff]   ;;  %v14677_v33 = vld [vmem:[#allocation5 + $0x804] ss:$72 sps:$4 sm:$0xff]   ;;  %v14678_v49 = vld [vmem:[#allocation5 + $0x808] ss:$72 sps:$4 sm:$0xff]  }
 0x20c   :  { %v2422_v24 = vrot.slane %v2421_v9, 1  ;;  %v2432_v26 = vrot.slane %v2431_v10, 4  ;;  %v2282_v27 = vadd.f32 %v2258_v23, %v16231_v11  ;;  %4915 = vmatmul.mubr.bf16.gmra.mrb[56].mxu1 %v15788_v32  ;;  %v2283_v28 = vadd.f32 %v2259_v31, %v16242_v19  ;;  %4960 = vmatpush1.bf16.msra.mxu0 %v14663_v52  ;;  %v14680_v39 = vld [vmem:[#allocation5 + $0x80c] ss:$72 sps:$4 sm:$0xff]   ;;  %v15789_v46 = vld [vmem:[#allocation2 + $0x164] ss:$24 sps:$4 sm:$0xff]  }
 0x20d   :  { %v2429_v35 = vrot.slane %v2428_v17, 1  ;;  %v2439_v36 = vrot.slane %v2438_v18, 4  ;;  %v2221_v25 = vrot.slane %v16282_v8, 1  ;;  %8021 = vmatpush1.bf16.msra.mxu1 %v14666_v53  ;;  %v2222_v29 = vrot.slane %v16289_v16, 1  ;;  %4961 = vmatprep.subr.bf16.mxu0 %v14671_v63  ;;  %v14675_v47 = vld [vmem:[#allocation5 + $0x800] ss:$72 sps:$4 sm:$0xff]  }
 0x20e   :  { %v16301_v11 = vmax.f32 %v2421_v9, %v2422_v24  ;;  %v2433_v20 = vmax.f32 %v2431_v10, %v2432_v26  ;;  %v2325_v38 = vadd.f32 %v16201_v15, %v2282_v27  ;;  %8022 = vmatprep.subr.bf16.mxu1 %v14674_v0  ;;  %v2326_v19 = vadd.f32 %v16204_v21, %v2283_v28  ;;  %v16310_v43 = vpop.f32.mrb[16].mxu0  ;;  %v14683_v62 = vld [vmem:[#allocation5 + $0x894] ss:$72 sps:$4 sm:$0xff]   ;;  %v14681_v58 = vld [vmem:[#allocation5 + $0x890] ss:$72 sps:$4 sm:$0xff]  }
 0x20f   :  { %v16305_v40 = vmax.f32 %v2428_v17, %v2429_v35  ;;  %v2440_v41 = vmax.f32 %v2438_v18, %v2439_v36  ;;  %v2256_v42 = vsel %vm2239_vm0, %v2219_v59, %v2221_v25  ;;  %v16312_v45 = vpop.f32.mrb[16].mxu1  ;;  %4585 = vmatprep.mubr.bf16.mxu0 %v15789_v46  ;;  %v2257_v54 = vsel %vm2239_vm0, %v2220_v5, %v2222_v29  ;;  %v16319_v56 = vpop.f32.mrb[17].mxu0  ;;  %v14686_v63 = vld [vmem:[#allocation5 + $0x89c] ss:$72 sps:$4 sm:$0xff]   ;;  %v15790_v36 = vld [vmem:[#allocation2 + $0x160] ss:$24 sps:$4 sm:$0xff]  }
 0x210   :  { %v2434_v50 = vrot.slane %v2433_v20, 2  ;;  %v2357_v52 = vmax.f32 %v2325_v38, 0.0  ;;  %v2284_v53 = vadd.f32 %v2256_v42, %v16262_v48  ;;  %v16321_v59 = vpop.f32.mrb[17].mxu1  ;;  %4924 = vmatprep.mubr.bf16.mxu1 %v15789_v46  ;;  %v2358_v1 = vmax.f32 %v2326_v19, 0.0  ;;  %v16325_v9 = vpop.f32.mrb[18].mxu0  ;;  %4962 = vmatpush1.bf16.msra.mxu0 %v14669_v34 }
 0x211   :  { %v2441_v0 = vrot.slane %v2440_v41, 2  ;;  %v2285_v3 = vadd.f32 %v2257_v54, %v16270_v61  ;;  %v2223_v8 = vrot.slane %v16312_v45, 1  ;;  %v16327_v48 = vpop.f32.mrb[18].mxu1  ;;  %8023 = vmatpush1.bf16.msra.mxu1 %v14672_v37  ;;  %v2224_v17 = vrot.slane %v16321_v59, 1  ;;  %v16335_v18 = vpop.f32.mrb[19].mxu0  ;;  %4963 = vmatprep.subr.bf16.mxu0 %v14677_v33 }
 0x212   :  { %v2435_v5 = vmax.f32 %v2433_v20, %v2434_v50  ;;  %v2395_v10 = vsel %vm2380_vm1, %v2357_v52, 0.0  ;;  %v16332_v12 = vadd.f32 %v16201_v15, %v2284_v53  ;;  %v16337_v61 = vpop.f32.mrb[19].mxu1  ;;  %8024 = vmatprep.subr.bf16.mxu1 %v14680_v39  ;;  %v2396_v26 = vsel %vm2380_vm1, %v2358_v1, 0.0  ;;  %v14684_v38 = vld [vmem:[#allocation5 + $0x898] ss:$72 sps:$4 sm:$0xff]  }
 0x213   :  { %v2442_v23 = vmax.f32 %v2440_v41, %v2441_v0  ;;  %v2445_v24 = vmax.f32 %v2355_v13, %v2395_v10  ;;  %v16344_v27 = vadd.f32 %v16204_v21, %v2285_v3  ;;  %v2452_v32 = vmax.f32 %v2356_v22, %v2396_v26  ;;  %4586 = vmatmul.mubr.bf16.gmra.mrb[60].mxu0 %v15790_v36  ;;  %v14689_v39 = vld [vmem:[#allocation5 + $0x924] ss:$72 sps:$4 sm:$0xff]   ;;  %v14690_v59 = vld [vmem:[#allocation5 + $0x928] ss:$72 sps:$4 sm:$0xff]  }
 0x214   :  { %v2436_v31 = vrot.slane %v2435_v5, 1  ;;  %v2359_v34 = vmax.f32 %v16332_v12, 0.0  ;;  %v2254_v35 = vsel %vm2239_vm0, %v2221_v25, %v2223_v8  ;;  %4925 = vmatmul.mubr.bf16.gmra.mrb[60].mxu1 %v15790_v36  ;;  %4964 = vmatpush1.bf16.msra.mxu0 %v14675_v47  ;;  %v2255_v25 = vsel %vm2239_vm0, %v2222_v29, %v2224_v17  ;;  %v14692_v41 = vld [vmem:[#allocation5 + $0x92c] ss:$72 sps:$4 sm:$0xff]   ;;  %v15791_v16 = vld [vmem:[#allocation2 + $0x4] ss:$24 sps:$4 sm:$0xff]  }
 0x215   :  { %v2443_v13 = vrot.slane %v2442_v23, 1  ;;  %v2446_v28 = vrot.slane %v2445_v24, 4  ;;  %v2360_v37 = vmax.f32 %v16344_v27, 0.0  ;;  %v2286_v20 = vadd.f32 %v2254_v35, %v16280_v7  ;;  %8025 = vmatpush1.bf16.msra.mxu1 %v14678_v49  ;;  %4965 = vmatprep.subr.bf16.mxu0 %v14683_v62  ;;  %v14687_v29 = vld [vmem:[#allocation5 + $0x920] ss:$72 sps:$4 sm:$0xff]  }
 0x216   :  { %v2437_v4 = vmax.f32 %v2435_v5, %v2436_v31  ;;  %v2453_v22 = vrot.slane %v2452_v32, 4  ;;  %v2225_v33 = vrot.slane %v16327_v48, 1  ;;  %8026 = vmatprep.subr.bf16.mxu1 %v14686_v63  ;;  %v2287_v45 = vadd.f32 %v2255_v25, %v16287_v14  ;;  %v16362_v46 = vpop.f32.mrb[20].mxu0  ;;  %4967 = vmatprep.mubr.bf16.mxu0 %v15791_v16  ;;  %v14695_v62 = vld [vmem:[#allocation5 + $0x9b4] ss:$72 sps:$4 sm:$0xff]  }
 0x217   :  { %v16358_v19 = vmax.f32 %v2442_v23, %v2443_v13  ;;  %v2447_v7 = vmax.f32 %v2445_v24, %v2446_v28  ;;  %v2329_v42 = vadd.f32 %v16201_v15, %v2286_v20  ;;  %v16364_v47 = vpop.f32.mrb[20].mxu1  ;;  %v2226_v53 = vrot.slane %v16337_v61, 1  ;;  %v16373_v54 = vpop.f32.mrb[21].mxu0  ;;  %8028 = vmatprep.mubr.bf16.mxu1 %v15791_v16  ;;  %v14693_v36 = vld [vmem:[#allocation5 + $0x9b0] ss:$72 sps:$4 sm:$0xff]  }
 0x218   :  { %v16368_v49 = vsel %vm9882_vm2, %v2437_v4, %v16301_v11  ;;  %v2454_v50 = vmax.f32 %v2452_v32, %v2453_v22  ;;  %v2252_v52 = vsel %vm2239_vm0, %v2223_v8, %v2225_v33  ;;  %v16375_v14 = vpop.f32.mrb[21].mxu1  ;;  %v2330_v1 = vadd.f32 %v16204_v21, %v2287_v45  ;;  %v16379_v3 = vpop.f32.mrb[22].mxu0  ;;  %4966 = vmatpush1.bf16.msra.mxu0 %v14681_v58  ;;  %v14698_v8 = vld [vmem:[#allocation5 + $0x9bc] ss:$72 sps:$4 sm:$0xff]   ;;  %v15792_v20 = vld [vmem:[#allocation2] ss:$24 sps:$4 sm:$0xff]  }
 0x219   :  { %v2448_v63 = vrot.slane %v2447_v7, 2  ;;  %v2361_v0 = vmax.f32 %v2329_v42, 0.0  ;;  %v2288_v11 = vadd.f32 %v2252_v52, %v16310_v43  ;;  %v16381_v48 = vpop.f32.mrb[22].mxu1  ;;  %8027 = vmatpush1.bf16.msra.mxu1 %v14684_v38  ;;  %v2253_v10 = vsel %vm2239_vm0, %v2224_v17, %v2226_v53  ;;  %v16387_v24 = vpop.f32.mrb[23].mxu0  ;;  %5048 = vmatprep.subr.bf16.mxu0 %v14689_v39  ;;  %v14696_v39 = vld [vmem:[#allocation5 + $0x9b8] ss:$72 sps:$4 sm:$0xff]  }
 0x21a   :  { %v2455_v5 = vrot.slane %v2454_v50, 2  ;;  %v2227_v61 = vrot.slane %v16364_v47, 1  ;;  %v2228_v23 = vrot.slane %v16375_v14, 1  ;;  %v16389_v26 = vpop.f32.mrb[23].mxu1  ;;  %8109 = vmatprep.subr.bf16.mxu1 %v14692_v41  ;;  %v2362_v32 = vmax.f32 %v2330_v1, 0.0 }
 0x21b   :  { %v2449_v43 = vmax.f32 %v2447_v7, %v2448_v63  ;;  %v2399_v31 = vsel %vm2380_vm1, %v2361_v0, 0.0  ;;  %v16394_v35 = vadd.f32 %v16201_v15, %v2288_v11  ;;  %v2289_v13 = vadd.f32 %v2253_v10, %v16319_v56  ;;  %4968 = vmatmul.mubr.bf16.vlgmr.msra.gmra.mrb[64].mxu0 %v15792_v20  ;;  %v14701_v41 = vld [vmem:[#allocation5 + $0xa44] ss:$72 sps:$4 sm:$0xff]  }
 0x21c   :  { %v2456_v17 = vmax.f32 %v2454_v50, %v2455_v5  ;;  %v2459_v58 = vmax.f32 %v2359_v34, %v2399_v31  ;;  %v2250_v28 = vsel %vm2239_vm0, %v2225_v33, %v2227_v61  ;;  %v2400_v4 = vsel %vm2380_vm1, %v2362_v32, 0.0  ;;  %8029 = vmatmul.mubr.bf16.vlgmr.msra.gmra.mrb[64].mxu1 %v15792_v20  ;;  %5049 = vmatpush1.bf16.msra.mxu0 %v14687_v29  ;;  %v14704_v7 = vld [vmem:[#allocation5 + $0xa4c] ss:$72 sps:$4 sm:$0xff]   ;;  %v14699_v29 = vld [vmem:[#allocation5 + $0xa40] ss:$72 sps:$4 sm:$0xff]  }
 0x21d   :  { %v2450_v38 = vrot.slane %v2449_v43, 1  ;;  %v2363_v22 = vmax.f32 %v16394_v35, 0.0  ;;  %v2290_v25 = vadd.f32 %v2250_v28, %v16325_v9  ;;  %v2466_v56 = vmax.f32 %v2360_v37, %v2400_v4  ;;  %8110 = vmatpush1.bf16.msra.mxu1 %v14690_v59  ;;  %5050 = vmatprep.subr.bf16.mxu0 %v14695_v62  ;;  %v15793_v37 = vld [vmem:[#allocation2 + $0x34] ss:$24 sps:$4 sm:$0xff]  }
 0x21e   :  { %v2457_v12 = vrot.slane %v2456_v17, 1  ;;  %v2460_v34 = vrot.slane %v2459_v58, 4  ;;  %v16408_v33 = vadd.f32 %v16204_v21, %v2289_v13  ;;  %v2251_v9 = vsel %vm2239_vm0, %v2226_v53, %v2228_v23  ;;  %v16416_v16 = vpop.f32.mrb[24].mxu0  ;;  %8111 = vmatprep.subr.bf16.mxu1 %v14698_v8  ;;  %4977 = vmatprep.mubr.bf16.mxu0 %v15793_v37  ;;  %v14702_v53 = vld [vmem:[#allocation5 + $0xa48] ss:$72 sps:$4 sm:$0xff]  }
 0x21f   :  { %v2451_v42 = vmax.f32 %v2449_v43, %v2450_v38  ;;  %v2333_v45 = vadd.f32 %v16201_v15, %v2290_v25  ;;  %v2229_v47 = vrot.slane %v16381_v48, 1  ;;  %v16418_v27 = vpop.f32.mrb[24].mxu1  ;;  %v2467_v59 = vrot.slane %v2466_v56, 4  ;;  %v16423_v63 = vpop.f32.mrb[25].mxu0  ;;  %8038 = vmatprep.mubr.bf16.mxu1 %v15793_v37  ;;  %v14707_v43 = vld [vmem:[#allocation5 + $0xad4] ss:$72 sps:$4 sm:$0xff]  }
 0x220   :  { %v16420_v50 = vmax.f32 %v2456_v17, %v2457_v12  ;;  %v2461_v52 = vmax.f32 %v2459_v58, %v2460_v34  ;;  %v2364_v62 = vmax.f32 %v16408_v33, 0.0  ;;  %v16425_v0 = vpop.f32.mrb[25].mxu1  ;;  %v2291_v48 = vadd.f32 %v2251_v9, %v16335_v18  ;;  %v16434_v5 = vpop.f32.mrb[26].mxu0  ;;  %5051 = vmatpush1.bf16.msra.mxu0 %v14693_v36  ;;  %v14710_v18 = vld [vmem:[#allocation5 + $0xadc] ss:$72 sps:$4 sm:$0xff]  }
 0x221   :  { %v16429_v1 = vsel %vm9884_vm3, %v2451_v42, %v16368_v49  ;;  %v2365_v11 = vmax.f32 %v2333_v45, 0.0  ;;  %v2248_v8 = vsel %vm2239_vm0, %v2227_v61, %v2229_v47  ;;  %v16436_v10 = vpop.f32.mrb[26].mxu1  ;;  %v2468_v32 = vmax.f32 %v2466_v56, %v2467_v59  ;;  %8112 = vmatpush1.bf16.msra.mxu1 %v14696_v39  ;;  %v16440_v49 = vpop.f32.mrb[27].mxu0  ;;  %5052 = vmatprep.subr.bf16.mxu0 %v14701_v41  ;;  %v15794_v25 = vld [vmem:[#allocation2 + $0x30] ss:$24 sps:$4 sm:$0xff]  }
 0x222   :  { %v2462_v31 = vrot.slane %v2461_v52, 2  ;;  %v2292_v35 = vadd.f32 %v2248_v8, %v16362_v46  ;;  %v2230_v17 = vrot.slane %v16389_v26, 1  ;;  %v16442_v58 = vpop.f32.mrb[27].mxu1  ;;  %v2334_v13 = vadd.f32 %v16204_v21, %v2291_v48  ;;  %8113 = vmatprep.subr.bf16.mxu1 %v14704_v7  ;;  %v14705_v46 = vld [vmem:[#allocation5 + $0xad0] ss:$72 sps:$4 sm:$0xff]  }
 0x223   :  { %v2403_v61 = vsel %vm2380_vm1, %v2365_v11, 0.0  ;;  %v2231_v36 = vrot.slane %v16418_v27, 1  ;;  %v2232_v28 = vrot.slane %v16425_v0, 1  ;;  %v2469_v26 = vrot.slane %v2468_v32, 2  ;;  %4978 = vmatmul.mubr.bf16.gmra.mrb[68].mxu0 %v15794_v25  ;;  %v14708_v56 = vld [vmem:[#allocation5 + $0xad8] ss:$72 sps:$4 sm:$0xff]  }
 0x224   :  { %v2463_v20 = vmax.f32 %v2461_v52, %v2462_v31  ;;  %v2473_v38 = vmax.f32 %v2363_v22, %v2403_v61  ;;  %v16450_v4 = vadd.f32 %v16201_v15, %v2292_v35  ;;  %v2366_v39 = vmax.f32 %v2334_v13, 0.0  ;;  %8039 = vmatmul.mubr.bf16.gmra.mrb[68].mxu1 %v15794_v25  ;;  %5053 = vmatpush1.bf16.msra.mxu0 %v14699_v29  ;;  %v14713_v33 = vld [vmem:[#allocation5 + $0xb64] ss:$72 sps:$4 sm:$0xff]   ;;  %v14711_v11 = vld [vmem:[#allocation5 + $0xb60] ss:$72 sps:$4 sm:$0xff]  }
 0x225   :  { %v2249_v12 = vsel %vm2239_vm0, %v2228_v23, %v2230_v17  ;;  %v2246_v34 = vsel %vm2239_vm0, %v2229_v47, %v2231_v36  ;;  %v2247_v22 = vsel %vm2239_vm0, %v2230_v17, %v2232_v28  ;;  %v2470_v7 = vmax.f32 %v2468_v32, %v2469_v26  ;;  %8114 = vmatpush1.bf16.msra.mxu1 %v14702_v53  ;;  %v14716_v23 = vld [vmem:[#allocation5 + $0xb6c] ss:$72 sps:$4 sm:$0xff]   ;;  %v15795_v59 = vld [vmem:[#allocation2 + $0x64] ss:$24 sps:$4 sm:$0xff]  }
 0x226   :  { %v2464_v41 = vrot.slane %v2463_v20, 1  ;;  %v2474_v14 = vrot.slane %v2473_v38, 4  ;;  %v2367_v42 = vmax.f32 %v16450_v4, 0.0  ;;  %5054 = vmatprep.subr.bf16.mxu0 %v14707_v43  ;;  %v2404_v45 = vsel %vm2380_vm1, %v2366_v39, 0.0  ;;  %v16470_v29 = vpop.f32.mrb[28].mxu0  ;;  %8115 = vmatprep.subr.bf16.mxu1 %v14710_v18 }
 0x227   :  { %v2293_v9 = vadd.f32 %v2249_v12, %v16373_v54  ;;  %v2294_v47 = vadd.f32 %v2246_v34, %v16379_v3  ;;  %v2295_v37 = vadd.f32 %v2247_v22, %v16387_v24  ;;  %v16472_v52 = vpop.f32.mrb[28].mxu1  ;;  %4987 = vmatprep.mubr.bf16.mxu0 %v15795_v59  ;;  %v2471_v48 = vrot.slane %v2470_v7, 1  ;;  %v16476_v31 = vpop.f32.mrb[29].mxu0  ;;  %8048 = vmatprep.mubr.bf16.mxu1 %v15795_v59  ;;  %v14714_v3 = vld [vmem:[#allocation5 + $0xb68] ss:$72 sps:$4 sm:$0xff]  }
 0x228   :  { %v16474_v53 = vmax.f32 %v2463_v20, %v2464_v41  ;;  %v2475_v8 = vmax.f32 %v2473_v38, %v2474_v14  ;;  %v2480_v43 = vmax.f32 %v2364_v62, %v2404_v45  ;;  %v16478_v54 = vpop.f32.mrb[29].mxu1  ;;  %v2233_v17 = vrot.slane %v16436_v10, 1  ;;  %v16484_v18 = vpop.f32.mrb[30].mxu0  ;;  %5055 = vmatpush1.bf16.msra.mxu0 %v14705_v46  ;;  %v14719_v62 = vld [vmem:[#allocation5 + $0xbf4] ss:$72 sps:$4 sm:$0xff]  }
 0x229   :  { %v2336_v24 = vadd.f32 %v16204_v21, %v2293_v9  ;;  %v2337_v32 = vadd.f32 %v16201_v15, %v2294_v47  ;;  %v2338_v35 = vadd.f32 %v16204_v21, %v2295_v37  ;;  %v16486_v61 = vpop.f32.mrb[30].mxu1  ;;  %v16488_v13 = vmax.f32 %v2470_v7, %v2471_v48  ;;  %8116 = vmatpush1.bf16.msra.mxu1 %v14708_v56  ;;  %v16491_v4 = vpop.f32.mrb[31].mxu0  ;;  %v14722_v34 = vld [vmem:[#allocation5 + $0xbfc] ss:$72 sps:$4 sm:$0xff]  }
 0x22a   :  { %v2476_v20 = vrot.slane %v2475_v8, 2  ;;  %v2481_v26 = vrot.slane %v2480_v43, 4  ;;  %v2234_v38 = vrot.slane %v16442_v58, 1  ;;  %v16493_v25 = vpop.f32.mrb[31].mxu1  ;;  %5056 = vmatprep.subr.bf16.mxu0 %v14713_v33  ;;  %v2244_v46 = vsel %vm2239_vm0, %v2231_v36, %v2233_v17  ;;  %8117 = vmatprep.subr.bf16.mxu1 %v14716_v23  ;;  %v15796_v33 = vld [vmem:[#allocation2 + $0x60] ss:$24 sps:$4 sm:$0xff]  }
 0x22b   :  { %v2368_v39 = vmax.f32 %v2336_v24, 0.0  ;;  %v2369_v10 = vmax.f32 %v2337_v32, 0.0  ;;  %v2370_v12 = vmax.f32 %v2338_v35, 0.0  ;;  %v2296_v58 = vadd.f32 %v2244_v46, %v16416_v16  ;;  %4988 = vmatmul.mubr.bf16.gmra.mrb[72].mxu0 %v15796_v33  ;;  %v14717_v16 = vld [vmem:[#allocation5 + $0xbf0] ss:$72 sps:$4 sm:$0xff]  }
 0x22c   :  { %v2477_v22 = vmax.f32 %v2475_v8, %v2476_v20  ;;  %v2482_v41 = vmax.f32 %v2480_v43, %v2481_v26  ;;  %v2245_v56 = vsel %vm2239_vm0, %v2232_v28, %v2234_v38  ;;  %v2235_v14 = vrot.slane %v16472_v52, 1  ;;  %8049 = vmatmul.mubr.bf16.gmra.mrb[72].mxu1 %v15796_v33  ;;  %5057 = vmatpush1.bf16.msra.mxu0 %v14711_v11  ;;  %v14720_v28 = vld [vmem:[#allocation5 + $0xbf8] ss:$72 sps:$4 sm:$0xff]   ;;  %v14725_v47 = vld [vmem:[#allocation5 + $0xc84] ss:$72 sps:$4 sm:$0xff]  }
 0x22d   :  { %v2407_v7 = vsel %vm2380_vm1, %v2369_v10, 0.0  ;;  %v2408_v27 = vsel %vm2380_vm1, %v2370_v12, 0.0  ;;  %v2297_v36 = vadd.f32 %v2245_v56, %v16423_v63  ;;  %8118 = vmatpush1.bf16.msra.mxu1 %v14714_v3  ;;  %5058 = vmatprep.subr.bf16.mxu0 %v14719_v62  ;;  %v16511_v37 = vadd.f32 %v16201_v15, %v2296_v58  ;;  %v15797_v11 = vld [vmem:[#allocation2 + $0x94] ss:$24 sps:$4 sm:$0xff]   ;;  %v14726_v62 = vld [vmem:[#allocation5 + $0xc88] ss:$72 sps:$4 sm:$0xff]  }
 0x22e   :  { %v2478_v23 = vrot.slane %v2477_v22, 1  ;;  %v2483_v0 = vrot.slane %v2482_v41, 2  ;;  %v2487_v45 = vmax.f32 %v2367_v42, %v2407_v7  ;;  %v2494_v9 = vmax.f32 %v2368_v39, %v2408_v27  ;;  %8119 = vmatprep.subr.bf16.mxu1 %v14722_v34  ;;  %4997 = vmatprep.mubr.bf16.mxu0 %v15797_v11  ;;  %v14728_v42 = vld [vmem:[#allocation5 + $0xc8c] ss:$72 sps:$4 sm:$0xff]   ;;  %v14734_v46 = vld [vmem:[#allocation5 + $0xd1c] ss:$72 sps:$4 sm:$0xff]  }
 0x22f   :  { %v16514_v59 = vadd.f32 %v16204_v21, %v2297_v36  ;;  %v2242_v63 = vsel %vm2239_vm0, %v2233_v17, %v2235_v14  ;;  %v2236_v52 = vrot.slane %v16478_v54, 1  ;;  %8058 = vmatprep.mubr.bf16.mxu1 %v15797_v11  ;;  %v2371_v24 = vmax.f32 %v16511_v37, 0.0  ;;  %v14723_v17 = vld [vmem:[#allocation5 + $0xc80] ss:$72 sps:$4 sm:$0xff]   ;;  %v14731_v12 = vld [vmem:[#allocation5 + $0xd14] ss:$72 sps:$4 sm:$0xff]  }
 0x230   :  { %v16519_v48 = vmax.f32 %v2477_v22, %v2478_v23  ;;  %v16521_v8 = vmax.f32 %v2482_v41, %v2483_v0  ;;  %v2488_v43 = vrot.slane %v2487_v45, 4  ;;  %v2495_v3 = vrot.slane %v2494_v9, 4  ;;  %5059 = vmatpush1.bf16.msra.mxu0 %v14717_v16  ;;  %v15798_v33 = vld [vmem:[#allocation2 + $0x90] ss:$24 sps:$4 sm:$0xff]  }
 0x231   :  { %v2372_v32 = vmax.f32 %v16514_v59, 0.0  ;;  %v2298_v35 = vadd.f32 %v2242_v63, %v16434_v5  ;;  %v2243_v54 = vsel %vm2239_vm0, %v2234_v38, %v2236_v52  ;;  %v2237_v10 = vrot.slane %v16486_v61, 1  ;;  %8120 = vmatpush1.bf16.msra.mxu1 %v14720_v28  ;;  %5060 = vmatprep.subr.bf16.mxu0 %v14725_v47  ;;  %v14729_v38 = vld [vmem:[#allocation5 + $0xd10] ss:$72 sps:$4 sm:$0xff]   ;;  %v14743_v63 = vld [vmem:[#allocation5 + $0xe34] ss:$72 sps:$4 sm:$0xff]  }
 0x232   :  { %v2489_v20 = vmax.f32 %v2487_v45, %v2488_v43  ;;  %v16528_v26 = vmax.f32 %v2494_v9, %v2495_v3  ;;  %v2299_v39 = vadd.f32 %v2243_v54, %v16440_v49  ;;  %v2238_v34 = vrot.slane %v16493_v25, 1  ;;  %8121 = vmatprep.subr.bf16.mxu1 %v14728_v42  ;;  %v14740_v9 = vld [vmem:[#allocation5 + $0xdac] ss:$72 sps:$4 sm:$0xff]   ;;  %v14738_v59 = vld [vmem:[#allocation5 + $0xda8] ss:$72 sps:$4 sm:$0xff]  }
 0x233   :  { %v2341_v5 = vadd.f32 %v16201_v15, %v2298_v35  ;;  %v2485_v22 = vrot.slane %v16521_v8, 1  ;;  %v9896_v41 = vsel %vm9882_vm2, %v16358_v19, %v16305_v40  ;;  %v2240_v56 = vsel %vm2239_vm0, %v2235_v14, %v2237_v10  ;;  %4998 = vmatmul.mubr.bf16.gmra.mrb[76].mxu0 %v15798_v33  ;;  %v14746_v42 = vld [vmem:[#allocation5 + $0xe3c] ss:$72 sps:$4 sm:$0xff]  }
 0x234   :  { %v2490_v49 = vrot.slane %v2489_v20, 2  ;;  %v2497_v61 = vrot.slane %v16528_v26, 2  ;;  %v2342_v58 = vadd.f32 %v16204_v21, %v2299_v39  ;;  %v2270_v7 = vsel %vm2239_vm0, %v2237_v10, %v2207_v55  ;;  %8059 = vmatmul.mubr.bf16.gmra.mrb[76].mxu1 %v15798_v33  ;;  %5061 = vmatpush1.bf16.msra.mxu0 %v14723_v17  ;;  %v14737_v55 = vld [vmem:[#allocation5 + $0xda4] ss:$72 sps:$4 sm:$0xff]  }
 0x235   :  { %v2373_v25 = vmax.f32 %v2341_v5, 0.0  ;;  %v2300_v27 = vadd.f32 %v2240_v56, %v16470_v29  ;;  %v2241_v40 = vsel %vm2239_vm0, %v2236_v52, %v2238_v34  ;;  %v2302_v14 = vadd.f32 %v2270_v7, %v16484_v18  ;;  %8122 = vmatpush1.bf16.msra.mxu1 %v14726_v62  ;;  %5062 = vmatprep.subr.bf16.mxu0 %v14731_v12  ;;  %v15799_v18 = vld [vmem:[#allocation2 + $0xc4] ss:$24 sps:$4 sm:$0xff]  }
 0x236   :  { %v2491_v19 = vmax.f32 %v2489_v20, %v2490_v49  ;;  %v2374_v36 = vmax.f32 %v2342_v58, 0.0  ;;  %v2271_v16 = vsel %vm2239_vm0, %v2238_v34, %v2208_v60  ;;  %v2301_v0 = vadd.f32 %v2241_v40, %v16476_v31  ;;  %8123 = vmatprep.subr.bf16.mxu1 %v14734_v46  ;;  %5007 = vmatprep.mubr.bf16.mxu0 %v15799_v18  ;;  %v15801_v49 = vld [vmem:[#allocation2 + $0xf4] ss:$24 sps:$4 sm:$0xff]  }
 0x237   :  { %v2411_v29 = vsel %vm2380_vm1, %v2373_v25, 0.0  ;;  %v2343_v23 = vadd.f32 %v16201_v15, %v2300_v27  ;;  %v2303_v45 = vadd.f32 %v2271_v16, %v16491_v4  ;;  %v2345_v37 = vadd.f32 %v16201_v15, %v2302_v14  ;;  %8068 = vmatprep.mubr.bf16.mxu1 %v15799_v18  ;;  %v14752_v58 = vld [vmem:[#allocation5 + $0xecc] ss:$72 sps:$4 sm:$0xff]   ;;  %v14750_v25 = vld [vmem:[#allocation5 + $0xec8] ss:$72 sps:$4 sm:$0xff]  }
 0x238   :  { %v2492_v28 = vrot.slane %v2491_v19, 1  ;;  %v2501_v60 = vmax.f32 %v2371_v24, %v2411_v29  ;;  %v2412_v47 = vsel %vm2380_vm1, %v2374_v36, 0.0  ;;  %v2344_v31 = vadd.f32 %v16204_v21, %v2301_v0  ;;  %5063 = vmatpush1.bf16.msra.mxu0 %v14729_v38  ;;  %v14755_v7 = vld [vmem:[#allocation5 + $0xf54] ss:$72 sps:$4 sm:$0xff]   ;;  %v14753_v18 = vld [vmem:[#allocation5 + $0xf50] ss:$72 sps:$4 sm:$0xff]  }
 0x239   :  { %v2508_v52 = vmax.f32 %v2372_v32, %v2412_v47  ;;  %v2375_v11 = vmax.f32 %v2343_v23, 0.0  ;;  %v2346_v4 = vadd.f32 %v16204_v21, %v2303_v45  ;;  %v2377_v35 = vmax.f32 %v2345_v37, 0.0  ;;  %8124 = vmatpush1.bf16.msra.mxu1 %v14732_v51  ;;  %5064 = vmatprep.subr.bf16.mxu0 %v14737_v55  ;;  %v15800_v21 = vld [vmem:[#allocation2 + $0xc0] ss:$24 sps:$4 sm:$0xff]   ;;  %v14758_v36 = vld [vmem:[#allocation5 + $0xf5c] ss:$72 sps:$4 sm:$0xff]  }
 0x23a   :  { %v2493_v43 = vmax.f32 %v2491_v19, %v2492_v28  ;;  %v2502_v3 = vrot.slane %v2501_v60, 4  ;;  %v2486_v24 = vmax.f32 %v16521_v8, %v2485_v22  ;;  %v2376_v15 = vmax.f32 %v2344_v31, 0.0  ;;  %8125 = vmatprep.subr.bf16.mxu1 %v14740_v9  ;;  %v14749_v22 = vld [vmem:[#allocation5 + $0xec4] ss:$72 sps:$4 sm:$0xff]   ;;  %v15802_v23 = vld [vmem:[#allocation2 + $0xf0] ss:$24 sps:$4 sm:$0xff]  }
 0x23b   :  { %v2509_v54 = vrot.slane %v2508_v52, 4  ;;  %v2378_v17 = vmax.f32 %v2346_v4, 0.0  ;;  %v2498_v32 = vmax.f32 %v16528_v26, %v2497_v61  ;;  %v2415_v20 = vsel %vm2380_vm1, %v2377_v35, 0.0  ;;  %5008 = vmatmul.mubr.bf16.gmra.mrb[80].mxu0 %v15800_v21  ;;  %v14741_v26 = vld [vmem:[#allocation5 + $0xe30] ss:$72 sps:$4 sm:$0xff]  }
 0x23c   :  { %v2503_v62 = vmax.f32 %v2501_v60, %v2502_v3  ;;  %v9897_v39 = vsel %vm9884_vm3, %v16420_v50, %v9896_v41  ;;  %v9887_v10 = vsel %vm9886_vm4, %v16474_v53, %v16429_v1  ;;  %v2515_v12 = vmax.f32 %v2375_v11, %v2415_v20  ;;  %8069 = vmatmul.mubr.bf16.gmra.mrb[80].mxu1 %v15800_v21  ;;  %v14744_v50 = vld [vmem:[#allocation5 + $0xe38] ss:$72 sps:$4 sm:$0xff]   ;;  %v14761_v60 = vld [vmem:[#allocation5 + $0xfe4] ss:$72 sps:$4 sm:$0xff]   ;;  %v14762_v4 = vld [vmem:[#allocation5 + $0xfe8] ss:$72 sps:$4 sm:$0xff]  }
 0x23d   :  { %v2510_v8 = vmax.f32 %v2508_v52, %v2509_v54  ;;  %v2416_v46 = vsel %vm2380_vm1, %v2378_v17, 0.0  ;;  %5065 = vmatpush1.bf16.msra.mxu0 %v14735_v57  ;;  %v9898_v5 = vsel %vm9886_vm4, %v16488_v13, %v9897_v39  ;;  %8126 = vmatpush1.bf16.msra.mxu1 %v14738_v59  ;;  %v9889_v1 = vsel %vm9888_vm5, %v16519_v48, %v9887_v10  ;;  %v14747_v61 = vld [vmem:[#allocation5 + $0xec0] ss:$72 sps:$4 sm:$0xff]   ;;  %v15803_v59 = vld [vmem:[#allocation2 + $0x124] ss:$24 sps:$4 sm:$0xff]  }
 0x23e   :  { %v2504_v34 = vrot.slane %v2503_v62, 2  ;;  %v2522_v38 = vmax.f32 %v2376_v15, %v2416_v46  ;;  %5066 = vmatprep.subr.bf16.mxu0 %v14743_v63  ;;  %v9899_v41 = vsel %vm9888_vm5, %v2486_v24, %v9898_v5  ;;  %v2516_v53 = vrot.slane %v2515_v12, 4  ;;  %8127 = vmatprep.subr.bf16.mxu1 %v14746_v42  ;;  %v14756_v28 = vld [vmem:[#allocation5 + $0xf58] ss:$72 sps:$4 sm:$0xff]   ;;  %v14764_v52 = vld [vmem:[#allocation5 + $0xfec] ss:$72 sps:$4 sm:$0xff]  }
 0x23f   :  { %5017 = vmatprep.mubr.bf16.mxu0 %v15801_v49  ;;  %v9891_v56 = vsel %vm9890_vm6, %v2493_v43, %v9889_v1  ;;  %8078 = vmatprep.mubr.bf16.mxu1 %v15801_v49  ;;  %v2499_v27 = vrot.slane %v2498_v32, 1  ;;  %v2511_v40 = vrot.slane %v2510_v8, 2  ;;  %v14759_v63 = vld [vmem:[#allocation5 + $0xfe0] ss:$72 sps:$4 sm:$0xff]   ;;  %v14767_v42 = vld [vmem:[#allocation5 + $0x1074] ss:$72 sps:$4 sm:$0xff]  }
 0x240   :  { %v2505_v13 = vmax.f32 %v2503_v62, %v2504_v34  ;;  %v2523_v33 = vrot.slane %v2522_v38, 4  ;;  %v2517_v19 = vmax.f32 %v2515_v12, %v2516_v53  ;;  %v14770_v3 = vld [vmem:[#allocation5 + $0x107c] ss:$72 sps:$4 sm:$0xff]   ;;  %v15804_v17 = vld [vmem:[#allocation2 + $0x120] ss:$24 sps:$4 sm:$0xff]  }
 0x241   :  { %5067 = vmatpush1.bf16.msra.mxu0 %v14741_v26  ;;  %8128 = vmatpush1.bf16.msra.mxu1 %v14744_v50  ;;  %v2500_v16 = vmax.f32 %v2498_v32, %v2499_v27  ;;  %v2512_v51 = vmax.f32 %v2510_v8, %v2511_v40  ;;  %v14765_v32 = vld [vmem:[#allocation5 + $0x1070] ss:$72 sps:$4 sm:$0xff]   ;;  %v14773_v21 = vld [vmem:[#allocation5 + $0x1104] ss:$72 sps:$4 sm:$0xff]   ;;  %v14771_v10 = vld [vmem:[#allocation5 + $0x1100] ss:$72 sps:$4 sm:$0xff]  }
 0x242   :  { %v2506_v14 = vrot.slane %v2505_v13, 1  ;;  %v2524_v48 = vmax.f32 %v2522_v38, %v2523_v33  ;;  %5068 = vmatprep.subr.bf16.mxu0 %v14749_v22  ;;  %v2518_v55 = vrot.slane %v2517_v19, 2  ;;  %8129 = vmatprep.subr.bf16.mxu1 %v14752_v58  ;;  %v14768_v20 = vld [vmem:[#allocation5 + $0x1078] ss:$72 sps:$4 sm:$0xff]   ;;  %v15805_v39 = vld [vmem:[#allocation2 + $0x154] ss:$24 sps:$4 sm:$0xff]  }
 0x243   :  { %5018 = vmatmul.mubr.bf16.gmra.mrb[84].mxu0 %v15802_v23  ;;  %v9900_v0 = vsel %vm9890_vm6, %v2500_v16, %v9899_v41  ;;  %v2513_v57 = vrot.slane %v2512_v51, 1  ;;  %v14776_v8 = vld [vmem:[#allocation5 + $0x110c] ss:$72 sps:$4 sm:$0xff]   ;;  %v14774_v12 = vld [vmem:[#allocation5 + $0x1108] ss:$72 sps:$4 sm:$0xff]  }
 0x244   :  { %v2507_v29 = vmax.f32 %v2505_v13, %v2506_v14  ;;  %v2519_v45 = vmax.f32 %v2517_v19, %v2518_v55  ;;  %8079 = vmatmul.mubr.bf16.gmra.mrb[84].mxu1 %v15802_v23  ;;  %v2525_v9 = vrot.slane %v2524_v48, 2  ;;  %5027 = vmatprep.mubr.bf16.mxu0 %v15803_v59  ;;  %v14779_v46 = vld [vmem:[#allocation5 + $0x1194] ss:$72 sps:$4 sm:$0xff]   ;;  %v15806_v5 = vld [vmem:[#allocation2 + $0x150] ss:$24 sps:$4 sm:$0xff]  }
 0x245   :  { %5069 = vmatpush1.bf16.msra.mxu0 %v14747_v61  ;;  %8130 = vmatpush1.bf16.msra.mxu1 %v14750_v25  ;;  %v2514_v11 = vmax.f32 %v2512_v51, %v2513_v57  ;;  %v14782_v26 = vld [vmem:[#allocation5 + $0x119c] ss:$72 sps:$4 sm:$0xff]   ;;  %v14777_v34 = vld [vmem:[#allocation5 + $0x1190] ss:$72 sps:$4 sm:$0xff]   ;;  %v14783_v41 = vld [vmem:[#allocation5 + $0x1220] ss:$72 sps:$4 sm:$0xff]  }
 0x246   :  { %5070 = vmatprep.subr.bf16.mxu0 %v14755_v7  ;;  %v9893_v47 = vsel %vm9892_vm7, %v2507_v29, %v9891_v56  ;;  %v2520_v37 = vrot.slane %v2519_v45, 1  ;;  %8131 = vmatprep.subr.bf16.mxu1 %v14758_v36  ;;  %v2526_v31 = vmax.f32 %v2524_v48, %v2525_v9  ;;  %v14780_v38 = vld [vmem:[#allocation5 + $0x1198] ss:$72 sps:$4 sm:$0xff]   ;;  %v14785_v50 = vld [vmem:[#allocation5 + $0x1224] ss:$72 sps:$4 sm:$0xff]  }
 0x247   :  { %8088 = vmatprep.mubr.bf16.mxu1 %v15803_v59  ;;  %v9901_v24 = vsel %vm9892_vm7, %v2514_v11, %v9900_v0  ;;  %v15807_v22 = vld [vmem:[#allocation2 + $0xc] ss:$24 sps:$4 sm:$0xff]   ;;  %v14786_v53 = vld [vmem:[#allocation5 + $0x1228] ss:$72 sps:$4 sm:$0xff]   ;;  %v14791_v49 = vld [vmem:[#allocation5 + $0x12b4] ss:$72 sps:$4 sm:$0xff]  }
 0x248   :  { %v2521_v43 = vmax.f32 %v2519_v45, %v2520_v37  ;;  %v2527_v35 = vrot.slane %v2526_v31, 1  ;;  %v14788_v1 = vld [vmem:[#allocation5 + $0x122c] ss:$72 sps:$4 sm:$0xff]   ;;  %v14794_v61 = vld [vmem:[#allocation5 + $0x12bc] ss:$72 sps:$4 sm:$0xff]  }
 0x249   :  { %5071 = vmatpush1.bf16.msra.mxu0 %v14753_v18  ;;  %8132 = vmatpush1.bf16.msra.mxu1 %v14756_v28  ;;  %v15808_v58 = vld [vmem:[#allocation2 + $0x8] ss:$24 sps:$4 sm:$0xff]   ;;  %v14789_v56 = vld [vmem:[#allocation5 + $0x12b0] ss:$72 sps:$4 sm:$0xff]   ;;  %v14797_v33 = vld [vmem:[#allocation5 + $0x1344] ss:$72 sps:$4 sm:$0xff]  }
 0x24a   :  { %5072 = vmatprep.subr.bf16.mxu0 %v14761_v60  ;;  %8133 = vmatprep.subr.bf16.mxu1 %v14764_v52  ;;  %v2528_v54 = vmax.f32 %v2526_v31, %v2527_v35  ;;  %v16585_v15 = vsel %vm9894_vm8, %v2521_v43, %v9893_v47  ;;  %v14792_v13 = vld [vmem:[#allocation5 + $0x12b8] ss:$72 sps:$4 sm:$0xff]   ;;  %v15809_v25 = vld [vmem:[#allocation2 + $0x3c] ss:$24 sps:$4 sm:$0xff]   ;;  %v14798_v40 = vld [vmem:[#allocation5 + $0x1348] ss:$72 sps:$4 sm:$0xff]  }
 0x24b   :  { %5028 = vmatmul.mubr.bf16.gmra.mrb[88].mxu0 %v15804_v17  ;;  %v14795_v7 = vld [vmem:[#allocation5 + $0x1340] ss:$72 sps:$4 sm:$0xff]   ;;  %v14800_v27 = vld [vmem:[#allocation5 + $0x134c] ss:$72 sps:$4 sm:$0xff]   ;;  %v14806_v36 = vld [vmem:[#allocation5 + $0x13dc] ss:$72 sps:$4 sm:$0xff]  }
 0x24c   :  { %8089 = vmatmul.mubr.bf16.gmra.mrb[88].mxu1 %v15804_v17  ;;  %v16588_v62 = vsel %vm9894_vm8, %v2528_v54, %v9901_v24  ;;  %5037 = vmatprep.mubr.bf16.mxu0 %v15805_v39  ;;  %v14803_v19 = vld [vmem:[#allocation5 + $0x13d4] ss:$72 sps:$4 sm:$0xff]   ;;  %v15810_v14 = vld [vmem:[#allocation2 + $0x38] ss:$24 sps:$4 sm:$0xff]   ;;  %v14809_v51 = vld [vmem:[#allocation5 + $0x1464] ss:$72 sps:$4 sm:$0xff]  }
 0x24d   :  { %5073 = vmatpush1.bf16.msra.mxu0 %v14759_v63  ;;  %8134 = vmatpush1.bf16.msra.mxu1 %v14762_v4  ;;  %v14801_v48 = vld [vmem:[#allocation5 + $0x13d0] ss:$72 sps:$4 sm:$0xff]   ;;  %v15811_v55 = vld [vmem:[#allocation2 + $0x6c] ss:$24 sps:$4 sm:$0xff]   ;;  %v14807_v29 = vld [vmem:[#allocation5 + $0x1460] ss:$72 sps:$4 sm:$0xff]  }
 0x24e   :  { %5074 = vmatprep.subr.bf16.mxu0 %v14767_v42  ;;  %8135 = vmatprep.subr.bf16.mxu1 %v14770_v3  ;;  %v14804_v16 = vld [vmem:[#allocation5 + $0x13d8] ss:$72 sps:$4 sm:$0xff]   ;;  %v14812_v23 = vld [vmem:[#allocation5 + $0x146c] ss:$72 sps:$4 sm:$0xff]   ;;  %v14810_v0 = vld [vmem:[#allocation5 + $0x1468] ss:$72 sps:$4 sm:$0xff]  }
 0x24f   :  { %8098 = vmatprep.mubr.bf16.mxu1 %v15805_v39  ;;  %v14815_v45 = vld [vmem:[#allocation5 + $0x14f4] ss:$72 sps:$4 sm:$0xff]   ;;  %v15812_v57 = vld [vmem:[#allocation2 + $0x68] ss:$24 sps:$4 sm:$0xff]   ;;  %v14813_v9 = vld [vmem:[#allocation5 + $0x14f0] ss:$72 sps:$4 sm:$0xff]  }
 0x250   :  { %v14818_v18 = vld [vmem:[#allocation5 + $0x14fc] ss:$72 sps:$4 sm:$0xff]   ;;  %v14816_v28 = vld [vmem:[#allocation5 + $0x14f8] ss:$72 sps:$4 sm:$0xff]   ;;  %v14824_v59 = vld [vmem:[#allocation5 + $0x158c] ss:$72 sps:$4 sm:$0xff]  }
 0x251   :  { %5075 = vmatpush1.bf16.msra.mxu0 %v14765_v32  ;;  %8136 = vmatpush1.bf16.msra.mxu1 %v14768_v20  ;;  %v14821_v60 = vld [vmem:[#allocation5 + $0x1584] ss:$72 sps:$4 sm:$0xff]   ;;  %v15813_v47 = vld [vmem:[#allocation2 + $0x9c] ss:$24 sps:$4 sm:$0xff]   ;;  %v14819_v37 = vld [vmem:[#allocation5 + $0x1580] ss:$72 sps:$4 sm:$0xff]  }
 0x252   :  { %5076 = vmatprep.subr.bf16.mxu0 %v14773_v21  ;;  %8137 = vmatprep.subr.bf16.mxu1 %v14776_v8  ;;  %v14822_v63 = vld [vmem:[#allocation5 + $0x1588] ss:$72 sps:$4 sm:$0xff]   ;;  %v14827_v52 = vld [vmem:[#allocation5 + $0x1614] ss:$72 sps:$4 sm:$0xff]   ;;  %v14828_v42 = vld [vmem:[#allocation5 + $0x1618] ss:$72 sps:$4 sm:$0xff]  }
 0x253   :  { %5038 = vmatmul.mubr.bf16.gmra.mrb[92].mxu0 %v15806_v5  ;;  %v14830_v11 = vld [vmem:[#allocation5 + $0x161c] ss:$72 sps:$4 sm:$0xff]   ;;  %v15814_v31 = vld [vmem:[#allocation2 + $0x98] ss:$24 sps:$4 sm:$0xff]   ;;  %v14831_v35 = vld [vmem:[#allocation5 + $0x16a0] ss:$72 sps:$4 sm:$0xff]  }
 0x254   :  { %8099 = vmatmul.mubr.bf16.gmra.mrb[92].mxu1 %v15806_v5  ;;  %5080 = vmatprep.mubr.bf16.mxu0 %v15807_v22  ;;  %v14825_v4 = vld [vmem:[#allocation5 + $0x1610] ss:$72 sps:$4 sm:$0xff]   ;;  %v14833_v43 = vld [vmem:[#allocation5 + $0x16a4] ss:$72 sps:$4 sm:$0xff]   ;;  %v14839_v17 = vld [vmem:[#allocation5 + $0x1734] ss:$72 sps:$4 sm:$0xff]  }
 0x255   :  { %5077 = vmatpush1.bf16.msra.mxu0 %v14771_v10  ;;  %8138 = vmatpush1.bf16.msra.mxu1 %v14774_v12  ;;  %v15815_v3 = vld [vmem:[#allocation2 + $0xcc] ss:$24 sps:$4 sm:$0xff]   ;;  %v14834_v54 = vld [vmem:[#allocation5 + $0x16a8] ss:$72 sps:$4 sm:$0xff]   ;;  %v14840_v39 = vld [vmem:[#allocation5 + $0x1738] ss:$72 sps:$4 sm:$0xff]  }
 0x256   :  { %5078 = vmatprep.subr.bf16.mxu0 %v14779_v46  ;;  %8139 = vmatprep.subr.bf16.mxu1 %v14782_v26  ;;  %v14836_v24 = vld [vmem:[#allocation5 + $0x16ac] ss:$72 sps:$4 sm:$0xff]   ;;  %v14842_v32 = vld [vmem:[#allocation5 + $0x173c] ss:$72 sps:$4 sm:$0xff]   ;;  %v15816_v20 = vld [vmem:[#allocation2 + $0xc8] ss:$24 sps:$4 sm:$0xff]  }
 0x257   :  { %8141 = vmatprep.mubr.bf16.mxu1 %v15807_v22  ;;  %v14837_v21 = vld [vmem:[#allocation5 + $0x1730] ss:$72 sps:$4 sm:$0xff]   ;;  %v14845_v10 = vld [vmem:[#allocation5 + $0x17c4] ss:$72 sps:$4 sm:$0xff]   ;;  %v15817_v8 = vld [vmem:[#allocation2 + $0xfc] ss:$24 sps:$4 sm:$0xff]  }
 0x258   :  { %v14843_v12 = vld [vmem:[#allocation5 + $0x17c0] ss:$72 sps:$4 sm:$0xff]   ;;  %v14848_v46 = vld [vmem:[#allocation5 + $0x17cc] ss:$72 sps:$4 sm:$0xff]  }
 0x259   :  { %5079 = vmatpush1.bf16.msra.mxu0 %v14777_v34  ;;  %8140 = vmatpush1.bf16.msra.mxu1 %v14780_v38  ;;  %v14846_v26 = vld [vmem:[#allocation5 + $0x17c8] ss:$72 sps:$4 sm:$0xff]   ;;  %v14851_v5 = vld [vmem:[#allocation5 + $0x1854] ss:$72 sps:$4 sm:$0xff]   ;;  %v14852_v22 = vld [vmem:[#allocation5 + $0x1858] ss:$72 sps:$4 sm:$0xff]  }
 0x25a   :  { %5161 = vmatprep.subr.bf16.mxu0 %v14785_v50  ;;  %8222 = vmatprep.subr.bf16.mxu1 %v14788_v1  ;;  %v14854_v34 = vld [vmem:[#allocation5 + $0x185c] ss:$72 sps:$4 sm:$0xff]   ;;  %v15818_v38 = vld [vmem:[#allocation2 + $0xf8] ss:$24 sps:$4 sm:$0xff]  }
 0x25b   :  { %v14849_v50 = vld [vmem:[#allocation5 + $0x1850] ss:$72 sps:$4 sm:$0xff]   ;;  %v15819_v1 = vld [vmem:[#allocation2 + $0x12c] ss:$24 sps:$4 sm:$0xff]  }
 0x25c   :  { %5081 = vmatmul.mubr.bf16.vlgmr.msra.gmra.mrb[64].mxu0 %v15808_v58  ;;  %8142 = vmatmul.mubr.bf16.vlgmr.msra.gmra.mrb[64].mxu1 %v15808_v58  ;;  %v14863_v58 = vld [vmem:[#allocation5 + $0x1974] ss:$72 sps:$4 sm:$0xff]  }
 0x25d   :  { %5162 = vmatpush1.bf16.msra.mxu0 %v14783_v41  ;;  %8223 = vmatpush1.bf16.msra.mxu1 %v14786_v53  ;;  %v14857_v41 = vld [vmem:[#allocation5 + $0x18e4] ss:$72 sps:$4 sm:$0xff]   ;;  %v14855_v53 = vld [vmem:[#allocation5 + $0x18e0] ss:$72 sps:$4 sm:$0xff]  }
 0x25e   :  { %5163 = vmatprep.subr.bf16.mxu0 %v14791_v49  ;;  %8224 = vmatprep.subr.bf16.mxu1 %v14794_v61  ;;  %v14860_v49 = vld [vmem:[#allocation5 + $0x18ec] ss:$72 sps:$4 sm:$0xff]   ;;  %v14858_v61 = vld [vmem:[#allocation5 + $0x18e8] ss:$72 sps:$4 sm:$0xff]  }
 0x25f   :  { %5090 = vmatprep.mubr.bf16.mxu0 %v15809_v25  ;;  %8151 = vmatprep.mubr.bf16.mxu1 %v15809_v25  ;;  %v14864_v25 = vld [vmem:[#allocation5 + $0x1978] ss:$72 sps:$4 sm:$0xff]  }
 0x261   :  { %5164 = vmatpush1.bf16.msra.mxu0 %v14789_v56  ;;  %8225 = vmatpush1.bf16.msra.mxu1 %v14792_v13  ;;  %v14866_v56 = vld [vmem:[#allocation5 + $0x197c] ss:$72 sps:$4 sm:$0xff]   ;;  %v15820_v13 = vld [vmem:[#allocation2 + $0x128] ss:$24 sps:$4 sm:$0xff]  }
 0x262   :  { %5165 = vmatprep.subr.bf16.mxu0 %v14797_v33  ;;  %8226 = vmatprep.subr.bf16.mxu1 %v14800_v27  ;;  %v14861_v33 = vld [vmem:[#allocation5 + $0x1970] ss:$72 sps:$4 sm:$0xff]   ;;  %v15821_v27 = vld [vmem:[#allocation2 + $0x15c] ss:$24 sps:$4 sm:$0xff]  }
 0x264   :  { %5091 = vmatmul.mubr.bf16.gmra.mrb[68].mxu0 %v15810_v14  ;;  %8152 = vmatmul.mubr.bf16.gmra.mrb[68].mxu1 %v15810_v14  ;;  %v14875_v14 = vld [vmem:[#allocation5 + $0x1a94] ss:$72 sps:$4 sm:$0xff]  }
 0x265   :  { %5166 = vmatpush1.bf16.msra.mxu0 %v14795_v7  ;;  %8227 = vmatpush1.bf16.msra.mxu1 %v14798_v40  ;;  %v14869_v7 = vld [vmem:[#allocation5 + $0x1a04] ss:$72 sps:$4 sm:$0xff]   ;;  %v14867_v40 = vld [vmem:[#allocation5 + $0x1a00] ss:$72 sps:$4 sm:$0xff]  }
 0x266   :  { %5167 = vmatprep.subr.bf16.mxu0 %v14803_v19  ;;  %8228 = vmatprep.subr.bf16.mxu1 %v14806_v36  ;;  %v14872_v19 = vld [vmem:[#allocation5 + $0x1a0c] ss:$72 sps:$4 sm:$0xff]   ;;  %v14870_v36 = vld [vmem:[#allocation5 + $0x1a08] ss:$72 sps:$4 sm:$0xff]  }
 0x267   :  { %5100 = vmatprep.mubr.bf16.mxu0 %v15811_v55  ;;  %8161 = vmatprep.mubr.bf16.mxu1 %v15811_v55  ;;  %v14876_v55 = vld [vmem:[#allocation5 + $0x1a98] ss:$72 sps:$4 sm:$0xff]  }
 0x269   :  { %5168 = vmatpush1.bf16.msra.mxu0 %v14801_v48  ;;  %8229 = vmatpush1.bf16.msra.mxu1 %v14804_v16  ;;  %v14878_v48 = vld [vmem:[#allocation5 + $0x1a9c] ss:$72 sps:$4 sm:$0xff]   ;;  %v15822_v16 = vld [vmem:[#allocation2 + $0x158] ss:$24 sps:$4 sm:$0xff]  }
 0x26a   :  { %5169 = vmatprep.subr.bf16.mxu0 %v14809_v51  ;;  %8230 = vmatprep.subr.bf16.mxu1 %v14812_v23  ;;  %v14873_v51 = vld [vmem:[#allocation5 + $0x1a90] ss:$72 sps:$4 sm:$0xff]   ;;  %v15823_v23 = vld [vmem:[#allocation2 + $0x14] ss:$24 sps:$4 sm:$0xff]  }
 0x26c   :  { %5101 = vmatmul.mubr.bf16.gmra.mrb[72].mxu0 %v15812_v57  ;;  %8162 = vmatmul.mubr.bf16.gmra.mrb[72].mxu1 %v15812_v57  ;;  %v14887_v57 = vld [vmem:[#allocation5 + $0xc4] ss:$72 sps:$4 sm:$0xff]  }
 0x26d   :  { %5170 = vmatpush1.bf16.msra.mxu0 %v14807_v29  ;;  %8231 = vmatpush1.bf16.msra.mxu1 %v14810_v0  ;;  %v14881_v29 = vld [vmem:[#allocation5 + $0x34] ss:$72 sps:$4 sm:$0xff]   ;;  %v14879_v0 = vld [vmem:[#allocation5 + $0x30] ss:$72 sps:$4 sm:$0xff]  }
 0x26e   :  { %5171 = vmatprep.subr.bf16.mxu0 %v14815_v45  ;;  %8232 = vmatprep.subr.bf16.mxu1 %v14818_v18  ;;  %v14884_v45 = vld [vmem:[#allocation5 + $0x3c] ss:$72 sps:$4 sm:$0xff]   ;;  %v14882_v18 = vld [vmem:[#allocation5 + $0x38] ss:$72 sps:$4 sm:$0xff]  }
 0x26f   :  { %5110 = vmatprep.mubr.bf16.mxu0 %v15813_v47  ;;  %8171 = vmatprep.mubr.bf16.mxu1 %v15813_v47  ;;  %v14888_v47 = vld [vmem:[#allocation5 + $0xc8] ss:$72 sps:$4 sm:$0xff]  }
 0x271   :  { %5172 = vmatpush1.bf16.msra.mxu0 %v14813_v9  ;;  %8233 = vmatpush1.bf16.msra.mxu1 %v14816_v28  ;;  %v14890_v9 = vld [vmem:[#allocation5 + $0xcc] ss:$72 sps:$4 sm:$0xff]   ;;  %v15824_v28 = vld [vmem:[#allocation2 + $0x10] ss:$24 sps:$4 sm:$0xff]  }
 0x272   :  { %5173 = vmatprep.subr.bf16.mxu0 %v14821_v60  ;;  %8234 = vmatprep.subr.bf16.mxu1 %v14824_v59  ;;  %v14885_v60 = vld [vmem:[#allocation5 + $0xc0] ss:$72 sps:$4 sm:$0xff]   ;;  %v15825_v59 = vld [vmem:[#allocation2 + $0x44] ss:$24 sps:$4 sm:$0xff]  }
 0x274   :  { %5111 = vmatmul.mubr.bf16.gmra.mrb[76].mxu0 %v15814_v31  ;;  %8172 = vmatmul.mubr.bf16.gmra.mrb[76].mxu1 %v15814_v31  ;;  %v14899_v31 = vld [vmem:[#allocation5 + $0x1e4] ss:$72 sps:$4 sm:$0xff]  }
 0x275   :  { %5174 = vmatpush1.bf16.msra.mxu0 %v14819_v37  ;;  %8235 = vmatpush1.bf16.msra.mxu1 %v14822_v63  ;;  %v14893_v37 = vld [vmem:[#allocation5 + $0x154] ss:$72 sps:$4 sm:$0xff]   ;;  %v14891_v63 = vld [vmem:[#allocation5 + $0x150] ss:$72 sps:$4 sm:$0xff]  }
 0x276   :  { %5175 = vmatprep.subr.bf16.mxu0 %v14827_v52  ;;  %8236 = vmatprep.subr.bf16.mxu1 %v14830_v11  ;;  %v14896_v52 = vld [vmem:[#allocation5 + $0x15c] ss:$72 sps:$4 sm:$0xff]   ;;  %v14894_v11 = vld [vmem:[#allocation5 + $0x158] ss:$72 sps:$4 sm:$0xff]  }
 0x277   :  { %5120 = vmatprep.mubr.bf16.mxu0 %v15815_v3  ;;  %8181 = vmatprep.mubr.bf16.mxu1 %v15815_v3  ;;  %v14900_v3 = vld [vmem:[#allocation5 + $0x1e8] ss:$72 sps:$4 sm:$0xff]  }
 0x279   :  { %5176 = vmatpush1.bf16.msra.mxu0 %v14825_v4  ;;  %8237 = vmatpush1.bf16.msra.mxu1 %v14828_v42  ;;  %v14902_v4 = vld [vmem:[#allocation5 + $0x1ec] ss:$72 sps:$4 sm:$0xff]   ;;  %v15826_v42 = vld [vmem:[#allocation2 + $0x40] ss:$24 sps:$4 sm:$0xff]  }
 0x27a   :  { %5177 = vmatprep.subr.bf16.mxu0 %v14833_v43  ;;  %8238 = vmatprep.subr.bf16.mxu1 %v14836_v24  ;;  %v14897_v43 = vld [vmem:[#allocation5 + $0x1e0] ss:$72 sps:$4 sm:$0xff]   ;;  %v15827_v24 = vld [vmem:[#allocation2 + $0x74] ss:$24 sps:$4 sm:$0xff]  }
 0x27c   :  { %5121 = vmatmul.mubr.bf16.gmra.mrb[80].mxu0 %v15816_v20  ;;  %8182 = vmatmul.mubr.bf16.gmra.mrb[80].mxu1 %v15816_v20  ;;  %v14911_v20 = vld [vmem:[#allocation5 + $0x304] ss:$72 sps:$4 sm:$0xff]  }
 0x27d   :  { %5178 = vmatpush1.bf16.msra.mxu0 %v14831_v35  ;;  %8239 = vmatpush1.bf16.msra.mxu1 %v14834_v54  ;;  %v14905_v35 = vld [vmem:[#allocation5 + $0x274] ss:$72 sps:$4 sm:$0xff]   ;;  %v14903_v54 = vld [vmem:[#allocation5 + $0x270] ss:$72 sps:$4 sm:$0xff]  }
 0x27e   :  { %5179 = vmatprep.subr.bf16.mxu0 %v14839_v17  ;;  %8240 = vmatprep.subr.bf16.mxu1 %v14842_v32  ;;  %v14908_v17 = vld [vmem:[#allocation5 + $0x27c] ss:$72 sps:$4 sm:$0xff]   ;;  %v14906_v32 = vld [vmem:[#allocation5 + $0x278] ss:$72 sps:$4 sm:$0xff]  }
 0x27f   :  { %5130 = vmatprep.mubr.bf16.mxu0 %v15817_v8  ;;  %8191 = vmatprep.mubr.bf16.mxu1 %v15817_v8  ;;  %v14912_v8 = vld [vmem:[#allocation5 + $0x308] ss:$72 sps:$4 sm:$0xff]  }
 0x281   :  { %5180 = vmatpush1.bf16.msra.mxu0 %v14837_v21  ;;  %8241 = vmatpush1.bf16.msra.mxu1 %v14840_v39  ;;  %v14914_v21 = vld [vmem:[#allocation5 + $0x30c] ss:$72 sps:$4 sm:$0xff]   ;;  %v15828_v39 = vld [vmem:[#allocation2 + $0x70] ss:$24 sps:$4 sm:$0xff]  }
 0x282   :  { %5181 = vmatprep.subr.bf16.mxu0 %v14845_v10  ;;  %8242 = vmatprep.subr.bf16.mxu1 %v14848_v46  ;;  %v14909_v10 = vld [vmem:[#allocation5 + $0x300] ss:$72 sps:$4 sm:$0xff]  }
 0x284   :  { %5131 = vmatmul.mubr.bf16.gmra.mrb[84].mxu0 %v15818_v38  ;;  %8192 = vmatmul.mubr.bf16.gmra.mrb[84].mxu1 %v15818_v38  ;;  %v14920_v38 = vld [vmem:[#allocation5 + $0x39c] ss:$72 sps:$4 sm:$0xff]  }
 0x285   :  { %5182 = vmatpush1.bf16.msra.mxu0 %v14843_v12  ;;  %8243 = vmatpush1.bf16.msra.mxu1 %v14846_v26  ;;  %v14917_v12 = vld [vmem:[#allocation5 + $0x394] ss:$72 sps:$4 sm:$0xff]  }
 0x286   :  { %5183 = vmatprep.subr.bf16.mxu0 %v14851_v5  ;;  %8244 = vmatprep.subr.bf16.mxu1 %v14854_v34  ;;  %v15829_v5 = vld [vmem:[#allocation2 + $0xa4] ss:$24 sps:$4 sm:$0xff]   ;;  %v14915_v34 = vld [vmem:[#allocation5 + $0x390] ss:$72 sps:$4 sm:$0xff]  }
 0x287   :  { %5140 = vmatprep.mubr.bf16.mxu0 %v15819_v1  ;;  %8201 = vmatprep.mubr.bf16.mxu1 %v15819_v1  ;;  %v14918_v1 = vld [vmem:[#allocation5 + $0x398] ss:$72 sps:$4 sm:$0xff]  }
 0x289   :  { %5184 = vmatpush1.bf16.msra.mxu0 %v14849_v50  ;;  %8245 = vmatpush1.bf16.msra.mxu1 %v14852_v22 }
 0x28a   :  { %5185 = vmatprep.subr.bf16.mxu0 %v14857_v41  ;;  %8246 = vmatprep.subr.bf16.mxu1 %v14860_v49 }
 0x28c   :  { %5141 = vmatmul.mubr.bf16.gmra.mrb[88].mxu0 %v15820_v13  ;;  %8202 = vmatmul.mubr.bf16.gmra.mrb[88].mxu1 %v15820_v13 }
 0x28d   :  { %5186 = vmatpush1.bf16.msra.mxu0 %v14855_v53  ;;  %8247 = vmatpush1.bf16.msra.mxu1 %v14858_v61  ;;  %v14923_v53 = vld [vmem:[#allocation5 + $0x424] ss:$72 sps:$4 sm:$0xff]  }
 0x28e   :  { %5187 = vmatprep.subr.bf16.mxu0 %v14863_v58  ;;  %8248 = vmatprep.subr.bf16.mxu1 %v14866_v56  ;;  %v14926_v56 = vld [vmem:[#allocation5 + $0x42c] ss:$72 sps:$4 sm:$0xff]  }
 0x28f   :  { %5150 = vmatprep.mubr.bf16.mxu0 %v15821_v27  ;;  %8211 = vmatprep.mubr.bf16.mxu1 %v15821_v27 }
 0x291   :  { %5188 = vmatpush1.bf16.msra.mxu0 %v14861_v33  ;;  %8249 = vmatpush1.bf16.msra.mxu1 %v14864_v25 }
 0x292   :  { %5189 = vmatprep.subr.bf16.mxu0 %v14869_v7  ;;  %8250 = vmatprep.subr.bf16.mxu1 %v14872_v19 }
 0x294   :  { %5151 = vmatmul.mubr.bf16.gmra.mrb[92].mxu0 %v15822_v16  ;;  %8212 = vmatmul.mubr.bf16.gmra.mrb[92].mxu1 %v15822_v16  ;;  %v14924_v16 = vld [vmem:[#allocation5 + $0x428] ss:$72 sps:$4 sm:$0xff]  }
 0x295   :  { %5190 = vmatpush1.bf16.msra.mxu0 %v14867_v40  ;;  %8251 = vmatpush1.bf16.msra.mxu1 %v14870_v36  ;;  %v15830_v40 = vld [vmem:[#allocation2 + $0xa0] ss:$24 sps:$4 sm:$0xff]  }
 0x296   :  { %5191 = vmatprep.subr.bf16.mxu0 %v14875_v14  ;;  %8252 = vmatprep.subr.bf16.mxu1 %v14878_v48  ;;  %v14921_v14 = vld [vmem:[#allocation5 + $0x420] ss:$72 sps:$4 sm:$0xff]  }
 0x297   :  { %5193 = vmatprep.mubr.bf16.mxu0 %v15823_v23  ;;  %8254 = vmatprep.mubr.bf16.mxu1 %v15823_v23  ;;  %v15831_v23 = vld [vmem:[#allocation2 + $0xd4] ss:$24 sps:$4 sm:$0xff]  }
 0x299   :  { %5192 = vmatpush1.bf16.msra.mxu0 %v14873_v51  ;;  %8253 = vmatpush1.bf16.msra.mxu1 %v14876_v55  ;;  %v14929_v51 = vld [vmem:[#allocation5 + $0x4b4] ss:$72 sps:$4 sm:$0xff]  }
 0x29a   :  { %8335 = vmatprep.subr.bf16.mxu0 %v14881_v29  ;;  %8674 = vmatprep.subr.bf16.mxu1 %v14884_v45  ;;  %v14932_v45 = vld [vmem:[#allocation5 + $0x4bc] ss:$72 sps:$4 sm:$0xff]  }
 0x29c   :  { %5194 = vmatmul.mubr.bf16.vlgmr.msra.gmra.mrb[64].mxu0 %v15824_v28  ;;  %8255 = vmatmul.mubr.bf16.vlgmr.msra.gmra.mrb[64].mxu1 %v15824_v28  ;;  %v14930_v28 = vld [vmem:[#allocation5 + $0x4b8] ss:$72 sps:$4 sm:$0xff]  }
 0x29d   :  { %8336 = vmatpush1.bf16.msra.mxu0 %v14879_v0  ;;  %8675 = vmatpush1.bf16.msra.mxu1 %v14882_v18  ;;  %v14927_v0 = vld [vmem:[#allocation5 + $0x4b0] ss:$72 sps:$4 sm:$0xff]  }
 0x29e   :  { %8337 = vmatprep.subr.bf16.mxu0 %v14887_v57  ;;  %8676 = vmatprep.subr.bf16.mxu1 %v14890_v9 }
 0x29f   :  { %5203 = vmatprep.mubr.bf16.mxu0 %v15825_v59  ;;  %8264 = vmatprep.mubr.bf16.mxu1 %v15825_v59 }
 0x2a1   :  { %8338 = vmatpush1.bf16.msra.mxu0 %v14885_v60  ;;  %8677 = vmatpush1.bf16.msra.mxu1 %v14888_v47  ;;  %v14935_v60 = vld [vmem:[#allocation5 + $0x544] ss:$72 sps:$4 sm:$0xff]  }
 0x2a2   :  { %8339 = vmatprep.subr.bf16.mxu0 %v14893_v37  ;;  %8678 = vmatprep.subr.bf16.mxu1 %v14896_v52 }
 0x2a4   :  { %5204 = vmatmul.mubr.bf16.gmra.mrb[68].mxu0 %v15826_v42  ;;  %8265 = vmatmul.mubr.bf16.gmra.mrb[68].mxu1 %v15826_v42 }
 0x2a5   :  { %8340 = vmatpush1.bf16.msra.mxu0 %v14891_v63  ;;  %8679 = vmatpush1.bf16.msra.mxu1 %v14894_v11  ;;  %v14938_v63 = vld [vmem:[#allocation5 + $0x54c] ss:$72 sps:$4 sm:$0xff]  }
 0x2a6   :  { %8341 = vmatprep.subr.bf16.mxu0 %v14899_v31  ;;  %8680 = vmatprep.subr.bf16.mxu1 %v14902_v4 }
 0x2a7   :  { %5213 = vmatprep.mubr.bf16.mxu0 %v15827_v24  ;;  %8274 = vmatprep.mubr.bf16.mxu1 %v15827_v24 }
 0x2a9   :  { %8342 = vmatpush1.bf16.msra.mxu0 %v14897_v43  ;;  %8681 = vmatpush1.bf16.msra.mxu1 %v14900_v3 }
 0x2aa   :  { %8343 = vmatprep.subr.bf16.mxu0 %v14905_v35  ;;  %8682 = vmatprep.subr.bf16.mxu1 %v14908_v17 }
 0x2ac   :  { %5214 = vmatmul.mubr.bf16.gmra.mrb[72].mxu0 %v15828_v39  ;;  %8275 = vmatmul.mubr.bf16.gmra.mrb[72].mxu1 %v15828_v39  ;;  %v14936_v39 = vld [vmem:[#allocation5 + $0x548] ss:$72 sps:$4 sm:$0xff]  }
 0x2ad   :  { %8344 = vmatpush1.bf16.msra.mxu0 %v14903_v54  ;;  %8683 = vmatpush1.bf16.msra.mxu1 %v14906_v32  ;;  %v15832_v54 = vld [vmem:[#allocation2 + $0xd0] ss:$24 sps:$4 sm:$0xff]  }
 0x2ae   :  { %8345 = vmatprep.subr.bf16.mxu0 %v14911_v20  ;;  %v4517_v46 = vpop.f32.mrb[32].mxu0  ;;  %8684 = vmatprep.subr.bf16.mxu1 %v14914_v21  ;;  %v14933_v20 = vld [vmem:[#allocation5 + $0x540] ss:$72 sps:$4 sm:$0xff]  }
 0x2af   :  { %v16590_v26 = vpop.f32.mrb[32].mxu1  ;;  %5223 = vmatprep.mubr.bf16.mxu0 %v15829_v5  ;;  %v4519_v22 = vpop.f32.mrb[33].mxu0  ;;  %8284 = vmatprep.mubr.bf16.mxu1 %v15829_v5  ;;  %v14939_v5 = vld [vmem:[#allocation5 + $0x5d0] ss:$72 sps:$4 sm:$0xff]  }
 0x2b0   :  { %v5274_v50 = vrot.slane %v16590_v26, 1  ;;  %v16593_v41 = vpop.f32.mrb[33].mxu1  ;;  %v4521_v61 = vpop.f32.mrb[34].mxu0  ;;  %v15008_v26 = vld [vmem:[#allocation5 + $0xc08] ss:$72 sps:$4 sm:$0xff]  }
 0x2b1   :  { %v5275_v49 = vrot.slane %v16593_v41, 1  ;;  %v4860_v58 = vpop.f32.mrb[34].mxu1  ;;  %8346 = vmatpush1.bf16.msra.mxu0 %v14909_v10  ;;  %8685 = vmatpush1.bf16.msra.mxu1 %v14912_v8  ;;  %v4523_v33 = vpop.f32.mrb[35].mxu0  ;;  %v14941_v10 = vld [vmem:[#allocation5 + $0x5d4] ss:$72 sps:$4 sm:$0xff]  }
 0x2b2   :  { %v5276_v13 = vrot.slane %v4860_v58, 1  ;;  %v4862_v25 = vpop.f32.mrb[35].mxu1  ;;  %8347 = vmatprep.subr.bf16.mxu0 %v14917_v12  ;;  %8686 = vmatprep.subr.bf16.mxu1 %v14920_v38  ;;  %v15011_v41 = vld [vmem:[#allocation5 + $0xc90] ss:$72 sps:$4 sm:$0xff]  }
 0x2b3   :  { %v5277_v7 = vrot.slane %v4862_v25, 1 }
 0x2b4   :  { %v5334_v27 = vsel %vm2239_vm0, %v5274_v50, %v5276_v13  ;;  %5224 = vmatmul.mubr.bf16.gmra.mrb[76].mxu0 %v15830_v40  ;;  %8285 = vmatmul.mubr.bf16.gmra.mrb[76].mxu1 %v15830_v40 }
 0x2b5   :  { %v16600_v19 = vadd.f32 %v5334_v27, %v4517_v46  ;;  %v5335_v36 = vsel %vm2239_vm0, %v5275_v49, %v5277_v7  ;;  %8348 = vmatpush1.bf16.msra.mxu0 %v14915_v34  ;;  %8687 = vmatpush1.bf16.msra.mxu1 %v14918_v1  ;;  %v15833_v46 = vld [vmem:[#allocation2 + $0x104] ss:$24 sps:$4 sm:$0xff]  }
 0x2b6   :  { %v16606_v48 = vadd.f32 %v5335_v36, %v4519_v22  ;;  %8349 = vmatprep.subr.bf16.mxu0 %v14923_v53  ;;  %v4527_v55 = vpop.f32.mrb[36].mxu0  ;;  %8688 = vmatprep.subr.bf16.mxu1 %v14926_v56  ;;  %v14944_v34 = vld [vmem:[#allocation5 + $0x5dc] ss:$72 sps:$4 sm:$0xff]   ;;  %v14942_v53 = vld [vmem:[#allocation5 + $0x5d8] ss:$72 sps:$4 sm:$0xff]  }
 0x2b7   :  { %v4866_v29 = vpop.f32.mrb[36].mxu1  ;;  %5233 = vmatprep.mubr.bf16.mxu0 %v15831_v23  ;;  %v4529_v57 = vpop.f32.mrb[37].mxu0  ;;  %8294 = vmatprep.mubr.bf16.mxu1 %v15831_v23 }
 0x2b8   :  { %v5278_v18 = vrot.slane %v4866_v29, 1  ;;  %v4868_v9 = vpop.f32.mrb[37].mxu1  ;;  %v4531_v37 = vpop.f32.mrb[38].mxu0  ;;  %v15834_v29 = vld [vmem:[#allocation2 + $0x100] ss:$24 sps:$4 sm:$0xff]  }
 0x2b9   :  { %v5279_v47 = vrot.slane %v4868_v9, 1  ;;  %v4870_v59 = vpop.f32.mrb[38].mxu1  ;;  %8350 = vmatpush1.bf16.msra.mxu0 %v14921_v14  ;;  %8689 = vmatpush1.bf16.msra.mxu1 %v14924_v16  ;;  %v4533_v31 = vpop.f32.mrb[39].mxu0  ;;  %v14953_v9 = vld [vmem:[#allocation5 + $0x6f4] ss:$72 sps:$4 sm:$0xff]  }
 0x2ba   :  { %v5332_v52 = vsel %vm2239_vm0, %v5276_v13, %v5278_v18  ;;  %v5280_v11 = vrot.slane %v4870_v59, 1  ;;  %v4872_v4 = vpop.f32.mrb[39].mxu1  ;;  %8351 = vmatprep.subr.bf16.mxu0 %v14929_v51  ;;  %8690 = vmatprep.subr.bf16.mxu1 %v14932_v45  ;;  %v14945_v45 = vld [vmem:[#allocation5 + $0x660] ss:$72 sps:$4 sm:$0xff]   ;;  %v14956_v59 = vld [vmem:[#allocation5 + $0x6fc] ss:$72 sps:$4 sm:$0xff]  }
 0x2bb   :  { %v16610_v42 = vadd.f32 %v5332_v52, %v4521_v61  ;;  %v5333_v43 = vsel %vm2239_vm0, %v5277_v7, %v5279_v47  ;;  %v5281_v3 = vrot.slane %v4872_v4, 1  ;;  %v14947_v61 = vld [vmem:[#allocation5 + $0x664] ss:$72 sps:$4 sm:$0xff]  }
 0x2bc   :  { %v16614_v35 = vadd.f32 %v5333_v43, %v4523_v33  ;;  %v5330_v24 = vsel %vm2239_vm0, %v5278_v18, %v5280_v11  ;;  %5234 = vmatmul.mubr.bf16.gmra.mrb[80].mxu0 %v15832_v54  ;;  %8295 = vmatmul.mubr.bf16.gmra.mrb[80].mxu1 %v15832_v54  ;;  %v14950_v33 = vld [vmem:[#allocation5 + $0x66c] ss:$72 sps:$4 sm:$0xff]  }
 0x2bd   :  { %v16618_v17 = vadd.f32 %v5330_v24, %v4527_v55  ;;  %v5331_v32 = vsel %vm2239_vm0, %v5279_v47, %v5281_v3  ;;  %8352 = vmatpush1.bf16.msra.mxu0 %v14927_v0  ;;  %8691 = vmatpush1.bf16.msra.mxu1 %v14930_v28  ;;  %v15835_v47 = vld [vmem:[#allocation2 + $0x134] ss:$24 sps:$4 sm:$0xff]  }
 0x2be   :  { %v16622_v21 = vadd.f32 %v5331_v32, %v4529_v57  ;;  %8353 = vmatprep.subr.bf16.mxu0 %v14935_v60  ;;  %v4537_v8 = vpop.f32.mrb[40].mxu0  ;;  %8692 = vmatprep.subr.bf16.mxu1 %v14938_v63  ;;  %v14948_v57 = vld [vmem:[#allocation5 + $0x668] ss:$72 sps:$4 sm:$0xff]   ;;  %v14959_v4 = vld [vmem:[#allocation5 + $0x784] ss:$72 sps:$4 sm:$0xff]  }
 0x2bf   :  { %v4876_v12 = vpop.f32.mrb[40].mxu1  ;;  %5243 = vmatprep.mubr.bf16.mxu0 %v15833_v46  ;;  %v4539_v22 = vpop.f32.mrb[41].mxu0  ;;  %8304 = vmatprep.mubr.bf16.mxu1 %v15833_v46  ;;  %v14962_v54 = vld [vmem:[#allocation5 + $0x78c] ss:$72 sps:$4 sm:$0xff]  }
 0x2c0   :  { %v5282_v38 = vrot.slane %v4876_v12, 1  ;;  %v4878_v1 = vpop.f32.mrb[41].mxu1  ;;  %v4541_v56 = vpop.f32.mrb[42].mxu0 }
 0x2c1   :  { %v5283_v58 = vrot.slane %v4878_v1, 1  ;;  %v4880_v13 = vpop.f32.mrb[42].mxu1  ;;  %8354 = vmatpush1.bf16.msra.mxu0 %v14933_v20  ;;  %8693 = vmatpush1.bf16.msra.mxu1 %v14936_v39  ;;  %v4543_v27 = vpop.f32.mrb[43].mxu0 }
 0x2c2   :  { %v5328_v25 = vsel %vm2239_vm0, %v5280_v11, %v5282_v38  ;;  %v5284_v7 = vrot.slane %v4880_v13, 1  ;;  %v4882_v40 = vpop.f32.mrb[43].mxu1  ;;  %8355 = vmatprep.subr.bf16.mxu0 %v14941_v10  ;;  %8694 = vmatprep.subr.bf16.mxu1 %v14944_v34 }
 0x2c3   :  { %v16626_v36 = vadd.f32 %v5328_v25, %v4531_v37  ;;  %v5329_v14 = vsel %vm2239_vm0, %v5281_v3, %v5283_v58  ;;  %v5285_v16 = vrot.slane %v4882_v40, 1  ;;  %v14951_v37 = vld [vmem:[#allocation5 + $0x6f0] ss:$72 sps:$4 sm:$0xff]   ;;  %v15837_v25 = vld [vmem:[#allocation2 + $0x164] ss:$24 sps:$4 sm:$0xff]  }
 0x2c4   :  { %v16630_v51 = vadd.f32 %v5329_v14, %v4533_v31  ;;  %v5326_v55 = vsel %vm2239_vm0, %v5282_v38, %v5284_v7  ;;  %5244 = vmatmul.mubr.bf16.gmra.mrb[84].mxu0 %v15834_v29  ;;  %8305 = vmatmul.mubr.bf16.gmra.mrb[84].mxu1 %v15834_v29  ;;  %v14954_v31 = vld [vmem:[#allocation5 + $0x6f8] ss:$72 sps:$4 sm:$0xff]   ;;  %v15836_v38 = vld [vmem:[#allocation2 + $0x130] ss:$24 sps:$4 sm:$0xff]   ;;  %v14971_v29 = vld [vmem:[#allocation5 + $0x8a4] ss:$72 sps:$4 sm:$0xff]  }
 0x2c5   :  { %v16634_v23 = vadd.f32 %v5326_v55, %v4537_v8  ;;  %v5327_v0 = vsel %vm2239_vm0, %v5283_v58, %v5285_v16  ;;  %8356 = vmatpush1.bf16.msra.mxu0 %v14939_v5  ;;  %8695 = vmatpush1.bf16.msra.mxu1 %v14942_v53  ;;  %v14957_v53 = vld [vmem:[#allocation5 + $0x780] ss:$72 sps:$4 sm:$0xff]  }
 0x2c6   :  { %v16638_v18 = vadd.f32 %v5327_v0, %v4539_v22  ;;  %8357 = vmatprep.subr.bf16.mxu0 %v14947_v61  ;;  %v4547_v28 = vpop.f32.mrb[44].mxu0  ;;  %8696 = vmatprep.subr.bf16.mxu1 %v14950_v33  ;;  %v14960_v58 = vld [vmem:[#allocation5 + $0x788] ss:$72 sps:$4 sm:$0xff]   ;;  %v14966_v55 = vld [vmem:[#allocation5 + $0x818] ss:$72 sps:$4 sm:$0xff]  }
 0x2c7   :  { %v4886_v60 = vpop.f32.mrb[44].mxu1  ;;  %5253 = vmatprep.mubr.bf16.mxu0 %v15835_v47  ;;  %v4549_v52 = vpop.f32.mrb[45].mxu0  ;;  %8314 = vmatprep.mubr.bf16.mxu1 %v15835_v47 }
 0x2c8   :  { %v5286_v63 = vrot.slane %v4886_v60, 1  ;;  %v4888_v11 = vpop.f32.mrb[45].mxu1  ;;  %v4551_v3 = vpop.f32.mrb[46].mxu0 }
 0x2c9   :  { %v5287_v43 = vrot.slane %v4888_v11, 1  ;;  %v4890_v24 = vpop.f32.mrb[46].mxu1  ;;  %8358 = vmatpush1.bf16.msra.mxu0 %v14945_v45  ;;  %8697 = vmatpush1.bf16.msra.mxu1 %v14948_v57  ;;  %v4553_v39 = vpop.f32.mrb[47].mxu0 }
 0x2ca   :  { %v5324_v32 = vsel %vm2239_vm0, %v5284_v7, %v5286_v63  ;;  %v5288_v20 = vrot.slane %v4890_v24, 1  ;;  %v4892_v10 = vpop.f32.mrb[47].mxu1  ;;  %8359 = vmatprep.subr.bf16.mxu0 %v14953_v9  ;;  %8698 = vmatprep.subr.bf16.mxu1 %v14956_v59  ;;  %v14963_v7 = vld [vmem:[#allocation5 + $0x810] ss:$72 sps:$4 sm:$0xff]   ;;  %v14974_v9 = vld [vmem:[#allocation5 + $0x8ac] ss:$72 sps:$4 sm:$0xff]  }
 0x2cb   :  { %v16642_v8 = vadd.f32 %v5324_v32, %v4541_v56  ;;  %v5325_v12 = vsel %vm2239_vm0, %v5285_v16, %v5287_v43  ;;  %v5289_v46 = vrot.slane %v4892_v10, 1  ;;  %v14965_v56 = vld [vmem:[#allocation5 + $0x814] ss:$72 sps:$4 sm:$0xff]   ;;  %v14972_v32 = vld [vmem:[#allocation5 + $0x8a8] ss:$72 sps:$4 sm:$0xff]  }
 0x2cc   :  { %v16646_v5 = vadd.f32 %v5325_v12, %v4543_v27  ;;  %v5322_v34 = vsel %vm2239_vm0, %v5286_v63, %v5288_v20  ;;  %5254 = vmatmul.mubr.bf16.gmra.mrb[88].mxu0 %v15836_v38  ;;  %8315 = vmatmul.mubr.bf16.gmra.mrb[88].mxu1 %v15836_v38  ;;  %v14968_v27 = vld [vmem:[#allocation5 + $0x81c] ss:$72 sps:$4 sm:$0xff]  }
 0x2cd   :  { %v16650_v22 = vadd.f32 %v5322_v34, %v4547_v28  ;;  %v5323_v1 = vsel %vm2239_vm0, %v5287_v43, %v5289_v46  ;;  %8360 = vmatpush1.bf16.msra.mxu0 %v14951_v37  ;;  %8699 = vmatpush1.bf16.msra.mxu1 %v14954_v31  ;;  %v15839_v12 = vld [vmem:[#allocation2 + $0x4] ss:$24 sps:$4 sm:$0xff]  }
 0x2ce   :  { %v16654_v61 = vadd.f32 %v5323_v1, %v4549_v52  ;;  %8361 = vmatprep.subr.bf16.mxu0 %v14959_v4  ;;  %v4557_v13 = vpop.f32.mrb[48].mxu0  ;;  %8700 = vmatprep.subr.bf16.mxu1 %v14962_v54  ;;  %v15838_v4 = vld [vmem:[#allocation2 + $0x160] ss:$24 sps:$4 sm:$0xff]   ;;  %v14980_v34 = vld [vmem:[#allocation5 + $0x93c] ss:$72 sps:$4 sm:$0xff]  }
 0x2cf   :  { %v4896_v33 = vpop.f32.mrb[48].mxu1  ;;  %5263 = vmatprep.mubr.bf16.mxu0 %v15837_v25  ;;  %v4559_v14 = vpop.f32.mrb[49].mxu0  ;;  %8324 = vmatprep.mubr.bf16.mxu1 %v15837_v25 }
 0x2d0   :  { %v5290_v40 = vrot.slane %v4896_v33, 1  ;;  %v4898_v16 = vpop.f32.mrb[49].mxu1  ;;  %v4561_v45 = vpop.f32.mrb[50].mxu0 }
 0x2d1   :  { %v5291_v0 = vrot.slane %v4898_v16, 1  ;;  %v4900_v57 = vpop.f32.mrb[50].mxu1  ;;  %8362 = vmatpush1.bf16.msra.mxu0 %v14957_v53  ;;  %8701 = vmatpush1.bf16.msra.mxu1 %v14960_v58  ;;  %v4563_v47 = vpop.f32.mrb[51].mxu0  ;;  %v14978_v58 = vld [vmem:[#allocation5 + $0x938] ss:$72 sps:$4 sm:$0xff]  }
 0x2d2   :  { %v5320_v28 = vsel %vm2239_vm0, %v5288_v20, %v5290_v40  ;;  %v5292_v60 = vrot.slane %v4900_v57, 1  ;;  %v4902_v37 = vpop.f32.mrb[51].mxu1  ;;  %8363 = vmatprep.subr.bf16.mxu0 %v14965_v56  ;;  %8702 = vmatprep.subr.bf16.mxu1 %v14968_v27  ;;  %v14977_v20 = vld [vmem:[#allocation5 + $0x934] ss:$72 sps:$4 sm:$0xff]   ;;  %v14983_v56 = vld [vmem:[#allocation5 + $0x9c4] ss:$72 sps:$4 sm:$0xff]  }
 0x2d3   :  { %v16658_v59 = vadd.f32 %v5320_v28, %v4551_v3  ;;  %v5321_v63 = vsel %vm2239_vm0, %v5289_v46, %v5291_v0  ;;  %v5293_v52 = vrot.slane %v4902_v37, 1  ;;  %v14969_v3 = vld [vmem:[#allocation5 + $0x8a0] ss:$72 sps:$4 sm:$0xff]   ;;  %v14975_v46 = vld [vmem:[#allocation5 + $0x930] ss:$72 sps:$4 sm:$0xff]  }
 0x2d4   :  { %v16662_v11 = vadd.f32 %v5321_v63, %v4553_v39  ;;  %v5318_v31 = vsel %vm2239_vm0, %v5290_v40, %v5292_v60  ;;  %5264 = vmatmul.mubr.bf16.gmra.mrb[92].mxu0 %v15838_v4  ;;  %8325 = vmatmul.mubr.bf16.gmra.mrb[92].mxu1 %v15838_v4  ;;  %v15840_v28 = vld [vmem:[#allocation2] ss:$24 sps:$4 sm:$0xff]  }
 0x2d5   :  { %v16666_v43 = vadd.f32 %v5318_v31, %v4557_v13  ;;  %v5319_v24 = vsel %vm2239_vm0, %v5291_v0, %v5293_v52  ;;  %8364 = vmatpush1.bf16.msra.mxu0 %v14963_v7  ;;  %8703 = vmatpush1.bf16.msra.mxu1 %v14966_v55  ;;  %v14986_v7 = vld [vmem:[#allocation5 + $0x9cc] ss:$72 sps:$4 sm:$0xff]  }
 0x2d6   :  { %v16670_v54 = vadd.f32 %v5319_v24, %v4559_v14  ;;  %8365 = vmatprep.subr.bf16.mxu0 %v14971_v29  ;;  %v4567_v39 = vpop.f32.mrb[52].mxu0  ;;  %8704 = vmatprep.subr.bf16.mxu1 %v14974_v9  ;;  %v15841_v24 = vld [vmem:[#allocation2 + $0x34] ss:$24 sps:$4 sm:$0xff]  }
 0x2d7   :  { %v4906_v10 = vpop.f32.mrb[52].mxu1  ;;  %8367 = vmatprep.mubr.bf16.mxu0 %v15839_v12  ;;  %v4569_v1 = vpop.f32.mrb[53].mxu0  ;;  %8706 = vmatprep.mubr.bf16.mxu1 %v15839_v12  ;;  %v14990_v12 = vld [vmem:[#allocation5 + $0xa58] ss:$72 sps:$4 sm:$0xff]  }
 0x2d8   :  { %v5294_v38 = vrot.slane %v4906_v10, 1  ;;  %v4908_v53 = vpop.f32.mrb[53].mxu1  ;;  %v4571_v33 = vpop.f32.mrb[54].mxu0 }
 0x2d9   :  { %v5295_v13 = vrot.slane %v4908_v53, 1  ;;  %v4910_v25 = vpop.f32.mrb[54].mxu1  ;;  %8366 = vmatpush1.bf16.msra.mxu0 %v14969_v3  ;;  %8705 = vmatpush1.bf16.msra.mxu1 %v14972_v32  ;;  %v4573_v14 = vpop.f32.mrb[55].mxu0  ;;  %v14987_v3 = vld [vmem:[#allocation5 + $0xa50] ss:$72 sps:$4 sm:$0xff]  }
 0x2da   :  { %v5316_v27 = vsel %vm2239_vm0, %v5292_v60, %v5294_v38  ;;  %v5296_v40 = vrot.slane %v4910_v25, 1  ;;  %v4912_v16 = vpop.f32.mrb[55].mxu1  ;;  %8448 = vmatprep.subr.bf16.mxu0 %v14977_v20  ;;  %8787 = vmatprep.subr.bf16.mxu1 %v14980_v34  ;;  %v14992_v32 = vld [vmem:[#allocation5 + $0xa5c] ss:$72 sps:$4 sm:$0xff]   ;;  %v14998_v53 = vld [vmem:[#allocation5 + $0xaec] ss:$72 sps:$4 sm:$0xff]  }
 0x2db   :  { %v16674_v55 = vadd.f32 %v5316_v27, %v4561_v45  ;;  %v5317_v29 = vsel %vm2239_vm0, %v5293_v52, %v5295_v13  ;;  %v5297_v0 = vrot.slane %v4912_v16, 1  ;;  %v14981_v45 = vld [vmem:[#allocation5 + $0x9c0] ss:$72 sps:$4 sm:$0xff]  }
 0x2dc   :  { %v16678_v57 = vadd.f32 %v5317_v29, %v4563_v47  ;;  %v5314_v9 = vsel %vm2239_vm0, %v5294_v38, %v5296_v40  ;;  %8368 = vmatmul.mubr.bf16.vlgmr.msra.gmra.mrb[96].mxu0 %v15840_v28  ;;  %8707 = vmatmul.mubr.bf16.vlgmr.msra.gmra.mrb[96].mxu1 %v15840_v28  ;;  %v14984_v52 = vld [vmem:[#allocation5 + $0x9c8] ss:$72 sps:$4 sm:$0xff]   ;;  %v14989_v47 = vld [vmem:[#allocation5 + $0xa54] ss:$72 sps:$4 sm:$0xff]  }
 0x2dd   :  { %v16682_v60 = vadd.f32 %v5314_v9, %v4567_v39  ;;  %v5315_v37 = vsel %vm2239_vm0, %v5295_v13, %v5297_v0  ;;  %8449 = vmatpush1.bf16.msra.mxu0 %v14975_v46  ;;  %8788 = vmatpush1.bf16.msra.mxu1 %v14978_v58  ;;  %v14995_v46 = vld [vmem:[#allocation5 + $0xae4] ss:$72 sps:$4 sm:$0xff]   ;;  %v15842_v28 = vld [vmem:[#allocation2 + $0x30] ss:$24 sps:$4 sm:$0xff]  }
 0x2de   :  { %v16686_v63 = vadd.f32 %v5315_v37, %v4569_v1  ;;  %8450 = vmatprep.subr.bf16.mxu0 %v14983_v56  ;;  %v4577_v31 = vpop.f32.mrb[56].mxu0  ;;  %8789 = vmatprep.subr.bf16.mxu1 %v14986_v7 }
 0x2df   :  { %v4916_v4 = vpop.f32.mrb[56].mxu1  ;;  %8377 = vmatprep.mubr.bf16.mxu0 %v15841_v24  ;;  %v4579_v39 = vpop.f32.mrb[57].mxu0  ;;  %8716 = vmatprep.mubr.bf16.mxu1 %v15841_v24  ;;  %v15004_v24 = vld [vmem:[#allocation5 + $0xb7c] ss:$72 sps:$4 sm:$0xff]  }
 0x2e0   :  { %v5298_v20 = vrot.slane %v4916_v4, 1  ;;  %v4918_v10 = vpop.f32.mrb[57].mxu1  ;;  %v4581_v38 = vpop.f32.mrb[58].mxu0  ;;  %v15843_v4 = vld [vmem:[#allocation2 + $0x64] ss:$24 sps:$4 sm:$0xff]  }
 0x2e1   :  { %v5299_v34 = vrot.slane %v4918_v10, 1  ;;  %v4920_v1 = vpop.f32.mrb[58].mxu1  ;;  %8451 = vmatpush1.bf16.msra.mxu0 %v14981_v45  ;;  %8790 = vmatpush1.bf16.msra.mxu1 %v14984_v52  ;;  %v4583_v13 = vpop.f32.mrb[59].mxu0  ;;  %v14999_v10 = vld [vmem:[#allocation5 + $0xb70] ss:$72 sps:$4 sm:$0xff]  }
 0x2e2   :  { %v5312_v58 = vsel %vm2239_vm0, %v5296_v40, %v5298_v20  ;;  %v5300_v56 = vrot.slane %v4920_v1, 1  ;;  %v4922_v25 = vpop.f32.mrb[59].mxu1  ;;  %8452 = vmatprep.subr.bf16.mxu0 %v14989_v47  ;;  %8791 = vmatprep.subr.bf16.mxu1 %v14992_v32 }
 0x2e3   :  { %v16690_v7 = vadd.f32 %v5312_v58, %v4571_v33  ;;  %v5313_v27 = vsel %vm2239_vm0, %v5297_v0, %v5299_v34  ;;  %v5301_v16 = vrot.slane %v4922_v25, 1  ;;  %v14993_v33 = vld [vmem:[#allocation5 + $0xae0] ss:$72 sps:$4 sm:$0xff]  }
 0x2e4   :  { %v16694_v29 = vadd.f32 %v5313_v27, %v4573_v14  ;;  %v5310_v9 = vsel %vm2239_vm0, %v5298_v20, %v5300_v56  ;;  %8378 = vmatmul.mubr.bf16.gmra.mrb[100].mxu0 %v15842_v28  ;;  %8717 = vmatmul.mubr.bf16.gmra.mrb[100].mxu1 %v15842_v28  ;;  %v14996_v0 = vld [vmem:[#allocation5 + $0xae8] ss:$72 sps:$4 sm:$0xff]   ;;  %v15001_v14 = vld [vmem:[#allocation5 + $0xb74] ss:$72 sps:$4 sm:$0xff]  }
 0x2e5   :  { %v16698_v40 = vadd.f32 %v5310_v9, %v4577_v31  ;;  %v5311_v37 = vsel %vm2239_vm0, %v5299_v34, %v5301_v16  ;;  %8453 = vmatpush1.bf16.msra.mxu0 %v14987_v3  ;;  %8792 = vmatpush1.bf16.msra.mxu1 %v14990_v12  ;;  %v15002_v34 = vld [vmem:[#allocation5 + $0xb78] ss:$72 sps:$4 sm:$0xff]   ;;  %v15007_v12 = vld [vmem:[#allocation5 + $0xc04] ss:$72 sps:$4 sm:$0xff]  }
 0x2e6   :  { %v16702_v45 = vadd.f32 %v5311_v37, %v4579_v39  ;;  %8454 = vmatprep.subr.bf16.mxu0 %v14995_v46  ;;  %v4587_v52 = vpop.f32.mrb[60].mxu0  ;;  %8793 = vmatprep.subr.bf16.mxu1 %v14998_v53  ;;  %v15010_v46 = vld [vmem:[#allocation5 + $0xc0c] ss:$72 sps:$4 sm:$0xff]  }
 0x2e7   :  { %v4926_v47 = vpop.f32.mrb[60].mxu1  ;;  %8387 = vmatprep.mubr.bf16.mxu0 %v15843_v4  ;;  %v4589_v32 = vpop.f32.mrb[61].mxu0  ;;  %8726 = vmatprep.mubr.bf16.mxu1 %v15843_v4  ;;  %v15005_v4 = vld [vmem:[#allocation5 + $0xc00] ss:$72 sps:$4 sm:$0xff]  }
 0x2e8   :  { %v5302_v31 = vrot.slane %v4926_v47, 1  ;;  %v4928_v20 = vpop.f32.mrb[61].mxu1  ;;  %v4591_v1 = vpop.f32.mrb[62].mxu0 }
 0x2e9   :  { %v5303_v3 = vrot.slane %v4928_v20, 1  ;;  %v4930_v39 = vpop.f32.mrb[62].mxu1  ;;  %8455 = vmatpush1.bf16.msra.mxu0 %v14993_v33  ;;  %8794 = vmatpush1.bf16.msra.mxu1 %v14996_v0  ;;  %v4593_v53 = vpop.f32.mrb[63].mxu0  ;;  %v15844_v0 = vld [vmem:[#allocation2 + $0x60] ss:$24 sps:$4 sm:$0xff]  }
 0x2ea   :  { %v5308_v58 = vsel %vm2239_vm0, %v5300_v56, %v5302_v31  ;;  %v5304_v25 = vrot.slane %v4930_v39, 1  ;;  %v4932_v27 = vpop.f32.mrb[63].mxu1  ;;  %8456 = vmatprep.subr.bf16.mxu0 %v15001_v14  ;;  %8795 = vmatprep.subr.bf16.mxu1 %v15004_v24  ;;  %v15013_v24 = vld [vmem:[#allocation5 + $0xc94] ss:$72 sps:$4 sm:$0xff]   ;;  %v15017_v39 = vld [vmem:[#allocation5 + $0xd20] ss:$72 sps:$4 sm:$0xff]  }
 0x2eb   :  { %v16706_v9 = vadd.f32 %v5308_v58, %v4581_v38  ;;  %v5309_v28 = vsel %vm2239_vm0, %v5301_v16, %v5303_v3  ;;  %v5305_v37 = vrot.slane %v4932_v27, 1  ;;  %v15845_v20 = vld [vmem:[#allocation2 + $0x94] ss:$24 sps:$4 sm:$0xff]   ;;  %v15020_v58 = vld [vmem:[#allocation5 + $0xd28] ss:$72 sps:$4 sm:$0xff]  }
 0x2ec   :  { %v16710_v47 = vadd.f32 %v5309_v28, %v4583_v13  ;;  %v5306_v33 = vsel %vm2239_vm0, %v5302_v31, %v5304_v25  ;;  %v5336_v56 = vsel %vm2239_vm0, %v5304_v25, %v5274_v50  ;;  %8388 = vmatmul.mubr.bf16.gmra.mrb[104].mxu0 %v15844_v0  ;;  %8727 = vmatmul.mubr.bf16.gmra.mrb[104].mxu1 %v15844_v0  ;;  %v15026_v25 = vld [vmem:[#allocation5 + $0xdb8] ss:$72 sps:$4 sm:$0xff]   ;;  %v15034_v27 = vld [vmem:[#allocation5 + $0xe4c] ss:$72 sps:$4 sm:$0xff]  }
 0x2ed   :  { %v16718_v14 = vadd.f32 %v5306_v33, %v4587_v52  ;;  %v16720_v38 = vadd.f32 %v5336_v56, %v4591_v1  ;;  %v5307_v16 = vsel %vm2239_vm0, %v5303_v3, %v5305_v37  ;;  %v5337_v13 = vsel %vm2239_vm0, %v5305_v37, %v5275_v49  ;;  %8457 = vmatpush1.bf16.msra.mxu0 %v14999_v10  ;;  %v15016_v52 = vld [vmem:[#allocation5 + $0xc9c] ss:$72 sps:$4 sm:$0xff]   ;;  %v15014_v3 = vld [vmem:[#allocation5 + $0xc98] ss:$72 sps:$4 sm:$0xff]   ;;  %v15022_v49 = vld [vmem:[#allocation5 + $0xd2c] ss:$72 sps:$4 sm:$0xff]  }
 0x2ee   :  { %v16728_v31 = vadd.f32 %v5307_v16, %v4589_v32  ;;  %v16730_v50 = vadd.f32 %v5337_v13, %v4593_v53  ;;  %8796 = vmatpush1.bf16.msra.mxu1 %v15002_v34  ;;  %8458 = vmatprep.subr.bf16.mxu0 %v15007_v12  ;;  %v15019_v1 = vld [vmem:[#allocation5 + $0xd24] ss:$72 sps:$4 sm:$0xff]   ;;  %v15846_v32 = vld [vmem:[#allocation2 + $0x90] ss:$24 sps:$4 sm:$0xff]   ;;  %v15025_v34 = vld [vmem:[#allocation5 + $0xdb4] ss:$72 sps:$4 sm:$0xff]  }
 0x2ef   :  { %8797 = vmatprep.subr.bf16.mxu1 %v15010_v46  ;;  %8397 = vmatprep.mubr.bf16.mxu0 %v15845_v20  ;;  %v15847_v10 = vld [vmem:[#allocation2 + $0xc4] ss:$24 sps:$4 sm:$0xff]   ;;  %v15023_v46 = vld [vmem:[#allocation5 + $0xdb0] ss:$72 sps:$4 sm:$0xff]   ;;  %v15029_v37 = vld [vmem:[#allocation5 + $0xe40] ss:$72 sps:$4 sm:$0xff]  }
 0x2f0   :  { %8736 = vmatprep.mubr.bf16.mxu1 %v15845_v20  ;;  %v15028_v12 = vld [vmem:[#allocation5 + $0xdbc] ss:$72 sps:$4 sm:$0xff]   ;;  %v15848_v28 = vld [vmem:[#allocation2 + $0xc0] ss:$24 sps:$4 sm:$0xff]   ;;  %v15032_v33 = vld [vmem:[#allocation5 + $0xe48] ss:$72 sps:$4 sm:$0xff]  }
 0x2f1   :  { %8459 = vmatpush1.bf16.msra.mxu0 %v15005_v4  ;;  %v15031_v53 = vld [vmem:[#allocation5 + $0xe44] ss:$72 sps:$4 sm:$0xff]   ;;  %v15037_v0 = vld [vmem:[#allocation5 + $0xed4] ss:$72 sps:$4 sm:$0xff]   ;;  %v15035_v13 = vld [vmem:[#allocation5 + $0xed0] ss:$72 sps:$4 sm:$0xff]  }
 0x2f2   :  { %8798 = vmatpush1.bf16.msra.mxu1 %v15008_v26  ;;  %8460 = vmatprep.subr.bf16.mxu0 %v15013_v24  ;;  %v15849_v56 = vld [vmem:[#allocation2 + $0xf4] ss:$24 sps:$4 sm:$0xff]   ;;  %v15040_v16 = vld [vmem:[#allocation5 + $0xedc] ss:$72 sps:$4 sm:$0xff]   ;;  %v15038_v4 = vld [vmem:[#allocation5 + $0xed8] ss:$72 sps:$4 sm:$0xff]  }
 0x2f3   :  { %8799 = vmatprep.subr.bf16.mxu1 %v15016_v52  ;;  %v15043_v26 = vld [vmem:[#allocation5 + $0xf64] ss:$72 sps:$4 sm:$0xff]   ;;  %v15850_v52 = vld [vmem:[#allocation2 + $0xf0] ss:$24 sps:$4 sm:$0xff]  }
 0x2f4   :  { %8398 = vmatmul.mubr.bf16.gmra.mrb[108].mxu0 %v15846_v32  ;;  %8737 = vmatmul.mubr.bf16.gmra.mrb[108].mxu1 %v15846_v32  ;;  %v15046_v24 = vld [vmem:[#allocation5 + $0xf6c] ss:$72 sps:$4 sm:$0xff]   ;;  %v15041_v20 = vld [vmem:[#allocation5 + $0xf60] ss:$72 sps:$4 sm:$0xff]   ;;  %v15047_v32 = vld [vmem:[#allocation5 + $0xff0] ss:$72 sps:$4 sm:$0xff]  }
 0x2f5   :  { %8407 = vmatprep.mubr.bf16.mxu0 %v15847_v10  ;;  %8461 = vmatpush1.bf16.msra.mxu0 %v15011_v41  ;;  %v15044_v41 = vld [vmem:[#allocation5 + $0xf68] ss:$72 sps:$4 sm:$0xff]  }
 0x2f6   :  { %8800 = vmatpush1.bf16.msra.mxu1 %v15014_v3  ;;  %8462 = vmatprep.subr.bf16.mxu0 %v15019_v1  ;;  %v15851_v3 = vld [vmem:[#allocation2 + $0x124] ss:$24 sps:$4 sm:$0xff]  }
 0x2f7   :  { %8801 = vmatprep.subr.bf16.mxu1 %v15022_v49  ;;  %8746 = vmatprep.mubr.bf16.mxu1 %v15847_v10  ;;  %v15049_v1 = vld [vmem:[#allocation5 + $0xff4] ss:$72 sps:$4 sm:$0xff]  }
 0x2f8   :  { %v15052_v49 = vld [vmem:[#allocation5 + $0xffc] ss:$72 sps:$4 sm:$0xff]   ;;  %v15058_v10 = vld [vmem:[#allocation5 + $0x108c] ss:$72 sps:$4 sm:$0xff]  }
 0x2f9   :  { %8463 = vmatpush1.bf16.msra.mxu0 %v15017_v39  ;;  %v15050_v39 = vld [vmem:[#allocation5 + $0xff8] ss:$72 sps:$4 sm:$0xff]  }
 0x2fa   :  { %8802 = vmatpush1.bf16.msra.mxu1 %v15020_v58  ;;  %8464 = vmatprep.subr.bf16.mxu0 %v15025_v34  ;;  %v15055_v58 = vld [vmem:[#allocation5 + $0x1084] ss:$72 sps:$4 sm:$0xff]   ;;  %v15852_v34 = vld [vmem:[#allocation2 + $0x120] ss:$24 sps:$4 sm:$0xff]  }
 0x2fb   :  { %8803 = vmatprep.subr.bf16.mxu1 %v15028_v12  ;;  %v15053_v12 = vld [vmem:[#allocation5 + $0x1080] ss:$72 sps:$4 sm:$0xff]  }
 0x2fc   :  { %8408 = vmatmul.mubr.bf16.gmra.mrb[112].mxu0 %v15848_v28  ;;  %8747 = vmatmul.mubr.bf16.gmra.mrb[112].mxu1 %v15848_v28  ;;  %v15059_v28 = vld [vmem:[#allocation5 + $0x1110] ss:$72 sps:$4 sm:$0xff]  }
 0x2fd   :  { %8417 = vmatprep.mubr.bf16.mxu0 %v15849_v56  ;;  %8465 = vmatpush1.bf16.msra.mxu0 %v15023_v46  ;;  %v15056_v46 = vld [vmem:[#allocation5 + $0x1088] ss:$72 sps:$4 sm:$0xff]  }
 0x2fe   :  { %8804 = vmatpush1.bf16.msra.mxu1 %v15026_v25  ;;  %8466 = vmatprep.subr.bf16.mxu0 %v15031_v53  ;;  %v15853_v25 = vld [vmem:[#allocation2 + $0x154] ss:$24 sps:$4 sm:$0xff]  }
 0x2ff   :  { %8805 = vmatprep.subr.bf16.mxu1 %v15034_v27  ;;  %8756 = vmatprep.mubr.bf16.mxu1 %v15849_v56  ;;  %v15061_v53 = vld [vmem:[#allocation5 + $0x1114] ss:$72 sps:$4 sm:$0xff]  }
 0x300   :  { %v15064_v27 = vld [vmem:[#allocation5 + $0x111c] ss:$72 sps:$4 sm:$0xff]   ;;  %v15070_v56 = vld [vmem:[#allocation5 + $0x11ac] ss:$72 sps:$4 sm:$0xff]  }
 0x301   :  { %8467 = vmatpush1.bf16.msra.mxu0 %v15029_v37  ;;  %v15062_v37 = vld [vmem:[#allocation5 + $0x1118] ss:$72 sps:$4 sm:$0xff]  }
 0x302   :  { %8806 = vmatpush1.bf16.msra.mxu1 %v15032_v33  ;;  %8468 = vmatprep.subr.bf16.mxu0 %v15037_v0  ;;  %v15067_v33 = vld [vmem:[#allocation5 + $0x11a4] ss:$72 sps:$4 sm:$0xff]   ;;  %v15854_v0 = vld [vmem:[#allocation2 + $0x150] ss:$24 sps:$4 sm:$0xff]  }
 0x303   :  { %8807 = vmatprep.subr.bf16.mxu1 %v15040_v16  ;;  %v15065_v16 = vld [vmem:[#allocation5 + $0x11a0] ss:$72 sps:$4 sm:$0xff]  }
 0x304   :  { %8418 = vmatmul.mubr.bf16.gmra.mrb[116].mxu0 %v15850_v52  ;;  %8757 = vmatmul.mubr.bf16.gmra.mrb[116].mxu1 %v15850_v52  ;;  %v15071_v52 = vld [vmem:[#allocation5 + $0x1230] ss:$72 sps:$4 sm:$0xff]  }
 0x305   :  { %8427 = vmatprep.mubr.bf16.mxu0 %v15851_v3  ;;  %8469 = vmatpush1.bf16.msra.mxu0 %v15035_v13  ;;  %v15068_v13 = vld [vmem:[#allocation5 + $0x11a8] ss:$72 sps:$4 sm:$0xff]  }
 0x306   :  { %8808 = vmatpush1.bf16.msra.mxu1 %v15038_v4  ;;  %8470 = vmatprep.subr.bf16.mxu0 %v15043_v26  ;;  %v15855_v4 = vld [vmem:[#allocation2 + $0xc] ss:$24 sps:$4 sm:$0xff]   ;;  %v15073_v26 = vld [vmem:[#allocation5 + $0x1234] ss:$72 sps:$4 sm:$0xff]  }
 0x307   :  { %8809 = vmatprep.subr.bf16.mxu1 %v15046_v24  ;;  %8766 = vmatprep.mubr.bf16.mxu1 %v15851_v3  ;;  %v15076_v24 = vld [vmem:[#allocation5 + $0x123c] ss:$72 sps:$4 sm:$0xff]   ;;  %v15082_v3 = vld [vmem:[#allocation5 + $0x12cc] ss:$72 sps:$4 sm:$0xff]  }
 0x309   :  { %8471 = vmatpush1.bf16.msra.mxu0 %v15041_v20  ;;  %v15074_v20 = vld [vmem:[#allocation5 + $0x1238] ss:$72 sps:$4 sm:$0xff]  }
 0x30a   :  { %8810 = vmatpush1.bf16.msra.mxu1 %v15044_v41  ;;  %8472 = vmatprep.subr.bf16.mxu0 %v15049_v1  ;;  %v15079_v41 = vld [vmem:[#allocation5 + $0x12c4] ss:$72 sps:$4 sm:$0xff]   ;;  %v15077_v1 = vld [vmem:[#allocation5 + $0x12c0] ss:$72 sps:$4 sm:$0xff]  }
 0x30b   :  { %8811 = vmatprep.subr.bf16.mxu1 %v15052_v49  ;;  %v15080_v49 = vld [vmem:[#allocation5 + $0x12c8] ss:$72 sps:$4 sm:$0xff]  }
 0x30c   :  { %8428 = vmatmul.mubr.bf16.gmra.mrb[120].mxu0 %v15852_v34  ;;  %8767 = vmatmul.mubr.bf16.gmra.mrb[120].mxu1 %v15852_v34  ;;  %v15083_v34 = vld [vmem:[#allocation5 + $0x1350] ss:$72 sps:$4 sm:$0xff]  }
 0x30d   :  { %8437 = vmatprep.mubr.bf16.mxu0 %v15853_v25  ;;  %8473 = vmatpush1.bf16.msra.mxu0 %v15047_v32  ;;  %v15856_v32 = vld [vmem:[#allocation2 + $0x8] ss:$24 sps:$4 sm:$0xff]  }
 0x30e   :  { %8812 = vmatpush1.bf16.msra.mxu1 %v15050_v39  ;;  %8474 = vmatprep.subr.bf16.mxu0 %v15055_v58  ;;  %v15085_v39 = vld [vmem:[#allocation5 + $0x1354] ss:$72 sps:$4 sm:$0xff]  }
 0x30f   :  { %8813 = vmatprep.subr.bf16.mxu1 %v15058_v10  ;;  %8776 = vmatprep.mubr.bf16.mxu1 %v15853_v25  ;;  %v15088_v58 = vld [vmem:[#allocation5 + $0x135c] ss:$72 sps:$4 sm:$0xff]   ;;  %v15094_v25 = vld [vmem:[#allocation5 + $0x13ec] ss:$72 sps:$4 sm:$0xff]  }
 0x310   :  { %v15857_v10 = vld [vmem:[#allocation2 + $0x3c] ss:$24 sps:$4 sm:$0xff]  }
 0x311   :  { %8475 = vmatpush1.bf16.msra.mxu0 %v15053_v12  ;;  %v15086_v12 = vld [vmem:[#allocation5 + $0x1358] ss:$72 sps:$4 sm:$0xff]  }
 0x312   :  { %8814 = vmatpush1.bf16.msra.mxu1 %v15056_v46  ;;  %8476 = vmatprep.subr.bf16.mxu0 %v15061_v53  ;;  %v15091_v46 = vld [vmem:[#allocation5 + $0x13e4] ss:$72 sps:$4 sm:$0xff]   ;;  %v15858_v53 = vld [vmem:[#allocation2 + $0x38] ss:$24 sps:$4 sm:$0xff]  }
 0x313   :  { %8815 = vmatprep.subr.bf16.mxu1 %v15064_v27  ;;  %v15089_v27 = vld [vmem:[#allocation5 + $0x13e0] ss:$72 sps:$4 sm:$0xff]  }
 0x314   :  { %8438 = vmatmul.mubr.bf16.gmra.mrb[124].mxu0 %v15854_v0  ;;  %8777 = vmatmul.mubr.bf16.gmra.mrb[124].mxu1 %v15854_v0  ;;  %v15095_v0 = vld [vmem:[#allocation5 + $0x1470] ss:$72 sps:$4 sm:$0xff]  }
 0x315   :  { %8480 = vmatprep.mubr.bf16.mxu0 %v15855_v4  ;;  %8477 = vmatpush1.bf16.msra.mxu0 %v15059_v28  ;;  %v15092_v28 = vld [vmem:[#allocation5 + $0x13e8] ss:$72 sps:$4 sm:$0xff]  }
 0x316   :  { %8816 = vmatpush1.bf16.msra.mxu1 %v15062_v37  ;;  %8478 = vmatprep.subr.bf16.mxu0 %v15067_v33  ;;  %v15097_v37 = vld [vmem:[#allocation5 + $0x1474] ss:$72 sps:$4 sm:$0xff]  }
 0x317   :  { %8817 = vmatprep.subr.bf16.mxu1 %v15070_v56  ;;  %8819 = vmatprep.mubr.bf16.mxu1 %v15855_v4  ;;  %v15100_v33 = vld [vmem:[#allocation5 + $0x147c] ss:$72 sps:$4 sm:$0xff]   ;;  %v15106_v4 = vld [vmem:[#allocation5 + $0x150c] ss:$72 sps:$4 sm:$0xff]  }
 0x318   :  { %v15859_v56 = vld [vmem:[#allocation2 + $0x6c] ss:$24 sps:$4 sm:$0xff]  }
 0x319   :  { %8479 = vmatpush1.bf16.msra.mxu0 %v15065_v16  ;;  %v15098_v16 = vld [vmem:[#allocation5 + $0x1478] ss:$72 sps:$4 sm:$0xff]  }
 0x31a   :  { %8818 = vmatpush1.bf16.msra.mxu1 %v15068_v13  ;;  %8561 = vmatprep.subr.bf16.mxu0 %v15073_v26  ;;  %v15103_v13 = vld [vmem:[#allocation5 + $0x1504] ss:$72 sps:$4 sm:$0xff]   ;;  %v15860_v26 = vld [vmem:[#allocation2 + $0x68] ss:$24 sps:$4 sm:$0xff]  }
 0x31b   :  { %8900 = vmatprep.subr.bf16.mxu1 %v15076_v24  ;;  %v15101_v24 = vld [vmem:[#allocation5 + $0x1500] ss:$72 sps:$4 sm:$0xff]  }
 0x31c   :  { %8481 = vmatmul.mubr.bf16.vlgmr.msra.gmra.mrb[96].mxu0 %v15856_v32 }
 0x31d   :  { %8820 = vmatmul.mubr.bf16.vlgmr.msra.gmra.mrb[96].mxu1 %v15856_v32  ;;  %8562 = vmatpush1.bf16.msra.mxu0 %v15071_v52  ;;  %v15104_v52 = vld [vmem:[#allocation5 + $0x1508] ss:$72 sps:$4 sm:$0xff]   ;;  %v15115_v32 = vld [vmem:[#allocation5 + $0x1624] ss:$72 sps:$4 sm:$0xff]  }
 0x31e   :  { %8901 = vmatpush1.bf16.msra.mxu1 %v15074_v20  ;;  %8563 = vmatprep.subr.bf16.mxu0 %v15079_v41  ;;  %v15109_v20 = vld [vmem:[#allocation5 + $0x1594] ss:$72 sps:$4 sm:$0xff]  }
 0x31f   :  { %8902 = vmatprep.subr.bf16.mxu1 %v15082_v3  ;;  %8490 = vmatprep.mubr.bf16.mxu0 %v15857_v10  ;;  %v15112_v41 = vld [vmem:[#allocation5 + $0x159c] ss:$72 sps:$4 sm:$0xff]  }
 0x320   :  { %8829 = vmatprep.mubr.bf16.mxu1 %v15857_v10  ;;  %v15861_v3 = vld [vmem:[#allocation2 + $0x9c] ss:$24 sps:$4 sm:$0xff]   ;;  %v15113_v10 = vld [vmem:[#allocation5 + $0x1620] ss:$72 sps:$4 sm:$0xff]  }
 0x321   :  { %8564 = vmatpush1.bf16.msra.mxu0 %v15077_v1  ;;  %v15107_v1 = vld [vmem:[#allocation5 + $0x1590] ss:$72 sps:$4 sm:$0xff]  }
 0x322   :  { %8903 = vmatpush1.bf16.msra.mxu1 %v15080_v49  ;;  %8565 = vmatprep.subr.bf16.mxu0 %v15085_v39  ;;  %v15110_v49 = vld [vmem:[#allocation5 + $0x1598] ss:$72 sps:$4 sm:$0xff]   ;;  %v15118_v39 = vld [vmem:[#allocation5 + $0x162c] ss:$72 sps:$4 sm:$0xff]  }
 0x323   :  { %8904 = vmatprep.subr.bf16.mxu1 %v15088_v58  ;;  %v15862_v58 = vld [vmem:[#allocation2 + $0x98] ss:$24 sps:$4 sm:$0xff]  }
 0x324   :  { %8491 = vmatmul.mubr.bf16.gmra.mrb[100].mxu0 %v15858_v53 }
 0x325   :  { %8830 = vmatmul.mubr.bf16.gmra.mrb[100].mxu1 %v15858_v53  ;;  %8566 = vmatpush1.bf16.msra.mxu0 %v15083_v34  ;;  %v15116_v34 = vld [vmem:[#allocation5 + $0x1628] ss:$72 sps:$4 sm:$0xff]  }
 0x326   :  { %8905 = vmatpush1.bf16.msra.mxu1 %v15086_v12  ;;  %8567 = vmatprep.subr.bf16.mxu0 %v15091_v46  ;;  %v15121_v12 = vld [vmem:[#allocation5 + $0x16b4] ss:$72 sps:$4 sm:$0xff]   ;;  %v15119_v53 = vld [vmem:[#allocation5 + $0x16b0] ss:$72 sps:$4 sm:$0xff]  }
 0x327   :  { %8906 = vmatprep.subr.bf16.mxu1 %v15094_v25  ;;  %8500 = vmatprep.mubr.bf16.mxu0 %v15859_v56  ;;  %v15124_v46 = vld [vmem:[#allocation5 + $0x16bc] ss:$72 sps:$4 sm:$0xff]  }
 0x328   :  { %8839 = vmatprep.mubr.bf16.mxu1 %v15859_v56  ;;  %v15863_v25 = vld [vmem:[#allocation2 + $0xcc] ss:$24 sps:$4 sm:$0xff]   ;;  %v15125_v56 = vld [vmem:[#allocation5 + $0x1740] ss:$72 sps:$4 sm:$0xff]  }
 0x329   :  { %8568 = vmatpush1.bf16.msra.mxu0 %v15089_v27  ;;  %v15122_v27 = vld [vmem:[#allocation5 + $0x16b8] ss:$72 sps:$4 sm:$0xff]  }
 0x32a   :  { %8907 = vmatpush1.bf16.msra.mxu1 %v15092_v28  ;;  %8569 = vmatprep.subr.bf16.mxu0 %v15097_v37  ;;  %v15127_v28 = vld [vmem:[#allocation5 + $0x1744] ss:$72 sps:$4 sm:$0xff]  }
 0x32b   :  { %8908 = vmatprep.subr.bf16.mxu1 %v15100_v33  ;;  %v15130_v37 = vld [vmem:[#allocation5 + $0x174c] ss:$72 sps:$4 sm:$0xff]   ;;  %v15864_v33 = vld [vmem:[#allocation2 + $0xc8] ss:$24 sps:$4 sm:$0xff]  }
 0x32c   :  { %8501 = vmatmul.mubr.bf16.gmra.mrb[104].mxu0 %v15860_v26 }
 0x32d   :  { %8840 = vmatmul.mubr.bf16.gmra.mrb[104].mxu1 %v15860_v26  ;;  %8570 = vmatpush1.bf16.msra.mxu0 %v15095_v0  ;;  %v15128_v0 = vld [vmem:[#allocation5 + $0x1748] ss:$72 sps:$4 sm:$0xff]  }
 0x32e   :  { %8909 = vmatpush1.bf16.msra.mxu1 %v15098_v16  ;;  %8571 = vmatprep.subr.bf16.mxu0 %v15103_v13  ;;  %v15133_v16 = vld [vmem:[#allocation5 + $0x17d4] ss:$72 sps:$4 sm:$0xff]   ;;  %v15131_v26 = vld [vmem:[#allocation5 + $0x17d0] ss:$72 sps:$4 sm:$0xff]  }
 0x32f   :  { %8910 = vmatprep.subr.bf16.mxu1 %v15106_v4  ;;  %8510 = vmatprep.mubr.bf16.mxu0 %v15861_v3  ;;  %v15136_v13 = vld [vmem:[#allocation5 + $0x17dc] ss:$72 sps:$4 sm:$0xff]  }
 0x330   :  { %8849 = vmatprep.mubr.bf16.mxu1 %v15861_v3  ;;  %v15865_v4 = vld [vmem:[#allocation2 + $0xfc] ss:$24 sps:$4 sm:$0xff]   ;;  %v15137_v3 = vld [vmem:[#allocation5 + $0x1860] ss:$72 sps:$4 sm:$0xff]  }
 0x331   :  { %8572 = vmatpush1.bf16.msra.mxu0 %v15101_v24  ;;  %v15134_v24 = vld [vmem:[#allocation5 + $0x17d8] ss:$72 sps:$4 sm:$0xff]  }
 0x332   :  { %8911 = vmatpush1.bf16.msra.mxu1 %v15104_v52  ;;  %8573 = vmatprep.subr.bf16.mxu0 %v15109_v20  ;;  %v15139_v52 = vld [vmem:[#allocation5 + $0x1864] ss:$72 sps:$4 sm:$0xff]  }
 0x333   :  { %8912 = vmatprep.subr.bf16.mxu1 %v15112_v41  ;;  %v15142_v20 = vld [vmem:[#allocation5 + $0x186c] ss:$72 sps:$4 sm:$0xff]   ;;  %v15866_v41 = vld [vmem:[#allocation2 + $0xf8] ss:$24 sps:$4 sm:$0xff]  }
 0x334   :  { %8511 = vmatmul.mubr.bf16.gmra.mrb[108].mxu0 %v15862_v58 }
 0x335   :  { %8850 = vmatmul.mubr.bf16.gmra.mrb[108].mxu1 %v15862_v58  ;;  %8574 = vmatpush1.bf16.msra.mxu0 %v15107_v1  ;;  %v15140_v1 = vld [vmem:[#allocation5 + $0x1868] ss:$72 sps:$4 sm:$0xff]  }
 0x336   :  { %8913 = vmatpush1.bf16.msra.mxu1 %v15110_v49  ;;  %8575 = vmatprep.subr.bf16.mxu0 %v15115_v32  ;;  %v15145_v49 = vld [vmem:[#allocation5 + $0x18f4] ss:$72 sps:$4 sm:$0xff]   ;;  %v15143_v58 = vld [vmem:[#allocation5 + $0x18f0] ss:$72 sps:$4 sm:$0xff]  }
 0x337   :  { %8914 = vmatprep.subr.bf16.mxu1 %v15118_v39  ;;  %8520 = vmatprep.mubr.bf16.mxu0 %v15863_v25  ;;  %v15148_v32 = vld [vmem:[#allocation5 + $0x18fc] ss:$72 sps:$4 sm:$0xff]  }
 0x338   :  { %8859 = vmatprep.mubr.bf16.mxu1 %v15863_v25  ;;  %v15867_v39 = vld [vmem:[#allocation2 + $0x12c] ss:$24 sps:$4 sm:$0xff]   ;;  %v15149_v25 = vld [vmem:[#allocation5 + $0x1980] ss:$72 sps:$4 sm:$0xff]  }
 0x339   :  { %8576 = vmatpush1.bf16.msra.mxu0 %v15113_v10  ;;  %v15146_v10 = vld [vmem:[#allocation5 + $0x18f8] ss:$72 sps:$4 sm:$0xff]  }
 0x33a   :  { %8915 = vmatpush1.bf16.msra.mxu1 %v15116_v34  ;;  %8577 = vmatprep.subr.bf16.mxu0 %v15121_v12  ;;  %v15151_v34 = vld [vmem:[#allocation5 + $0x1984] ss:$72 sps:$4 sm:$0xff]  }
 0x33b   :  { %8916 = vmatprep.subr.bf16.mxu1 %v15124_v46  ;;  %v15154_v12 = vld [vmem:[#allocation5 + $0x198c] ss:$72 sps:$4 sm:$0xff]   ;;  %v15868_v46 = vld [vmem:[#allocation2 + $0x128] ss:$24 sps:$4 sm:$0xff]  }
 0x33c   :  { %8521 = vmatmul.mubr.bf16.gmra.mrb[112].mxu0 %v15864_v33 }
 0x33d   :  { %8860 = vmatmul.mubr.bf16.gmra.mrb[112].mxu1 %v15864_v33  ;;  %8578 = vmatpush1.bf16.msra.mxu0 %v15119_v53  ;;  %v15152_v53 = vld [vmem:[#allocation5 + $0x1988] ss:$72 sps:$4 sm:$0xff]  }
 0x33e   :  { %8917 = vmatpush1.bf16.msra.mxu1 %v15122_v27  ;;  %8579 = vmatprep.subr.bf16.mxu0 %v15127_v28  ;;  %v15157_v27 = vld [vmem:[#allocation5 + $0x1a14] ss:$72 sps:$4 sm:$0xff]   ;;  %v15155_v33 = vld [vmem:[#allocation5 + $0x1a10] ss:$72 sps:$4 sm:$0xff]  }
 0x33f   :  { %8918 = vmatprep.subr.bf16.mxu1 %v15130_v37  ;;  %8530 = vmatprep.mubr.bf16.mxu0 %v15865_v4  ;;  %v15160_v28 = vld [vmem:[#allocation5 + $0x1a1c] ss:$72 sps:$4 sm:$0xff]  }
 0x340   :  { %8869 = vmatprep.mubr.bf16.mxu1 %v15865_v4  ;;  %v15869_v37 = vld [vmem:[#allocation2 + $0x15c] ss:$24 sps:$4 sm:$0xff]   ;;  %v15161_v4 = vld [vmem:[#allocation5 + $0x1aa0] ss:$72 sps:$4 sm:$0xff]  }
 0x341   :  { %8580 = vmatpush1.bf16.msra.mxu0 %v15125_v56  ;;  %v15158_v56 = vld [vmem:[#allocation5 + $0x1a18] ss:$72 sps:$4 sm:$0xff]  }
 0x342   :  { %8919 = vmatpush1.bf16.msra.mxu1 %v15128_v0  ;;  %8581 = vmatprep.subr.bf16.mxu0 %v15133_v16  ;;  %v15163_v0 = vld [vmem:[#allocation5 + $0x1aa4] ss:$72 sps:$4 sm:$0xff]  }
 0x343   :  { %8920 = vmatprep.subr.bf16.mxu1 %v15136_v13  ;;  %v15166_v16 = vld [vmem:[#allocation5 + $0x1aac] ss:$72 sps:$4 sm:$0xff]   ;;  %v15870_v13 = vld [vmem:[#allocation2 + $0x158] ss:$24 sps:$4 sm:$0xff]  }
 0x344   :  { %8531 = vmatmul.mubr.bf16.gmra.mrb[116].mxu0 %v15866_v41 }
 0x345   :  { %8870 = vmatmul.mubr.bf16.gmra.mrb[116].mxu1 %v15866_v41  ;;  %8582 = vmatpush1.bf16.msra.mxu0 %v15131_v26  ;;  %v15164_v26 = vld [vmem:[#allocation5 + $0x1aa8] ss:$72 sps:$4 sm:$0xff]  }
 0x346   :  { %8921 = vmatpush1.bf16.msra.mxu1 %v15134_v24  ;;  %8583 = vmatprep.subr.bf16.mxu0 %v15139_v52  ;;  %v15169_v24 = vld [vmem:[#allocation5 + $0x44] ss:$72 sps:$4 sm:$0xff]   ;;  %v15167_v41 = vld [vmem:[#allocation5 + $0x40] ss:$72 sps:$4 sm:$0xff]  }
 0x347   :  { %8922 = vmatprep.subr.bf16.mxu1 %v15142_v20  ;;  %8540 = vmatprep.mubr.bf16.mxu0 %v15867_v39  ;;  %v15172_v52 = vld [vmem:[#allocation8 + $0x4] ss:$24 sps:$4 sm:$0xff]  }
 0x348   :  { %8879 = vmatprep.mubr.bf16.mxu1 %v15867_v39  ;;  %v15871_v20 = vld [vmem:[#allocation2 + $0x14] ss:$24 sps:$4 sm:$0xff]   ;;  %v15173_v39 = vld [vmem:[#allocation5 + $0xd0] ss:$72 sps:$4 sm:$0xff]  }
 0x349   :  { %8584 = vmatpush1.bf16.msra.mxu0 %v15137_v3  ;;  %v15170_v3 = vld [vmem:[#allocation8] ss:$24 sps:$4 sm:$0xff]  }
 0x34a   :  { %8923 = vmatpush1.bf16.msra.mxu1 %v15140_v1  ;;  %8585 = vmatprep.subr.bf16.mxu0 %v15145_v49  ;;  %v15175_v1 = vld [vmem:[#allocation5 + $0xd4] ss:$72 sps:$4 sm:$0xff]  }
 0x34b   :  { %8924 = vmatprep.subr.bf16.mxu1 %v15148_v32  ;;  %v15178_v49 = vld [vmem:[#allocation8 + $0x34] ss:$24 sps:$4 sm:$0xff]  }
 0x34c   :  { %8541 = vmatmul.mubr.bf16.gmra.mrb[120].mxu0 %v15868_v46  ;;  %v15872_v32 = vld [vmem:[#allocation2 + $0x10] ss:$24 sps:$4 sm:$0xff]  }
 0x34d   :  { %8880 = vmatmul.mubr.bf16.gmra.mrb[120].mxu1 %v15868_v46  ;;  %8586 = vmatpush1.bf16.msra.mxu0 %v15143_v58  ;;  %v15176_v58 = vld [vmem:[#allocation8 + $0x30] ss:$24 sps:$4 sm:$0xff]   ;;  %v15179_v46 = vld [vmem:[#allocation5 + $0x160] ss:$72 sps:$4 sm:$0xff]  }
 0x34e   :  { %8925 = vmatpush1.bf16.msra.mxu1 %v15146_v10  ;;  %8587 = vmatprep.subr.bf16.mxu0 %v15151_v34  ;;  %v15181_v10 = vld [vmem:[#allocation5 + $0x164] ss:$72 sps:$4 sm:$0xff]  }
 0x34f   :  { %8926 = vmatprep.subr.bf16.mxu1 %v15154_v12  ;;  %8550 = vmatprep.mubr.bf16.mxu0 %v15869_v37  ;;  %v15184_v34 = vld [vmem:[#allocation8 + $0x64] ss:$24 sps:$4 sm:$0xff]  }
 0x350   :  { %8889 = vmatprep.mubr.bf16.mxu1 %v15869_v37  ;;  %v15873_v12 = vld [vmem:[#allocation2 + $0x44] ss:$24 sps:$4 sm:$0xff]   ;;  %v15185_v37 = vld [vmem:[#allocation5 + $0x1f0] ss:$72 sps:$4 sm:$0xff]  }
 0x351   :  { %8588 = vmatpush1.bf16.msra.mxu0 %v15149_v25  ;;  %v15182_v25 = vld [vmem:[#allocation8 + $0x60] ss:$24 sps:$4 sm:$0xff]  }
 0x352   :  { %8927 = vmatpush1.bf16.msra.mxu1 %v15152_v53  ;;  %8589 = vmatprep.subr.bf16.mxu0 %v15157_v27  ;;  %v15187_v53 = vld [vmem:[#allocation5 + $0x1f4] ss:$72 sps:$4 sm:$0xff]  }
 0x353   :  { %8928 = vmatprep.subr.bf16.mxu1 %v15160_v28  ;;  %v15190_v27 = vld [vmem:[#allocation8 + $0x94] ss:$24 sps:$4 sm:$0xff]  }
 0x354   :  { %8551 = vmatmul.mubr.bf16.gmra.mrb[124].mxu0 %v15870_v13  ;;  %v15874_v28 = vld [vmem:[#allocation2 + $0x40] ss:$24 sps:$4 sm:$0xff]  }
 0x355   :  { %8890 = vmatmul.mubr.bf16.gmra.mrb[124].mxu1 %v15870_v13  ;;  %8590 = vmatpush1.bf16.msra.mxu0 %v15155_v33  ;;  %v15188_v33 = vld [vmem:[#allocation8 + $0x90] ss:$24 sps:$4 sm:$0xff]   ;;  %v15191_v13 = vld [vmem:[#allocation5 + $0x280] ss:$72 sps:$4 sm:$0xff]  }
 0x356   :  { %8929 = vmatpush1.bf16.msra.mxu1 %v15158_v56  ;;  %8591 = vmatprep.subr.bf16.mxu0 %v15163_v0  ;;  %v15193_v56 = vld [vmem:[#allocation5 + $0x284] ss:$72 sps:$4 sm:$0xff]  }
 0x357   :  { %8930 = vmatprep.subr.bf16.mxu1 %v15166_v16  ;;  %8593 = vmatprep.mubr.bf16.mxu0 %v15871_v20  ;;  %v15196_v0 = vld [vmem:[#allocation8 + $0xc4] ss:$24 sps:$4 sm:$0xff]  }
 0x358   :  { %8932 = vmatprep.mubr.bf16.mxu1 %v15871_v20  ;;  %v15875_v16 = vld [vmem:[#allocation2 + $0x74] ss:$24 sps:$4 sm:$0xff]   ;;  %v15197_v20 = vld [vmem:[#allocation5 + $0x310] ss:$72 sps:$4 sm:$0xff]  }
 0x359   :  { %8592 = vmatpush1.bf16.msra.mxu0 %v15161_v4  ;;  %v15194_v4 = vld [vmem:[#allocation8 + $0xc0] ss:$24 sps:$4 sm:$0xff]  }
 0x35a   :  { %8931 = vmatpush1.bf16.msra.mxu1 %v15164_v26  ;;  %9013 = vmatprep.subr.bf16.mxu0 %v15169_v24  ;;  %v15199_v26 = vld [vmem:[#allocation5 + $0x314] ss:$72 sps:$4 sm:$0xff]  }
 0x35b   :  { %11735 = vmatprep.subr.bf16.mxu1 %v15172_v52  ;;  %v15202_v24 = vld [vmem:[#allocation8 + $0xf4] ss:$24 sps:$4 sm:$0xff]  }
 0x35c   :  { %8594 = vmatmul.mubr.bf16.vlgmr.msra.gmra.mrb[96].mxu0 %v15872_v32  ;;  %v15876_v52 = vld [vmem:[#allocation2 + $0x70] ss:$24 sps:$4 sm:$0xff]  }
 0x35d   :  { %8933 = vmatmul.mubr.bf16.vlgmr.msra.gmra.mrb[96].mxu1 %v15872_v32  ;;  %9014 = vmatpush1.bf16.msra.mxu0 %v15167_v41  ;;  %v15200_v41 = vld [vmem:[#allocation8 + $0xf0] ss:$24 sps:$4 sm:$0xff]  }
 0x35e   :  { %11736 = vmatpush1.bf16.msra.mxu1 %v15170_v3  ;;  %9015 = vmatprep.subr.bf16.mxu0 %v15175_v1  ;;  %v15205_v1 = vld [vmem:[#allocation5 + $0x3a4] ss:$72 sps:$4 sm:$0xff]  }
 0x35f   :  { %11737 = vmatprep.subr.bf16.mxu1 %v15178_v49  ;;  %8603 = vmatprep.mubr.bf16.mxu0 %v15873_v12  ;;  %v15208_v49 = vld [vmem:[#allocation8 + $0x124] ss:$24 sps:$4 sm:$0xff]  }
 0x360   :  { %8942 = vmatprep.mubr.bf16.mxu1 %v15873_v12  ;;  %v15206_v12 = vld [vmem:[#allocation8 + $0x120] ss:$24 sps:$4 sm:$0xff]  }
 0x361   :  { %9016 = vmatpush1.bf16.msra.mxu0 %v15173_v39  ;;  %v15877_v39 = vld [vmem:[#allocation2 + $0xa4] ss:$24 sps:$4 sm:$0xff]  }
 0x362   :  { %11738 = vmatpush1.bf16.msra.mxu1 %v15176_v58  ;;  %9017 = vmatprep.subr.bf16.mxu0 %v15181_v10 }
 0x363   :  { %11739 = vmatprep.subr.bf16.mxu1 %v15184_v34  ;;  %v15203_v34 = vld [vmem:[#allocation5 + $0x3a0] ss:$72 sps:$4 sm:$0xff]  }
 0x364   :  { %8604 = vmatmul.mubr.bf16.gmra.mrb[100].mxu0 %v15874_v28 }
 0x365   :  { %8943 = vmatmul.mubr.bf16.gmra.mrb[100].mxu1 %v15874_v28  ;;  %9018 = vmatpush1.bf16.msra.mxu0 %v15179_v46  ;;  %v15211_v28 = vld [vmem:[#allocation5 + $0x434] ss:$72 sps:$4 sm:$0xff]  }
 0x366   :  { %11740 = vmatpush1.bf16.msra.mxu1 %v15182_v25  ;;  %9019 = vmatprep.subr.bf16.mxu0 %v15187_v53 }
 0x367   :  { %11741 = vmatprep.subr.bf16.mxu1 %v15190_v27  ;;  %8613 = vmatprep.mubr.bf16.mxu0 %v15875_v16 }
 0x368   :  { %8952 = vmatprep.mubr.bf16.mxu1 %v15875_v16 }
 0x369   :  { %9020 = vmatpush1.bf16.msra.mxu0 %v15185_v37 }
 0x36a   :  { %11742 = vmatpush1.bf16.msra.mxu1 %v15188_v33  ;;  %9021 = vmatprep.subr.bf16.mxu0 %v15193_v56 }
 0x36b   :  { %11743 = vmatprep.subr.bf16.mxu1 %v15196_v0  ;;  %v15214_v0 = vld [vmem:[#allocation8 + $0x154] ss:$24 sps:$4 sm:$0xff]  }
 0x36c   :  { %8614 = vmatmul.mubr.bf16.gmra.mrb[104].mxu0 %v15876_v52 }
 0x36d   :  { %8953 = vmatmul.mubr.bf16.gmra.mrb[104].mxu1 %v15876_v52  ;;  %9022 = vmatpush1.bf16.msra.mxu0 %v15191_v13 }
 0x36e   :  { %11744 = vmatpush1.bf16.msra.mxu1 %v15194_v4  ;;  %9023 = vmatprep.subr.bf16.mxu0 %v15199_v26  ;;  %v15878_v4 = vld [vmem:[#allocation7] sm:$0x3f] }
 0x36f   :  { %v16732_v3 = vpop.f32.mrb[64].mxu0  ;;  %11745 = vmatprep.subr.bf16.mxu1 %v15202_v24  ;;  %8623 = vmatprep.mubr.bf16.mxu0 %v15877_v39  ;;  %v16737_v58 = vpop.f32.mrb[64].mxu1  ;;  %v5467_v26 = vrot.slane %v15878_v4, 2 }
 0x370   :  { %v16734_v32 = vpop.f32.mrb[65].mxu0  ;;  %8962 = vmatprep.mubr.bf16.mxu1 %v15877_v39  ;;  %v16739_v46 = vpop.f32.mrb[65].mxu1  ;;  %v17673_v25 = vrot.slane %v16732_v3, 2 }
 0x371   :  { %v5199_v10 = vpop.f32.mrb[66].mxu0  ;;  %9024 = vmatpush1.bf16.msra.mxu0 %v15197_v20  ;;  %v16742_v37 = vpop.f32.mrb[66].mxu1  ;;  %v17672_v33 = vrot.slane %v16734_v32, 2  ;;  %v15879_v20 = vld [vmem:[#allocation2 + $0xa0] ss:$24 sps:$4 sm:$0xff]  }
 0x372   :  { %v5372_v53 = vrot.slane %v5199_v10, 2  ;;  %11746 = vmatpush1.bf16.msra.mxu1 %v15200_v41  ;;  %v5201_v27 = vpop.f32.mrb[67].mxu0  ;;  %9025 = vmatprep.subr.bf16.mxu0 %v15205_v1  ;;  %v16745_v16 = vpop.f32.mrb[67].mxu1  ;;  %v15209_v1 = vld [vmem:[#allocation5 + $0x430] ss:$72 sps:$4 sm:$0xff]  }
 0x373   :  { %v5373_v56 = vrot.slane %v5201_v27, 2  ;;  %11747 = vmatprep.subr.bf16.mxu1 %v15208_v49  ;;  %17685 = vst [vmem:[#allocation18_spill] sm:$0xff] %v16745_v16  ;;  %v15212_v49 = vld [vmem:[#allocation8 + $0x150] ss:$24 sps:$4 sm:$0xff]   ;;  %v15220_v27 = vld [vmem:[#allocation8 + $0x184] ss:$24 sps:$4 sm:$0xff]  }
 0x374   :  { %v5431_v13 = vsel %vm5402_vm9, %v17673_v25, %v5372_v53  ;;  %8624 = vmatmul.mubr.bf16.gmra.mrb[108].mxu0 %v15879_v20  ;;  %v15217_v10 = vld [vmem:[#allocation5 + $0x4c4] ss:$72 sps:$4 sm:$0xff]  }
 0x375   :  { %v5435_v24 = vadd.f32 %v5431_v13, %v16600_v19  ;;  %v5432_v52 = vsel %vm5402_vm9, %v17672_v33, %v5373_v56  ;;  %8963 = vmatmul.mubr.bf16.gmra.mrb[108].mxu1 %v15879_v20  ;;  %9026 = vmatpush1.bf16.msra.mxu0 %v15203_v34  ;;  %v16758_v19 = vrot.slane %v5467_v26, %v16187_v2  ;;  %v15880_v20 = vld [vmem:[#allocation2 + $0xd4] ss:$24 sps:$4 sm:$0xff]  }
 0x376   :  { %v5436_v41 = vadd.f32 %v5432_v52, %v16606_v48  ;;  %11748 = vmatpush1.bf16.msra.mxu1 %v15206_v12  ;;  %9027 = vmatprep.subr.bf16.mxu0 %v15211_v28  ;;  %v16761_v13 = vrot.slane %v5467_v26, %v16194_v6  ;;  %v15215_v52 = vld [vmem:[#allocation5 + $0x4c0] ss:$72 sps:$4 sm:$0xff]  }
 0x377   :  { %v5205_v39 = vpop.f32.mrb[68].mxu0  ;;  %11749 = vmatprep.subr.bf16.mxu1 %v15214_v0  ;;  %8633 = vmatprep.mubr.bf16.mxu0 %v15880_v20  ;;  %v16763_v48 = vpop.f32.mrb[68].mxu1  ;;  %v15218_v6 = vld [vmem:[#allocation8 + $0x180] ss:$24 sps:$4 sm:$0xff]  }
 0x378   :  { %v5374_v4 = vrot.slane %v5205_v39, 2  ;;  %v5207_v33 = vpop.f32.mrb[69].mxu0  ;;  %8972 = vmatprep.mubr.bf16.mxu1 %v15880_v20  ;;  %17686 = vst [vmem:[#allocation19_spill] sm:$0xff] %v16763_v48  ;;  %v16765_v28 = vpop.f32.mrb[69].mxu1  ;;  %v15223_v48 = vld [vmem:[#allocation5 + $0x554] ss:$72 sps:$4 sm:$0xff]  }
 0x379   :  { %v5375_v34 = vrot.slane %v5207_v33, 2  ;;  %v5209_v12 = vpop.f32.mrb[70].mxu0  ;;  %17687 = vst [vmem:[#allocation20_spill] sm:$0xff] %v16765_v28  ;;  %9028 = vmatpush1.bf16.msra.mxu0 %v15209_v1  ;;  %v16769_v39 = vpop.f32.mrb[70].mxu1  ;;  %v15226_v28 = vld [vmem:[#allocation8 + $0x1b4] ss:$24 sps:$4 sm:$0xff]   ;;  %v5479_v1 = vadd.f32 %v16761_v13, %v5436_v41 }
 0x37a   :  { %v5429_v0 = vsel %vm5402_vm9, %v5372_v53, %v5374_v4  ;;  %v5376_v25 = vrot.slane %v5209_v12, 2  ;;  %11750 = vmatpush1.bf16.msra.mxu1 %v15212_v49  ;;  %v5211_v26 = vpop.f32.mrb[71].mxu0  ;;  %17688 = vst [vmem:[#allocation21_spill] sm:$0xff] %v16769_v39  ;;  %9029 = vmatprep.subr.bf16.mxu0 %v15217_v10  ;;  %v16774_v16 = vpop.f32.mrb[71].mxu1  ;;  %v5478_v53 = vadd.f32 %v16758_v19, %v5435_v24 }
 0x37b   :  { %v5437_v2 = vadd.f32 %v5429_v0, %v16610_v42  ;;  %v5430_v20 = vsel %vm5402_vm9, %v5373_v56, %v5375_v34  ;;  %v5377_v33 = vrot.slane %v5211_v26, 2  ;;  %11751 = vmatprep.subr.bf16.mxu1 %v15220_v27  ;;  %17689 = vst [vmem:[#allocation22_spill] sm:$0xff] %v16774_v16  ;;  %v15881_v27 = vld [vmem:[#allocation2 + $0xd0] ss:$24 sps:$4 sm:$0xff]   ;;  %v15882_v16 = vld [vmem:[#allocation2 + $0x104] ss:$24 sps:$4 sm:$0xff]  }
 0x37c   :  { %v5438_v49 = vadd.f32 %v5430_v20, %v16614_v35  ;;  %v5427_v12 = vsel %vm5402_vm9, %v5374_v4, %v5376_v25  ;;  %8634 = vmatmul.mubr.bf16.gmra.mrb[112].mxu0 %v15881_v27  ;;  %v15221_v35 = vld [vmem:[#allocation5 + $0x550] ss:$72 sps:$4 sm:$0xff]   ;;  %v15232_v26 = vld [vmem:[#allocation8 + $0x1e4] ss:$24 sps:$4 sm:$0xff]  }
 0x37d   :  { %v5480_v42 = vadd.f32 %v16758_v19, %v5437_v2  ;;  %v5439_v56 = vadd.f32 %v5427_v12, %v16618_v17  ;;  %v5428_v10 = vsel %vm5402_vm9, %v5375_v34, %v5377_v33  ;;  %8973 = vmatmul.mubr.bf16.gmra.mrb[112].mxu1 %v15881_v27  ;;  %9030 = vmatpush1.bf16.msra.mxu0 %v15215_v52  ;;  %v15224_v4 = vld [vmem:[#allocation8 + $0x1b0] ss:$24 sps:$4 sm:$0xff]   ;;  %v5510_v34 = vmax.f32 %v5478_v53, 0.0 }
 0x37e   :  { %v5481_v24 = vadd.f32 %v16761_v13, %v5438_v49  ;;  %v5440_v41 = vadd.f32 %v5428_v10, %v16622_v21  ;;  %11752 = vmatpush1.bf16.msra.mxu1 %v15218_v6  ;;  %9031 = vmatprep.subr.bf16.mxu0 %v15223_v48  ;;  %v15229_v17 = vld [vmem:[#allocation5 + $0x5e4] ss:$72 sps:$4 sm:$0xff]   ;;  %v16790_v21 = vpack.c.bf16 %v16585_v15, %v16585_v15  ;;  %v5511_v52 = vmax.f32 %v5479_v1, 0.0 }
 0x37f   :  { %v5512_v0 = vmax.f32 %v5480_v42, 0.0  ;;  %v5215_v2 = vpop.f32.mrb[72].mxu0  ;;  %11753 = vmatprep.subr.bf16.mxu1 %v15226_v28  ;;  %8643 = vmatprep.mubr.bf16.mxu0 %v15882_v16  ;;  %v16792_v6 = vpop.f32.mrb[72].mxu1  ;;  %v16797_v28 = vadd.f32 %v16758_v19, %v5439_v56  ;;  %v15227_v56 = vld [vmem:[#allocation5 + $0x5e0] ss:$72 sps:$4 sm:$0xff]  }
 0x380   :  { %v5513_v20 = vmax.f32 %v5481_v24, 0.0  ;;  %v5378_v12 = vrot.slane %v5215_v2, 2  ;;  %v5217_v27 = vpop.f32.mrb[73].mxu0  ;;  %8982 = vmatprep.mubr.bf16.mxu1 %v15882_v16  ;;  %17690 = vst [vmem:[#allocation23_spill] sm:$0xff] %v16792_v6  ;;  %v16801_v42 = vpop.f32.mrb[73].mxu1  ;;  %v16806_v15 = vadd.f32 %v16761_v13, %v5440_v41 }
 0x381   :  { %v5550_v48 = vsel %vm5543_vm10, %v5512_v0, 0.0  ;;  %v5379_v53 = vrot.slane %v5217_v27, 2  ;;  %v16799_v49 = vpop.f32.mrb[74].mxu0  ;;  %17691 = vst [vmem:[#allocation24_spill] sm:$0xff] %v16801_v42  ;;  %9032 = vmatpush1.bf16.msra.mxu0 %v15221_v35  ;;  %v16812_v0 = vpop.f32.mrb[74].mxu1 }
 0x382   :  { %v5580_v10 = vmax.f32 %v5510_v34, %v5550_v48  ;;  %v5551_v16 = vsel %vm5543_vm10, %v5513_v20, 0.0  ;;  %v5425_v1 = vsel %vm5402_vm9, %v5376_v25, %v5378_v12  ;;  %11754 = vmatpush1.bf16.msra.mxu1 %v15224_v4  ;;  %v16810_v24 = vpop.f32.mrb[75].mxu0  ;;  %17692 = vst [vmem:[#allocation25_spill] sm:$0xff] %v16812_v0  ;;  %v5380_v20 = vrot.slane %v16799_v49, 2  ;;  %9033 = vmatprep.subr.bf16.mxu0 %v15229_v17  ;;  %v15230_v41 = vld [vmem:[#allocation8 + $0x1e0] ss:$24 sps:$4 sm:$0xff]  }
 0x383   :  { %v5587_v2 = vmax.f32 %v5511_v52, %v5551_v16  ;;  %v5441_v27 = vadd.f32 %v5425_v1, %v16626_v36  ;;  %v5426_v34 = vsel %vm5402_vm9, %v5377_v33, %v5379_v53  ;;  %11755 = vmatprep.subr.bf16.mxu1 %v15232_v26  ;;  %v15235_v48 = vld [vmem:[#allocation5 + $0x674] ss:$72 sps:$4 sm:$0xff]   ;;  %v16818_v25 = vpop.f32.mrb[75].mxu1  ;;  %v5381_v42 = vrot.slane %v16810_v24, 2  ;;  %v15883_v49 = vld [vmem:[#allocation2 + $0x100] ss:$24 sps:$4 sm:$0xff]  }
 0x384   :  { %17693 = vst [vmem:[#allocation26_spill] sm:$0xff] %v16818_v25  ;;  %v5581_v35 = vrot.slane %v5580_v10, 4  ;;  %v5442_v4 = vadd.f32 %v5426_v34, %v16630_v51  ;;  %v15238_v0 = vld [vmem:[#allocation8 + $0x214] ss:$24 sps:$4 sm:$0xff]   ;;  %v16824_v36 = vpack.c.bf16 %v16588_v62, %v16588_v62  ;;  %v5514_v33 = vmax.f32 %v16797_v28, 0.0  ;;  %8644 = vmatmul.mubr.bf16.gmra.mrb[116].mxu0 %v15883_v49 }
 0x385   :  { %v5588_v52 = vrot.slane %v5587_v2, 4  ;;  %v5484_v17 = vadd.f32 %v16758_v19, %v5441_v27  ;;  %v5423_v26 = vsel %vm5402_vm9, %v5378_v12, %v5380_v20  ;;  %8983 = vmatmul.mubr.bf16.gmra.mrb[116].mxu1 %v15883_v49  ;;  %v5424_v62 = vsel %vm5402_vm9, %v5379_v53, %v5381_v42  ;;  %9034 = vmatpush1.bf16.msra.mxu0 %v15227_v56  ;;  %v15233_v24 = vld [vmem:[#allocation5 + $0x670] ss:$72 sps:$4 sm:$0xff]   ;;  %v15241_v28 = vld [vmem:[#allocation5 + $0x704] ss:$72 sps:$4 sm:$0xff]  }
 0x386   :  { %v5582_v16 = vmax.f32 %v5580_v10, %v5581_v35  ;;  %v5485_v51 = vadd.f32 %v16761_v13, %v5442_v4  ;;  %v5443_v1 = vadd.f32 %v5423_v26, %v16634_v23  ;;  %v15236_v34 = vld [vmem:[#allocation8 + $0x210] ss:$24 sps:$4 sm:$0xff]   ;;  %v5515_v27 = vmax.f32 %v16806_v15, 0.0  ;;  %11756 = vmatpush1.bf16.msra.mxu1 %v15230_v41  ;;  %9035 = vmatprep.subr.bf16.mxu0 %v15235_v48  ;;  %v15244_v10 = vld [vmem:[#allocation8 + $0x244] ss:$24 sps:$4 sm:$0xff]  }
 0x387   :  { %v5589_v25 = vmax.f32 %v5587_v2, %v5588_v52  ;;  %v5516_v6 = vmax.f32 %v5484_v17, 0.0  ;;  %v5444_v12 = vadd.f32 %v5424_v62, %v16638_v18  ;;  %v5225_v49 = vpop.f32.mrb[76].mxu0  ;;  %11757 = vmatprep.subr.bf16.mxu1 %v15238_v0  ;;  %v15884_v26 = vld [vmem:[#allocation2 + $0x134] ss:$24 sps:$4 sm:$0xff]   ;;  %v16841_v2 = vpop.f32.mrb[76].mxu1 }
 0x388   :  { %v5583_v35 = vrot.slane %v5582_v16, 2  ;;  %v5517_v4 = vmax.f32 %v5485_v51, 0.0  ;;  %v16837_v23 = vadd.f32 %v16758_v19, %v5443_v1  ;;  %v5382_v53 = vrot.slane %v5225_v49, 2  ;;  %v16839_v56 = vpop.f32.mrb[77].mxu0  ;;  %8653 = vmatprep.mubr.bf16.mxu0 %v15884_v26  ;;  %17694 = vst [vmem:[#allocation27_spill] sm:$0xff] %v16841_v2  ;;  %8992 = vmatprep.mubr.bf16.mxu1 %v15884_v26  ;;  %v16851_v17 = vpop.f32.mrb[77].mxu1 }
 0x389   :  { %v5590_v15 = vrot.slane %v5589_v25, 2  ;;  %v5554_v18 = vsel %vm5543_vm10, %v5516_v6, 0.0  ;;  %v16846_v41 = vadd.f32 %v16761_v13, %v5444_v12  ;;  %v5383_v48 = vrot.slane %v16839_v56, 2  ;;  %v16849_v52 = vpop.f32.mrb[78].mxu0  ;;  %9036 = vmatpush1.bf16.msra.mxu0 %v15233_v24  ;;  %v15239_v6 = vld [vmem:[#allocation5 + $0x700] ss:$72 sps:$4 sm:$0xff]  }
 0x38a   :  { %v5584_v51 = vmax.f32 %v5582_v16, %v5583_v35  ;;  %v5594_v0 = vmax.f32 %v5514_v33, %v5554_v18  ;;  %v5555_v1 = vsel %vm5543_vm10, %v5517_v4, 0.0  ;;  %v16856_v49 = vpop.f32.mrb[79].mxu0  ;;  %v16858_v12 = vpop.f32.mrb[78].mxu1  ;;  %v5421_v26 = vsel %vm5402_vm9, %v5380_v20, %v5382_v53  ;;  %11758 = vmatpush1.bf16.msra.mxu1 %v15236_v34  ;;  %9037 = vmatprep.subr.bf16.mxu0 %v15241_v28  ;;  %v15242_v33 = vld [vmem:[#allocation8 + $0x240] ss:$24 sps:$4 sm:$0xff]  }
 0x38b   :  { %17695 = vst [vmem:[#allocation28_spill] sm:$0xff] %v16858_v12  ;;  %v5591_v2 = vmax.f32 %v5589_v25, %v5590_v15  ;;  %v5601_v56 = vmax.f32 %v5515_v27, %v5555_v1  ;;  %v16863_v16 = vpop.f32.mrb[79].mxu1  ;;  %v5445_v24 = vadd.f32 %v5421_v26, %v16642_v8  ;;  %v5422_v18 = vsel %vm5402_vm9, %v5381_v42, %v5383_v48  ;;  %v15247_v25 = vld [vmem:[#allocation5 + $0x794] ss:$72 sps:$4 sm:$0xff]   ;;  %v15885_v34 = vld [vmem:[#allocation2 + $0x130] ss:$24 sps:$4 sm:$0xff]  }
 0x38c   :  { %17696 = vst [vmem:[#allocation29_spill] sm:$0xff] %v16863_v16  ;;  %v5585_v35 = vrot.slane %v5584_v51, 1  ;;  %v5595_v4 = vrot.slane %v5594_v0, 4  ;;  %11759 = vmatprep.subr.bf16.mxu1 %v15244_v10  ;;  %v15250_v27 = vld [vmem:[#allocation8 + $0x274] ss:$24 sps:$4 sm:$0xff]   ;;  %v5446_v39 = vadd.f32 %v5422_v18, %v16646_v5  ;;  %v5384_v20 = vrot.slane %v16849_v52, 2  ;;  %8654 = vmatmul.mubr.bf16.gmra.mrb[120].mxu0 %v15885_v34 }
 0x38d   :  { %v5592_v15 = vrot.slane %v5591_v2, 1  ;;  %v5602_v1 = vrot.slane %v5601_v56, 4  ;;  %8993 = vmatmul.mubr.bf16.gmra.mrb[120].mxu1 %v15885_v34  ;;  %v5488_v8 = vadd.f32 %v16758_v19, %v5445_v24  ;;  %v5385_v26 = vrot.slane %v16856_v49, 2  ;;  %9038 = vmatpush1.bf16.msra.mxu0 %v15239_v6  ;;  %v15245_v42 = vld [vmem:[#allocation5 + $0x790] ss:$72 sps:$4 sm:$0xff]  }
 0x38e   :  { %v16870_v28 = vmax.f32 %v5584_v51, %v5585_v35  ;;  %v5596_v62 = vmax.f32 %v5594_v0, %v5595_v4  ;;  %v15886_v10 = vld [vmem:[#allocation2 + $0x164] ss:$24 sps:$4 sm:$0xff]   ;;  %v5489_v5 = vadd.f32 %v16761_v13, %v5446_v39  ;;  %v5419_v52 = vsel %vm5402_vm9, %v5382_v53, %v5384_v20  ;;  %11760 = vmatpush1.bf16.msra.mxu1 %v15242_v33  ;;  %v15248_v0 = vld [vmem:[#allocation8 + $0x270] ss:$24 sps:$4 sm:$0xff]  }
 0x38f   :  { %8663 = vmatprep.mubr.bf16.mxu0 %v15886_v10  ;;  %v16874_v16 = vmax.f32 %v5591_v2, %v5592_v15  ;;  %v5603_v12 = vmax.f32 %v5601_v56, %v5602_v1  ;;  %v16879_v51 = vpop.f32.mrb[80].mxu0  ;;  %v15253_v35 = vld [vmem:[#allocation5 + $0x824] ss:$72 sps:$4 sm:$0xff]   ;;  %v5520_v24 = vmax.f32 %v5488_v8, 0.0  ;;  %v5447_v49 = vadd.f32 %v5419_v52, %v16650_v22  ;;  %9039 = vmatprep.subr.bf16.mxu0 %v15247_v25  ;;  %v16886_v56 = vpop.f32.mrb[80].mxu1 }
 0x390   :  { %v5597_v4 = vrot.slane %v5596_v62, 2  ;;  %v5420_v6 = vsel %vm5402_vm9, %v5383_v48, %v5385_v26  ;;  %v16884_v2 = vpop.f32.mrb[81].mxu0  ;;  %11761 = vmatprep.subr.bf16.mxu1 %v15250_v27  ;;  %v15256_v39 = vld [vmem:[#allocation8 + $0x2a4] ss:$24 sps:$4 sm:$0xff]   ;;  %v5521_v33 = vmax.f32 %v5489_v5, 0.0  ;;  %v5386_v15 = vrot.slane %v16879_v51, 2  ;;  %9002 = vmatprep.mubr.bf16.mxu1 %v15886_v10 }
 0x391   :  { %v5604_v53 = vrot.slane %v5603_v12, 2  ;;  %v5448_v18 = vadd.f32 %v5420_v6, %v16654_v61  ;;  %v16890_v1 = vpop.f32.mrb[82].mxu0  ;;  %v16892_v22 = vpop.f32.mrb[81].mxu1  ;;  %v5558_v48 = vsel %vm5543_vm10, %v5520_v24, 0.0  ;;  %v16897_v25 = vadd.f32 %v16758_v19, %v5447_v49  ;;  %9040 = vmatpush1.bf16.msra.mxu0 %v15245_v42  ;;  %v15251_v61 = vld [vmem:[#allocation5 + $0x820] ss:$72 sps:$4 sm:$0xff]  }
 0x392   :  { %17697 = vst [vmem:[#allocation30_spill] sm:$0xff] %v16892_v22  ;;  %v5598_v34 = vmax.f32 %v5596_v62, %v5597_v4  ;;  %v5387_v27 = vrot.slane %v16884_v2, 2  ;;  %v16900_v8 = vpop.f32.mrb[83].mxu0  ;;  %v16902_v5 = vpop.f32.mrb[82].mxu1  ;;  %v17699_v10 = vmax.f32 %v16837_v23, 0.0  ;;  %v5559_v62 = vsel %vm5543_vm10, %v5521_v33, 0.0  ;;  %11762 = vmatpush1.bf16.msra.mxu1 %v15248_v0  ;;  %9041 = vmatprep.subr.bf16.mxu0 %v15253_v35 }
 0x393   :  { %17698 = vst [vmem:[#allocation31_spill] sm:$0xff] %v16902_v5  ;;  %v5605_v52 = vmax.f32 %v5603_v12, %v5604_v53  ;;  %v16909_v4 = vadd.f32 %v16761_v13, %v5448_v18  ;;  %v15254_v24 = vld [vmem:[#allocation8 + $0x2a0] ss:$24 sps:$4 sm:$0xff]   ;;  %v16911_v49 = vpop.f32.mrb[83].mxu1  ;;  %v17701_v6 = vmax.f32 %v16846_v41, 0.0  ;;  %v5522_v12 = vmax.f32 %v16897_v25, 0.0  ;;  %11763 = vmatprep.subr.bf16.mxu1 %v15256_v39 }
 0x394   :  { %v5608_v51 = vmax.f32 %v17699_v10, %v5558_v48  ;;  %17700 = vst [vmem:[#allocation32_spill] sm:$0xff] %v16911_v49  ;;  %v5599_v42 = vrot.slane %v5598_v34, 1  ;;  %v5417_v23 = vsel %vm5402_vm9, %v5384_v20, %v5386_v15  ;;  %v15259_v53 = vld [vmem:[#allocation5 + $0x8b4] ss:$72 sps:$4 sm:$0xff]   ;;  %v15887_v10 = vld [vmem:[#allocation2 + $0x160] ss:$24 sps:$4 sm:$0xff]   ;;  %v5418_v25 = vsel %vm5402_vm9, %v5385_v26, %v5387_v27 }
 0x395   :  { %v5615_v2 = vmax.f32 %v17701_v6, %v5559_v62  ;;  %v15262_v33 = vld [vmem:[#allocation8 + $0x2d4] ss:$24 sps:$4 sm:$0xff]   ;;  %v5606_v48 = vrot.slane %v5605_v52, 1  ;;  %v5449_v35 = vadd.f32 %v5417_v23, %v16658_v59  ;;  %8664 = vmatmul.mubr.bf16.gmra.mrb[124].mxu0 %v15887_v10  ;;  %9003 = vmatmul.mubr.bf16.gmra.mrb[124].mxu1 %v15887_v10  ;;  %v5388_v20 = vrot.slane %v16890_v1, 2  ;;  %v15265_v10 = vld [vmem:[#allocation5 + $0x944] ss:$72 sps:$4 sm:$0xff]  }
 0x396   :  { %v5609_v18 = vrot.slane %v5608_v51, 4  ;;  %v16920_v49 = vmax.f32 %v5598_v34, %v5599_v42  ;;  %9042 = vmatpush1.bf16.msra.mxu0 %v15251_v61  ;;  %11767 = vmatprep.mubr.bf16.mxu1 %v16824_v36  ;;  %v15257_v39 = vld [vmem:[#allocation5 + $0x8b0] ss:$72 sps:$4 sm:$0xff]   ;;  %v5450_v23 = vadd.f32 %v5418_v25, %v16662_v11  ;;  %v5389_v1 = vrot.slane %v16900_v8, 2  ;;  %v15263_v8 = vld [vmem:[#allocation5 + $0x940] ss:$72 sps:$4 sm:$0xff]  }
 0x397   :  { %v5616_v41 = vrot.slane %v5615_v2, 4  ;;  %v16926_v62 = vmax.f32 %v5605_v52, %v5606_v48  ;;  %v5492_v59 = vadd.f32 %v16758_v19, %v5449_v35  ;;  %11764 = vmatpush1.bf16.msra.mxu1 %v15254_v24  ;;  %v16930_v34 = vpop.f32.mrb[84].mxu0  ;;  %v15260_v42 = vld [vmem:[#allocation8 + $0x2d0] ss:$24 sps:$4 sm:$0xff]   ;;  %v5415_v26 = vsel %vm5402_vm9, %v5386_v15, %v5388_v20  ;;  %9043 = vmatprep.subr.bf16.mxu0 %v15259_v53  ;;  %v16938_v48 = vpop.f32.mrb[84].mxu1 }
 0x398   :  { %v5610_v6 = vmax.f32 %v5608_v51, %v5609_v18  ;;  %v17678_v61 = vrot.slane %v16930_v34, 2  ;;  %v16936_v52 = vpop.f32.mrb[85].mxu0  ;;  %11765 = vmatprep.subr.bf16.mxu1 %v15262_v33  ;;  %v15268_v51 = vld [vmem:[#allocation8 + $0x304] ss:$24 sps:$4 sm:$0xff]   ;;  %17702 = vst [vmem:[#allocation33_spill] sm:$0xff] %v16938_v48  ;;  %v5493_v18 = vadd.f32 %v16761_v13, %v5450_v23  ;;  %v5416_v53 = vsel %vm5402_vm9, %v5387_v27, %v5389_v1 }
 0x399   :  { %v5617_v0 = vmax.f32 %v5615_v2, %v5616_v41  ;;  %v5524_v24 = vmax.f32 %v5492_v59, 0.0  ;;  %v5451_v2 = vadd.f32 %v5415_v26, %v16666_v43  ;;  %v16942_v35 = vpop.f32.mrb[86].mxu0  ;;  %v15888_v15 = vld [vmem:[#allocation2 + $0x4] ss:$24 sps:$4 sm:$0xff]   ;;  %v16944_v41 = vpop.f32.mrb[85].mxu1  ;;  %v5452_v59 = vadd.f32 %v5416_v53, %v16670_v54 }
 0x39a   :  { %v5611_v11 = vrot.slane %v5610_v6, 2  ;;  %9045 = vmatprep.mubr.bf16.mxu0 %v15888_v15  ;;  %17703 = vst [vmem:[#allocation34_spill] sm:$0xff] %v16944_v41  ;;  %v5413_v33 = vsel %vm5402_vm9, %v5388_v20, %v17678_v61  ;;  %9044 = vmatpush1.bf16.msra.mxu0 %v15257_v39  ;;  %v16953_v43 = vpop.f32.mrb[87].mxu0  ;;  %v15266_v23 = vld [vmem:[#allocation8 + $0x300] ss:$24 sps:$4 sm:$0xff]   ;;  %v16955_v26 = vpop.f32.mrb[86].mxu1 }
 0x39b   :  { %v5618_v25 = vrot.slane %v5617_v0, 2  ;;  %v5562_v41 = vsel %vm5543_vm10, %v5524_v24, 0.0  ;;  %v5525_v48 = vmax.f32 %v5493_v18, 0.0  ;;  %v16960_v27 = vadd.f32 %v16758_v19, %v5451_v2  ;;  %11766 = vmatpush1.bf16.msra.mxu1 %v15260_v42  ;;  %9126 = vmatprep.subr.bf16.mxu0 %v15265_v10  ;;  %v15271_v5 = vld [vmem:[#allocation5 + $0x9d4] ss:$72 sps:$4 sm:$0xff]   ;;  %v16962_v20 = vpop.f32.mrb[87].mxu1 }
 0x39c   :  { %v5612_v15 = vmax.f32 %v5610_v6, %v5611_v11  ;;  %v5622_v39 = vmax.f32 %v5522_v12, %v5562_v41  ;;  %v5453_v22 = vadd.f32 %v5413_v33, %v16674_v55  ;;  %11776 = vmatprep.subr.bf16.mxu1 %v15268_v51  ;;  %v15274_v6 = vld [vmem:[#allocation8 + $0x334] ss:$24 sps:$4 sm:$0xff]   ;;  %v17704_v42 = vrot.slane %v16936_v52, 2 }
 0x39d   :  { %v5619_v61 = vmax.f32 %v5617_v0, %v5618_v25  ;;  %v5563_v24 = vsel %vm5543_vm10, %v5525_v48, 0.0  ;;  %v5526_v18 = vmax.f32 %v16960_v27, 0.0  ;;  %v15889_v2 = vld [vmem:[#allocation2] ss:$24 sps:$4 sm:$0xff]   ;;  %v17705_v54 = vmax.f32 %v16909_v4, 0.0 }
 0x39e   :  { %v5613_v11 = vrot.slane %v5612_v15, 1  ;;  %v5414_v10 = vsel %vm5402_vm9, %v5389_v1, %v17704_v42  ;;  %9046 = vmatmul.mubr.bf16.vlgmr.msra.gmra.mrb[128].mxu0 %v15889_v2  ;;  %v5623_v0 = vrot.slane %v5622_v39, 4  ;;  %v5495_v51 = vadd.f32 %v16761_v13, %v5452_v59  ;;  %11768 = vmatmul.mubr.bf16.vlgmr.msra.gmra.mrb[128].mxu1 %v16790_v21  ;;  %v15269_v48 = vld [vmem:[#allocation5 + $0x9d0] ss:$72 sps:$4 sm:$0xff]   ;;  %v15277_v27 = vld [vmem:[#allocation5 + $0xa64] ss:$72 sps:$4 sm:$0xff]  }
 0x39f   :  { %v5620_v12 = vrot.slane %v5619_v61, 1  ;;  %v5629_v55 = vmax.f32 %v17705_v54, %v5563_v24  ;;  %9127 = vmatpush1.bf16.msra.mxu0 %v15263_v8  ;;  %v5496_v25 = vadd.f32 %v16758_v19, %v5453_v22  ;;  %v5454_v53 = vadd.f32 %v5414_v10, %v16678_v57  ;;  %11777 = vmatpush1.bf16.msra.mxu1 %v15266_v23  ;;  %v16982_v33 = vpop.f32.mrb[88].mxu0  ;;  %v15272_v4 = vld [vmem:[#allocation8 + $0x330] ss:$24 sps:$4 sm:$0xff]   ;;  %v15280_v22 = vld [vmem:[#allocation8 + $0x364] ss:$24 sps:$4 sm:$0xff]  }
 0x3a0   :  { %v16977_v41 = vmax.f32 %v5612_v15, %v5613_v11  ;;  %v5392_v1 = vrot.slane %v16942_v35, 2  ;;  %9128 = vmatprep.subr.bf16.mxu0 %v15271_v5  ;;  %v5624_v59 = vmax.f32 %v5622_v39, %v5623_v0  ;;  %v5527_v8 = vmax.f32 %v5495_v51, 0.0  ;;  %v16986_v2 = vpop.f32.mrb[89].mxu0  ;;  %11778 = vmatprep.subr.bf16.mxu1 %v15274_v6  ;;  %v15890_v15 = vld [vmem:[#allocation2 + $0x34] ss:$24 sps:$4 sm:$0xff]   ;;  %v16988_v57 = vpop.f32.mrb[88].mxu1 }
 0x3a1   :  { %v16984_v24 = vmax.f32 %v5619_v61, %v5620_v12  ;;  %v5630_v42 = vrot.slane %v5629_v55, 4  ;;  %9055 = vmatprep.mubr.bf16.mxu0 %v15890_v15  ;;  %v5528_v35 = vmax.f32 %v5496_v25, 0.0  ;;  %v5497_v23 = vadd.f32 %v16761_v13, %v5454_v53  ;;  %v16996_v11 = vpop.f32.mrb[90].mxu0  ;;  %v15275_v10 = vld [vmem:[#allocation5 + $0xa60] ss:$72 sps:$4 sm:$0xff]   ;;  %v16998_v12 = vpop.f32.mrb[89].mxu1 }
 0x3a2   :  { %v17706_v5 = vrot.slane %v16930_v34, 2  ;;  %v5393_v39 = vrot.slane %v16953_v43, 2  ;;  %17707 = vst [vmem:[#allocation35_spill] sm:$0xff] %v16998_v12  ;;  %v5625_v6 = vrot.slane %v5624_v59, 2  ;;  %v17002_v25 = vpop.f32.mrb[91].mxu0  ;;  %v17004_v53 = vpop.f32.mrb[90].mxu1 }
 0x3a3   :  { %v5631_v0 = vmax.f32 %v5629_v55, %v5630_v42  ;;  %9129 = vmatpush1.bf16.msra.mxu0 %v15269_v48  ;;  %v15278_v34 = vld [vmem:[#allocation8 + $0x360] ss:$24 sps:$4 sm:$0xff]   ;;  %17708 = vst [vmem:[#allocation36_spill] sm:$0xff] %v17004_v53  ;;  %v5566_v43 = vsel %vm5543_vm10, %v5528_v35, 0.0  ;;  %v5529_v15 = vmax.f32 %v5497_v23, 0.0  ;;  %v17679_v55 = vrot.slane %v16986_v2, 2  ;;  %11779 = vmatpush1.bf16.msra.mxu1 %v15272_v4 }
 0x3a4   :  { %v5411_v61 = vsel %vm5402_vm9, %v17706_v5, %v5392_v1  ;;  %v17709_v5 = vrot.slane %v16936_v52, 2  ;;  %9130 = vmatprep.subr.bf16.mxu0 %v15277_v27  ;;  %v17013_v48 = vpop.f32.mrb[91].mxu1  ;;  %v5626_v42 = vmax.f32 %v5624_v59, %v5625_v6  ;;  %v5636_v51 = vmax.f32 %v5526_v18, %v5566_v43  ;;  %11780 = vmatprep.subr.bf16.mxu1 %v15280_v22  ;;  %v15286_v35 = vld [vmem:[#allocation8 + $0x394] ss:$24 sps:$4 sm:$0xff]  }
 0x3a5   :  { %v5455_v54 = vadd.f32 %v5411_v61, %v16682_v60  ;;  %v15283_v60 = vld [vmem:[#allocation5 + $0xaf4] ss:$72 sps:$4 sm:$0xff]   ;;  %17710 = vst [vmem:[#allocation37_spill] sm:$0xff] %v17013_v48  ;;  %v5632_v61 = vrot.slane %v5631_v0, 2  ;;  %v5567_v52 = vsel %vm5543_vm10, %v5529_v15, 0.0  ;;  %v5410_v18 = vsel %vm5402_vm9, %v5393_v39, %v17679_v55 }
 0x3a6   :  { %v5412_v12 = vsel %vm5402_vm9, %v17709_v5, %v5393_v39  ;;  %v17711_v5 = vrot.slane %v16982_v33, 2  ;;  %v15891_v27 = vld [vmem:[#allocation2 + $0x30] ss:$24 sps:$4 sm:$0xff]   ;;  %v5627_v59 = vrot.slane %v5626_v42, 1  ;;  %v5637_v6 = vrot.slane %v5636_v51, 4 }
 0x3a7   :  { %v17016_v53 = vadd.f32 %v16758_v19, %v5455_v54  ;;  %v5456_v23 = vadd.f32 %v5412_v12, %v16686_v63  ;;  %9056 = vmatmul.mubr.bf16.gmra.mrb[132].mxu0 %v15891_v27  ;;  %v5633_v22 = vmax.f32 %v5631_v0, %v5632_v61  ;;  %v5643_v54 = vmax.f32 %v5527_v8, %v5567_v52  ;;  %v15281_v43 = vld [vmem:[#allocation5 + $0xaf0] ss:$72 sps:$4 sm:$0xff]   ;;  %v15892_v15 = vld [vmem:[#allocation2 + $0x64] ss:$24 sps:$4 sm:$0xff]   ;;  %v17033_v39 = vpop.f32.mrb[92].mxu0 }
 0x3a8   :  { %v5409_v4 = vsel %vm5402_vm9, %v5392_v1, %v17711_v5  ;;  %9131 = vmatpush1.bf16.msra.mxu0 %v15275_v10  ;;  %9065 = vmatprep.mubr.bf16.mxu0 %v15892_v15  ;;  %v5458_v5 = vadd.f32 %v5410_v18, %v16694_v29  ;;  %v15284_v27 = vld [vmem:[#allocation8 + $0x390] ss:$24 sps:$4 sm:$0xff]   ;;  %v17035_v61 = vmax.f32 %v5626_v42, %v5627_v59  ;;  %v17037_v15 = vpop.f32.mrb[93].mxu0  ;;  %v15287_v42 = vld [vmem:[#allocation5 + $0xb80] ss:$72 sps:$4 sm:$0xff]  }
 0x3a9   :  { %v5530_v63 = vmax.f32 %v17016_v53, 0.0  ;;  %v5499_v12 = vadd.f32 %v16761_v13, %v5456_v23  ;;  %v5457_v1 = vadd.f32 %v5409_v4, %v16690_v7  ;;  %11781 = vmatpush1.bf16.msra.mxu1 %v15278_v34  ;;  %9132 = vmatprep.subr.bf16.mxu0 %v15283_v60  ;;  %v15289_v0 = vld [vmem:[#allocation5 + $0xb84] ss:$72 sps:$4 sm:$0xff]   ;;  %v5634_v8 = vrot.slane %v5633_v22, 1  ;;  %v17039_v23 = vpop.f32.mrb[92].mxu1  ;;  %v17044_v4 = vpop.f32.mrb[94].mxu0 }
 0x3aa   :  { %v5638_v10 = vmax.f32 %v5636_v51, %v5637_v6  ;;  %v5644_v52 = vrot.slane %v5643_v54, 4  ;;  %11782 = vmatprep.subr.bf16.mxu1 %v15286_v35  ;;  %v15292_v53 = vld [vmem:[#allocation8 + $0x3c4] ss:$24 sps:$4 sm:$0xff]   ;;  %17712 = vst [vmem:[#allocation38_spill] sm:$0xff] %v17039_v23  ;;  %v5501_v34 = vadd.f32 %v16761_v13, %v5458_v5  ;;  %v5396_v60 = vrot.slane %v16996_v11, 2  ;;  %v17046_v18 = vpop.f32.mrb[93].mxu1 }
 0x3ab   :  { %v5531_v7 = vmax.f32 %v5499_v12, 0.0  ;;  %v5500_v29 = vadd.f32 %v16758_v19, %v5457_v1  ;;  %17713 = vst [vmem:[#allocation39_spill] sm:$0xff] %v17046_v18  ;;  %v17048_v51 = vmax.f32 %v5633_v22, %v5634_v8  ;;  %v5397_v35 = vrot.slane %v17002_v25, 2  ;;  %v17051_v55 = vpop.f32.mrb[95].mxu0  ;;  %v15290_v12 = vld [vmem:[#allocation8 + $0x3c0] ss:$24 sps:$4 sm:$0xff]  }
 0x3ac   :  { %v5639_v59 = vrot.slane %v5638_v10, 2  ;;  %v5645_v6 = vmax.f32 %v5643_v54, %v5644_v52  ;;  %9133 = vmatpush1.bf16.msra.mxu0 %v15281_v43  ;;  %v17053_v1 = vpop.f32.mrb[94].mxu1  ;;  %v5533_v23 = vmax.f32 %v5501_v34, 0.0  ;;  %v17714_v11 = vrot.slane %v16982_v33, 2  ;;  %v15295_v54 = vld [vmem:[#allocation5 + $0xc14] ss:$72 sps:$4 sm:$0xff]  }
 0x3ad   :  { %v5532_v5 = vmax.f32 %v5500_v29, 0.0  ;;  %v5398_v22 = vrot.slane %v17033_v39, 2  ;;  %11783 = vmatpush1.bf16.msra.mxu1 %v15284_v27  ;;  %9134 = vmatprep.subr.bf16.mxu0 %v15289_v0  ;;  %v17060_v8 = vpop.f32.mrb[95].mxu1  ;;  %v17715_v18 = vrot.slane %v16986_v2, 2  ;;  %v15298_v33 = vld [vmem:[#allocation8 + $0x3f4] ss:$24 sps:$4 sm:$0xff]  }
 0x3ae   :  { %v5407_v48 = vsel %vm5402_vm9, %v17714_v11, %v5396_v60  ;;  %v5640_v25 = vmax.f32 %v5638_v10, %v5639_v59  ;;  %v5646_v43 = vrot.slane %v5645_v6, 2  ;;  %11784 = vmatprep.subr.bf16.mxu1 %v15292_v53  ;;  %v5571_v39 = vsel %vm5543_vm10, %v5533_v23, 0.0  ;;  %v15893_v10 = vld [vmem:[#allocation2 + $0x60] ss:$24 sps:$4 sm:$0xff]   ;;  %v15894_v59 = vld [vmem:[#allocation2 + $0x94] ss:$24 sps:$4 sm:$0xff]  }
 0x3af   :  { %v5459_v52 = vadd.f32 %v5407_v48, %v16698_v40  ;;  %v5408_v29 = vsel %vm5402_vm9, %v17715_v18, %v5397_v35  ;;  %v5570_v34 = vsel %vm5543_vm10, %v5532_v5, 0.0  ;;  %v5405_v0 = vsel %vm5402_vm9, %v5396_v60, %v5398_v22  ;;  %9066 = vmatmul.mubr.bf16.gmra.mrb[136].mxu0 %v15893_v10  ;;  %v15293_v53 = vld [vmem:[#allocation5 + $0xc10] ss:$72 sps:$4 sm:$0xff]  }
 0x3b0   :  { %v5460_v27 = vadd.f32 %v5408_v29, %v16702_v45  ;;  %v5641_v40 = vrot.slane %v5640_v25, 1  ;;  %v17074_v2 = vmax.f32 %v5645_v6, %v5646_v43  ;;  %v5650_v48 = vmax.f32 %v5530_v63, %v5570_v34  ;;  %9135 = vmatpush1.bf16.msra.mxu0 %v15287_v42  ;;  %9075 = vmatprep.mubr.bf16.mxu0 %v15894_v59  ;;  %v15296_v11 = vld [vmem:[#allocation8 + $0x3f0] ss:$24 sps:$4 sm:$0xff]   ;;  %v15304_v29 = vld [vmem:[#allocation8 + $0x424] ss:$24 sps:$4 sm:$0xff]  }
 0x3b1   :  { %v5657_v18 = vmax.f32 %v5531_v7, %v5571_v39  ;;  %v5502_v5 = vadd.f32 %v16758_v19, %v5459_v52  ;;  %v5461_v45 = vadd.f32 %v5405_v0, %v16706_v9  ;;  %v5399_v60 = vrot.slane %v17037_v15, 2  ;;  %11785 = vmatpush1.bf16.msra.mxu1 %v15290_v12  ;;  %9136 = vmatprep.subr.bf16.mxu0 %v15295_v54  ;;  %v15301_v6 = vld [vmem:[#allocation5 + $0xca4] ss:$72 sps:$4 sm:$0xff]   ;;  %v15310_v59 = vld [vmem:[#allocation8 + $0x454] ss:$24 sps:$4 sm:$0xff]  }
 0x3b2   :  { %v17078_v23 = vadd.f32 %v16761_v13, %v5460_v27  ;;  %v17082_v43 = vmax.f32 %v5640_v25, %v5641_v40  ;;  %v5651_v63 = vrot.slane %v5650_v48, 4  ;;  %v5400_v42 = vrot.slane %v17044_v4, 2  ;;  %11786 = vmatprep.subr.bf16.mxu1 %v15298_v33  ;;  %v15299_v27 = vld [vmem:[#allocation5 + $0xca0] ss:$72 sps:$4 sm:$0xff]  }
 0x3b3   :  { %v5658_v7 = vrot.slane %v5657_v18, 4  ;;  %v5534_v52 = vmax.f32 %v5502_v5, 0.0  ;;  %v5504_v39 = vadd.f32 %v16758_v19, %v5461_v45  ;;  %v5406_v9 = vsel %vm5402_vm9, %v5397_v35, %v5399_v60  ;;  %v15302_v35 = vld [vmem:[#allocation8 + $0x420] ss:$24 sps:$4 sm:$0xff]  }
 0x3b4   :  { %v5535_v34 = vmax.f32 %v17078_v23, 0.0  ;;  %v5652_v15 = vmax.f32 %v5650_v48, %v5651_v63  ;;  %v5462_v54 = vadd.f32 %v5406_v9, %v16710_v47  ;;  %v5403_v25 = vsel %vm5402_vm9, %v5398_v22, %v5400_v42  ;;  %9137 = vmatpush1.bf16.msra.mxu0 %v15293_v53  ;;  %v15307_v48 = vld [vmem:[#allocation5 + $0xd34] ss:$72 sps:$4 sm:$0xff]   ;;  %v15895_v45 = vld [vmem:[#allocation2 + $0x90] ss:$24 sps:$4 sm:$0xff]  }
 0x3b5   :  { %v5659_v12 = vmax.f32 %v5657_v18, %v5658_v7  ;;  %v5536_v4 = vmax.f32 %v5504_v39, 0.0  ;;  %v17716_v33 = vrot.slane %v16732_v3, 2  ;;  %v5463_v10 = vadd.f32 %v5403_v25, %v16718_v14  ;;  %11787 = vmatpush1.bf16.msra.mxu1 %v15296_v11  ;;  %9138 = vmatprep.subr.bf16.mxu0 %v15301_v6  ;;  %v15305_v7 = vld [vmem:[#allocation5 + $0xd30] ss:$72 sps:$4 sm:$0xff]   ;;  %v15313_v9 = vld [vmem:[#allocation5 + $0xdc4] ss:$72 sps:$4 sm:$0xff]  }
 0x3b6   :  { %v5401_v40 = vrot.slane %v17051_v55, 2  ;;  %v5653_v47 = vrot.slane %v5652_v15, 2  ;;  %v5505_v22 = vadd.f32 %v16761_v13, %v5462_v54  ;;  %11788 = vmatprep.subr.bf16.mxu1 %v15304_v29  ;;  %v17717_v55 = vrot.slane %v16734_v32, 2  ;;  %v15308_v32 = vld [vmem:[#allocation8 + $0x450] ss:$24 sps:$4 sm:$0xff]  }
 0x3b7   :  { %v5433_v0 = vsel %vm5402_vm9, %v5400_v42, %v17716_v33  ;;  %v5660_v18 = vrot.slane %v5659_v12, 2  ;;  %v5574_v3 = vsel %vm5543_vm10, %v5536_v4, 0.0  ;;  %v5506_v5 = vadd.f32 %v16758_v19, %v5463_v10  ;;  %9076 = vmatmul.mubr.bf16.gmra.mrb[140].mxu0 %v15895_v45  ;;  %v15896_v42 = vld [vmem:[#allocation2 + $0xc4] ss:$24 sps:$4 sm:$0xff]  }
 0x3b8   :  { %v5465_v53 = vadd.f32 %v5433_v0, %v16720_v38  ;;  %v5404_v14 = vsel %vm5402_vm9, %v5399_v60, %v5401_v40  ;;  %v5434_v23 = vsel %vm5402_vm9, %v5401_v40, %v17717_v55  ;;  %v5654_v11 = vmax.f32 %v5652_v15, %v5653_v47  ;;  %9139 = vmatpush1.bf16.msra.mxu0 %v15299_v27  ;;  %v15316_v27 = vld [vmem:[#allocation8 + $0x484] ss:$24 sps:$4 sm:$0xff]  }
 0x3b9   :  { %v5664_v6 = vmax.f32 %v5534_v52, %v5574_v3  ;;  %v5537_v38 = vmax.f32 %v5505_v22, 0.0  ;;  %9085 = vmatprep.mubr.bf16.mxu0 %v15896_v42  ;;  %v5538_v29 = vmax.f32 %v5506_v5, 0.0  ;;  %v5464_v39 = vadd.f32 %v5404_v14, %v16728_v31  ;;  %11789 = vmatpush1.bf16.msra.mxu1 %v15302_v35  ;;  %v15311_v40 = vld [vmem:[#allocation5 + $0xdc0] ss:$72 sps:$4 sm:$0xff]   ;;  %v15322_v3 = vld [vmem:[#allocation8 + $0x4b4] ss:$24 sps:$4 sm:$0xff]  }
 0x3ba   :  { %v5508_v63 = vadd.f32 %v16758_v19, %v5465_v53  ;;  %v5466_v60 = vadd.f32 %v5434_v23, %v16730_v50  ;;  %9140 = vmatprep.subr.bf16.mxu0 %v15307_v48  ;;  %v5648_v54 = vrot.slane %v17074_v2, 1  ;;  %v5655_v15 = vrot.slane %v5654_v11, 1  ;;  %11790 = vmatprep.subr.bf16.mxu1 %v15310_v59  ;;  %v15314_v35 = vld [vmem:[#allocation8 + $0x480] ss:$24 sps:$4 sm:$0xff]  }
 0x3bb   :  { %v5665_v52 = vrot.slane %v5664_v6, 4  ;;  %v5575_v19 = vsel %vm5543_vm10, %v5537_v38, 0.0  ;;  %v5507_v33 = vadd.f32 %v16761_v13, %v5464_v39  ;;  %v5661_v48 = vmax.f32 %v5659_v12, %v5660_v18  ;;  %v15317_v38 = vld [vmem:[#allocation5 + $0xe50] ss:$72 sps:$4 sm:$0xff]  }
 0x3bc   :  { %v5540_v25 = vmax.f32 %v5508_v63, 0.0  ;;  %v5671_v4 = vmax.f32 %v5535_v34, %v5575_v19  ;;  %v5509_v31 = vadd.f32 %v16761_v13, %v5466_v60  ;;  %v5649_v50 = vmax.f32 %v17074_v2, %v5648_v54  ;;  %9141 = vmatpush1.bf16.msra.mxu0 %v15305_v7  ;;  %v15319_v13 = vld [vmem:[#allocation5 + $0xe54] ss:$72 sps:$4 sm:$0xff]  }
 0x3bd   :  { %v5666_v0 = vmax.f32 %v5664_v6, %v5665_v52  ;;  %v9928_v47 = vsel %vm9882_vm2, %v16926_v62, %v16874_v16  ;;  %v5539_v53 = vmax.f32 %v5507_v33, 0.0  ;;  %11791 = vmatpush1.bf16.msra.mxu1 %v15308_v32  ;;  %9142 = vmatprep.subr.bf16.mxu0 %v15313_v9  ;;  %v5662_v5 = vrot.slane %v5661_v48, 1  ;;  %v15897_v62 = vld [vmem:[#allocation2 + $0xc0] ss:$24 sps:$4 sm:$0xff]   ;;  %v15898_v63 = vld [vmem:[#allocation2 + $0xf4] ss:$24 sps:$4 sm:$0xff]  }
 0x3be   :  { %v5578_v10 = vsel %vm5543_vm10, %v5540_v25, 0.0  ;;  %v5672_v22 = vrot.slane %v5671_v4, 4  ;;  %v5541_v59 = vmax.f32 %v5509_v31, 0.0  ;;  %11792 = vmatprep.subr.bf16.mxu1 %v15316_v27  ;;  %v9929_v14 = vsel %vm9884_vm3, %v16984_v24, %v9928_v47  ;;  %v15320_v24 = vld [vmem:[#allocation8 + $0x4b0] ss:$24 sps:$4 sm:$0xff]  }
 0x3bf   :  { %v5678_v34 = vmax.f32 %v5538_v29, %v5578_v10  ;;  %v5667_v2 = vrot.slane %v5666_v0, 2  ;;  %v5656_v55 = vmax.f32 %v5654_v11, %v5655_v15  ;;  %9086 = vmatmul.mubr.bf16.gmra.mrb[144].mxu0 %v15897_v62  ;;  %v9930_v23 = vsel %vm9886_vm4, %v17048_v51, %v9929_v14  ;;  %v15325_v11 = vld [vmem:[#allocation5 + $0xee4] ss:$72 sps:$4 sm:$0xff]   ;;  %v15343_v62 = vld [vmem:[#allocation5 + $0x1094] ss:$72 sps:$4 sm:$0xff]  }
 0x3c0   :  { %v5673_v12 = vmax.f32 %v5671_v4, %v5672_v22  ;;  %v5579_v16 = vsel %vm5543_vm10, %v5541_v59, 0.0  ;;  %9143 = vmatpush1.bf16.msra.mxu0 %v15311_v40  ;;  %9095 = vmatprep.mubr.bf16.mxu0 %v15898_v63  ;;  %v5663_v7 = vmax.f32 %v5661_v48, %v5662_v5  ;;  %v9931_v39 = vsel %vm9888_vm5, %v5649_v50, %v9930_v23  ;;  %v15328_v32 = vld [vmem:[#allocation8 + $0x4e4] ss:$24 sps:$4 sm:$0xff]   ;;  %v15331_v50 = vld [vmem:[#allocation5 + $0xf74] ss:$72 sps:$4 sm:$0xff]  }
 0x3c1   :  { %v5679_v18 = vrot.slane %v5678_v34, 4  ;;  %v5668_v45 = vmax.f32 %v5666_v0, %v5667_v2  ;;  %v5685_v6 = vmax.f32 %v5539_v53, %v5579_v16  ;;  %11793 = vmatpush1.bf16.msra.mxu1 %v15314_v35  ;;  %9144 = vmatprep.subr.bf16.mxu0 %v15319_v13  ;;  %v9921_v60 = vsel %vm9882_vm2, %v16920_v49, %v16870_v28  ;;  %v15323_v4 = vld [vmem:[#allocation5 + $0xee0] ss:$72 sps:$4 sm:$0xff]   ;;  %v15334_v40 = vld [vmem:[#allocation8 + $0x514] ss:$24 sps:$4 sm:$0xff]  }
 0x3c2   :  { %v5674_v29 = vrot.slane %v5673_v12, 2  ;;  %11794 = vmatprep.subr.bf16.mxu1 %v15322_v3  ;;  %v9932_v9 = vsel %vm9890_vm6, %v5663_v7, %v9931_v39  ;;  %v9922_v15 = vsel %vm9884_vm3, %v16977_v41, %v9921_v60  ;;  %v15326_v49 = vld [vmem:[#allocation8 + $0x4e0] ss:$24 sps:$4 sm:$0xff]   ;;  %v15332_v59 = vld [vmem:[#allocation8 + $0x510] ss:$24 sps:$4 sm:$0xff]  }
 0x3c3   :  { %v5680_v42 = vmax.f32 %v5678_v34, %v5679_v18  ;;  %v5686_v51 = vrot.slane %v5685_v6, 4  ;;  %v5669_v54 = vrot.slane %v5668_v45, 1  ;;  %v9923_v25 = vsel %vm9886_vm4, %v17035_v61, %v9922_v15  ;;  %v15899_v35 = vld [vmem:[#allocation2 + $0xf0] ss:$24 sps:$4 sm:$0xff]   ;;  %v15900_v34 = vld [vmem:[#allocation2 + $0x124] ss:$24 sps:$4 sm:$0xff]  }
 0x3c4   :  { %v5675_v19 = vmax.f32 %v5673_v12, %v5674_v29  ;;  %9145 = vmatpush1.bf16.msra.mxu0 %v15317_v38  ;;  %v9924_v28 = vsel %vm9888_vm5, %v17082_v43, %v9923_v25  ;;  %v15329_v43 = vld [vmem:[#allocation5 + $0xf70] ss:$72 sps:$4 sm:$0xff]   ;;  %v15337_v13 = vld [vmem:[#allocation5 + $0x1004] ss:$72 sps:$4 sm:$0xff]   ;;  %v15335_v12 = vld [vmem:[#allocation5 + $0x1000] ss:$72 sps:$4 sm:$0xff]  }
 0x3c5   :  { %v5681_v52 = vrot.slane %v5680_v42, 2  ;;  %v5687_v27 = vmax.f32 %v5685_v6, %v5686_v51  ;;  %v5670_v33 = vmax.f32 %v5668_v45, %v5669_v54  ;;  %11795 = vmatpush1.bf16.msra.mxu1 %v15320_v24  ;;  %9146 = vmatprep.subr.bf16.mxu0 %v15325_v11  ;;  %v9925_v41 = vsel %vm9890_vm6, %v5656_v55, %v9924_v28  ;;  %v15340_v5 = vld [vmem:[#allocation8 + $0x544] ss:$24 sps:$4 sm:$0xff]   ;;  %v15338_v18 = vld [vmem:[#allocation8 + $0x540] ss:$24 sps:$4 sm:$0xff]  }
 0x3c6   :  { %v5676_v31 = vrot.slane %v5675_v19, 1  ;;  %11796 = vmatprep.subr.bf16.mxu1 %v15328_v32  ;;  %v15346_v23 = vld [vmem:[#allocation8 + $0x574] ss:$24 sps:$4 sm:$0xff]   ;;  %v15344_v7 = vld [vmem:[#allocation8 + $0x570] ss:$24 sps:$4 sm:$0xff]  }
 0x3c7   :  { %v5682_v0 = vmax.f32 %v5680_v42, %v5681_v52  ;;  %v5688_v10 = vrot.slane %v5687_v27, 2  ;;  %v9926_v61 = vsel %vm9892_vm7, %v5670_v33, %v9925_v41  ;;  %9096 = vmatmul.mubr.bf16.gmra.mrb[148].mxu0 %v15899_v35  ;;  %v15901_v6 = vld [vmem:[#allocation2 + $0x120] ss:$24 sps:$4 sm:$0xff]   ;;  %v15902_v63 = vld [vmem:[#allocation2 + $0x154] ss:$24 sps:$4 sm:$0xff]  }
 0x3c8   :  { %v5677_v48 = vmax.f32 %v5675_v19, %v5676_v31  ;;  %9147 = vmatpush1.bf16.msra.mxu0 %v15323_v4  ;;  %9105 = vmatprep.mubr.bf16.mxu0 %v15900_v34  ;;  %v15341_v38 = vld [vmem:[#allocation5 + $0x1090] ss:$72 sps:$4 sm:$0xff]   ;;  %v15349_v42 = vld [vmem:[#allocation5 + $0x1124] ss:$72 sps:$4 sm:$0xff]   ;;  %v15347_v11 = vld [vmem:[#allocation5 + $0x1120] ss:$72 sps:$4 sm:$0xff]  }
 0x3c9   :  { %v5683_v47 = vrot.slane %v5682_v0, 1  ;;  %v5689_v22 = vmax.f32 %v5687_v27, %v5688_v10  ;;  %11797 = vmatpush1.bf16.msra.mxu1 %v15326_v49  ;;  %9148 = vmatprep.subr.bf16.mxu0 %v15331_v50  ;;  %v15352_v24 = vld [vmem:[#allocation8 + $0x5a4] ss:$24 sps:$4 sm:$0xff]   ;;  %v15350_v29 = vld [vmem:[#allocation8 + $0x5a0] ss:$24 sps:$4 sm:$0xff]  }
 0x3ca   :  { %v9933_v53 = vsel %vm9892_vm7, %v5677_v48, %v9932_v9  ;;  %11798 = vmatprep.subr.bf16.mxu1 %v15334_v40  ;;  %v15355_v39 = vld [vmem:[#allocation5 + $0x11b4] ss:$72 sps:$4 sm:$0xff]   ;;  %v15903_v51 = vld [vmem:[#allocation2 + $0x150] ss:$24 sps:$4 sm:$0xff]   ;;  %v15904_v9 = vld [vmem:[#allocation2 + $0xc] ss:$24 sps:$4 sm:$0xff]  }
 0x3cb   :  { %v5684_v2 = vmax.f32 %v5682_v0, %v5683_v47  ;;  %v5690_v3 = vrot.slane %v5689_v22, 1  ;;  %v15358_v60 = vld [vmem:[#allocation8 + $0x5d4] ss:$24 sps:$4 sm:$0xff]   ;;  %v15356_v54 = vld [vmem:[#allocation8 + $0x5d0] ss:$24 sps:$4 sm:$0xff]  }
 0x3cc   :  { %9149 = vmatpush1.bf16.msra.mxu0 %v15329_v43  ;;  %v15353_v32 = vld [vmem:[#allocation5 + $0x11b0] ss:$72 sps:$4 sm:$0xff]   ;;  %v15361_v15 = vld [vmem:[#allocation5 + $0x1244] ss:$72 sps:$4 sm:$0xff]   ;;  %v15359_v52 = vld [vmem:[#allocation5 + $0x1240] ss:$72 sps:$4 sm:$0xff]  }
 0x3cd   :  { %v9927_v14 = vsel %vm9894_vm8, %v5684_v2, %v9926_v61  ;;  %v5691_v55 = vmax.f32 %v5689_v22, %v5690_v3  ;;  %11799 = vmatpush1.bf16.msra.mxu1 %v15332_v59  ;;  %9150 = vmatprep.subr.bf16.mxu0 %v15337_v13  ;;  %v15364_v19 = vld [vmem:[#allocation5 + $0x12d4] ss:$72 sps:$4 sm:$0xff]   ;;  %v15905_v27 = vld [vmem:[#allocation2 + $0x8] ss:$24 sps:$4 sm:$0xff]   ;;  %v15362_v4 = vld [vmem:[#allocation5 + $0x12d0] ss:$72 sps:$4 sm:$0xff]  }
 0x3ce   :  { %11800 = vmatprep.subr.bf16.mxu1 %v15340_v5  ;;  %v17148_v25 = vpack.c.bf16 %v9927_v14, %v9927_v14  ;;  %v15906_v33 = vld [vmem:[#allocation2 + $0x3c] ss:$24 sps:$4 sm:$0xff]   ;;  %v15367_v28 = vld [vmem:[#allocation5 + $0x1364] ss:$72 sps:$4 sm:$0xff]   ;;  %v15365_v49 = vld [vmem:[#allocation5 + $0x1360] ss:$72 sps:$4 sm:$0xff]  }
 0x3cf   :  { %v9934_v16 = vsel %vm9894_vm8, %v5691_v55, %v9933_v53  ;;  %9106 = vmatmul.mubr.bf16.gmra.mrb[152].mxu0 %v15901_v6  ;;  %v15370_v31 = vld [vmem:[#allocation5 + $0x13f4] ss:$72 sps:$4 sm:$0xff]   ;;  %v15907_v50 = vld [vmem:[#allocation2 + $0x38] ss:$24 sps:$4 sm:$0xff]   ;;  %v15908_v41 = vld [vmem:[#allocation2 + $0x6c] ss:$24 sps:$4 sm:$0xff]  }
 0x3d0   :  { %v17145_v45 = vpack.c.bf16 %v9934_v16, %v9934_v16  ;;  %9151 = vmatpush1.bf16.msra.mxu0 %v15335_v12  ;;  %9115 = vmatprep.mubr.bf16.mxu0 %v15902_v63  ;;  %v15368_v0 = vld [vmem:[#allocation5 + $0x13f0] ss:$72 sps:$4 sm:$0xff]   ;;  %v15373_v10 = vld [vmem:[#allocation5 + $0x1484] ss:$72 sps:$4 sm:$0xff]   ;;  %v15371_v40 = vld [vmem:[#allocation5 + $0x1480] ss:$72 sps:$4 sm:$0xff]  }
 0x3d1   :  { %11801 = vmatpush1.bf16.msra.mxu1 %v15338_v18  ;;  %9152 = vmatprep.subr.bf16.mxu0 %v15343_v62  ;;  %v15376_v61 = vld [vmem:[#allocation5 + $0x1514] ss:$72 sps:$4 sm:$0xff]   ;;  %v15909_v35 = vld [vmem:[#allocation2 + $0x68] ss:$24 sps:$4 sm:$0xff]   ;;  %v15374_v48 = vld [vmem:[#allocation5 + $0x1510] ss:$72 sps:$4 sm:$0xff]  }
 0x3d2   :  { %11808 = vmatprep.mubr.bf16.mxu1 %v17145_v45  ;;  %11802 = vmatprep.subr.bf16.mxu1 %v15346_v23  ;;  %v15910_v47 = vld [vmem:[#allocation2 + $0x9c] ss:$24 sps:$4 sm:$0xff]   ;;  %v15379_v22 = vld [vmem:[#allocation5 + $0x15a4] ss:$72 sps:$4 sm:$0xff]   ;;  %v15377_v43 = vld [vmem:[#allocation5 + $0x15a0] ss:$72 sps:$4 sm:$0xff]  }
 0x3d3   :  { %v15382_v34 = vld [vmem:[#allocation5 + $0x1634] ss:$72 sps:$4 sm:$0xff]   ;;  %v15911_v53 = vld [vmem:[#allocation2 + $0x98] ss:$24 sps:$4 sm:$0xff]   ;;  %v15912_v13 = vld [vmem:[#allocation2 + $0xcc] ss:$24 sps:$4 sm:$0xff]  }
 0x3d4   :  { %9153 = vmatpush1.bf16.msra.mxu0 %v15341_v38  ;;  %v15380_v59 = vld [vmem:[#allocation5 + $0x1630] ss:$72 sps:$4 sm:$0xff]   ;;  %v15385_v2 = vld [vmem:[#allocation5 + $0x16c4] ss:$72 sps:$4 sm:$0xff]   ;;  %v15383_v3 = vld [vmem:[#allocation5 + $0x16c0] ss:$72 sps:$4 sm:$0xff]  }
 0x3d5   :  { %11803 = vmatpush1.bf16.msra.mxu1 %v15344_v7  ;;  %9154 = vmatprep.subr.bf16.mxu0 %v15349_v42  ;;  %v15388_v5 = vld [vmem:[#allocation5 + $0x1754] ss:$72 sps:$4 sm:$0xff]   ;;  %v15913_v14 = vld [vmem:[#allocation2 + $0xc8] ss:$24 sps:$4 sm:$0xff]   ;;  %v15386_v55 = vld [vmem:[#allocation5 + $0x1750] ss:$72 sps:$4 sm:$0xff]  }
 0x3d6   :  { %11804 = vmatprep.subr.bf16.mxu1 %v15352_v24  ;;  %v15914_v12 = vld [vmem:[#allocation2 + $0xfc] ss:$24 sps:$4 sm:$0xff]   ;;  %v15391_v18 = vld [vmem:[#allocation5 + $0x17e4] ss:$72 sps:$4 sm:$0xff]   ;;  %v15389_v16 = vld [vmem:[#allocation5 + $0x17e0] ss:$72 sps:$4 sm:$0xff]  }
 0x3d7   :  { %9116 = vmatmul.mubr.bf16.gmra.mrb[156].mxu0 %v15903_v51  ;;  %v15394_v62 = vld [vmem:[#allocation5 + $0x1874] ss:$72 sps:$4 sm:$0xff]   ;;  %v15915_v23 = vld [vmem:[#allocation2 + $0xf8] ss:$24 sps:$4 sm:$0xff]   ;;  %v15916_v38 = vld [vmem:[#allocation2 + $0x12c] ss:$24 sps:$4 sm:$0xff]  }
 0x3d8   :  { %9155 = vmatpush1.bf16.msra.mxu0 %v15347_v11  ;;  %9158 = vmatprep.mubr.bf16.mxu0 %v15904_v9  ;;  %v15392_v6 = vld [vmem:[#allocation5 + $0x1870] ss:$72 sps:$4 sm:$0xff]   ;;  %v15397_v63 = vld [vmem:[#allocation5 + $0x1904] ss:$72 sps:$4 sm:$0xff]   ;;  %v15395_v7 = vld [vmem:[#allocation5 + $0x1900] ss:$72 sps:$4 sm:$0xff]  }
 0x3d9   :  { %11805 = vmatpush1.bf16.msra.mxu1 %v15350_v29  ;;  %9156 = vmatprep.subr.bf16.mxu0 %v15355_v39  ;;  %v15400_v42 = vld [vmem:[#allocation5 + $0x1994] ss:$72 sps:$4 sm:$0xff]   ;;  %v15917_v24 = vld [vmem:[#allocation2 + $0x128] ss:$24 sps:$4 sm:$0xff]   ;;  %v15398_v11 = vld [vmem:[#allocation5 + $0x1990] ss:$72 sps:$4 sm:$0xff]  }
 0x3da   :  { %11806 = vmatprep.subr.bf16.mxu1 %v15358_v60  ;;  %v15918_v29 = vld [vmem:[#allocation2 + $0x15c] ss:$24 sps:$4 sm:$0xff]   ;;  %v15403_v39 = vld [vmem:[#allocation5 + $0x1a24] ss:$72 sps:$4 sm:$0xff]   ;;  %v15401_v60 = vld [vmem:[#allocation5 + $0x1a20] ss:$72 sps:$4 sm:$0xff]  }
 0x3db   :  { %v15406_v51 = vld [vmem:[#allocation5 + $0x1ab4] ss:$72 sps:$4 sm:$0xff]   ;;  %v15404_v9 = vld [vmem:[#allocation5 + $0x1ab0] ss:$72 sps:$4 sm:$0xff]  }
 0x3dc   :  { %9157 = vmatpush1.bf16.msra.mxu0 %v15353_v32  ;;  %v15919_v32 = vld [vmem:[#allocation2 + $0x158] ss:$24 sps:$4 sm:$0xff]  }
 0x3dd   :  { %11807 = vmatpush1.bf16.msra.mxu1 %v15356_v54  ;;  %9239 = vmatprep.subr.bf16.mxu0 %v15361_v15  ;;  %v15920_v54 = vld [vmem:[#allocation2 + $0x14] ss:$24 sps:$4 sm:$0xff]  }
 0x3de   :  { %v15409_v15 = vld [vmem:[#allocation8 + $0xc] ss:$24 sps:$4 sm:$0xff]  }
 0x3df   :  { %9159 = vmatmul.mubr.bf16.vlgmr.msra.gmra.mrb[128].mxu0 %v15905_v27  ;;  %v15921_v27 = vld [vmem:[#allocation2 + $0x10] ss:$24 sps:$4 sm:$0xff]  }
 0x3e0   :  { %11809 = vmatmul.mubr.bf16.vlgmr.msra.gmra.mrb[128].mxu1 %v17148_v25  ;;  %9240 = vmatpush1.bf16.msra.mxu0 %v15359_v52  ;;  %v15407_v52 = vld [vmem:[#allocation8 + $0x8] ss:$24 sps:$4 sm:$0xff]  }
 0x3e1   :  { %9241 = vmatprep.subr.bf16.mxu0 %v15364_v19  ;;  %9168 = vmatprep.mubr.bf16.mxu0 %v15906_v33  ;;  %v15412_v19 = vld [vmem:[#allocation8 + $0x3c] ss:$24 sps:$4 sm:$0xff]  }
 0x3e2   :  { %v15922_v33 = vld [vmem:[#allocation2 + $0x44] ss:$24 sps:$4 sm:$0xff]  }
 0x3e4   :  { %9242 = vmatpush1.bf16.msra.mxu0 %v15362_v4  ;;  %v15410_v4 = vld [vmem:[#allocation8 + $0x38] ss:$24 sps:$4 sm:$0xff]  }
 0x3e5   :  { %9243 = vmatprep.subr.bf16.mxu0 %v15367_v28  ;;  %v15415_v28 = vld [vmem:[#allocation8 + $0x6c] ss:$24 sps:$4 sm:$0xff]  }
 0x3e7   :  { %9169 = vmatmul.mubr.bf16.gmra.mrb[132].mxu0 %v15907_v50  ;;  %v15923_v50 = vld [vmem:[#allocation2 + $0x40] ss:$24 sps:$4 sm:$0xff]  }
 0x3e8   :  { %9244 = vmatpush1.bf16.msra.mxu0 %v15365_v49  ;;  %9178 = vmatprep.mubr.bf16.mxu0 %v15908_v41  ;;  %v15413_v49 = vld [vmem:[#allocation8 + $0x68] ss:$24 sps:$4 sm:$0xff]  }
 0x3e9   :  { %9245 = vmatprep.subr.bf16.mxu0 %v15370_v31  ;;  %v15418_v31 = vld [vmem:[#allocation8 + $0x9c] ss:$24 sps:$4 sm:$0xff]   ;;  %v15924_v41 = vld [vmem:[#allocation2 + $0x74] ss:$24 sps:$4 sm:$0xff]  }
 0x3ec   :  { %9246 = vmatpush1.bf16.msra.mxu0 %v15368_v0  ;;  %v15416_v0 = vld [vmem:[#allocation8 + $0x98] ss:$24 sps:$4 sm:$0xff]  }
 0x3ed   :  { %9247 = vmatprep.subr.bf16.mxu0 %v15373_v10  ;;  %v15421_v10 = vld [vmem:[#allocation8 + $0xcc] ss:$24 sps:$4 sm:$0xff]  }
 0x3ef   :  { %9179 = vmatmul.mubr.bf16.gmra.mrb[136].mxu0 %v15909_v35  ;;  %v15925_v35 = vld [vmem:[#allocation2 + $0x70] ss:$24 sps:$4 sm:$0xff]  }
 0x3f0   :  { %9248 = vmatpush1.bf16.msra.mxu0 %v15371_v40  ;;  %9188 = vmatprep.mubr.bf16.mxu0 %v15910_v47  ;;  %v15419_v40 = vld [vmem:[#allocation8 + $0xc8] ss:$24 sps:$4 sm:$0xff]  }
 0x3f1   :  { %9249 = vmatprep.subr.bf16.mxu0 %v15376_v61  ;;  %v15424_v61 = vld [vmem:[#allocation8 + $0xfc] ss:$24 sps:$4 sm:$0xff]  }
 0x3f2   :  { %v15926_v47 = vld [vmem:[#allocation2 + $0xa4] ss:$24 sps:$4 sm:$0xff]  }
 0x3f4   :  { %9250 = vmatpush1.bf16.msra.mxu0 %v15374_v48  ;;  %v15422_v48 = vld [vmem:[#allocation8 + $0xf8] ss:$24 sps:$4 sm:$0xff]  }
 0x3f5   :  { %9251 = vmatprep.subr.bf16.mxu0 %v15379_v22  ;;  %v15427_v22 = vld [vmem:[#allocation8 + $0x12c] ss:$24 sps:$4 sm:$0xff]  }
 0x3f7   :  { %9189 = vmatmul.mubr.bf16.gmra.mrb[140].mxu0 %v15911_v53 }
 0x3f8   :  { %9252 = vmatpush1.bf16.msra.mxu0 %v15377_v43  ;;  %9198 = vmatprep.mubr.bf16.mxu0 %v15912_v13 }
 0x3f9   :  { %9253 = vmatprep.subr.bf16.mxu0 %v15382_v34 }
 0x3fc   :  { %9254 = vmatpush1.bf16.msra.mxu0 %v15380_v59 }
 0x3fd   :  { %9255 = vmatprep.subr.bf16.mxu0 %v15385_v2  ;;  %v15425_v2 = vld [vmem:[#allocation8 + $0x128] ss:$24 sps:$4 sm:$0xff]  }
 0x3ff   :  { %9199 = vmatmul.mubr.bf16.gmra.mrb[144].mxu0 %v15913_v14 }
 0x400   :  { %9256 = vmatpush1.bf16.msra.mxu0 %v15383_v3  ;;  %9208 = vmatprep.mubr.bf16.mxu0 %v15914_v12 }
 0x401   :  { %9257 = vmatprep.subr.bf16.mxu0 %v15388_v5 }
 0x404   :  { %9258 = vmatpush1.bf16.msra.mxu0 %v15386_v55  ;;  %v15430_v55 = vld [vmem:[#allocation8 + $0x15c] ss:$24 sps:$4 sm:$0xff]  }
 0x405   :  { %9259 = vmatprep.subr.bf16.mxu0 %v15391_v18 }
 0x407   :  { %9209 = vmatmul.mubr.bf16.gmra.mrb[148].mxu0 %v15915_v23 }
 0x408   :  { %9260 = vmatpush1.bf16.msra.mxu0 %v15389_v16  ;;  %9218 = vmatprep.mubr.bf16.mxu0 %v15916_v38 }
 0x409   :  { %9261 = vmatprep.subr.bf16.mxu0 %v15394_v62 }
 0x40c   :  { %9262 = vmatpush1.bf16.msra.mxu0 %v15392_v6 }
 0x40d   :  { %9263 = vmatprep.subr.bf16.mxu0 %v15397_v63 }
 0x40f   :  { %9219 = vmatmul.mubr.bf16.gmra.mrb[152].mxu0 %v15917_v24  ;;  %v15927_v24 = vld [vmem:[#allocation2 + $0xa0] ss:$24 sps:$4 sm:$0xff]  }
 0x410   :  { %9264 = vmatpush1.bf16.msra.mxu0 %v15395_v7  ;;  %9228 = vmatprep.mubr.bf16.mxu0 %v15918_v29 }
 0x411   :  { %9265 = vmatprep.subr.bf16.mxu0 %v15400_v42 }
 0x414   :  { %9266 = vmatpush1.bf16.msra.mxu0 %v15398_v11 }
 0x415   :  { %9267 = vmatprep.subr.bf16.mxu0 %v15403_v39 }
 0x417   :  { %9229 = vmatmul.mubr.bf16.gmra.mrb[156].mxu0 %v15919_v32 }
 0x418   :  { %9268 = vmatpush1.bf16.msra.mxu0 %v15401_v60  ;;  %9271 = vmatprep.mubr.bf16.mxu0 %v15920_v54  ;;  %v15428_v60 = vld [vmem:[#allocation8 + $0x158] ss:$24 sps:$4 sm:$0xff]  }
 0x419   :  { %9269 = vmatprep.subr.bf16.mxu0 %v15406_v51  ;;  %v15928_v51 = vld [vmem:[#allocation2 + $0xd4] ss:$24 sps:$4 sm:$0xff]  }
 0x41c   :  { %9270 = vmatpush1.bf16.msra.mxu0 %v15404_v9  ;;  %v15433_v9 = vld [vmem:[#allocation8 + $0x18c] ss:$24 sps:$4 sm:$0xff]  }
 0x41d   :  { %11858 = vmatprep.subr.bf16.mxu0 %v15409_v15 }
 0x41f   :  { %9272 = vmatmul.mubr.bf16.vlgmr.msra.gmra.mrb[128].mxu0 %v15921_v27 }
 0x420   :  { %11859 = vmatpush1.bf16.msra.mxu0 %v15407_v52  ;;  %9281 = vmatprep.mubr.bf16.mxu0 %v15922_v33 }
 0x421   :  { %11860 = vmatprep.subr.bf16.mxu0 %v15412_v19 }
 0x424   :  { %11861 = vmatpush1.bf16.msra.mxu0 %v15410_v4 }
 0x425   :  { %11862 = vmatprep.subr.bf16.mxu0 %v15415_v28 }
 0x427   :  { %9282 = vmatmul.mubr.bf16.gmra.mrb[132].mxu0 %v15923_v50 }
 0x428   :  { %11863 = vmatpush1.bf16.msra.mxu0 %v15413_v49  ;;  %9291 = vmatprep.mubr.bf16.mxu0 %v15924_v41 }
 0x429   :  { %11864 = vmatprep.subr.bf16.mxu0 %v15418_v31 }
 0x42c   :  { %11865 = vmatpush1.bf16.msra.mxu0 %v15416_v0  ;;  %v15431_v0 = vld [vmem:[#allocation8 + $0x188] ss:$24 sps:$4 sm:$0xff]  }
 0x42d   :  { %11866 = vmatprep.subr.bf16.mxu0 %v15421_v10 }
 0x42f   :  { %9292 = vmatmul.mubr.bf16.gmra.mrb[136].mxu0 %v15925_v35  ;;  %v17151_v43 = vpop.f32.mrb[96].mxu0 }
 0x430   :  { %11867 = vmatpush1.bf16.msra.mxu0 %v15419_v40  ;;  %9301 = vmatprep.mubr.bf16.mxu0 %v15926_v47  ;;  %v17153_v34 = vpop.f32.mrb[96].mxu1  ;;  %v17155_v53 = vpop.f32.mrb[97].mxu0  ;;  %v9352_v12 = vrot.slane %v17151_v43, 1 }
 0x431   :  { %11868 = vmatprep.subr.bf16.mxu0 %v15424_v61  ;;  %v17681_v59 = vrot.slane %v17153_v34, 2  ;;  %v17158_v13 = vpop.f32.mrb[97].mxu1  ;;  %v8599_v3 = vpop.f32.mrb[98].mxu0  ;;  %v17682_v6 = vrot.slane %v17155_v53, 1 }
 0x432   :  { %v17680_v5 = vrot.slane %v17158_v13, 2  ;;  %v8938_v14 = vpop.f32.mrb[98].mxu1  ;;  %v9354_v18 = vrot.slane %v8599_v3, 1  ;;  %v8601_v16 = vpop.f32.mrb[99].mxu0 }
 0x433   :  { %v9450_v62 = vrot.slane %v8938_v14, 2  ;;  %v8940_v23 = vpop.f32.mrb[99].mxu1  ;;  %v9355_v38 = vrot.slane %v8601_v16, 1  ;;  %v17718_v14 = vld [vmem:[#allocation18_spill] sm:$0xff] }
 0x434   :  { %11869 = vmatpush1.bf16.msra.mxu0 %v15422_v48  ;;  %v9451_v63 = vrot.slane %v8940_v23, 2  ;;  %v9412_v7 = vsel %vm2239_vm0, %v9352_v12, %v9354_v18  ;;  %v15436_v48 = vld [vmem:[#allocation8 + $0x1bc] ss:$24 sps:$4 sm:$0xff]   ;;  %v15929_v23 = vld [vmem:[#allocation2 + $0xd0] ss:$24 sps:$4 sm:$0xff]  }
 0x435   :  { %11870 = vmatprep.subr.bf16.mxu0 %v15427_v22  ;;  %v9508_v42 = vsel %vm5402_vm9, %v17681_v59, %v9450_v62  ;;  %v9416_v11 = vadd.f32 %v9412_v7, %v16737_v58  ;;  %v9413_v29 = vsel %vm2239_vm0, %v17682_v6, %v9355_v38  ;;  %v17719_v7 = vld [vmem:[#allocation19_spill] sm:$0xff]  ;;  %v17737_v6 = vld [vmem:[#allocation37_spill] sm:$0xff] }
 0x436   :  { %v9509_v39 = vsel %vm5402_vm9, %v17680_v5, %v9451_v63  ;;  %v9417_v32 = vadd.f32 %v9413_v29, %v16739_v46 }
 0x437   :  { %9302 = vmatmul.mubr.bf16.gmra.mrb[140].mxu0 %v15927_v24  ;;  %v17181_v54 = vadd.f32 %v9508_v42, %v9416_v11  ;;  %v8605_v58 = vpop.f32.mrb[100].mxu0  ;;  %v15930_v24 = vld [vmem:[#allocation2 + $0x104] ss:$24 sps:$4 sm:$0xff]  }
 0x438   :  { %11871 = vmatpush1.bf16.msra.mxu0 %v15425_v2  ;;  %9311 = vmatprep.mubr.bf16.mxu0 %v15928_v51  ;;  %v8944_v15 = vpop.f32.mrb[100].mxu1  ;;  %v17183_v52 = vadd.f32 %v9509_v39, %v9417_v32  ;;  %v9356_v19 = vrot.slane %v8605_v58, 1  ;;  %v8607_v27 = vpop.f32.mrb[101].mxu0  ;;  %v17720_v11 = vld [vmem:[#allocation20_spill] sm:$0xff]  ;;  %v15439_v51 = vld [vmem:[#allocation8 + $0x1ec] ss:$24 sps:$4 sm:$0xff]  }
 0x439   :  { %11872 = vmatprep.subr.bf16.mxu0 %v15430_v55  ;;  %v9452_v4 = vrot.slane %v8944_v15, 2  ;;  %v8946_v33 = vpop.f32.mrb[101].mxu1  ;;  %v9357_v28 = vrot.slane %v8607_v27, 1  ;;  %v8609_v49 = vpop.f32.mrb[102].mxu0 }
 0x43a   :  { %v9453_v31 = vrot.slane %v8946_v33, 2  ;;  %v8948_v50 = vpop.f32.mrb[102].mxu1  ;;  %v9410_v46 = vsel %vm2239_vm0, %v9354_v18, %v9356_v19  ;;  %v9358_v41 = vrot.slane %v8609_v49, 1  ;;  %v8611_v40 = vpop.f32.mrb[103].mxu0 }
 0x43b   :  { %v9506_v10 = vsel %vm5402_vm9, %v9450_v62, %v9452_v4  ;;  %v9454_v61 = vrot.slane %v8948_v50, 2  ;;  %v8950_v35 = vpop.f32.mrb[103].mxu1  ;;  %v9418_v47 = vadd.f32 %v9410_v46, %v16742_v37  ;;  %v9411_v22 = vsel %vm2239_vm0, %v9355_v38, %v9357_v28  ;;  %v15437_v46 = vld [vmem:[#allocation8 + $0x1e8] ss:$24 sps:$4 sm:$0xff]  }
 0x43c   :  { %11873 = vmatpush1.bf16.msra.mxu0 %v15428_v60  ;;  %v9359_v2 = vrot.slane %v8611_v40, 1  ;;  %v9507_v3 = vsel %vm5402_vm9, %v9451_v63, %v9453_v31  ;;  %v9419_v55 = vadd.f32 %v9411_v22, %v17718_v14  ;;  %v9408_v18 = vsel %vm2239_vm0, %v9356_v19, %v9358_v41  ;;  %v15434_v63 = vld [vmem:[#allocation8 + $0x1b8] ss:$24 sps:$4 sm:$0xff]   ;;  %v15442_v22 = vld [vmem:[#allocation8 + $0x21c] ss:$24 sps:$4 sm:$0xff]  }
 0x43d   :  { %11874 = vmatprep.subr.bf16.mxu0 %v15433_v9  ;;  %v9504_v16 = vsel %vm5402_vm9, %v9452_v4, %v9454_v61  ;;  %v9455_v62 = vrot.slane %v8950_v35, 2  ;;  %v9420_v37 = vadd.f32 %v9408_v18, %v17719_v7  ;;  %v17200_v42 = vadd.f32 %v9506_v10, %v9418_v47 }
 0x43e   :  { %v9409_v38 = vsel %vm2239_vm0, %v9357_v28, %v9359_v2  ;;  %v17205_v39 = vadd.f32 %v9507_v3, %v9419_v55  ;;  %v17721_v3 = vld [vmem:[#allocation21_spill] sm:$0xff] }
 0x43f   :  { %9312 = vmatmul.mubr.bf16.gmra.mrb[144].mxu0 %v15929_v23  ;;  %v9421_v29 = vadd.f32 %v9409_v38, %v17720_v11  ;;  %v9505_v60 = vsel %vm5402_vm9, %v9453_v31, %v9455_v62  ;;  %v17209_v32 = vadd.f32 %v9504_v16, %v9420_v37  ;;  %v8615_v9 = vpop.f32.mrb[104].mxu0  ;;  %v17722_v23 = vld [vmem:[#allocation22_spill] sm:$0xff]  ;;  %v15931_v38 = vld [vmem:[#allocation2 + $0x100] ss:$24 sps:$4 sm:$0xff]  }
 0x440   :  { %11875 = vmatpush1.bf16.msra.mxu0 %v15431_v0  ;;  %9321 = vmatprep.mubr.bf16.mxu0 %v15930_v24  ;;  %v8954_v58 = vpop.f32.mrb[104].mxu1  ;;  %v9360_v19 = vrot.slane %v8615_v9, 1  ;;  %v8617_v27 = vpop.f32.mrb[105].mxu0 }
 0x441   :  { %11876 = vmatprep.subr.bf16.mxu0 %v15436_v48  ;;  %v17211_v15 = vadd.f32 %v9505_v60, %v9421_v29  ;;  %v9456_v4 = vrot.slane %v8954_v58, 2  ;;  %v8956_v33 = vpop.f32.mrb[105].mxu1  ;;  %v9361_v28 = vrot.slane %v8617_v27, 1  ;;  %v8619_v49 = vpop.f32.mrb[106].mxu0  ;;  %v15932_v29 = vld [vmem:[#allocation2 + $0x134] ss:$24 sps:$4 sm:$0xff]  }
 0x442   :  { %v9457_v50 = vrot.slane %v8956_v33, 2  ;;  %v8958_v0 = vpop.f32.mrb[106].mxu1  ;;  %v9406_v31 = vsel %vm2239_vm0, %v9358_v41, %v9360_v19  ;;  %v9362_v10 = vrot.slane %v8619_v49, 1  ;;  %v8621_v35 = vpop.f32.mrb[107].mxu0  ;;  %v17724_v60 = vld [vmem:[#allocation24_spill] sm:$0xff] }
 0x443   :  { %v9502_v40 = vsel %vm5402_vm9, %v9454_v61, %v9456_v4  ;;  %v9458_v48 = vrot.slane %v8958_v0, 2  ;;  %v8960_v47 = vpop.f32.mrb[107].mxu1  ;;  %v9422_v14 = vadd.f32 %v9406_v31, %v17721_v3  ;;  %v9407_v55 = vsel %vm2239_vm0, %v9359_v2, %v9361_v28 }
 0x444   :  { %11877 = vmatpush1.bf16.msra.mxu0 %v15434_v63  ;;  %v9363_v18 = vrot.slane %v8621_v35, 1  ;;  %v9503_v16 = vsel %vm5402_vm9, %v9455_v62, %v9457_v50  ;;  %v9423_v41 = vadd.f32 %v9407_v55, %v17722_v23  ;;  %v9404_v7 = vsel %vm2239_vm0, %v9360_v19, %v9362_v10  ;;  %v17723_v63 = vld [vmem:[#allocation23_spill] sm:$0xff] }
 0x445   :  { %11878 = vmatprep.subr.bf16.mxu0 %v15439_v51  ;;  %v9500_v61 = vsel %vm5402_vm9, %v9456_v4, %v9458_v48  ;;  %v9459_v37 = vrot.slane %v8960_v47, 2  ;;  %v9424_v24 = vadd.f32 %v9404_v7, %v17723_v63  ;;  %v17228_v11 = vadd.f32 %v9502_v40, %v9422_v14  ;;  %v15440_v62 = vld [vmem:[#allocation8 + $0x218] ss:$24 sps:$4 sm:$0xff]   ;;  %v15445_v19 = vld [vmem:[#allocation8 + $0x24c] ss:$24 sps:$4 sm:$0xff]  }
 0x446   :  { %v9405_v2 = vsel %vm2239_vm0, %v9361_v28, %v9363_v18  ;;  %v17233_v9 = vadd.f32 %v9503_v16, %v9423_v41  ;;  %v15443_v14 = vld [vmem:[#allocation8 + $0x248] ss:$24 sps:$4 sm:$0xff]   ;;  %v15448_v7 = vld [vmem:[#allocation8 + $0x27c] ss:$24 sps:$4 sm:$0xff]  }
 0x447   :  { %9322 = vmatmul.mubr.bf16.gmra.mrb[148].mxu0 %v15931_v38  ;;  %v9425_v51 = vadd.f32 %v9405_v2, %v17724_v60  ;;  %v9501_v58 = vsel %vm5402_vm9, %v9457_v50, %v9459_v37  ;;  %v17237_v27 = vadd.f32 %v9500_v61, %v9424_v24  ;;  %v8625_v4 = vpop.f32.mrb[108].mxu0  ;;  %v17725_v61 = vld [vmem:[#allocation25_spill] sm:$0xff] }
 0x448   :  { %11879 = vmatpush1.bf16.msra.mxu0 %v15437_v46  ;;  %9331 = vmatprep.mubr.bf16.mxu0 %v15932_v29  ;;  %v8964_v33 = vpop.f32.mrb[108].mxu1  ;;  %v9364_v28 = vrot.slane %v8625_v4, 1  ;;  %v8627_v0 = vpop.f32.mrb[109].mxu0 }
 0x449   :  { %11880 = vmatprep.subr.bf16.mxu0 %v15442_v22  ;;  %v17239_v49 = vadd.f32 %v9501_v58, %v9425_v51  ;;  %v9460_v46 = vrot.slane %v8964_v33, 2  ;;  %v8966_v31 = vpop.f32.mrb[109].mxu1  ;;  %v9365_v40 = vrot.slane %v8627_v0, 1  ;;  %v8629_v35 = vpop.f32.mrb[110].mxu0  ;;  %v15933_v51 = vld [vmem:[#allocation2 + $0x130] ss:$24 sps:$4 sm:$0xff]  }
 0x44a   :  { %v9461_v47 = vrot.slane %v8966_v31, 2  ;;  %v8968_v3 = vpop.f32.mrb[110].mxu1  ;;  %v9402_v50 = vsel %vm2239_vm0, %v9362_v10, %v9364_v28  ;;  %v9366_v22 = vrot.slane %v8629_v35, 1  ;;  %v8631_v16 = vpop.f32.mrb[111].mxu0  ;;  %v17727_v58 = vld [vmem:[#allocation27_spill] sm:$0xff] }
 0x44b   :  { %v9498_v55 = vsel %vm5402_vm9, %v9458_v48, %v9460_v46  ;;  %v9462_v23 = vrot.slane %v8968_v3, 2  ;;  %v8970_v41 = vpop.f32.mrb[111].mxu1  ;;  %v9426_v38 = vadd.f32 %v9402_v50, %v17725_v61  ;;  %v9403_v63 = vsel %vm2239_vm0, %v9363_v18, %v9365_v40  ;;  %v15934_v33 = vld [vmem:[#allocation2 + $0x164] ss:$24 sps:$4 sm:$0xff]   ;;  %v15451_v31 = vld [vmem:[#allocation8 + $0x2ac] ss:$24 sps:$4 sm:$0xff]  }
 0x44c   :  { %11881 = vmatpush1.bf16.msra.mxu0 %v15440_v62  ;;  %v9367_v24 = vrot.slane %v8631_v16, 1  ;;  %v9499_v2 = vsel %vm5402_vm9, %v9459_v37, %v9461_v47  ;;  %v17726_v62 = vld [vmem:[#allocation26_spill] sm:$0xff]  ;;  %v9400_v29 = vsel %vm2239_vm0, %v9364_v28, %v9366_v22  ;;  %v9463_v60 = vrot.slane %v8970_v41, 2  ;;  %v15446_v37 = vld [vmem:[#allocation8 + $0x278] ss:$24 sps:$4 sm:$0xff]  }
 0x44d   :  { %11882 = vmatprep.subr.bf16.mxu0 %v15445_v19  ;;  %v9427_v10 = vadd.f32 %v9403_v63, %v17726_v62  ;;  %v9496_v48 = vsel %vm5402_vm9, %v9460_v46, %v9462_v23  ;;  %v9428_v19 = vadd.f32 %v9400_v29, %v17727_v58  ;;  %v17256_v4 = vadd.f32 %v9498_v55, %v9426_v38  ;;  %v17728_v58 = vld [vmem:[#allocation28_spill] sm:$0xff] }
 0x44e   :  { %v9401_v18 = vsel %vm2239_vm0, %v9365_v40, %v9367_v24  ;;  %v9497_v46 = vsel %vm5402_vm9, %v9461_v47, %v9463_v60 }
 0x44f   :  { %9332 = vmatmul.mubr.bf16.gmra.mrb[152].mxu0 %v15933_v51  ;;  %v9429_v0 = vadd.f32 %v9401_v18, %v16851_v17  ;;  %v17261_v28 = vadd.f32 %v9499_v2, %v9427_v10  ;;  %v17265_v35 = vadd.f32 %v9496_v48, %v9428_v19  ;;  %v8635_v3 = vpop.f32.mrb[112].mxu0  ;;  %v15449_v2 = vld [vmem:[#allocation8 + $0x2a8] ss:$24 sps:$4 sm:$0xff]   ;;  %v15454_v51 = vld [vmem:[#allocation8 + $0x2dc] ss:$24 sps:$4 sm:$0xff]  }
 0x450   :  { %11883 = vmatpush1.bf16.msra.mxu0 %v15443_v14  ;;  %9341 = vmatprep.mubr.bf16.mxu0 %v15934_v33  ;;  %v8974_v50 = vpop.f32.mrb[112].mxu1  ;;  %v9368_v40 = vrot.slane %v8635_v3, 1  ;;  %v8637_v14 = vpop.f32.mrb[113].mxu0 }
 0x451   :  { %11884 = vmatprep.subr.bf16.mxu0 %v15448_v7  ;;  %v17267_v55 = vadd.f32 %v9497_v46, %v9429_v0  ;;  %v9464_v16 = vrot.slane %v8974_v50, 2  ;;  %v8976_v41 = vpop.f32.mrb[113].mxu1  ;;  %v9369_v61 = vrot.slane %v8637_v14, 1  ;;  %v8639_v38 = vpop.f32.mrb[114].mxu0  ;;  %v17729_v0 = vld [vmem:[#allocation29_spill] sm:$0xff] }
 0x452   :  { %v9465_v17 = vrot.slane %v8976_v41, 2  ;;  %v8978_v63 = vpop.f32.mrb[114].mxu1  ;;  %v9398_v47 = vsel %vm2239_vm0, %v9366_v22, %v9368_v40  ;;  %v9370_v7 = vrot.slane %v8639_v38, 1  ;;  %v8641_v10 = vpop.f32.mrb[115].mxu0  ;;  %v17730_v41 = vld [vmem:[#allocation30_spill] sm:$0xff] }
 0x453   :  { %v9494_v62 = vsel %vm5402_vm9, %v9462_v23, %v9464_v16  ;;  %v9466_v29 = vrot.slane %v8978_v63, 2  ;;  %v8980_v48 = vpop.f32.mrb[115].mxu1  ;;  %v9430_v19 = vadd.f32 %v9398_v47, %v17728_v58  ;;  %v9399_v18 = vsel %vm2239_vm0, %v9367_v24, %v9369_v61  ;;  %v15457_v63 = vld [vmem:[#allocation8 + $0x30c] ss:$24 sps:$4 sm:$0xff]  }
 0x454   :  { %11885 = vmatpush1.bf16.msra.mxu0 %v15446_v37  ;;  %v9371_v37 = vrot.slane %v8641_v10, 1  ;;  %v9495_v33 = vsel %vm5402_vm9, %v9463_v60, %v9465_v17  ;;  %v9431_v22 = vadd.f32 %v9399_v18, %v17729_v0  ;;  %v9396_v46 = vsel %vm2239_vm0, %v9368_v40, %v9370_v7  ;;  %v15452_v60 = vld [vmem:[#allocation8 + $0x2d8] ss:$24 sps:$4 sm:$0xff]  }
 0x455   :  { %11886 = vmatprep.subr.bf16.mxu0 %v15451_v31  ;;  %v9492_v23 = vsel %vm5402_vm9, %v9464_v16, %v9466_v29  ;;  %v9467_v3 = vrot.slane %v8980_v48, 2  ;;  %v15935_v31 = vld [vmem:[#allocation2 + $0x160] ss:$24 sps:$4 sm:$0xff]   ;;  %v9432_v50 = vadd.f32 %v9396_v46, %v16886_v56  ;;  %v17284_v14 = vadd.f32 %v9494_v62, %v9430_v19 }
 0x456   :  { %v9397_v24 = vsel %vm2239_vm0, %v9369_v61, %v9371_v37  ;;  %v17290_v40 = vadd.f32 %v9495_v33, %v9431_v22  ;;  %v15455_v22 = vld [vmem:[#allocation8 + $0x308] ss:$24 sps:$4 sm:$0xff]  }
 0x457   :  { %9342 = vmatmul.mubr.bf16.gmra.mrb[156].mxu0 %v15935_v31  ;;  %v9433_v38 = vadd.f32 %v9397_v24, %v17730_v41  ;;  %v9493_v16 = vsel %vm5402_vm9, %v9465_v17, %v9467_v3  ;;  %v17294_v47 = vadd.f32 %v9492_v23, %v9432_v50  ;;  %v8645_v56 = vpop.f32.mrb[116].mxu0  ;;  %v15460_v24 = vld [vmem:[#allocation8 + $0x33c] ss:$24 sps:$4 sm:$0xff]  }
 0x458   :  { %11887 = vmatpush1.bf16.msra.mxu0 %v15449_v2  ;;  %11890 = vmatprep.mubr.bf16.mxu0 %v16824_v36  ;;  %v8984_v62 = vpop.f32.mrb[116].mxu1  ;;  %v9372_v61 = vrot.slane %v8645_v56, 1  ;;  %v8647_v2 = vpop.f32.mrb[117].mxu0  ;;  %v17731_v41 = vld [vmem:[#allocation31_spill] sm:$0xff] }
 0x459   :  { %11888 = vmatprep.subr.bf16.mxu0 %v15454_v51  ;;  %v17296_v10 = vadd.f32 %v9493_v16, %v9433_v38  ;;  %v9468_v48 = vrot.slane %v8984_v62, 2  ;;  %v8986_v58 = vpop.f32.mrb[117].mxu1  ;;  %v9373_v19 = vrot.slane %v8647_v2, 1  ;;  %v8649_v18 = vpop.f32.mrb[118].mxu0  ;;  %v17732_v62 = vld [vmem:[#allocation32_spill] sm:$0xff] }
 0x45a   :  { %v9469_v33 = vrot.slane %v8986_v58, 2  ;;  %v8988_v0 = vpop.f32.mrb[118].mxu1  ;;  %v9394_v17 = vsel %vm2239_vm0, %v9370_v7, %v9372_v61  ;;  %v9374_v51 = vrot.slane %v8649_v18, 1  ;;  %v8651_v23 = vpop.f32.mrb[119].mxu0 }
 0x45b   :  { %v9490_v46 = vsel %vm5402_vm9, %v9466_v29, %v9468_v48  ;;  %v9470_v31 = vrot.slane %v8988_v0, 2  ;;  %v8990_v50 = vpop.f32.mrb[119].mxu1  ;;  %v9434_v38 = vadd.f32 %v9394_v17, %v17731_v41  ;;  %v9375_v16 = vrot.slane %v8651_v23, 1  ;;  %v17734_v17 = vld [vmem:[#allocation34_spill] sm:$0xff] }
 0x45c   :  { %11889 = vmatpush1.bf16.msra.mxu0 %v15452_v60  ;;  %v9395_v60 = vsel %vm2239_vm0, %v9371_v37, %v9373_v19  ;;  %v9491_v56 = vsel %vm5402_vm9, %v9467_v3, %v9469_v33  ;;  %v9392_v2 = vsel %vm2239_vm0, %v9372_v61, %v9374_v51  ;;  %v9471_v58 = vrot.slane %v8990_v50, 2  ;;  %v15458_v3 = vld [vmem:[#allocation8 + $0x338] ss:$24 sps:$4 sm:$0xff]   ;;  %v15463_v50 = vld [vmem:[#allocation8 + $0x36c] ss:$24 sps:$4 sm:$0xff]  }
 0x45d   :  { %11899 = vmatprep.subr.bf16.mxu0 %v15457_v63  ;;  %v9435_v7 = vadd.f32 %v9395_v60, %v17732_v62  ;;  %v9488_v29 = vsel %vm5402_vm9, %v9468_v48, %v9470_v31  ;;  %v17733_v63 = vld [vmem:[#allocation33_spill] sm:$0xff]  ;;  %v17314_v0 = vadd.f32 %v9490_v46, %v9434_v38  ;;  %v9393_v37 = vsel %vm2239_vm0, %v9373_v19, %v9375_v16 }
 0x45e   :  { %v9436_v18 = vadd.f32 %v9392_v2, %v17733_v63  ;;  %v9437_v23 = vadd.f32 %v9393_v37, %v17734_v17  ;;  %v9489_v48 = vsel %vm5402_vm9, %v9469_v33, %v9471_v58  ;;  %v15461_v37 = vld [vmem:[#allocation8 + $0x368] ss:$24 sps:$4 sm:$0xff]  }
 0x45f   :  { %11891 = vmatmul.mubr.bf16.vlgmr.msra.gmra.mrb[160].mxu0 %v16790_v21  ;;  %v17320_v61 = vadd.f32 %v9491_v56, %v9435_v7  ;;  %v8655_v46 = vpop.f32.mrb[120].mxu0 }
 0x460   :  { %11900 = vmatpush1.bf16.msra.mxu0 %v15455_v22  ;;  %11931 = vmatprep.mubr.bf16.mxu0 %v17145_v45  ;;  %v17324_v41 = vadd.f32 %v9488_v29, %v9436_v18  ;;  %v8994_v38 = vpop.f32.mrb[120].mxu1  ;;  %v17326_v60 = vadd.f32 %v9489_v48, %v9437_v23  ;;  %v9376_v19 = vrot.slane %v8655_v46, 1  ;;  %v8657_v22 = vpop.f32.mrb[121].mxu0  ;;  %v15466_v48 = vld [vmem:[#allocation8 + $0x39c] ss:$24 sps:$4 sm:$0xff]  }
 0x461   :  { %11901 = vmatprep.subr.bf16.mxu0 %v15460_v24  ;;  %v9472_v62 = vrot.slane %v8994_v38, 2  ;;  %v8996_v2 = vpop.f32.mrb[121].mxu1  ;;  %v9377_v63 = vrot.slane %v8657_v22, 1  ;;  %v8659_v5 = vpop.f32.mrb[122].mxu0 }
 0x462   :  { %v9473_v56 = vrot.slane %v8996_v2, 2  ;;  %v8998_v7 = vpop.f32.mrb[122].mxu1  ;;  %v9390_v33 = vsel %vm2239_vm0, %v9374_v51, %v9376_v19  ;;  %v9378_v24 = vrot.slane %v8659_v5, 1  ;;  %v8661_v18 = vpop.f32.mrb[123].mxu0 }
 0x463   :  { %v9486_v29 = vsel %vm5402_vm9, %v9470_v31, %v9472_v62  ;;  %v9474_v17 = vrot.slane %v8998_v7, 2  ;;  %v9000_v23 = vpop.f32.mrb[123].mxu1  ;;  %v9438_v46 = vadd.f32 %v9390_v33, %v16955_v26  ;;  %v9379_v38 = vrot.slane %v8661_v18, 1  ;;  %v17735_v33 = vld [vmem:[#allocation35_spill] sm:$0xff] }
 0x464   :  { %11902 = vmatpush1.bf16.msra.mxu0 %v15458_v3  ;;  %v9391_v3 = vsel %vm2239_vm0, %v9375_v16, %v9377_v63  ;;  %v9487_v22 = vsel %vm5402_vm9, %v9471_v58, %v9473_v56  ;;  %v9388_v5 = vsel %vm2239_vm0, %v9376_v19, %v9378_v24  ;;  %v9475_v2 = vrot.slane %v9000_v23, 2  ;;  %v15464_v16 = vld [vmem:[#allocation8 + $0x398] ss:$24 sps:$4 sm:$0xff]   ;;  %v15469_v19 = vld [vmem:[#allocation8 + $0x3cc] ss:$24 sps:$4 sm:$0xff]  }
 0x465   :  { %11903 = vmatprep.subr.bf16.mxu0 %v15463_v50  ;;  %v9439_v51 = vadd.f32 %v9391_v3, %v16962_v20  ;;  %v9484_v31 = vsel %vm5402_vm9, %v9472_v62, %v9474_v17  ;;  %v9440_v50 = vadd.f32 %v9388_v5, %v16988_v57  ;;  %v17343_v7 = vadd.f32 %v9486_v29, %v9438_v46 }
 0x466   :  { %v9389_v26 = vsel %vm2239_vm0, %v9377_v63, %v9379_v38  ;;  %v9485_v20 = vsel %vm5402_vm9, %v9473_v56, %v9475_v2 }
 0x467   :  { %v9441_v58 = vadd.f32 %v9389_v26, %v17735_v33  ;;  %v17348_v18 = vadd.f32 %v9487_v22, %v9439_v51  ;;  %v17352_v62 = vadd.f32 %v9484_v31, %v9440_v50  ;;  %v15467_v26 = vld [vmem:[#allocation8 + $0x3c8] ss:$24 sps:$4 sm:$0xff]  }
 0x468   :  { %11904 = vmatpush1.bf16.msra.mxu0 %v15461_v37  ;;  %v8665_v23 = vpop.f32.mrb[124].mxu0  ;;  %v9004_v57 = vpop.f32.mrb[124].mxu1 }
 0x469   :  { %11905 = vmatprep.subr.bf16.mxu0 %v15466_v48  ;;  %v17354_v29 = vadd.f32 %v9485_v20, %v9441_v58  ;;  %v9380_v46 = vrot.slane %v8665_v23, 1  ;;  %v8667_v3 = vpop.f32.mrb[125].mxu0  ;;  %v9476_v63 = vrot.slane %v9004_v57, 2  ;;  %v9006_v37 = vpop.f32.mrb[125].mxu1  ;;  %v15472_v20 = vld [vmem:[#allocation8 + $0x3fc] ss:$24 sps:$4 sm:$0xff]  }
 0x46a   :  { %v9381_v5 = vrot.slane %v8667_v3, 1  ;;  %v8669_v59 = vpop.f32.mrb[126].mxu0  ;;  %v9477_v22 = vrot.slane %v9006_v37, 2  ;;  %v9008_v51 = vpop.f32.mrb[126].mxu1  ;;  %v17736_v23 = vld [vmem:[#allocation36_spill] sm:$0xff] }
 0x46b   :  { %v9386_v56 = vsel %vm2239_vm0, %v9378_v24, %v9380_v46  ;;  %v9382_v48 = vrot.slane %v8669_v59, 1  ;;  %v9482_v31 = vsel %vm5402_vm9, %v9474_v17, %v9476_v63  ;;  %v8671_v50 = vpop.f32.mrb[127].mxu0  ;;  %v9478_v33 = vrot.slane %v9008_v51, 2  ;;  %v9010_v58 = vpop.f32.mrb[127].mxu1  ;;  %v17738_v51 = vld [vmem:[#allocation38_spill] sm:$0xff] }
 0x46c   :  { %11906 = vmatpush1.bf16.msra.mxu0 %v15464_v16  ;;  %v9442_v57 = vadd.f32 %v9386_v56, %v17736_v23  ;;  %v9387_v16 = vsel %vm2239_vm0, %v9379_v38, %v9381_v5  ;;  %v9383_v3 = vrot.slane %v8671_v50, 1  ;;  %v9483_v37 = vsel %vm5402_vm9, %v9475_v2, %v9477_v22  ;;  %v15470_v2 = vld [vmem:[#allocation8 + $0x3f8] ss:$24 sps:$4 sm:$0xff]  }
 0x46d   :  { %11907 = vmatprep.subr.bf16.mxu0 %v15469_v19  ;;  %v9443_v24 = vadd.f32 %v9387_v16, %v17737_v6  ;;  %v9384_v59 = vsel %vm2239_vm0, %v9380_v46, %v9382_v48  ;;  %v9414_v17 = vsel %vm2239_vm0, %v9382_v48, %v9352_v12  ;;  %v9480_v19 = vsel %vm5402_vm9, %v9476_v63, %v9478_v33  ;;  %v17740_v12 = vld [vmem:[#allocation39_spill] sm:$0xff] }
 0x46e   :  { %v9444_v56 = vadd.f32 %v9384_v59, %v17738_v51  ;;  %v9446_v38 = vadd.f32 %v9414_v17, %v17053_v1  ;;  %v17376_v50 = vadd.f32 %v9482_v31, %v9442_v57  ;;  %v9385_v6 = vsel %vm2239_vm0, %v9381_v5, %v9383_v3  ;;  %v15475_v31 = vld [vmem:[#allocation8 + $0x42c] ss:$24 sps:$4 sm:$0xff]   ;;  %v15479_v59 = vld [vmem:[#allocation8 + $0x488] ss:$24 sps:$4 sm:$0xff]   ;;  %v15490_v51 = vld [vmem:[#allocation8 + $0x51c] ss:$24 sps:$4 sm:$0xff]  }
 0x46f   :  { %v17739_v46 = vrot.slane %v17155_v53, 1  ;;  %v9445_v48 = vadd.f32 %v9385_v6, %v17740_v12  ;;  %v17385_v23 = vadd.f32 %v9483_v37, %v9443_v24  ;;  %v17741_v63 = vrot.slane %v17153_v34, 2  ;;  %v15473_v37 = vld [vmem:[#allocation8 + $0x428] ss:$24 sps:$4 sm:$0xff]   ;;  %v15476_v24 = vld [vmem:[#allocation8 + $0x458] ss:$24 sps:$4 sm:$0xff]  }
 0x470   :  { %11908 = vmatpush1.bf16.msra.mxu0 %v15467_v26  ;;  %v17392_v26 = vadd.f32 %v9480_v19, %v9444_v56  ;;  %v9479_v53 = vrot.slane %v9010_v58, 2  ;;  %v15481_v58 = vld [vmem:[#allocation8 + $0x48c] ss:$24 sps:$4 sm:$0xff]   ;;  %v15485_v19 = vld [vmem:[#allocation8 + $0x4e8] ss:$24 sps:$4 sm:$0xff]  }
 0x471   :  { %v9415_v43 = vsel %vm2239_vm0, %v9383_v3, %v17739_v46  ;;  %v9510_v1 = vsel %vm5402_vm9, %v9478_v33, %v17741_v63  ;;  %11909 = vmatprep.subr.bf16.mxu0 %v15472_v20  ;;  %v17742_v3 = vrot.slane %v17158_v13, 2  ;;  %v15482_v13 = vld [vmem:[#allocation8 + $0x4b8] ss:$24 sps:$4 sm:$0xff]   ;;  %v15487_v17 = vld [vmem:[#allocation8 + $0x4ec] ss:$24 sps:$4 sm:$0xff]  }
 0x472   :  { %v9447_v5 = vadd.f32 %v9415_v43, %v17060_v8  ;;  %v17394_v57 = vadd.f32 %v9510_v1, %v9446_v38  ;;  %v9481_v16 = vsel %vm5402_vm9, %v9477_v22, %v9479_v53  ;;  %v15478_v8 = vld [vmem:[#allocation8 + $0x45c] ss:$24 sps:$4 sm:$0xff]   ;;  %v15488_v56 = vld [vmem:[#allocation8 + $0x518] ss:$24 sps:$4 sm:$0xff]   ;;  %v15493_v38 = vld [vmem:[#allocation8 + $0x54c] ss:$24 sps:$4 sm:$0xff]  }
 0x473   :  { %v9511_v34 = vsel %vm5402_vm9, %v9479_v53, %v17742_v3  ;;  %v17402_v33 = vadd.f32 %v9481_v16, %v9445_v48  ;;  %v15484_v22 = vld [vmem:[#allocation8 + $0x4bc] ss:$24 sps:$4 sm:$0xff]   ;;  %v15491_v6 = vld [vmem:[#allocation8 + $0x548] ss:$24 sps:$4 sm:$0xff]   ;;  %v15494_v46 = vld [vmem:[#allocation8 + $0x578] ss:$24 sps:$4 sm:$0xff]  }
 0x474   :  { %11910 = vmatpush1.bf16.msra.mxu0 %v15470_v2  ;;  %v17404_v20 = vadd.f32 %v9511_v34, %v9447_v5  ;;  %v15496_v2 = vld [vmem:[#allocation8 + $0x57c] ss:$24 sps:$4 sm:$0xff]   ;;  %v15499_v43 = vld [vmem:[#allocation8 + $0x5ac] ss:$24 sps:$4 sm:$0xff]   ;;  %v15497_v12 = vld [vmem:[#allocation8 + $0x5a8] ss:$24 sps:$4 sm:$0xff]  }
 0x475   :  { %11911 = vmatprep.subr.bf16.mxu0 %v15475_v31  ;;  %v15502_v48 = vld [vmem:[#allocation8 + $0x5dc] ss:$24 sps:$4 sm:$0xff]   ;;  %v15500_v63 = vld [vmem:[#allocation8 + $0x5d8] ss:$24 sps:$4 sm:$0xff]   ;;  %v15506_v5 = vld [vmem:[#allocation8 + $0x608] ss:$24 sps:$4 sm:$0xff]  }
 0x476   :  { %v15503_v1 = vld [vmem:[#allocation8 + $0x600] ss:$24 sps:$4 sm:$0xff]   ;;  %v15505_v31 = vld [vmem:[#allocation8 + $0x604] ss:$24 sps:$4 sm:$0xff]   ;;  %v15509_v16 = vld [vmem:[#allocation8 + $0x630] ss:$24 sps:$4 sm:$0xff]  }
 0x477   :  { %11817 = vmatprep.subr.bf16.mxu1 %v15505_v31  ;;  %v15508_v53 = vld [vmem:[#allocation8 + $0x60c] ss:$24 sps:$4 sm:$0xff]   ;;  %v15514_v34 = vld [vmem:[#allocation8 + $0x63c] ss:$24 sps:$4 sm:$0xff]  }
 0x478   :  { %11912 = vmatpush1.bf16.msra.mxu0 %v15473_v37  ;;  %11818 = vmatpush1.bf16.msra.mxu1 %v15503_v1  ;;  %v15511_v3 = vld [vmem:[#allocation8 + $0x634] ss:$24 sps:$4 sm:$0xff]   ;;  %v15517_v37 = vld [vmem:[#allocation8 + $0x664] ss:$24 sps:$4 sm:$0xff]   ;;  %v15542_v1 = vld [vmem:[#allocation8 + $0x728] ss:$24 sps:$4 sm:$0xff]  }
 0x479   :  { %11913 = vmatprep.subr.bf16.mxu0 %v15478_v8  ;;  %11819 = vmatprep.subr.bf16.mxu1 %v15511_v3  ;;  %v15512_v8 = vld [vmem:[#allocation8 + $0x638] ss:$24 sps:$4 sm:$0xff]   ;;  %v15544_v31 = vld [vmem:[#allocation8 + $0x72c] ss:$24 sps:$4 sm:$0xff]  }
 0x47a   :  { %v15553_v3 = vld [vmem:[#allocation8 + $0x784] ss:$24 sps:$4 sm:$0xff]  }
 0x47c   :  { %11914 = vmatpush1.bf16.msra.mxu0 %v15476_v24  ;;  %11820 = vmatpush1.bf16.msra.mxu1 %v15509_v16  ;;  %v15515_v24 = vld [vmem:[#allocation8 + $0x660] ss:$24 sps:$4 sm:$0xff]   ;;  %v15550_v16 = vld [vmem:[#allocation8 + $0x75c] ss:$24 sps:$4 sm:$0xff]  }
 0x47d   :  { %11915 = vmatprep.subr.bf16.mxu0 %v15481_v58  ;;  %11821 = vmatprep.subr.bf16.mxu1 %v15517_v37  ;;  %v15518_v58 = vld [vmem:[#allocation8 + $0x668] ss:$24 sps:$4 sm:$0xff]  }
 0x47e   :  { %v15551_v37 = vld [vmem:[#allocation8 + $0x780] ss:$24 sps:$4 sm:$0xff]  }
 0x480   :  { %11916 = vmatpush1.bf16.msra.mxu0 %v15479_v59  ;;  %11822 = vmatpush1.bf16.msra.mxu1 %v15515_v24  ;;  %v15520_v59 = vld [vmem:[#allocation8 + $0x66c] ss:$24 sps:$4 sm:$0xff]   ;;  %v15554_v24 = vld [vmem:[#allocation8 + $0x788] ss:$24 sps:$4 sm:$0xff]  }
 0x481   :  { %11917 = vmatprep.subr.bf16.mxu0 %v15484_v22  ;;  %v15521_v22 = vld [vmem:[#allocation8 + $0x690] ss:$24 sps:$4 sm:$0xff]  }
 0x484   :  { %11918 = vmatpush1.bf16.msra.mxu0 %v15482_v13  ;;  %v15523_v13 = vld [vmem:[#allocation8 + $0x694] ss:$24 sps:$4 sm:$0xff]  }
 0x485   :  { %11919 = vmatprep.subr.bf16.mxu0 %v15487_v17  ;;  %v15524_v17 = vld [vmem:[#allocation8 + $0x698] ss:$24 sps:$4 sm:$0xff]   ;;  %11823 = vmatprep.subr.bf16.mxu1 %v15523_v13  ;;  %v15562_v13 = vld [vmem:[#allocation8 + $0x7bc] ss:$24 sps:$4 sm:$0xff]  }
 0x486   :  { %11824 = vmatpush1.bf16.msra.mxu1 %v15521_v22  ;;  %v15560_v22 = vld [vmem:[#allocation8 + $0x7b8] ss:$24 sps:$4 sm:$0xff]  }
 0x488   :  { %11920 = vmatpush1.bf16.msra.mxu0 %v15485_v19  ;;  %v15526_v19 = vld [vmem:[#allocation8 + $0x69c] ss:$24 sps:$4 sm:$0xff]  }
 0x489   :  { %11921 = vmatprep.subr.bf16.mxu0 %v15490_v51  ;;  %v15529_v51 = vld [vmem:[#allocation8 + $0x6c4] ss:$24 sps:$4 sm:$0xff]  }
 0x48a   :  { %11825 = vmatprep.subr.bf16.mxu1 %v15529_v51  ;;  %v15563_v51 = vld [vmem:[#allocation8 + $0x7e0] ss:$24 sps:$4 sm:$0xff]  }
 0x48c   :  { %11922 = vmatpush1.bf16.msra.mxu0 %v15488_v56  ;;  %v15527_v56 = vld [vmem:[#allocation8 + $0x6c0] ss:$24 sps:$4 sm:$0xff]  }
 0x48d   :  { %11923 = vmatprep.subr.bf16.mxu0 %v15493_v38  ;;  %v15530_v38 = vld [vmem:[#allocation8 + $0x6c8] ss:$24 sps:$4 sm:$0xff]   ;;  %11826 = vmatpush1.bf16.msra.mxu1 %v15527_v56  ;;  %v15571_v56 = vld [vmem:[#allocation8 + $0x814] ss:$24 sps:$4 sm:$0xff]  }
 0x490   :  { %11924 = vmatpush1.bf16.msra.mxu0 %v15491_v6  ;;  %v15532_v6 = vld [vmem:[#allocation8 + $0x6cc] ss:$24 sps:$4 sm:$0xff]  }
 0x491   :  { %11925 = vmatprep.subr.bf16.mxu0 %v15496_v2  ;;  %v15533_v2 = vld [vmem:[#allocation8 + $0x6f0] ss:$24 sps:$4 sm:$0xff]  }
 0x494   :  { %11926 = vmatpush1.bf16.msra.mxu0 %v15494_v46  ;;  %v15535_v46 = vld [vmem:[#allocation8 + $0x6f4] ss:$24 sps:$4 sm:$0xff]  }
 0x495   :  { %11927 = vmatprep.subr.bf16.mxu0 %v15499_v43  ;;  %v15538_v43 = vld [vmem:[#allocation8 + $0x6fc] ss:$24 sps:$4 sm:$0xff]   ;;  %11827 = vmatprep.subr.bf16.mxu1 %v15535_v46 }
 0x496   :  { %11828 = vmatpush1.bf16.msra.mxu1 %v15533_v2  ;;  %v15569_v2 = vld [vmem:[#allocation8 + $0x810] ss:$24 sps:$4 sm:$0xff]   ;;  %v15577_v46 = vld [vmem:[#allocation8 + $0x844] ss:$24 sps:$4 sm:$0xff]  }
 0x498   :  { %11928 = vmatpush1.bf16.msra.mxu0 %v15497_v12  ;;  %v15541_v12 = vld [vmem:[#allocation8 + $0x724] ss:$24 sps:$4 sm:$0xff]  }
 0x499   :  { %11929 = vmatprep.subr.bf16.mxu0 %v15502_v48  ;;  %v15536_v48 = vld [vmem:[#allocation8 + $0x6f8] ss:$24 sps:$4 sm:$0xff]   ;;  %11829 = vmatprep.subr.bf16.mxu1 %v15541_v12  ;;  %v15580_v12 = vld [vmem:[#allocation8 + $0x84c] ss:$24 sps:$4 sm:$0xff]  }
 0x49c   :  { %11930 = vmatpush1.bf16.msra.mxu0 %v15500_v63  ;;  %v15539_v63 = vld [vmem:[#allocation8 + $0x720] ss:$24 sps:$4 sm:$0xff]  }
 0x49d   :  { %11940 = vmatprep.subr.bf16.mxu0 %v15508_v53  ;;  %11830 = vmatpush1.bf16.msra.mxu1 %v15539_v63  ;;  %v15547_v53 = vld [vmem:[#allocation8 + $0x754] ss:$24 sps:$4 sm:$0xff]  }
 0x49e   :  { %11831 = vmatprep.subr.bf16.mxu1 %v15547_v53  ;;  %v15583_v63 = vld [vmem:[#allocation8 + $0x874] ss:$24 sps:$4 sm:$0xff]   ;;  %v15589_v53 = vld [vmem:[#allocation8 + $0x8a4] ss:$24 sps:$4 sm:$0xff]  }
 0x49f   :  { %11932 = vmatmul.mubr.bf16.vlgmr.msra.gmra.mrb[160].mxu0 %v17148_v25 }
 0x4a0   :  { %11941 = vmatpush1.bf16.msra.mxu0 %v15506_v5  ;;  %v15545_v5 = vld [vmem:[#allocation8 + $0x750] ss:$24 sps:$4 sm:$0xff]  }
 0x4a1   :  { %11942 = vmatprep.subr.bf16.mxu0 %v15514_v34  ;;  %v15548_v34 = vld [vmem:[#allocation8 + $0x758] ss:$24 sps:$4 sm:$0xff]   ;;  %11832 = vmatpush1.bf16.msra.mxu1 %v15545_v5 }
 0x4a2   :  { %11833 = vmatprep.subr.bf16.mxu1 %v15553_v3  ;;  %v15581_v5 = vld [vmem:[#allocation8 + $0x870] ss:$24 sps:$4 sm:$0xff]   ;;  %v15592_v3 = vld [vmem:[#allocation8 + $0x8ac] ss:$24 sps:$4 sm:$0xff]  }
 0x4a4   :  { %11943 = vmatpush1.bf16.msra.mxu0 %v15512_v8  ;;  %v15556_v8 = vld [vmem:[#allocation8 + $0x78c] ss:$24 sps:$4 sm:$0xff]  }
 0x4a5   :  { %11944 = vmatprep.subr.bf16.mxu0 %v15520_v59  ;;  %11834 = vmatpush1.bf16.msra.mxu1 %v15551_v37  ;;  %v15559_v59 = vld [vmem:[#allocation8 + $0x7b4] ss:$24 sps:$4 sm:$0xff]  }
 0x4a6   :  { %11835 = vmatprep.subr.bf16.mxu1 %v15559_v59  ;;  %v15595_v37 = vld [vmem:[#allocation8 + $0x8d4] ss:$24 sps:$4 sm:$0xff]  }
 0x4a7   :  { %v15601_v59 = vld [vmem:[#allocation8 + $0x14] ss:$24 sps:$4 sm:$0xff]  }
 0x4a8   :  { %11945 = vmatpush1.bf16.msra.mxu0 %v15518_v58  ;;  %v15557_v58 = vld [vmem:[#allocation8 + $0x7b0] ss:$24 sps:$4 sm:$0xff]  }
 0x4a9   :  { %11946 = vmatprep.subr.bf16.mxu0 %v15526_v19  ;;  %v15568_v19 = vld [vmem:[#allocation8 + $0x7ec] ss:$24 sps:$4 sm:$0xff]   ;;  %11836 = vmatpush1.bf16.msra.mxu1 %v15557_v58  ;;  %v15593_v58 = vld [vmem:[#allocation8 + $0x8d0] ss:$24 sps:$4 sm:$0xff]  }
 0x4ac   :  { %11947 = vmatpush1.bf16.msra.mxu0 %v15524_v17  ;;  %v15565_v17 = vld [vmem:[#allocation8 + $0x7e4] ss:$24 sps:$4 sm:$0xff]  }
 0x4ad   :  { %11948 = vmatprep.subr.bf16.mxu0 %v15532_v6  ;;  %11837 = vmatprep.subr.bf16.mxu1 %v15565_v17  ;;  %v15574_v6 = vld [vmem:[#allocation8 + $0x81c] ss:$24 sps:$4 sm:$0xff]  }
 0x4ae   :  { %11838 = vmatpush1.bf16.msra.mxu1 %v15563_v51 }
 0x4af   :  { %11839 = vmatprep.subr.bf16.mxu1 %v15571_v56 }
 0x4b0   :  { %11949 = vmatpush1.bf16.msra.mxu0 %v15530_v38  ;;  %v15566_v38 = vld [vmem:[#allocation8 + $0x7e8] ss:$24 sps:$4 sm:$0xff]  }
 0x4b1   :  { %11950 = vmatprep.subr.bf16.mxu0 %v15538_v43  ;;  %v15572_v43 = vld [vmem:[#allocation8 + $0x818] ss:$24 sps:$4 sm:$0xff]  }
 0x4b2   :  { %11840 = vmatpush1.bf16.msra.mxu1 %v15569_v2 }
 0x4b3   :  { %11841 = vmatprep.subr.bf16.mxu1 %v15577_v46 }
 0x4b4   :  { %11951 = vmatpush1.bf16.msra.mxu0 %v15536_v48  ;;  %v15575_v48 = vld [vmem:[#allocation8 + $0x840] ss:$24 sps:$4 sm:$0xff]  }
 0x4b5   :  { %11952 = vmatprep.subr.bf16.mxu0 %v15544_v31  ;;  %v15586_v31 = vld [vmem:[#allocation8 + $0x87c] ss:$24 sps:$4 sm:$0xff]  }
 0x4b6   :  { %11842 = vmatpush1.bf16.msra.mxu1 %v15575_v48 }
 0x4b7   :  { %11843 = vmatprep.subr.bf16.mxu1 %v15583_v63 }
 0x4b8   :  { %11953 = vmatpush1.bf16.msra.mxu0 %v15542_v1  ;;  %v15578_v1 = vld [vmem:[#allocation8 + $0x848] ss:$24 sps:$4 sm:$0xff]  }
 0x4b9   :  { %11954 = vmatprep.subr.bf16.mxu0 %v15550_v16  ;;  %v15584_v16 = vld [vmem:[#allocation8 + $0x878] ss:$24 sps:$4 sm:$0xff]  }
 0x4ba   :  { %11844 = vmatpush1.bf16.msra.mxu1 %v15581_v5  ;;  %v17743_v5 = vld [vmem:[#allocation16_spill] sm:$0xff] }
 0x4bb   :  { %11845 = vmatprep.subr.bf16.mxu1 %v15589_v53 }
 0x4bc   :  { %11955 = vmatpush1.bf16.msra.mxu0 %v15548_v34  ;;  %v15587_v34 = vld [vmem:[#allocation8 + $0x8a0] ss:$24 sps:$4 sm:$0xff]  }
 0x4bd   :  { %11956 = vmatprep.subr.bf16.mxu0 %v15556_v8  ;;  %v15590_v8 = vld [vmem:[#allocation8 + $0x8a8] ss:$24 sps:$4 sm:$0xff]  }
 0x4be   :  { %11846 = vmatpush1.bf16.msra.mxu1 %v15587_v34  ;;  %v17744_v34 = vld [vmem:[#allocation17_spill] sm:$0xff] }
 0x4bf   :  { %11847 = vmatprep.subr.bf16.mxu1 %v15595_v37 }
 0x4c0   :  { %11957 = vmatpush1.bf16.msra.mxu0 %v15554_v24  ;;  %v15598_v24 = vld [vmem:[#allocation8 + $0x8dc] ss:$24 sps:$4 sm:$0xff]  }
 0x4c1   :  { %11958 = vmatprep.subr.bf16.mxu0 %v15562_v13 }
 0x4c2   :  { %11848 = vmatpush1.bf16.msra.mxu1 %v15593_v58 }
 0x4c3   :  { %11981 = vmatprep.subr.bf16.mxu1 %v15601_v59 }
 0x4c4   :  { %11959 = vmatpush1.bf16.msra.mxu0 %v15560_v22  ;;  %v15596_v22 = vld [vmem:[#allocation8 + $0x8d8] ss:$24 sps:$4 sm:$0xff]  }
 0x4c5   :  { %11960 = vmatprep.subr.bf16.mxu0 %v15568_v19 }
 0x4c8   :  { %11961 = vmatpush1.bf16.msra.mxu0 %v15566_v38 }
 0x4c9   :  { %11962 = vmatprep.subr.bf16.mxu0 %v15574_v6 }
 0x4cc   :  { %11963 = vmatpush1.bf16.msra.mxu0 %v15572_v43  ;;  %v15936_v43 = vld [vmem:[#allocation7] sm:$0x3f] }
 0x4cd   :  { %11964 = vmatprep.subr.bf16.mxu0 %v15580_v12  ;;  %v9641_v12 = vrot.slane %v15936_v43, 4 }
 0x4cf   :  { %v17425_v53 = vrot.slane %v9641_v12, %v17743_v5  ;;  %v17428_v37 = vrot.slane %v9641_v12, %v17744_v34 }
 0x4d0   :  { %11965 = vmatpush1.bf16.msra.mxu0 %v15578_v1 }
 0x4d1   :  { %11966 = vmatprep.subr.bf16.mxu0 %v15586_v31 }
 0x4d4   :  { %11967 = vmatpush1.bf16.msra.mxu0 %v15584_v16 }
 0x4d5   :  { %11968 = vmatprep.subr.bf16.mxu0 %v15592_v3 }
 0x4d8   :  { %11969 = vmatpush1.bf16.msra.mxu0 %v15590_v8 }
 0x4d9   :  { %11970 = vmatprep.subr.bf16.mxu0 %v15598_v24 }
 0x4dc   :  { %11971 = vmatpush1.bf16.msra.mxu0 %v15596_v22 }
 0x4f2   :  { %v17407_v13 = vpop.f32.mrb[128].mxu0 }
 0x4f3   :  { %v17409_v17 = vpop.f32.mrb[129].mxu0  ;;  %v9544_v51 = vrot.slane %v17407_v13, 3 }
 0x4f4   :  { %v9277_v19 = vpop.f32.mrb[130].mxu0  ;;  %v9545_v6 = vrot.slane %v17409_v17, 3 }
 0x4f5   :  { %v9546_v56 = vrot.slane %v9277_v19, 3  ;;  %v9279_v38 = vpop.f32.mrb[131].mxu0 }
 0x4f6   :  { %v9547_v2 = vrot.slane %v9279_v38, 3 }
 0x4f7   :  { %v9605_v46 = vsel %vm9576_vm11, %v9544_v51, %v9546_v56 }
 0x4f8   :  { %v9609_v48 = vadd.f32 %v9605_v46, %v17181_v54  ;;  %v9606_v63 = vsel %vm9576_vm11, %v9545_v6, %v9547_v2 }
 0x4f9   :  { %v9610_v1 = vadd.f32 %v9606_v63, %v17183_v52 }
 0x4fa   :  { %v9283_v31 = vpop.f32.mrb[132].mxu0  ;;  %v9652_v38 = vadd.f32 %v17425_v53, %v9609_v48 }
 0x4fb   :  { %v9548_v16 = vrot.slane %v9283_v31, 3  ;;  %v9285_v3 = vpop.f32.mrb[133].mxu0  ;;  %v9653_v12 = vadd.f32 %v17428_v37, %v9610_v1 }
 0x4fc   :  { %v9549_v8 = vrot.slane %v9285_v3, 3  ;;  %v9287_v24 = vpop.f32.mrb[134].mxu0  ;;  %v9684_v3 = vmax.f32 %v9652_v38, 0.0 }
 0x4fd   :  { %v9603_v54 = vsel %vm9576_vm11, %v9546_v56, %v9548_v16  ;;  %v9550_v58 = vrot.slane %v9287_v24, 3  ;;  %v9289_v59 = vpop.f32.mrb[135].mxu0  ;;  %v9685_v1 = vmax.f32 %v9653_v12, 0.0 }
 0x4fe   :  { %v9611_v22 = vadd.f32 %v9603_v54, %v17200_v42  ;;  %v9604_v52 = vsel %vm9576_vm11, %v9547_v2, %v9549_v8  ;;  %v9551_v19 = vrot.slane %v9289_v59, 3 }
 0x4ff   :  { %v9612_v46 = vadd.f32 %v9604_v52, %v17205_v39  ;;  %v9601_v43 = vsel %vm9576_vm11, %v9548_v16, %v9550_v58 }
 0x500   :  { %v9654_v63 = vadd.f32 %v17425_v53, %v9611_v22  ;;  %v9613_v56 = vadd.f32 %v9601_v43, %v17209_v32  ;;  %v9602_v42 = vsel %vm9576_vm11, %v9549_v8, %v9551_v19 }
 0x501   :  { %v9655_v2 = vadd.f32 %v17428_v37, %v9612_v46  ;;  %v9614_v48 = vadd.f32 %v9602_v42, %v17211_v15 }
 0x502   :  { %v9686_v31 = vmax.f32 %v9654_v63, 0.0  ;;  %v9293_v39 = vpop.f32.mrb[136].mxu0  ;;  %v9656_v32 = vadd.f32 %v17425_v53, %v9613_v56 }
 0x503   :  { %v9687_v24 = vmax.f32 %v9655_v2, 0.0  ;;  %v9552_v16 = vrot.slane %v9293_v39, 3  ;;  %v9295_v54 = vpop.f32.mrb[137].mxu0  ;;  %v9657_v15 = vadd.f32 %v17428_v37, %v9614_v48 }
 0x504   :  { %v9724_v59 = vsel %vm9717_vm12, %v9686_v31, 0.0  ;;  %v9553_v22 = vrot.slane %v9295_v54, 3  ;;  %v9297_v8 = vpop.f32.mrb[138].mxu0  ;;  %v9688_v54 = vmax.f32 %v9656_v32, 0.0 }
 0x505   :  { %v9754_v52 = vmax.f32 %v9684_v3, %v9724_v59  ;;  %v9725_v46 = vsel %vm9717_vm12, %v9687_v24, 0.0  ;;  %v9599_v38 = vsel %vm9576_vm11, %v9550_v58, %v9552_v16  ;;  %v9299_v43 = vpop.f32.mrb[139].mxu0  ;;  %v9554_v2 = vrot.slane %v9297_v8, 3 }
 0x506   :  { %v9761_v63 = vmax.f32 %v9685_v1, %v9725_v46  ;;  %v9615_v12 = vadd.f32 %v9599_v38, %v17228_v11  ;;  %v9600_v42 = vsel %vm9576_vm11, %v9551_v19, %v9553_v22  ;;  %v9555_v39 = vrot.slane %v9299_v43, 3 }
 0x507   :  { %v9755_v56 = vrot.slane %v9754_v52, 4  ;;  %v9616_v31 = vadd.f32 %v9600_v42, %v17233_v9  ;;  %v9597_v48 = vsel %vm9576_vm11, %v9552_v16, %v9554_v2  ;;  %v9689_v8 = vmax.f32 %v9657_v15, 0.0 }
 0x508   :  { %v9762_v3 = vrot.slane %v9761_v63, 4  ;;  %v9658_v24 = vadd.f32 %v17425_v53, %v9615_v12  ;;  %v9617_v11 = vadd.f32 %v9597_v48, %v17237_v27  ;;  %v9598_v19 = vsel %vm9576_vm11, %v9553_v22, %v9555_v39 }
 0x509   :  { %v9756_v58 = vmax.f32 %v9754_v52, %v9755_v56  ;;  %v9659_v1 = vadd.f32 %v17428_v37, %v9616_v31  ;;  %v9618_v9 = vadd.f32 %v9598_v19, %v17239_v49 }
 0x50a   :  { %v9763_v59 = vmax.f32 %v9761_v63, %v9762_v3  ;;  %v9690_v46 = vmax.f32 %v9658_v24, 0.0  ;;  %v9303_v38 = vpop.f32.mrb[140].mxu0  ;;  %v9660_v12 = vadd.f32 %v17425_v53, %v9617_v11 }
 0x50b   :  { %v9757_v32 = vrot.slane %v9756_v58, 2  ;;  %v9691_v43 = vmax.f32 %v9659_v1, 0.0  ;;  %v9556_v42 = vrot.slane %v9303_v38, 3  ;;  %v9305_v16 = vpop.f32.mrb[141].mxu0  ;;  %v9661_v27 = vadd.f32 %v17428_v37, %v9618_v9 }
 0x50c   :  { %v9764_v52 = vrot.slane %v9763_v59, 2  ;;  %v9728_v56 = vsel %vm9717_vm12, %v9690_v46, 0.0  ;;  %v9557_v31 = vrot.slane %v9305_v16, 3  ;;  %v9307_v22 = vpop.f32.mrb[142].mxu0  ;;  %v9692_v1 = vmax.f32 %v9660_v12, 0.0 }
 0x50d   :  { %v9758_v63 = vmax.f32 %v9756_v58, %v9757_v32  ;;  %v9768_v15 = vmax.f32 %v9688_v54, %v9728_v56  ;;  %v9729_v49 = vsel %vm9717_vm12, %v9691_v43, 0.0  ;;  %v9309_v3 = vpop.f32.mrb[143].mxu0  ;;  %v9595_v11 = vsel %vm9576_vm11, %v9554_v2, %v9556_v42 }
 0x50e   :  { %v9765_v24 = vmax.f32 %v9763_v59, %v9764_v52  ;;  %v9775_v48 = vmax.f32 %v9689_v8, %v9729_v49  ;;  %v9619_v46 = vadd.f32 %v9595_v11, %v17256_v4  ;;  %v9596_v9 = vsel %vm9576_vm11, %v9555_v39, %v9557_v31 }
 0x50f   :  { %v9759_v19 = vrot.slane %v9758_v63, 1  ;;  %v9769_v38 = vrot.slane %v9768_v15, 4  ;;  %v9693_v58 = vmax.f32 %v9661_v27, 0.0  ;;  %v9620_v54 = vadd.f32 %v9596_v9, %v17261_v28 }
 0x510   :  { %v9776_v16 = vrot.slane %v9775_v48, 4  ;;  %v9558_v32 = vrot.slane %v9307_v22, 3  ;;  %v9766_v43 = vrot.slane %v9765_v24, 1  ;;  %v9662_v59 = vadd.f32 %v17425_v53, %v9619_v46 }
 0x511   :  { %v9770_v56 = vmax.f32 %v9768_v15, %v9769_v38  ;;  %v9559_v8 = vrot.slane %v9309_v3, 3  ;;  %v17480_v12 = vmax.f32 %v9758_v63, %v9759_v19  ;;  %v9663_v52 = vadd.f32 %v17428_v37, %v9620_v54 }
 0x512   :  { %v9777_v2 = vmax.f32 %v9775_v48, %v9776_v16  ;;  %v9593_v4 = vsel %vm9576_vm11, %v9556_v42, %v9558_v32  ;;  %v9313_v49 = vpop.f32.mrb[144].mxu0  ;;  %v9694_v11 = vmax.f32 %v9662_v59, 0.0 }
 0x513   :  { %v9771_v39 = vrot.slane %v9770_v56, 2  ;;  %v9621_v27 = vadd.f32 %v9593_v4, %v17265_v35  ;;  %v9594_v28 = vsel %vm9576_vm11, %v9557_v31, %v9559_v8  ;;  %v9315_v22 = vpop.f32.mrb[145].mxu0  ;;  %v9695_v38 = vmax.f32 %v9663_v52, 0.0 }
 0x514   :  { %v9778_v15 = vrot.slane %v9777_v2, 2  ;;  %v9622_v63 = vadd.f32 %v9594_v28, %v17267_v55  ;;  %v9560_v3 = vrot.slane %v9313_v49, 3  ;;  %v9317_v48 = vpop.f32.mrb[146].mxu0  ;;  %v9732_v46 = vsel %vm9717_vm12, %v9694_v11, 0.0 }
 0x515   :  { %v9772_v19 = vmax.f32 %v9770_v56, %v9771_v39  ;;  %v9664_v42 = vadd.f32 %v17425_v53, %v9621_v27  ;;  %v9561_v9 = vrot.slane %v9315_v22, 3  ;;  %v9319_v16 = vpop.f32.mrb[147].mxu0  ;;  %v9782_v35 = vmax.f32 %v9692_v1, %v9732_v46 }
 0x516   :  { %v9779_v54 = vmax.f32 %v9777_v2, %v9778_v15  ;;  %v9733_v31 = vsel %vm9717_vm12, %v9695_v38, 0.0  ;;  %v9665_v59 = vadd.f32 %v17428_v37, %v9622_v63  ;;  %v17495_v52 = vmax.f32 %v9765_v24, %v9766_v43 }
 0x517   :  { %v9773_v55 = vrot.slane %v9772_v19, 1  ;;  %v9789_v4 = vmax.f32 %v9693_v58, %v9733_v31  ;;  %v9591_v56 = vsel %vm9576_vm11, %v9558_v32, %v9560_v3  ;;  %v9783_v39 = vrot.slane %v9782_v35, 4 }
 0x518   :  { %v9780_v49 = vrot.slane %v9779_v54, 1  ;;  %v9696_v11 = vmax.f32 %v9664_v42, 0.0  ;;  %v9623_v27 = vadd.f32 %v9591_v56, %v17284_v14  ;;  %v9697_v2 = vmax.f32 %v9665_v59, 0.0 }
 0x519   :  { %v9790_v28 = vrot.slane %v9789_v4, 4  ;;  %v9592_v1 = vsel %vm9576_vm11, %v9559_v8, %v9561_v9  ;;  %v9562_v22 = vrot.slane %v9317_v48, 3  ;;  %v17502_v15 = vmax.f32 %v9772_v19, %v9773_v55 }
 0x51a   :  { %v9784_v24 = vmax.f32 %v9782_v35, %v9783_v39  ;;  %v9666_v43 = vadd.f32 %v17425_v53, %v9623_v27  ;;  %v9624_v58 = vadd.f32 %v9592_v1, %v17290_v40  ;;  %v9323_v38 = vpop.f32.mrb[148].mxu0  ;;  %v9563_v46 = vrot.slane %v9319_v16, 3 }
 0x51b   :  { %v9791_v32 = vmax.f32 %v9789_v4, %v9790_v28  ;;  %v9589_v63 = vsel %vm9576_vm11, %v9560_v3, %v9562_v22  ;;  %v9564_v14 = vrot.slane %v9323_v38, 3  ;;  %v9325_v42 = vpop.f32.mrb[149].mxu0 }
 0x51c   :  { %v9785_v31 = vrot.slane %v9784_v24, 2  ;;  %v9698_v59 = vmax.f32 %v9666_v43, 0.0  ;;  %v9667_v8 = vadd.f32 %v17428_v37, %v9624_v58  ;;  %v9625_v48 = vadd.f32 %v9589_v63, %v17294_v47  ;;  %v9327_v19 = vpop.f32.mrb[150].mxu0 }
 0x51d   :  { %v9792_v35 = vrot.slane %v9791_v32, 2  ;;  %v9590_v55 = vsel %vm9576_vm11, %v9561_v9, %v9563_v46  ;;  %v9587_v40 = vsel %vm9576_vm11, %v9562_v22, %v9564_v14  ;;  %v9565_v4 = vrot.slane %v9325_v42, 3  ;;  %v9329_v56 = vpop.f32.mrb[151].mxu0 }
 0x51e   :  { %v9786_v3 = vmax.f32 %v9784_v24, %v9785_v31  ;;  %v9736_v16 = vsel %vm9717_vm12, %v9698_v59, 0.0  ;;  %v9699_v39 = vmax.f32 %v9667_v8, 0.0  ;;  %v9668_v27 = vadd.f32 %v17425_v53, %v9625_v48 }
 0x51f   :  { %v9793_v28 = vmax.f32 %v9791_v32, %v9792_v35  ;;  %v9796_v1 = vmax.f32 %v9696_v11, %v9736_v16  ;;  %v9626_v47 = vadd.f32 %v9590_v55, %v17296_v10  ;;  %v9627_v43 = vadd.f32 %v9587_v40, %v17314_v0 }
 0x520   :  { %v17519_v58 = vmax.f32 %v9779_v54, %v9780_v49  ;;  %v9787_v9 = vrot.slane %v9786_v3, 1  ;;  %v9737_v22 = vsel %vm9717_vm12, %v9699_v39, 0.0  ;;  %v9588_v24 = vsel %vm9576_vm11, %v9563_v46, %v9565_v4 }
 0x521   :  { %v9797_v38 = vrot.slane %v9796_v1, 4  ;;  %v9803_v63 = vmax.f32 %v9697_v2, %v9737_v22  ;;  %v9700_v42 = vmax.f32 %v9668_v27, 0.0  ;;  %v9669_v31 = vadd.f32 %v17428_v37, %v9626_v47 }
 0x522   :  { %v9794_v32 = vrot.slane %v9793_v28, 1  ;;  %v9670_v11 = vadd.f32 %v17425_v53, %v9627_v43  ;;  %v9628_v10 = vadd.f32 %v9588_v24, %v17320_v61  ;;  %v9566_v0 = vrot.slane %v9327_v19, 3  ;;  %v9333_v54 = vpop.f32.mrb[152].mxu0 }
 0x523   :  { %v17528_v49 = vmax.f32 %v9786_v3, %v9787_v9  ;;  %v9798_v59 = vmax.f32 %v9796_v1, %v9797_v38  ;;  %v9804_v8 = vrot.slane %v9803_v63, 4  ;;  %v9701_v48 = vmax.f32 %v9669_v31, 0.0  ;;  %v9335_v35 = vpop.f32.mrb[153].mxu0 }
 0x524   :  { %v9702_v55 = vmax.f32 %v9670_v11, 0.0  ;;  %v9671_v46 = vadd.f32 %v17428_v37, %v9628_v10  ;;  %v9585_v2 = vsel %vm9576_vm11, %v9564_v14, %v9566_v0  ;;  %v9567_v40 = vrot.slane %v9329_v56, 3  ;;  %v9337_v16 = vpop.f32.mrb[154].mxu0 }
 0x525   :  { %v9799_v39 = vrot.slane %v9798_v59, 2  ;;  %v9805_v27 = vmax.f32 %v9803_v63, %v9804_v8  ;;  %v9629_v61 = vadd.f32 %v9585_v2, %v17324_v41  ;;  %v9568_v19 = vrot.slane %v9333_v54, 3  ;;  %v17534_v47 = vpop.f32.mrb[155].mxu0 }
 0x526   :  { %v9740_v3 = vsel %vm9717_vm12, %v9702_v55, 0.0  ;;  %v9703_v1 = vmax.f32 %v9671_v46, 0.0  ;;  %v9586_v43 = vsel %vm9576_vm11, %v9565_v4, %v9567_v40  ;;  %v9569_v9 = vrot.slane %v9335_v35, 3 }
 0x527   :  { %v9800_v22 = vmax.f32 %v9798_v59, %v9799_v39  ;;  %v9806_v24 = vrot.slane %v9805_v27, 2  ;;  %v9810_v14 = vmax.f32 %v9700_v42, %v9740_v3  ;;  %v9672_v56 = vadd.f32 %v17425_v53, %v9629_v61 }
 0x528   :  { %v9741_v38 = vsel %vm9717_vm12, %v9703_v1, 0.0  ;;  %v9630_v41 = vadd.f32 %v9586_v43, %v17326_v60  ;;  %v9583_v63 = vsel %vm9576_vm11, %v9566_v0, %v9568_v19  ;;  %v9584_v31 = vsel %vm9576_vm11, %v9567_v40, %v9569_v9 }
 0x529   :  { %v9801_v11 = vrot.slane %v9800_v22, 1  ;;  %v9807_v10 = vmax.f32 %v9805_v27, %v9806_v24  ;;  %v9811_v4 = vrot.slane %v9810_v14, 4  ;;  %v9817_v54 = vmax.f32 %v9701_v48, %v9741_v38 }
 0x52a   :  { %v17548_v59 = vmax.f32 %v9793_v28, %v9794_v32  ;;  %v9673_v42 = vadd.f32 %v17428_v37, %v9630_v41  ;;  %v9631_v8 = vadd.f32 %v9583_v63, %v17343_v7  ;;  %v9632_v35 = vadd.f32 %v9584_v31, %v17348_v18  ;;  %v9343_v55 = vpop.f32.mrb[156].mxu0 }
 0x52b   :  { %v17553_v60 = vmax.f32 %v9800_v22, %v9801_v11  ;;  %v9812_v46 = vmax.f32 %v9810_v14, %v9811_v4  ;;  %v9818_v0 = vrot.slane %v9817_v54, 4  ;;  %v9704_v2 = vmax.f32 %v9672_v56, 0.0  ;;  %v9345_v39 = vpop.f32.mrb[157].mxu0 }
 0x52c   :  { %v9808_v40 = vrot.slane %v9807_v10, 1  ;;  %v9674_v27 = vadd.f32 %v17425_v53, %v9631_v8  ;;  %v9675_v48 = vadd.f32 %v17428_v37, %v9632_v35  ;;  %v9570_v28 = vrot.slane %v9337_v16, 3  ;;  %v9347_v32 = vpop.f32.mrb[158].mxu0 }
 0x52d   :  { %v9813_v61 = vrot.slane %v9812_v46, 2  ;;  %v9819_v3 = vmax.f32 %v9817_v54, %v9818_v0  ;;  %v9705_v1 = vmax.f32 %v9673_v42, 0.0  ;;  %v9571_v7 = vrot.slane %v17534_v47, 3  ;;  %v9349_v18 = vpop.f32.mrb[159].mxu0 }
 0x52e   :  { %v9706_v43 = vmax.f32 %v9674_v27, 0.0  ;;  %v9707_v22 = vmax.f32 %v9675_v48, 0.0  ;;  %v9581_v24 = vsel %vm9576_vm11, %v9568_v19, %v9570_v28  ;;  %v9572_v14 = vrot.slane %v9343_v55, 3 }
 0x52f   :  { %v17560_v56 = vmax.f32 %v9812_v46, %v9813_v61  ;;  %v9820_v38 = vrot.slane %v9819_v3, 2  ;;  %v9633_v41 = vadd.f32 %v9581_v24, %v17352_v62  ;;  %v9582_v16 = vsel %vm9576_vm11, %v9569_v9, %v9571_v7 }
 0x530   :  { %v9744_v63 = vsel %vm9717_vm12, %v9706_v43, 0.0  ;;  %v9745_v47 = vsel %vm9717_vm12, %v9707_v22, 0.0  ;;  %v9634_v31 = vadd.f32 %v9582_v16, %v17354_v29  ;;  %v9579_v19 = vsel %vm9576_vm11, %v9570_v28, %v9572_v14 }
 0x531   :  { %v17572_v11 = vmax.f32 %v9807_v10, %v9808_v40  ;;  %v9815_v4 = vrot.slane %v17560_v56, 1  ;;  %v9824_v54 = vmax.f32 %v9704_v2, %v9744_v63  ;;  %v9831_v62 = vmax.f32 %v9705_v1, %v9745_v47 }
 0x532   :  { %v9676_v42 = vadd.f32 %v17425_v53, %v9633_v41  ;;  %v9677_v9 = vadd.f32 %v17428_v37, %v9634_v31  ;;  %v9635_v8 = vadd.f32 %v9579_v19, %v17376_v50  ;;  %v9573_v35 = vrot.slane %v9345_v39, 3 }
 0x533   :  { %v9821_v55 = vmax.f32 %v9819_v3, %v9820_v38  ;;  %v9825_v46 = vrot.slane %v9824_v54, 4  ;;  %v9832_v0 = vrot.slane %v9831_v62, 4  ;;  %v9574_v29 = vrot.slane %v9347_v32, 3 }
 0x534   :  { %v9708_v27 = vmax.f32 %v9676_v42, 0.0  ;;  %v9709_v48 = vmax.f32 %v9677_v9, 0.0  ;;  %v9678_v10 = vadd.f32 %v17425_v53, %v9635_v8  ;;  %v9580_v40 = vsel %vm9576_vm11, %v9571_v7, %v9573_v35 }
 0x535   :  { %v9826_v2 = vmax.f32 %v9824_v54, %v9825_v46  ;;  %v9833_v28 = vmax.f32 %v9831_v62, %v9832_v0  ;;  %v9636_v61 = vadd.f32 %v9580_v40, %v17385_v23  ;;  %v9577_v1 = vsel %vm9576_vm11, %v9572_v14, %v9574_v29 }
 0x536   :  { %v9710_v50 = vmax.f32 %v9678_v10, 0.0  ;;  %v9607_v39 = vsel %vm9576_vm11, %v9574_v29, %v9544_v51  ;;  %v9637_v32 = vadd.f32 %v9577_v1, %v17392_v26  ;;  %v9575_v3 = vrot.slane %v9349_v18, 3 }
 0x537   :  { %v9827_v43 = vrot.slane %v9826_v2, 2  ;;  %v9834_v22 = vrot.slane %v9833_v28, 2  ;;  %v9679_v7 = vadd.f32 %v17428_v37, %v9636_v61  ;;  %v9639_v24 = vadd.f32 %v9607_v39, %v17394_v57 }
 0x538   :  { %v9748_v23 = vsel %vm9717_vm12, %v9710_v50, 0.0  ;;  %v9680_v14 = vadd.f32 %v17425_v53, %v9637_v32  ;;  %v9578_v13 = vsel %vm9576_vm11, %v9573_v35, %v9575_v3  ;;  %v9608_v26 = vsel %vm9576_vm11, %v9575_v3, %v9545_v6 }
 0x539   :  { %v9828_v51 = vmax.f32 %v9826_v2, %v9827_v43  ;;  %v9838_v18 = vmax.f32 %v9708_v27, %v9748_v23  ;;  %v9711_v38 = vmax.f32 %v9679_v7, 0.0  ;;  %v9682_v41 = vadd.f32 %v17425_v53, %v9639_v24 }
 0x53a   :  { %v9712_v16 = vmax.f32 %v9680_v14, 0.0  ;;  %v9638_v57 = vadd.f32 %v9578_v13, %v17402_v33  ;;  %v9640_v63 = vadd.f32 %v9608_v26, %v17404_v20  ;;  %v9822_v47 = vrot.slane %v9821_v55, 1 }
 0x53b   :  { %v9829_v31 = vrot.slane %v9828_v51, 1  ;;  %v9839_v19 = vrot.slane %v9838_v18, 4  ;;  %v9749_v54 = vsel %vm9717_vm12, %v9711_v38, 0.0  ;;  %v9714_v17 = vmax.f32 %v9682_v41, 0.0 }
 0x53c   :  { %v9845_v62 = vmax.f32 %v9709_v48, %v9749_v54  ;;  %v9681_v6 = vadd.f32 %v17428_v37, %v9638_v57  ;;  %v9683_v42 = vadd.f32 %v17428_v37, %v9640_v63  ;;  %v9823_v9 = vmax.f32 %v9821_v55, %v9822_v47  ;;  %v15604_v54 = vld [vmem:[#allocation8 + $0x44] ss:$24 sps:$4 sm:$0xff]  }
 0x53d   :  { %v9840_v8 = vmax.f32 %v9838_v18, %v9839_v19  ;;  %v9752_v53 = vsel %vm9717_vm12, %v9714_v17, 0.0  ;;  %v9835_v33 = vmax.f32 %v9833_v28, %v9834_v22  ;;  %v9960_v20 = vsel %vm9882_vm2, %v17519_v58, %v17495_v52  ;;  %v15602_v17 = vld [vmem:[#allocation8 + $0x40] ss:$24 sps:$4 sm:$0xff]  }
 0x53e   :  { %v9846_v35 = vrot.slane %v9845_v62, 4  ;;  %v9852_v46 = vmax.f32 %v9712_v16, %v9752_v53  ;;  %v9713_v0 = vmax.f32 %v9681_v6, 0.0  ;;  %v9715_v29 = vmax.f32 %v9683_v42, 0.0  ;;  %v15605_v6 = vld [vmem:[#allocation8 + $0x70] ss:$24 sps:$4 sm:$0xff]  }
 0x53f   :  { %v9816_v27 = vmax.f32 %v17560_v56, %v9815_v4  ;;  %v9841_v48 = vrot.slane %v9840_v8, 2  ;;  %v9836_v10 = vrot.slane %v9835_v33, 1  ;;  %v9961_v37 = vsel %vm9884_vm3, %v17548_v59, %v9960_v20  ;;  %v15610_v42 = vld [vmem:[#allocation8 + $0xa4] ss:$24 sps:$4 sm:$0xff]   ;;  %v15611_v53 = vld [vmem:[#allocation8 + $0xd0] ss:$24 sps:$4 sm:$0xff]  }
 0x540   :  { %v9847_v55 = vmax.f32 %v9845_v62, %v9846_v35  ;;  %v9853_v40 = vrot.slane %v9852_v46, 4  ;;  %v9753_v2 = vsel %vm9717_vm12, %v9715_v29, 0.0  ;;  %v9962_v28 = vsel %vm9886_vm4, %v17572_v11, %v9961_v37  ;;  %v15607_v62 = vld [vmem:[#allocation8 + $0x74] ss:$24 sps:$4 sm:$0xff]   ;;  %v15614_v20 = vld [vmem:[#allocation8 + $0x100] ss:$24 sps:$4 sm:$0xff]  }
 0x541   :  { %v9842_v52 = vmax.f32 %v9840_v8, %v9841_v48  ;;  %v9859_v58 = vmax.f32 %v9713_v0, %v9753_v2  ;;  %v9837_v61 = vmax.f32 %v9835_v33, %v9836_v10  ;;  %v9963_v1 = vsel %vm9888_vm5, %v9823_v9, %v9962_v28  ;;  %v15608_v9 = vld [vmem:[#allocation8 + $0xa0] ss:$24 sps:$4 sm:$0xff]   ;;  %v15613_v8 = vld [vmem:[#allocation8 + $0xd4] ss:$24 sps:$4 sm:$0xff]   ;;  %v15616_v33 = vld [vmem:[#allocation8 + $0x104] ss:$24 sps:$4 sm:$0xff]  }
 0x542   :  { %v9854_v50 = vmax.f32 %v9852_v46, %v9853_v40  ;;  %v9848_v56 = vrot.slane %v9847_v55, 2  ;;  %v9830_v4 = vmax.f32 %v9828_v51, %v9829_v31  ;;  %v9953_v59 = vsel %vm9882_vm2, %v17502_v15, %v17480_v12  ;;  %v15599_v31 = vld [vmem:[#allocation8 + $0x10] ss:$24 sps:$4 sm:$0xff]   ;;  %v15619_v35 = vld [vmem:[#allocation8 + $0x134] ss:$24 sps:$4 sm:$0xff]  }
 0x543   :  { %v9860_v39 = vrot.slane %v9859_v58, 4  ;;  %v9964_v32 = vsel %vm9890_vm6, %v9837_v61, %v9963_v1  ;;  %v9843_v30 = vrot.slane %v9842_v52, 1  ;;  %v9954_v3 = vsel %vm9884_vm3, %v17528_v49, %v9953_v59  ;;  %v15622_v46 = vld [vmem:[#allocation8 + $0x164] ss:$24 sps:$4 sm:$0xff]   ;;  %v15620_v0 = vld [vmem:[#allocation8 + $0x160] ss:$24 sps:$4 sm:$0xff]  }
 0x544   :  { %v9855_v11 = vrot.slane %v9854_v50, 2  ;;  %v9849_v43 = vmax.f32 %v9847_v55, %v9848_v56  ;;  %v9955_v22 = vsel %vm9886_vm4, %v17553_v60, %v9954_v3  ;;  %v15625_v29 = vld [vmem:[#allocation8 + $0x194] ss:$24 sps:$4 sm:$0xff]   ;;  %v15628_v48 = vld [vmem:[#allocation8 + $0x1c4] ss:$24 sps:$4 sm:$0xff]  }
 0x545   :  { %v9861_v7 = vmax.f32 %v9859_v58, %v9860_v39  ;;  %v9844_v24 = vmax.f32 %v9842_v52, %v9843_v30  ;;  %v9956_v23 = vsel %vm9888_vm5, %v9816_v27, %v9955_v22  ;;  %v15623_v27 = vld [vmem:[#allocation8 + $0x190] ss:$24 sps:$4 sm:$0xff]   ;;  %v15626_v10 = vld [vmem:[#allocation8 + $0x1c0] ss:$24 sps:$4 sm:$0xff]   ;;  %v15631_v37 = vld [vmem:[#allocation8 + $0x1f4] ss:$24 sps:$4 sm:$0xff]  }
 0x546   :  { %v9850_v14 = vrot.slane %v9849_v43, 1  ;;  %v9856_v13 = vmax.f32 %v9854_v50, %v9855_v11  ;;  %v9957_v12 = vsel %vm9890_vm6, %v9830_v4, %v9956_v23  ;;  %v15629_v55 = vld [vmem:[#allocation8 + $0x1f0] ss:$24 sps:$4 sm:$0xff]   ;;  %v15634_v40 = vld [vmem:[#allocation8 + $0x224] ss:$24 sps:$4 sm:$0xff]  }
 0x547   :  { %v9862_v15 = vrot.slane %v9861_v7, 2  ;;  %v9958_v26 = vsel %vm9892_vm7, %v9844_v24, %v9957_v12  ;;  %v15632_v2 = vld [vmem:[#allocation8 + $0x220] ss:$24 sps:$4 sm:$0xff]   ;;  %v15637_v28 = vld [vmem:[#allocation8 + $0x254] ss:$24 sps:$4 sm:$0xff]  }
 0x548   :  { %v9851_v51 = vmax.f32 %v9849_v43, %v9850_v14  ;;  %v9857_v18 = vrot.slane %v9856_v13, 1  ;;  %v15635_v52 = vld [vmem:[#allocation8 + $0x250] ss:$24 sps:$4 sm:$0xff]   ;;  %v15640_v58 = vld [vmem:[#allocation8 + $0x284] ss:$24 sps:$4 sm:$0xff]  }
 0x549   :  { %v9863_v38 = vmax.f32 %v9861_v7, %v9862_v15  ;;  %v15638_v61 = vld [vmem:[#allocation8 + $0x280] ss:$24 sps:$4 sm:$0xff]   ;;  %v15643_v1 = vld [vmem:[#allocation8 + $0x2b4] ss:$24 sps:$4 sm:$0xff]   ;;  %v15641_v50 = vld [vmem:[#allocation8 + $0x2b0] ss:$24 sps:$4 sm:$0xff]  }
 0x54a   :  { %v9965_v49 = vsel %vm9892_vm7, %v9851_v51, %v9964_v32  ;;  %v9858_v41 = vmax.f32 %v9856_v13, %v9857_v18  ;;  %v15646_v56 = vld [vmem:[#allocation8 + $0x2e4] ss:$24 sps:$4 sm:$0xff]   ;;  %v15644_v4 = vld [vmem:[#allocation8 + $0x2e0] ss:$24 sps:$4 sm:$0xff]   ;;  %v15649_v59 = vld [vmem:[#allocation8 + $0x314] ss:$24 sps:$4 sm:$0xff]  }
 0x54b   :  { %v9864_v16 = vrot.slane %v9863_v38, 1  ;;  %v15647_v39 = vld [vmem:[#allocation8 + $0x310] ss:$24 sps:$4 sm:$0xff]   ;;  %v15652_v32 = vld [vmem:[#allocation8 + $0x344] ss:$24 sps:$4 sm:$0xff]  }
 0x54c   :  { %v9959_v60 = vsel %vm9894_vm8, %v9858_v41, %v9958_v26  ;;  %v15650_v30 = vld [vmem:[#allocation8 + $0x340] ss:$24 sps:$4 sm:$0xff]   ;;  %v15655_v3 = vld [vmem:[#allocation8 + $0x374] ss:$24 sps:$4 sm:$0xff]   ;;  %v15653_v11 = vld [vmem:[#allocation8 + $0x370] ss:$24 sps:$4 sm:$0xff]  }
 0x54d   :  { %v9865_v57 = vmax.f32 %v9863_v38, %v9864_v16  ;;  %v17636_v19 = vpack.c.bf16 %v9959_v60, %v9959_v60  ;;  %v15658_v43 = vld [vmem:[#allocation8 + $0x3a4] ss:$24 sps:$4 sm:$0xff]   ;;  %v15656_v22 = vld [vmem:[#allocation8 + $0x3a0] ss:$24 sps:$4 sm:$0xff]   ;;  %v15661_v7 = vld [vmem:[#allocation8 + $0x3d4] ss:$24 sps:$4 sm:$0xff]  }
 0x54e   :  { %v15659_v24 = vld [vmem:[#allocation8 + $0x3d0] ss:$24 sps:$4 sm:$0xff]   ;;  %v15664_v23 = vld [vmem:[#allocation8 + $0x404] ss:$24 sps:$4 sm:$0xff]   ;;  %v15667_v14 = vld [vmem:[#allocation8 + $0x434] ss:$24 sps:$4 sm:$0xff]  }
 0x54f   :  { %v9966_v63 = vsel %vm9894_vm8, %v9865_v57, %v9965_v49  ;;  %v15670_v13 = vld [vmem:[#allocation8 + $0x464] ss:$24 sps:$4 sm:$0xff]   ;;  %v15668_v12 = vld [vmem:[#allocation8 + $0x460] ss:$24 sps:$4 sm:$0xff]   ;;  %v15673_v15 = vld [vmem:[#allocation8 + $0x494] ss:$24 sps:$4 sm:$0xff]  }
 0x550   :  { %v17634_v47 = vpack.c.bf16 %v9966_v63, %v9966_v63  ;;  %v15671_v26 = vld [vmem:[#allocation8 + $0x490] ss:$24 sps:$4 sm:$0xff]   ;;  %v15676_v51 = vld [vmem:[#allocation8 + $0x4c4] ss:$24 sps:$4 sm:$0xff]   ;;  %v15674_v18 = vld [vmem:[#allocation8 + $0x4c0] ss:$24 sps:$4 sm:$0xff]  }
 0x551   :  { %v15679_v38 = vld [vmem:[#allocation8 + $0x4f4] ss:$24 sps:$4 sm:$0xff]   ;;  %v15677_v49 = vld [vmem:[#allocation8 + $0x4f0] ss:$24 sps:$4 sm:$0xff]   ;;  %v15682_v41 = vld [vmem:[#allocation8 + $0x524] ss:$24 sps:$4 sm:$0xff]  }
 0x552   :  { %11849 = vmatprep.mubr.bf16.mxu1 %v17634_v47  ;;  %11972 = vmatprep.mubr.bf16.mxu0 %v17634_v47  ;;  %v15680_v16 = vld [vmem:[#allocation8 + $0x520] ss:$24 sps:$4 sm:$0xff]   ;;  %v15685_v60 = vld [vmem:[#allocation8 + $0x554] ss:$24 sps:$4 sm:$0xff]   ;;  %v15683_v57 = vld [vmem:[#allocation8 + $0x550] ss:$24 sps:$4 sm:$0xff]  }
 0x553   :  { %11850 = vmatmul.mubr.bf16.vlgmr.msra.gmra.mrb[128].mxu1 %v17636_v19  ;;  %11973 = vmatmul.mubr.bf16.vlgmr.msra.gmra.mrb[160].mxu0 %v17636_v19  ;;  %v15688_v63 = vld [vmem:[#allocation8 + $0x584] ss:$24 sps:$4 sm:$0xff]  }
 0x554   :  { %11982 = vmatpush1.bf16.msra.mxu1 %v15599_v31  ;;  %12013 = vmatprep.mubr.bf16.mxu1 %v16824_v36  ;;  %v15617_v36 = vld [vmem:[#allocation8 + $0x130] ss:$24 sps:$4 sm:$0xff]   ;;  %v15686_v31 = vld [vmem:[#allocation8 + $0x580] ss:$24 sps:$4 sm:$0xff]  }
 0x555   :  { %11983 = vmatprep.subr.bf16.mxu1 %v15604_v54  ;;  %v15691_v54 = vld [vmem:[#allocation8 + $0x5b4] ss:$24 sps:$4 sm:$0xff]  }
 0x558   :  { %11984 = vmatpush1.bf16.msra.mxu1 %v15602_v17  ;;  %v15689_v17 = vld [vmem:[#allocation8 + $0x5b0] ss:$24 sps:$4 sm:$0xff]  }
 0x559   :  { %11985 = vmatprep.subr.bf16.mxu1 %v15607_v62  ;;  %v15694_v62 = vld [vmem:[#allocation8 + $0x5e4] ss:$24 sps:$4 sm:$0xff]  }
 0x55c   :  { %11986 = vmatpush1.bf16.msra.mxu1 %v15605_v6  ;;  %v15692_v6 = vld [vmem:[#allocation8 + $0x5e0] ss:$24 sps:$4 sm:$0xff]  }
 0x55d   :  { %11987 = vmatprep.subr.bf16.mxu1 %v15610_v42  ;;  %v15697_v42 = vld [vmem:[#allocation8 + $0x614] ss:$24 sps:$4 sm:$0xff]  }
 0x560   :  { %11988 = vmatpush1.bf16.msra.mxu1 %v15608_v9  ;;  %v15695_v9 = vld [vmem:[#allocation8 + $0x610] ss:$24 sps:$4 sm:$0xff]  }
 0x561   :  { %11989 = vmatprep.subr.bf16.mxu1 %v15613_v8  ;;  %v15700_v8 = vld [vmem:[#allocation8 + $0x644] ss:$24 sps:$4 sm:$0xff]  }
 0x564   :  { %11990 = vmatpush1.bf16.msra.mxu1 %v15611_v53  ;;  %v15698_v53 = vld [vmem:[#allocation8 + $0x640] ss:$24 sps:$4 sm:$0xff]  }
 0x565   :  { %11991 = vmatprep.subr.bf16.mxu1 %v15616_v33  ;;  %v15703_v33 = vld [vmem:[#allocation8 + $0x674] ss:$24 sps:$4 sm:$0xff]  }
 0x568   :  { %11992 = vmatpush1.bf16.msra.mxu1 %v15614_v20  ;;  %v15701_v20 = vld [vmem:[#allocation8 + $0x670] ss:$24 sps:$4 sm:$0xff]  }
 0x569   :  { %11993 = vmatprep.subr.bf16.mxu1 %v15619_v35  ;;  %v15706_v35 = vld [vmem:[#allocation8 + $0x6a4] ss:$24 sps:$4 sm:$0xff]  }
 0x56c   :  { %11994 = vmatpush1.bf16.msra.mxu1 %v15617_v36  ;;  %v15704_v36 = vld [vmem:[#allocation8 + $0x6a0] ss:$24 sps:$4 sm:$0xff]  }
 0x56d   :  { %11995 = vmatprep.subr.bf16.mxu1 %v15622_v46  ;;  %v15709_v46 = vld [vmem:[#allocation8 + $0x6d4] ss:$24 sps:$4 sm:$0xff]  }
 0x570   :  { %11996 = vmatpush1.bf16.msra.mxu1 %v15620_v0  ;;  %v15707_v0 = vld [vmem:[#allocation8 + $0x6d0] ss:$24 sps:$4 sm:$0xff]  }
 0x571   :  { %11997 = vmatprep.subr.bf16.mxu1 %v15625_v29  ;;  %v15712_v29 = vld [vmem:[#allocation8 + $0x704] ss:$24 sps:$4 sm:$0xff]  }
 0x574   :  { %11998 = vmatpush1.bf16.msra.mxu1 %v15623_v27  ;;  %v15715_v27 = vld [vmem:[#allocation8 + $0x734] ss:$24 sps:$4 sm:$0xff]  }
 0x575   :  { %11999 = vmatprep.subr.bf16.mxu1 %v15628_v48  ;;  %v15718_v48 = vld [vmem:[#allocation8 + $0x764] ss:$24 sps:$4 sm:$0xff]  }
 0x578   :  { %12000 = vmatpush1.bf16.msra.mxu1 %v15626_v10  ;;  %v15716_v10 = vld [vmem:[#allocation8 + $0x760] ss:$24 sps:$4 sm:$0xff]  }
 0x579   :  { %12001 = vmatprep.subr.bf16.mxu1 %v15631_v37  ;;  %v15721_v37 = vld [vmem:[#allocation8 + $0x794] ss:$24 sps:$4 sm:$0xff]  }
 0x57c   :  { %12002 = vmatpush1.bf16.msra.mxu1 %v15629_v55  ;;  %v15719_v55 = vld [vmem:[#allocation8 + $0x790] ss:$24 sps:$4 sm:$0xff]  }
 0x57d   :  { %12003 = vmatprep.subr.bf16.mxu1 %v15634_v40  ;;  %v15724_v40 = vld [vmem:[#allocation8 + $0x7c4] ss:$24 sps:$4 sm:$0xff]  }
 0x580   :  { %12004 = vmatpush1.bf16.msra.mxu1 %v15632_v2  ;;  %v15722_v2 = vld [vmem:[#allocation8 + $0x7c0] ss:$24 sps:$4 sm:$0xff]  }
 0x581   :  { %12005 = vmatprep.subr.bf16.mxu1 %v15637_v28  ;;  %v15727_v28 = vld [vmem:[#allocation8 + $0x7f4] ss:$24 sps:$4 sm:$0xff]  }
 0x584   :  { %12006 = vmatpush1.bf16.msra.mxu1 %v15635_v52  ;;  %v15725_v52 = vld [vmem:[#allocation8 + $0x7f0] ss:$24 sps:$4 sm:$0xff]  }
 0x585   :  { %12007 = vmatprep.subr.bf16.mxu1 %v15640_v58  ;;  %v15730_v58 = vld [vmem:[#allocation8 + $0x824] ss:$24 sps:$4 sm:$0xff]  }
 0x588   :  { %12008 = vmatpush1.bf16.msra.mxu1 %v15638_v61  ;;  %v15728_v61 = vld [vmem:[#allocation8 + $0x820] ss:$24 sps:$4 sm:$0xff]  }
 0x589   :  { %12009 = vmatprep.subr.bf16.mxu1 %v15643_v1  ;;  %v15733_v1 = vld [vmem:[#allocation8 + $0x854] ss:$24 sps:$4 sm:$0xff]  }
 0x58c   :  { %12010 = vmatpush1.bf16.msra.mxu1 %v15641_v50  ;;  %v15731_v50 = vld [vmem:[#allocation8 + $0x850] ss:$24 sps:$4 sm:$0xff]  }
 0x58d   :  { %12011 = vmatprep.subr.bf16.mxu1 %v15646_v56  ;;  %v15736_v56 = vld [vmem:[#allocation8 + $0x884] ss:$24 sps:$4 sm:$0xff]  }
 0x590   :  { %12012 = vmatpush1.bf16.msra.mxu1 %v15644_v4  ;;  %v15734_v4 = vld [vmem:[#allocation8 + $0x880] ss:$24 sps:$4 sm:$0xff]  }
 0x591   :  { %12022 = vmatprep.subr.bf16.mxu1 %v15649_v59  ;;  %v15739_v59 = vld [vmem:[#allocation8 + $0x8b4] ss:$24 sps:$4 sm:$0xff]  }
 0x593   :  { %12014 = vmatmul.mubr.bf16.vlgmr.msra.gmra.mrb[132].mxu1 %v16790_v21  ;;  %v15662_v21 = vld [vmem:[#allocation8 + $0x400] ss:$24 sps:$4 sm:$0xff]  }
 0x594   :  { %12023 = vmatpush1.bf16.msra.mxu1 %v15647_v39  ;;  %12054 = vmatprep.mubr.bf16.mxu1 %v17145_v45  ;;  %v15665_v45 = vld [vmem:[#allocation8 + $0x430] ss:$24 sps:$4 sm:$0xff]  }
 0x595   :  { %12024 = vmatprep.subr.bf16.mxu1 %v15652_v32  ;;  %v15737_v39 = vld [vmem:[#allocation8 + $0x8b0] ss:$24 sps:$4 sm:$0xff]   ;;  %v15742_v32 = vld [vmem:[#allocation8 + $0x8e4] ss:$24 sps:$4 sm:$0xff]  }
 0x598   :  { %12025 = vmatpush1.bf16.msra.mxu1 %v15650_v30  ;;  %v15740_v30 = vld [vmem:[#allocation8 + $0x8e0] ss:$24 sps:$4 sm:$0xff]  }
 0x599   :  { %12026 = vmatprep.subr.bf16.mxu1 %v15655_v3  ;;  %v10275_v3 = vsub.s32 2, %v16177_v44 }
 0x59c   :  { %12027 = vmatpush1.bf16.msra.mxu1 %v15653_v11  ;;  %v10263_v11 = vld [vmem:[#allocation10] sm:$0x3f] }
 0x59d   :  { %12028 = vmatprep.subr.bf16.mxu1 %v15658_v43  ;;  %v10279_v43 = vsub.s32 3, %v16177_v44 }
 0x5a0   :  { %12029 = vmatpush1.bf16.msra.mxu1 %v15656_v22  ;;  %v10268_v22 = vrot.slane %v10263_v11, %v17743_v5  ;;  %v10283_v5 = vsub.s32 4, %v16177_v44 }
 0x5a1   :  { %12030 = vmatprep.subr.bf16.mxu1 %v15661_v7  ;;  %v10276_v7 = vrot.slane %v10263_v11, %v10275_v3 }
 0x5a4   :  { %12031 = vmatpush1.bf16.msra.mxu1 %v15659_v24  ;;  %v10272_v24 = vrot.slane %v10263_v11, %v17744_v34  ;;  %v10287_v34 = vsub.s32 5, %v16177_v44 }
 0x5a5   :  { %12032 = vmatprep.subr.bf16.mxu1 %v15664_v23  ;;  %v10280_v23 = vrot.slane %v10263_v11, %v10279_v43 }
 0x5a8   :  { %12033 = vmatpush1.bf16.msra.mxu1 %v15662_v21 }
 0x5a9   :  { %12034 = vmatprep.subr.bf16.mxu1 %v15667_v14 }
 0x5ac   :  { %12035 = vmatpush1.bf16.msra.mxu1 %v15665_v45 }
 0x5ad   :  { %12036 = vmatprep.subr.bf16.mxu1 %v15670_v13 }
 0x5b0   :  { %12037 = vmatpush1.bf16.msra.mxu1 %v15668_v12 }
 0x5b1   :  { %12038 = vmatprep.subr.bf16.mxu1 %v15673_v15 }
 0x5b4   :  { %12039 = vmatpush1.bf16.msra.mxu1 %v15671_v26 }
 0x5b5   :  { %12040 = vmatprep.subr.bf16.mxu1 %v15676_v51 }
 0x5b8   :  { %12041 = vmatpush1.bf16.msra.mxu1 %v15674_v18 }
 0x5b9   :  { %12042 = vmatprep.subr.bf16.mxu1 %v15679_v38 }
 0x5bc   :  { %12043 = vmatpush1.bf16.msra.mxu1 %v15677_v49 }
 0x5bd   :  { %12044 = vmatprep.subr.bf16.mxu1 %v15682_v41  ;;  %v10284_v41 = vrot.slane %v10263_v11, %v10283_v5 }
 0x5c0   :  { %12045 = vmatpush1.bf16.msra.mxu1 %v15680_v16  ;;  %v10288_v16 = vrot.slane %v10263_v11, %v10287_v34 }
 0x5c1   :  { %12046 = vmatprep.subr.bf16.mxu1 %v15685_v60 }
 0x5c4   :  { %12047 = vmatpush1.bf16.msra.mxu1 %v15683_v57 }
 0x5c5   :  { %12048 = vmatprep.subr.bf16.mxu1 %v15688_v63 }
 0x5c8   :  { %12049 = vmatpush1.bf16.msra.mxu1 %v15686_v31 }
 0x5c9   :  { %12050 = vmatprep.subr.bf16.mxu1 %v15691_v54 }
 0x5cc   :  { %12051 = vmatpush1.bf16.msra.mxu1 %v15689_v17 }
 0x5cd   :  { %12052 = vmatprep.subr.bf16.mxu1 %v15694_v62 }
 0x5d0   :  { %12053 = vmatpush1.bf16.msra.mxu1 %v15692_v6 }
 0x5d1   :  { %12063 = vmatprep.subr.bf16.mxu1 %v15697_v42 }
 0x5d3   :  { %12055 = vmatmul.mubr.bf16.vlgmr.msra.gmra.mrb[132].mxu1 %v17148_v25  ;;  %v15710_v25 = vld [vmem:[#allocation8 + $0x700] ss:$24 sps:$4 sm:$0xff]  }
 0x5d4   :  { %12064 = vmatpush1.bf16.msra.mxu1 %v15695_v9  ;;  %12095 = vmatprep.mubr.bf16.mxu1 %v17634_v47  ;;  %v15713_v47 = vld [vmem:[#allocation8 + $0x730] ss:$24 sps:$4 sm:$0xff]  }
 0x5d5   :  { %12065 = vmatprep.subr.bf16.mxu1 %v15700_v8 }
 0x5d8   :  { %12066 = vmatpush1.bf16.msra.mxu1 %v15698_v53 }
 0x5d9   :  { %12067 = vmatprep.subr.bf16.mxu1 %v15703_v33 }
 0x5dc   :  { %12068 = vmatpush1.bf16.msra.mxu1 %v15701_v20 }
 0x5dd   :  { %12069 = vmatprep.subr.bf16.mxu1 %v15706_v35 }
 0x5e0   :  { %12070 = vmatpush1.bf16.msra.mxu1 %v15704_v36 }
 0x5e1   :  { %12071 = vmatprep.subr.bf16.mxu1 %v15709_v46 }
 0x5e4   :  { %12072 = vmatpush1.bf16.msra.mxu1 %v15707_v0 }
 0x5e5   :  { %12073 = vmatprep.subr.bf16.mxu1 %v15712_v29 }
 0x5e8   :  { %12074 = vmatpush1.bf16.msra.mxu1 %v15710_v25 }
 0x5e9   :  { %12075 = vmatprep.subr.bf16.mxu1 %v15715_v27 }
 0x5ec   :  { %12076 = vmatpush1.bf16.msra.mxu1 %v15713_v47 }
 0x5ed   :  { %12077 = vmatprep.subr.bf16.mxu1 %v15718_v48 }
 0x5f0   :  { %12078 = vmatpush1.bf16.msra.mxu1 %v15716_v10 }
 0x5f1   :  { %12079 = vmatprep.subr.bf16.mxu1 %v15721_v37 }
 0x5f4   :  { %12080 = vmatpush1.bf16.msra.mxu1 %v15719_v55 }
 0x5f5   :  { %12081 = vmatprep.subr.bf16.mxu1 %v15724_v40 }
 0x5f8   :  { %12082 = vmatpush1.bf16.msra.mxu1 %v15722_v2 }
 0x5f9   :  { %12083 = vmatprep.subr.bf16.mxu1 %v15727_v28 }
 0x5fc   :  { %12084 = vmatpush1.bf16.msra.mxu1 %v15725_v52 }
 0x5fd   :  { %12085 = vmatprep.subr.bf16.mxu1 %v15730_v58 }
 0x600   :  { %12086 = vmatpush1.bf16.msra.mxu1 %v15728_v61 }
 0x601   :  { %12087 = vmatprep.subr.bf16.mxu1 %v15733_v1 }
 0x604   :  { %12088 = vmatpush1.bf16.msra.mxu1 %v15731_v50 }
 0x605   :  { %12089 = vmatprep.subr.bf16.mxu1 %v15736_v56 }
 0x608   :  { %12090 = vmatpush1.bf16.msra.mxu1 %v15734_v4 }
 0x609   :  { %12091 = vmatprep.subr.bf16.mxu1 %v15739_v59 }
 0x60c   :  { %12092 = vmatpush1.bf16.msra.mxu1 %v15737_v39 }
 0x60d   :  { %12093 = vmatprep.subr.bf16.mxu1 %v15742_v32 }
 0x610   :  { %12094 = vmatpush1.bf16.msra.mxu1 %v15740_v30 }
 0x613   :  { %12096 = vmatmul.mubr.bf16.vlgmr.msra.gmra.mrb[132].mxu1 %v17636_v19 }
 0x626   :  { %v11851_v21 = vpop.f32.mrb[128].mxu1  ;;  %v11974_v14 = vpop.f32.mrb[160].mxu0 }
 0x627   :  { %v13327_v45 = vadd.f32 %v11851_v21, %v10268_v22  ;;  %v13329_v13 = vadd.f32 %v11974_v14, %v10276_v7  ;;  %v11853_v12 = vpop.f32.mrb[129].mxu1  ;;  %v11976_v15 = vpop.f32.mrb[161].mxu0 }
 0x628   :  { %v13328_v26 = vadd.f32 %v11853_v12, %v10272_v24  ;;  %v13330_v51 = vadd.f32 %v11976_v15, %v10280_v23  ;;  %v11855_v19 = vpop.f32.mrb[130].mxu1  ;;  %v11978_v18 = vpop.f32.mrb[162].mxu0 }
 0x629   :  { %12104 = vst [vmem:[#allocation11] sm:$0xff] %v13327_v45  ;;  %12106 = vst [vmem:[#allocation11 + $0x10] sm:$0xff] %v13329_v13  ;;  %v11856_v38 = vpop.f32.mrb[131].mxu1  ;;  %v11979_v49 = vpop.f32.mrb[163].mxu0 }
 0x62a   :  { %12105 = vst [vmem:[#allocation11 + $0x8] sm:$0xff] %v13328_v26  ;;  %12107 = vst [vmem:[#allocation11 + $0x18] sm:$0xff] %v13330_v51 }
 0x6e6   :  { %v12097_v60 = vpop.f32.mrb[132].mxu1 }
 0x6e7   :  { %v13331_v57 = vadd.f32 %v12097_v60, %v10284_v41  ;;  %v12099_v63 = vpop.f32.mrb[133].mxu1 }
 0x6e8   :  { %v13332_v31 = vadd.f32 %v12099_v63, %v10288_v16  ;;  %v12101_v54 = vpop.f32.mrb[134].mxu1 }
 0x6e9   :  { %12108 = vst [vmem:[#allocation11 + $0x20] sm:$0xff] %v13331_v57  ;;  %v12102_v17 = vpop.f32.mrb[135].mxu1 }
 0x6ea   :  { %12109 = vst [vmem:[#allocation11 + $0x28] sm:$0xff] %v13332_v31 }
 0x6eb   :  { %16058 = shalt.err (!%p16055_p2)
}
 0x6ec   :  { %s16059_s30 = scalar_lea.hbm %s17671_s5, 768 }
 0x6ed   :  { %p16060_p3 = scmp.ne.s32.totalorder %s17671_s5, %s16059_s30  ;;  %p16063_p4 = scmp.lt.u32.totalorder %s16059_s30, %s17671_s5 }
 0x6ef   :  { %p16065_p5 = pnand %p16063_p4, %p16060_p3 }
 0x6f1   :  { %16068 = shalt.err (!%p16065_p5)
}
 0x6f2   :  { %12119 = dma.vmem_to_hbm [thread:$0]  %s12117_s27, 768, %s17671_s5, [#allocation4]  }
 0x6f3   :  { %16075 = dma.done.wait [#allocation4], 768  }
 0x6f4   :  { %16076 = vsyncadd [#allocation4], 4294966528 }
 0x6f5   :  { %12123 = vsyncpa [#allocation3], 1 }
 0x6f6   :  { %12124 = vsyncpa [#allocation6], 1 }
 0x6f7   :  { %12125 = vsyncpa [#allocation9], 1 }
 0x6f8   :  { %12126 = vsyncpa [#allocation4], 1 }

</bundles_post_ra>
